<compile_context>
chip_gen: v7x
topology: tpu7x:2x2x1
jax: 0.10.0
libtpu: 0.0.40
codegen_flags: <defaults>
</compile_context>

<pallas_src>
import functools

import jax
import jax.numpy as jnp
from jax.experimental import pallas as pl
from jax.experimental.pallas import tpu as pltpu


def _cdiv(a, b):
    return -(-a // b)


def _round_up(a, b):
    return _cdiv(a, b) * b


# ---------------------------------------------------------------------------
# Fused kernel: relu(conv1x1) -> zero-pad -> relu(conv3x3), one (batch, tile).
# ---------------------------------------------------------------------------
def _fused_corr_encoder_kernel(x_ref, w1_ref, b1_ref, w2_ref, b2_ref, o_ref,
                               hid_ref, *, th, w_pad, chunk):
    """x_ref  : [(th+2)*w_pad, 3]   padded rows of (flow_x, flow_y, valid)
       w1_ref : [2, 256]            1x1 conv weight (Cin x Chid), f32
       b1_ref : [1, 256]            f32
       w2_ref : [9, 256, cout_pad]  3x3 conv weight, taps flattened, bf16
       b2_ref : [1, cout_pad]       f32
       o_ref  : [th*w_pad, cout_pad]
       hid_ref: [(th+2)*w_pad + 8, 256]  f32 scratch (fused intermediate)
    """
    chid = w1_ref.shape[1]
    n_in = (th + 2) * w_pad
    n_out = th * w_pad

    # ---- stage 1: 1x1 conv (Cin=2) + bias + ReLU on the VPU ---------------
    # The "valid" plane gates the bias, so conv-padding rows/cols come out 0.
    fx = x_ref[:, 0:1]                               # [n_in, 1]
    fy = x_ref[:, 1:2]
    vm = x_ref[:, 2:3]
    hid = fx * w1_ref[0:1, :] + fy * w1_ref[1:2, :] + vm * b1_ref[...]
    hid_ref[pl.ds(0, n_in), :] = jnp.maximum(hid, 0.0)
    # Guard rows: dx/dy-shifted taps read (harmlessly, into discarded padded
    # columns) up to 2 rows past n_in; keep them deterministic and in-bounds.
    hid_ref[pl.ds(n_in, 8), :] = jnp.zeros((8, chid), jnp.float32)

    b2 = b2_ref[...]                                  # hoisted, [1, cout_pad]

    # ---- stage 2: 3x3 conv as 9 shifted K=256 bf16 MXU matmuls ------------
    # Chunked over flat output rows: the chunk accumulator stays a live f32
    # value across the 9 chained dots (no VMEM read-modify-write per tap),
    # bias+ReLU fused in the epilogue, one dense store per chunk.
    for s in range(0, n_out, chunk):
        m = min(chunk, n_out - s)

        def tap(t, s=s, m=m):
            dy, dx = divmod(t, 3)
            lhs = hid_ref[pl.ds(s + dy * w_pad + dx, m), :].astype(jnp.bfloat16)
            return jnp.dot(lhs, w2_ref[t], preferred_element_type=jnp.float32)

        acc = tap(0)
        for t in range(1, 9):
            acc = acc + tap(t)
        o_ref[pl.ds(s, m), :] = jnp.maximum(acc + b2, 0.0).astype(o_ref.dtype)


# ---------------------------------------------------------------------------
# CorrEncoder.forward (== ScaleNet.flow_encoder)
# ---------------------------------------------------------------------------
def corr_encoder_forward(flow_nchw, w1, b1, w2, b2, *, tile_h=16,
                         chunk_rows=256):
    """flow_nchw: [B, 2, H, W] (PyTorch NCHW)
       w1: [2, 256], b1: [256]                 (convc1, 1x1)
       w2: [3, 3, 256, Cout] (HWIO), b2: [Cout] (convc2, 3x3, padding=1)
       returns [B, Cout, H, W]
       tile_h: sweep ~16 (v7x, 64 MiB VMEM) .. ~32 (v5e/v6e) for large W.
    """
    B, cin, H, W = flow_nchw.shape
    assert cin == 2
    chid = w1.shape[1]
    cout = w2.shape[-1]
    cout_pad = _round_up(cout, 128)       # lane-dense output stores
    th = max(1, min(tile_h, H))
    n_t = _cdiv(H, th)
    hp = n_t * th + 2                     # top/bottom halo + ragged-tile pad
    w_pad = _round_up(W + 2, 8)           # multiple of 8 keeps flat row-major
                                          # reshapes / slices layout-free
    n_in = (th + 2) * w_pad
    n_out = th * w_pad
    chunk = min(n_out, _round_up(chunk_rows, 8))

    # Channels-last padded input with an extra "valid" plane (tiny: 3 chans).
    x = jnp.concatenate([flow_nchw, jnp.ones_like(flow_nchw[:, :1])], axis=1)
    x = jnp.pad(x, ((0, 0), (0, 0), (1, hp - H - 1), (1, w_pad - W - 1)))
    x = jnp.transpose(x, (0, 2, 3, 1)).astype(jnp.float32)  # [B, hp, w_pad, 3]
    # Overlapping row tiles (2-row halo), gathered once here so the kernel
    # only sees plain non-overlapping blocks.
    rows = (jnp.arange(n_t) * th)[:, None] + jnp.arange(th + 2)[None, :]
    xt = jnp.take(x, rows, axis=1).reshape(B, n_t, n_in, 3)

    w2p = w2.reshape(9, chid, cout)
    b2p = b2
    if cout_pad != cout:
        w2p = jnp.pad(w2p, ((0, 0), (0, 0), (0, cout_pad - cout)))
        b2p = jnp.pad(b2, (0, cout_pad - cout))
    w2p = w2p.astype(jnp.bfloat16)        # MXU-native; halves weight DMA

    kernel = functools.partial(_fused_corr_encoder_kernel, th=th,
                               w_pad=w_pad, chunk=chunk)

    out = pl.pallas_call(
        kernel,
        out_shape=jax.ShapeDtypeStruct((B, n_t, n_out, cout_pad),
                                       flow_nchw.dtype),
        grid_spec=pltpu.PrefetchScalarGridSpec(
            num_scalar_prefetch=0,
            grid=(B, n_t),
            in_specs=[
                pl.BlockSpec((None, None, n_in, 3), lambda b, t: (b, t, 0, 0)),
                pl.BlockSpec((2, chid), lambda b, t: (0, 0)),
                pl.BlockSpec((1, chid), lambda b, t: (0, 0)),
                pl.BlockSpec((9, chid, cout_pad), lambda b, t: (0, 0, 0)),
                pl.BlockSpec((1, cout_pad), lambda b, t: (0, 0)),
            ],
            out_specs=pl.BlockSpec((None, None, n_out, cout_pad),
                                   lambda b, t: (b, t, 0, 0)),
            scratch_shapes=[
                pltpu.VMEM((n_in + 8, chid), jnp.float32),   # fused hidden
            ],
        ),
        compiler_params=pltpu.CompilerParams(
            dimension_semantics=("parallel", "parallel"),
            vmem_limit_bytes=48 * 1024 * 1024),
    )(xt, w1.astype(jnp.float32), b1.reshape(1, chid).astype(jnp.float32),
      w2p, b2p.reshape(1, cout_pad).astype(jnp.float32))

    # Padded (dense-store) result -> crop + NHWC -> NCHW in the wrapper.
    out = out.reshape(B, n_t * th, w_pad, cout_pad)[:, :H, :W, :cout]
    return jnp.transpose(out, (0, 3, 1, 2))


def scale_net_partial_forward(ini_flow, params):
    """Implementable slice of ScaleNet.forward (ini_scale + flow_encoder).

    # TODO(synk): ScaleEncoder / ScaleFormer / ScaleDecoder / GmaAtten /
    # BasicUpdateBlock / flow_wrap / local_correlation_with_flow /
    # upsample_{scale,flow}_with_mask are undefined in the provided source.
    """
    ini_scale = jnp.ones_like(ini_flow[:, 0:1, ...])
    flow_feature = corr_encoder_forward(
        ini_flow, params["w1"], params["b1"], params["w2"], params["b2"])
    return ini_scale, flow_feature


# ---------------------------------------------------------------------------
# Plain-JAX reference for correctness checking
# ---------------------------------------------------------------------------
def _reference(corr_nchw, w1, b1, w2, b2):
    x = jnp.transpose(corr_nchw, (0, 2, 3, 1))
    dn = ("NHWC", "HWIO", "NHWC")
    y = jax.lax.conv_general_dilated(
        x, w1.reshape(1, 1, *w1.shape), (1, 1), "VALID", dimension_numbers=dn,
        precision=jax.lax.Precision.HIGHEST)
    y = jnp.maximum(y + b1, 0.0)
    y = jax.lax.conv_general_dilated(
        y, w2, (1, 1), "SAME", dimension_numbers=dn,
        precision=jax.lax.Precision.HIGHEST)
    y = jnp.maximum(y + b2, 0.0)
    return jnp.transpose(y, (0, 3, 1, 2))


if __name__ == "__main__":
    key = jax.random.PRNGKey(0)
    B, H, W = 2, 16, 16
    dim_in = 2                  # flow has 2 channels (fixed by the module)
    hidden = 256                # hardcoded inside CorrEncoder
    feature_channels = 128      # ScaleNet default

    keys = jax.random.split(key, 10)
    ini_flow = jax.random.normal(keys[0], (B, dim_in, H, W), jnp.float32)
    params = {
        "w1": jax.random.normal(keys[1], (dim_in, hidden), jnp.float32) * 0.2,
        "b1": jax.random.normal(keys[2], (hidden,), jnp.float32) * 0.1,
        "w2": jax.random.normal(keys[3], (3, 3, hidden, feature_channels),
                                jnp.float32) * 0.02,
        "b2": jax.random.normal(keys[4], (feature_channels,), jnp.float32) * 0.1,
    }

    ini_scale, flow_feature = scale_net_partial_forward(ini_flow, params)
    flow_feature = jax.block_until_ready(flow_feature)

    ref = _reference(ini_flow, params["w1"], params["b1"],
                     params["w2"], params["b2"])
    assert flow_feature.shape == (B, feature_channels, H, W)
    assert ini_scale.shape == (B, 1, H, W)
    # bf16 MXU operands (deliberate, per perf review) -> relaxed tolerance.
    err = float(jnp.max(jnp.abs(flow_feature - ref)))
    assert jnp.allclose(flow_feature, ref, rtol=2e-2, atol=2e-2), err

    # Secondary check: odd H/W (ragged tile / padded width / padded-column
    # stores) and Cout < 128 (lane-padded output) code paths.
    flow2 = jax.random.normal(keys[5], (1, dim_in, 12, 10), jnp.float32)
    p2 = {
        "w1": jax.random.normal(keys[6], (dim_in, hidden), jnp.float32) * 0.2,
        "b1": jax.random.normal(keys[7], (hidden,), jnp.float32) * 0.1,
        "w2": jax.random.normal(keys[8], (3, 3, hidden, 32), jnp.float32) * 0.02,
        "b2": jax.random.normal(keys[9], (32,), jnp.float32) * 0.1,
    }
    out2 = corr_encoder_forward(flow2, p2["w1"], p2["b1"], p2["w2"], p2["b2"])
    out2 = jax.block_until_ready(out2)
    ref2 = _reference(flow2, p2["w1"], p2["b1"], p2["w2"], p2["b2"])
    err2 = float(jnp.max(jnp.abs(out2 - ref2)))
    assert out2.shape == (1, 32, 12, 10)
    assert jnp.allclose(out2, ref2, rtol=2e-2, atol=2e-2), err2

    print("KERNEL_OK")
</pallas_src>

<mosaic_0001>
module attributes {stable_mosaic.version = 11 : i64} {
  func.func @_fused_corr_encoder_kernel(%arg0: i32, %arg1: i32, %arg2: memref<1x1x432x3xf32, #tpu.memory_space<vmem>>, %arg3: memref<2x256xf32, #tpu.memory_space<vmem>>, %arg4: memref<1x256xf32, #tpu.memory_space<vmem>>, %arg5: memref<9x256x128xbf16, #tpu.memory_space<vmem>>, %arg6: memref<1x128xf32, #tpu.memory_space<vmem>>, %arg7: memref<1x1x384x128xf32, #tpu.memory_space<vmem>>, %arg8: memref<440x256xf32, #tpu.memory_space<vmem>>) attributes {dimension_semantics = [#tpu.dimension_semantics<parallel>, #tpu.dimension_semantics<parallel>], iteration_bounds = array<i64: 2, 1>, scalar_prefetch = 0 : i64, scratch_operands = 1 : i64, tpu.core_type = #tpu.core_type<tc>, window_params = [{transform_indices = @transform_0, window_bounds = array<i64: 1, 1, 432, 3>}, {pipeline_mode = #tpu.pipeline_mode<synchronous>, transform_indices = @transform_1, window_bounds = array<i64: 2, 256>}, {pipeline_mode = #tpu.pipeline_mode<synchronous>, transform_indices = @transform_2, window_bounds = array<i64: 1, 256>}, {pipeline_mode = #tpu.pipeline_mode<synchronous>, transform_indices = @transform_3, window_bounds = array<i64: 9, 256, 128>}, {pipeline_mode = #tpu.pipeline_mode<synchronous>, transform_indices = @transform_4, window_bounds = array<i64: 1, 128>}, {transform_indices = @transform_5, window_bounds = array<i64: 1, 1, 384, 128>}]} {
    %c0 = arith.constant 0 : index
    %c0_0 = arith.constant 0 : index
    %c0_1 = arith.constant 0 : index
    %c0_2 = arith.constant 0 : index
    %0 = vector.load %arg2[%c0, %c0_0, %c0_1, %c0_2] : memref<1x1x432x3xf32, #tpu.memory_space<vmem>>, vector<1x1x432x1xf32>
    %1 = vector.shape_cast %0 : vector<1x1x432x1xf32> to vector<432x1xf32>
    %c0_3 = arith.constant 0 : index
    %c0_4 = arith.constant 0 : index
    %c0_5 = arith.constant 0 : index
    %c1 = arith.constant 1 : index
    %2 = vector.load %arg2[%c0_3, %c0_4, %c0_5, %c1] : memref<1x1x432x3xf32, #tpu.memory_space<vmem>>, vector<1x1x432x1xf32>
    %3 = vector.shape_cast %2 : vector<1x1x432x1xf32> to vector<432x1xf32>
    %c0_6 = arith.constant 0 : index
    %c0_7 = arith.constant 0 : index
    %c0_8 = arith.constant 0 : index
    %c2 = arith.constant 2 : index
    %4 = vector.load %arg2[%c0_6, %c0_7, %c0_8, %c2] : memref<1x1x432x3xf32, #tpu.memory_space<vmem>>, vector<1x1x432x1xf32>
    %5 = vector.shape_cast %4 : vector<1x1x432x1xf32> to vector<432x1xf32>
    %c0_9 = arith.constant 0 : index
    %c0_10 = arith.constant 0 : index
    %6 = vector.load %arg3[%c0_9, %c0_10] : memref<2x256xf32, #tpu.memory_space<vmem>>, vector<1x256xf32>
    %7 = vector.broadcast %1 : vector<432x1xf32> to vector<432x256xf32>
    %8 = vector.broadcast %6 : vector<1x256xf32> to vector<432x256xf32>
    %9 = arith.mulf %7, %8 : vector<432x256xf32>
    %c1_11 = arith.constant 1 : index
    %c0_12 = arith.constant 0 : index
    %10 = vector.load %arg3[%c1_11, %c0_12] : memref<2x256xf32, #tpu.memory_space<vmem>>, vector<1x256xf32>
    %11 = vector.broadcast %3 : vector<432x1xf32> to vector<432x256xf32>
    %12 = vector.broadcast %10 : vector<1x256xf32> to vector<432x256xf32>
    %13 = arith.mulf %11, %12 : vector<432x256xf32>
    %14 = arith.addf %9, %13 : vector<432x256xf32>
    %c0_13 = arith.constant 0 : index
    %c0_14 = arith.constant 0 : index
    %15 = vector.load %arg4[%c0_13, %c0_14] : memref<1x256xf32, #tpu.memory_space<vmem>>, vector<1x256xf32>
    %16 = vector.broadcast %5 : vector<432x1xf32> to vector<432x256xf32>
    %17 = vector.broadcast %15 : vector<1x256xf32> to vector<432x256xf32>
    %18 = arith.mulf %16, %17 : vector<432x256xf32>
    %19 = arith.addf %14, %18 : vector<432x256xf32>
    %cst = arith.constant 0.000000e+00 : f32
    %20 = vector.broadcast %cst : f32 to vector<432x256xf32>
    %21 = arith.maximumf %19, %20 : vector<432x256xf32>
    %c0_15 = arith.constant 0 : index
    %c0_16 = arith.constant 0 : index
    %22 = vector.load %arg8[%c0_15, %c0_16] : memref<440x256xf32, #tpu.memory_space<vmem>>, vector<432x256xf32>
    tpu.vector_store %arg8[%c0_15, %c0_16], %21 {strides = array<i32>} : memref<440x256xf32, #tpu.memory_space<vmem>>, vector<432x256xf32>,
    %cst_17 = arith.constant 0.000000e+00 : f32
    %23 = vector.broadcast %cst_17 : f32 to vector<8x256xf32>
    %c432 = arith.constant 432 : index
    %c0_18 = arith.constant 0 : index
    %24 = vector.load %arg8[%c432, %c0_18] : memref<440x256xf32, #tpu.memory_space<vmem>>, vector<8x256xf32>
    tpu.vector_store %arg8[%c432, %c0_18], %23 {strides = array<i32>} : memref<440x256xf32, #tpu.memory_space<vmem>>, vector<8x256xf32>,
    %c0_19 = arith.constant 0 : index
    %c0_20 = arith.constant 0 : index
    %25 = vector.load %arg6[%c0_19, %c0_20] : memref<1x128xf32, #tpu.memory_space<vmem>>, vector<1x128xf32>
    %c0_21 = arith.constant 0 : index
    %c0_22 = arith.constant 0 : index
    %26 = vector.load %arg8[%c0_21, %c0_22] : memref<440x256xf32, #tpu.memory_space<vmem>>, vector<256x256xf32>
    %27 = arith.truncf %26 : vector<256x256xf32> to vector<256x256xbf16>
    %c0_23 = arith.constant 0 : index
    %c0_24 = arith.constant 0 : index
    %c0_25 = arith.constant 0 : index
    %28 = vector.load %arg5[%c0_23, %c0_24, %c0_25] : memref<9x256x128xbf16, #tpu.memory_space<vmem>>, vector<1x256x128xbf16>
    %29 = vector.shape_cast %28 : vector<1x256x128xbf16> to vector<256x128xbf16>
    %cst_26 = arith.constant dense<0.000000e+00> : vector<256x128xf32>
    %30 = tpu.matmul %27, %29, %cst_26 {dimension_numbers = #tpu.dot_dimension_numbers<[1], [0], [0], [1], [0, 0, 1, 1], [], []>} : vector<256x256xbf16>, vector<256x128xbf16>, vector<256x128xf32> -> vector<256x128xf32>
    %c1_27 = arith.constant 1 : index
    %c0_28 = arith.constant 0 : index
    %31 = vector.load %arg8[%c1_27, %c0_28] : memref<440x256xf32, #tpu.memory_space<vmem>>, vector<256x256xf32>
    %32 = arith.truncf %31 : vector<256x256xf32> to vector<256x256xbf16>
    %c1_29 = arith.constant 1 : index
    %c0_30 = arith.constant 0 : index
    %c0_31 = arith.constant 0 : index
    %33 = vector.load %arg5[%c1_29, %c0_30, %c0_31] : memref<9x256x128xbf16, #tpu.memory_space<vmem>>, vector<1x256x128xbf16>
    %34 = vector.shape_cast %33 : vector<1x256x128xbf16> to vector<256x128xbf16>
    %cst_32 = arith.constant dense<0.000000e+00> : vector<256x128xf32>
    %35 = tpu.matmul %32, %34, %cst_32 {dimension_numbers = #tpu.dot_dimension_numbers<[1], [0], [0], [1], [0, 0, 1, 1], [], []>} : vector<256x256xbf16>, vector<256x128xbf16>, vector<256x128xf32> -> vector<256x128xf32>
    %36 = arith.addf %30, %35 : vector<256x128xf32>
    %c2_33 = arith.constant 2 : index
    %c0_34 = arith.constant 0 : index
    %37 = vector.load %arg8[%c2_33, %c0_34] : memref<440x256xf32, #tpu.memory_space<vmem>>, vector<256x256xf32>
    %38 = arith.truncf %37 : vector<256x256xf32> to vector<256x256xbf16>
    %c2_35 = arith.constant 2 : index
    %c0_36 = arith.constant 0 : index
    %c0_37 = arith.constant 0 : index
    %39 = vector.load %arg5[%c2_35, %c0_36, %c0_37] : memref<9x256x128xbf16, #tpu.memory_space<vmem>>, vector<1x256x128xbf16>
    %40 = vector.shape_cast %39 : vector<1x256x128xbf16> to vector<256x128xbf16>
    %cst_38 = arith.constant dense<0.000000e+00> : vector<256x128xf32>
    %41 = tpu.matmul %38, %40, %cst_38 {dimension_numbers = #tpu.dot_dimension_numbers<[1], [0], [0], [1], [0, 0, 1, 1], [], []>} : vector<256x256xbf16>, vector<256x128xbf16>, vector<256x128xf32> -> vector<256x128xf32>
    %42 = arith.addf %36, %41 : vector<256x128xf32>
    %c24 = arith.constant 24 : index
    %c0_39 = arith.constant 0 : index
    %43 = vector.load %arg8[%c24, %c0_39] : memref<440x256xf32, #tpu.memory_space<vmem>>, vector<256x256xf32>
    %44 = arith.truncf %43 : vector<256x256xf32> to vector<256x256xbf16>
    %c3 = arith.constant 3 : index
    %c0_40 = arith.constant 0 : index
    %c0_41 = arith.constant 0 : index
    %45 = vector.load %arg5[%c3, %c0_40, %c0_41] : memref<9x256x128xbf16, #tpu.memory_space<vmem>>, vector<1x256x128xbf16>
    %46 = vector.shape_cast %45 : vector<1x256x128xbf16> to vector<256x128xbf16>
    %cst_42 = arith.constant dense<0.000000e+00> : vector<256x128xf32>
    %47 = tpu.matmul %44, %46, %cst_42 {dimension_numbers = #tpu.dot_dimension_numbers<[1], [0], [0], [1], [0, 0, 1, 1], [], []>} : vector<256x256xbf16>, vector<256x128xbf16>, vector<256x128xf32> -> vector<256x128xf32>
    %48 = arith.addf %42, %47 : vector<256x128xf32>
    %c25 = arith.constant 25 : index
    %c0_43 = arith.constant 0 : index
    %49 = vector.load %arg8[%c25, %c0_43] : memref<440x256xf32, #tpu.memory_space<vmem>>, vector<256x256xf32>
    %50 = arith.truncf %49 : vector<256x256xf32> to vector<256x256xbf16>
    %c4 = arith.constant 4 : index
    %c0_44 = arith.constant 0 : index
    %c0_45 = arith.constant 0 : index
    %51 = vector.load %arg5[%c4, %c0_44, %c0_45] : memref<9x256x128xbf16, #tpu.memory_space<vmem>>, vector<1x256x128xbf16>
    %52 = vector.shape_cast %51 : vector<1x256x128xbf16> to vector<256x128xbf16>
    %cst_46 = arith.constant dense<0.000000e+00> : vector<256x128xf32>
    %53 = tpu.matmul %50, %52, %cst_46 {dimension_numbers = #tpu.dot_dimension_numbers<[1], [0], [0], [1], [0, 0, 1, 1], [], []>} : vector<256x256xbf16>, vector<256x128xbf16>, vector<256x128xf32> -> vector<256x128xf32>
    %54 = arith.addf %48, %53 : vector<256x128xf32>
    %c26 = arith.constant 26 : index
    %c0_47 = arith.constant 0 : index
    %55 = vector.load %arg8[%c26, %c0_47] : memref<440x256xf32, #tpu.memory_space<vmem>>, vector<256x256xf32>
    %56 = arith.truncf %55 : vector<256x256xf32> to vector<256x256xbf16>
    %c5 = arith.constant 5 : index
    %c0_48 = arith.constant 0 : index
    %c0_49 = arith.constant 0 : index
    %57 = vector.load %arg5[%c5, %c0_48, %c0_49] : memref<9x256x128xbf16, #tpu.memory_space<vmem>>, vector<1x256x128xbf16>
    %58 = vector.shape_cast %57 : vector<1x256x128xbf16> to vector<256x128xbf16>
    %cst_50 = arith.constant dense<0.000000e+00> : vector<256x128xf32>
    %59 = tpu.matmul %56, %58, %cst_50 {dimension_numbers = #tpu.dot_dimension_numbers<[1], [0], [0], [1], [0, 0, 1, 1], [], []>} : vector<256x256xbf16>, vector<256x128xbf16>, vector<256x128xf32> -> vector<256x128xf32>
    %60 = arith.addf %54, %59 : vector<256x128xf32>
    %c48 = arith.constant 48 : index
    %c0_51 = arith.constant 0 : index
    %61 = vector.load %arg8[%c48, %c0_51] : memref<440x256xf32, #tpu.memory_space<vmem>>, vector<256x256xf32>
    %62 = arith.truncf %61 : vector<256x256xf32> to vector<256x256xbf16>
    %c6 = arith.constant 6 : index
    %c0_52 = arith.constant 0 : index
    %c0_53 = arith.constant 0 : index
    %63 = vector.load %arg5[%c6, %c0_52, %c0_53] : memref<9x256x128xbf16, #tpu.memory_space<vmem>>, vector<1x256x128xbf16>
    %64 = vector.shape_cast %63 : vector<1x256x128xbf16> to vector<256x128xbf16>
    %cst_54 = arith.constant dense<0.000000e+00> : vector<256x128xf32>
    %65 = tpu.matmul %62, %64, %cst_54 {dimension_numbers = #tpu.dot_dimension_numbers<[1], [0], [0], [1], [0, 0, 1, 1], [], []>} : vector<256x256xbf16>, vector<256x128xbf16>, vector<256x128xf32> -> vector<256x128xf32>
    %66 = arith.addf %60, %65 : vector<256x128xf32>
    %c49 = arith.constant 49 : index
    %c0_55 = arith.constant 0 : index
    %67 = vector.load %arg8[%c49, %c0_55] : memref<440x256xf32, #tpu.memory_space<vmem>>, vector<256x256xf32>
    %68 = arith.truncf %67 : vector<256x256xf32> to vector<256x256xbf16>
    %c7 = arith.constant 7 : index
    %c0_56 = arith.constant 0 : index
    %c0_57 = arith.constant 0 : index
    %69 = vector.load %arg5[%c7, %c0_56, %c0_57] : memref<9x256x128xbf16, #tpu.memory_space<vmem>>, vector<1x256x128xbf16>
    %70 = vector.shape_cast %69 : vector<1x256x128xbf16> to vector<256x128xbf16>
    %cst_58 = arith.constant dense<0.000000e+00> : vector<256x128xf32>
    %71 = tpu.matmul %68, %70, %cst_58 {dimension_numbers = #tpu.dot_dimension_numbers<[1], [0], [0], [1], [0, 0, 1, 1], [], []>} : vector<256x256xbf16>, vector<256x128xbf16>, vector<256x128xf32> -> vector<256x128xf32>
    %72 = arith.addf %66, %71 : vector<256x128xf32>
    %c50 = arith.constant 50 : index
    %c0_59 = arith.constant 0 : index
    %73 = vector.load %arg8[%c50, %c0_59] : memref<440x256xf32, #tpu.memory_space<vmem>>, vector<256x256xf32>
    %74 = arith.truncf %73 : vector<256x256xf32> to vector<256x256xbf16>
    %c8 = arith.constant 8 : index
    %c0_60 = arith.constant 0 : index
    %c0_61 = arith.constant 0 : index
    %75 = vector.load %arg5[%c8, %c0_60, %c0_61] : memref<9x256x128xbf16, #tpu.memory_space<vmem>>, vector<1x256x128xbf16>
    %76 = vector.shape_cast %75 : vector<1x256x128xbf16> to vector<256x128xbf16>
    %cst_62 = arith.constant dense<0.000000e+00> : vector<256x128xf32>
    %77 = tpu.matmul %74, %76, %cst_62 {dimension_numbers = #tpu.dot_dimension_numbers<[1], [0], [0], [1], [0, 0, 1, 1], [], []>} : vector<256x256xbf16>, vector<256x128xbf16>, vector<256x128xf32> -> vector<256x128xf32>
    %78 = arith.addf %72, %77 : vector<256x128xf32>
    %79 = vector.broadcast %25 : vector<1x128xf32> to vector<256x128xf32>
    %80 = arith.addf %78, %79 : vector<256x128xf32>
    %cst_63 = arith.constant 0.000000e+00 : f32
    %81 = vector.broadcast %cst_63 : f32 to vector<256x128xf32>
    %82 = arith.maximumf %80, %81 : vector<256x128xf32>
    %c0_64 = arith.constant 0 : index
    %c0_65 = arith.constant 0 : index
    %c0_66 = arith.constant 0 : index
    %c0_67 = arith.constant 0 : index
    %83 = vector.load %arg7[%c0_64, %c0_65, %c0_66, %c0_67] : memref<1x1x384x128xf32, #tpu.memory_space<vmem>>, vector<1x1x256x128xf32>
    %84 = vector.shape_cast %83 : vector<1x1x256x128xf32> to vector<256x128xf32>
    %85 = vector.shape_cast %82 : vector<256x128xf32> to vector<1x1x256x128xf32>
    tpu.vector_store %arg7[%c0_64, %c0_65, %c0_66, %c0_67], %85 {strides = array<i32>} : memref<1x1x384x128xf32, #tpu.memory_space<vmem>>, vector<1x1x256x128xf32>,
    %c256 = arith.constant 256 : index
    %c0_68 = arith.constant 0 : index
    %86 = vector.load %arg8[%c256, %c0_68] : memref<440x256xf32, #tpu.memory_space<vmem>>, vector<128x256xf32>
    %87 = arith.truncf %86 : vector<128x256xf32> to vector<128x256xbf16>
    %c0_69 = arith.constant 0 : index
    %c0_70 = arith.constant 0 : index
    %c0_71 = arith.constant 0 : index
    %88 = vector.load %arg5[%c0_69, %c0_70, %c0_71] : memref<9x256x128xbf16, #tpu.memory_space<vmem>>, vector<1x256x128xbf16>
    %89 = vector.shape_cast %88 : vector<1x256x128xbf16> to vector<256x128xbf16>
    %cst_72 = arith.constant dense<0.000000e+00> : vector<128x128xf32>
    %90 = tpu.matmul %87, %89, %cst_72 {dimension_numbers = #tpu.dot_dimension_numbers<[1], [0], [0], [1], [0, 0, 1, 1], [], []>} : vector<128x256xbf16>, vector<256x128xbf16>, vector<128x128xf32> -> vector<128x128xf32>
    %c257 = arith.constant 257 : index
    %c0_73 = arith.constant 0 : index
    %91 = vector.load %arg8[%c257, %c0_73] : memref<440x256xf32, #tpu.memory_space<vmem>>, vector<128x256xf32>
    %92 = arith.truncf %91 : vector<128x256xf32> to vector<128x256xbf16>
    %c1_74 = arith.constant 1 : index
    %c0_75 = arith.constant 0 : index
    %c0_76 = arith.constant 0 : index
    %93 = vector.load %arg5[%c1_74, %c0_75, %c0_76] : memref<9x256x128xbf16, #tpu.memory_space<vmem>>, vector<1x256x128xbf16>
    %94 = vector.shape_cast %93 : vector<1x256x128xbf16> to vector<256x128xbf16>
    %cst_77 = arith.constant dense<0.000000e+00> : vector<128x128xf32>
    %95 = tpu.matmul %92, %94, %cst_77 {dimension_numbers = #tpu.dot_dimension_numbers<[1], [0], [0], [1], [0, 0, 1, 1], [], []>} : vector<128x256xbf16>, vector<256x128xbf16>, vector<128x128xf32> -> vector<128x128xf32>
    %96 = arith.addf %90, %95 : vector<128x128xf32>
    %c258 = arith.constant 258 : index
    %c0_78 = arith.constant 0 : index
    %97 = vector.load %arg8[%c258, %c0_78] : memref<440x256xf32, #tpu.memory_space<vmem>>, vector<128x256xf32>
    %98 = arith.truncf %97 : vector<128x256xf32> to vector<128x256xbf16>
    %c2_79 = arith.constant 2 : index
    %c0_80 = arith.constant 0 : index
    %c0_81 = arith.constant 0 : index
    %99 = vector.load %arg5[%c2_79, %c0_80, %c0_81] : memref<9x256x128xbf16, #tpu.memory_space<vmem>>, vector<1x256x128xbf16>
    %100 = vector.shape_cast %99 : vector<1x256x128xbf16> to vector<256x128xbf16>
    %cst_82 = arith.constant dense<0.000000e+00> : vector<128x128xf32>
    %101 = tpu.matmul %98, %100, %cst_82 {dimension_numbers = #tpu.dot_dimension_numbers<[1], [0], [0], [1], [0, 0, 1, 1], [], []>} : vector<128x256xbf16>, vector<256x128xbf16>, vector<128x128xf32> -> vector<128x128xf32>
    %102 = arith.addf %96, %101 : vector<128x128xf32>
    %c280 = arith.constant 280 : index
    %c0_83 = arith.constant 0 : index
    %103 = vector.load %arg8[%c280, %c0_83] : memref<440x256xf32, #tpu.memory_space<vmem>>, vector<128x256xf32>
    %104 = arith.truncf %103 : vector<128x256xf32> to vector<128x256xbf16>
    %c3_84 = arith.constant 3 : index
    %c0_85 = arith.constant 0 : index
    %c0_86 = arith.constant 0 : index
    %105 = vector.load %arg5[%c3_84, %c0_85, %c0_86] : memref<9x256x128xbf16, #tpu.memory_space<vmem>>, vector<1x256x128xbf16>
    %106 = vector.shape_cast %105 : vector<1x256x128xbf16> to vector<256x128xbf16>
    %cst_87 = arith.constant dense<0.000000e+00> : vector<128x128xf32>
    %107 = tpu.matmul %104, %106, %cst_87 {dimension_numbers = #tpu.dot_dimension_numbers<[1], [0], [0], [1], [0, 0, 1, 1], [], []>} : vector<128x256xbf16>, vector<256x128xbf16>, vector<128x128xf32> -> vector<128x128xf32>
    %108 = arith.addf %102, %107 : vector<128x128xf32>
    %c281 = arith.constant 281 : index
    %c0_88 = arith.constant 0 : index
    %109 = vector.load %arg8[%c281, %c0_88] : memref<440x256xf32, #tpu.memory_space<vmem>>, vector<128x256xf32>
    %110 = arith.truncf %109 : vector<128x256xf32> to vector<128x256xbf16>
    %c4_89 = arith.constant 4 : index
    %c0_90 = arith.constant 0 : index
    %c0_91 = arith.constant 0 : index
    %111 = vector.load %arg5[%c4_89, %c0_90, %c0_91] : memref<9x256x128xbf16, #tpu.memory_space<vmem>>, vector<1x256x128xbf16>
    %112 = vector.shape_cast %111 : vector<1x256x128xbf16> to vector<256x128xbf16>
    %cst_92 = arith.constant dense<0.000000e+00> : vector<128x128xf32>
    %113 = tpu.matmul %110, %112, %cst_92 {dimension_numbers = #tpu.dot_dimension_numbers<[1], [0], [0], [1], [0, 0, 1, 1], [], []>} : vector<128x256xbf16>, vector<256x128xbf16>, vector<128x128xf32> -> vector<128x128xf32>
    %114 = arith.addf %108, %113 : vector<128x128xf32>
    %c282 = arith.constant 282 : index
    %c0_93 = arith.constant 0 : index
    %115 = vector.load %arg8[%c282, %c0_93] : memref<440x256xf32, #tpu.memory_space<vmem>>, vector<128x256xf32>
    %116 = arith.truncf %115 : vector<128x256xf32> to vector<128x256xbf16>
    %c5_94 = arith.constant 5 : index
    %c0_95 = arith.constant 0 : index
    %c0_96 = arith.constant 0 : index
    %117 = vector.load %arg5[%c5_94, %c0_95, %c0_96] : memref<9x256x128xbf16, #tpu.memory_space<vmem>>, vector<1x256x128xbf16>
    %118 = vector.shape_cast %117 : vector<1x256x128xbf16> to vector<256x128xbf16>
    %cst_97 = arith.constant dense<0.000000e+00> : vector<128x128xf32>
    %119 = tpu.matmul %116, %118, %cst_97 {dimension_numbers = #tpu.dot_dimension_numbers<[1], [0], [0], [1], [0, 0, 1, 1], [], []>} : vector<128x256xbf16>, vector<256x128xbf16>, vector<128x128xf32> -> vector<128x128xf32>
    %120 = arith.addf %114, %119 : vector<128x128xf32>
    %c304 = arith.constant 304 : index
    %c0_98 = arith.constant 0 : index
    %121 = vector.load %arg8[%c304, %c0_98] : memref<440x256xf32, #tpu.memory_space<vmem>>, vector<128x256xf32>
    %122 = arith.truncf %121 : vector<128x256xf32> to vector<128x256xbf16>
    %c6_99 = arith.constant 6 : index
    %c0_100 = arith.constant 0 : index
    %c0_101 = arith.constant 0 : index
    %123 = vector.load %arg5[%c6_99, %c0_100, %c0_101] : memref<9x256x128xbf16, #tpu.memory_space<vmem>>, vector<1x256x128xbf16>
    %124 = vector.shape_cast %123 : vector<1x256x128xbf16> to vector<256x128xbf16>
    %cst_102 = arith.constant dense<0.000000e+00> : vector<128x128xf32>
    %125 = tpu.matmul %122, %124, %cst_102 {dimension_numbers = #tpu.dot_dimension_numbers<[1], [0], [0], [1], [0, 0, 1, 1], [], []>} : vector<128x256xbf16>, vector<256x128xbf16>, vector<128x128xf32> -> vector<128x128xf32>
    %126 = arith.addf %120, %125 : vector<128x128xf32>
    %c305 = arith.constant 305 : index
    %c0_103 = arith.constant 0 : index
    %127 = vector.load %arg8[%c305, %c0_103] : memref<440x256xf32, #tpu.memory_space<vmem>>, vector<128x256xf32>
    %128 = arith.truncf %127 : vector<128x256xf32> to vector<128x256xbf16>
    %c7_104 = arith.constant 7 : index
    %c0_105 = arith.constant 0 : index
    %c0_106 = arith.constant 0 : index
    %129 = vector.load %arg5[%c7_104, %c0_105, %c0_106] : memref<9x256x128xbf16, #tpu.memory_space<vmem>>, vector<1x256x128xbf16>
    %130 = vector.shape_cast %129 : vector<1x256x128xbf16> to vector<256x128xbf16>
    %cst_107 = arith.constant dense<0.000000e+00> : vector<128x128xf32>
    %131 = tpu.matmul %128, %130, %cst_107 {dimension_numbers = #tpu.dot_dimension_numbers<[1], [0], [0], [1], [0, 0, 1, 1], [], []>} : vector<128x256xbf16>, vector<256x128xbf16>, vector<128x128xf32> -> vector<128x128xf32>
    %132 = arith.addf %126, %131 : vector<128x128xf32>
    %c306 = arith.constant 306 : index
    %c0_108 = arith.constant 0 : index
    %133 = vector.load %arg8[%c306, %c0_108] : memref<440x256xf32, #tpu.memory_space<vmem>>, vector<128x256xf32>
    %134 = arith.truncf %133 : vector<128x256xf32> to vector<128x256xbf16>
    %c8_109 = arith.constant 8 : index
    %c0_110 = arith.constant 0 : index
    %c0_111 = arith.constant 0 : index
    %135 = vector.load %arg5[%c8_109, %c0_110, %c0_111] : memref<9x256x128xbf16, #tpu.memory_space<vmem>>, vector<1x256x128xbf16>
    %136 = vector.shape_cast %135 : vector<1x256x128xbf16> to vector<256x128xbf16>
    %cst_112 = arith.constant dense<0.000000e+00> : vector<128x128xf32>
    %137 = tpu.matmul %134, %136, %cst_112 {dimension_numbers = #tpu.dot_dimension_numbers<[1], [0], [0], [1], [0, 0, 1, 1], [], []>} : vector<128x256xbf16>, vector<256x128xbf16>, vector<128x128xf32> -> vector<128x128xf32>
    %138 = arith.addf %132, %137 : vector<128x128xf32>
    %139 = vector.broadcast %25 : vector<1x128xf32> to vector<128x128xf32>
    %140 = arith.addf %138, %139 : vector<128x128xf32>
    %cst_113 = arith.constant 0.000000e+00 : f32
    %141 = vector.broadcast %cst_113 : f32 to vector<128x128xf32>
    %142 = arith.maximumf %140, %141 : vector<128x128xf32>
    %c0_114 = arith.constant 0 : index
    %c0_115 = arith.constant 0 : index
    %c256_116 = arith.constant 256 : index
    %c0_117 = arith.constant 0 : index
    %143 = vector.load %arg7[%c0_114, %c0_115, %c256_116, %c0_117] : memref<1x1x384x128xf32, #tpu.memory_space<vmem>>, vector<1x1x128x128xf32>
    %144 = vector.shape_cast %143 : vector<1x1x128x128xf32> to vector<128x128xf32>
    %145 = vector.shape_cast %142 : vector<128x128xf32> to vector<1x1x128x128xf32>
    tpu.vector_store %arg7[%c0_114, %c0_115, %c256_116, %c0_117], %145 {strides = array<i32>} : memref<1x1x384x128xf32, #tpu.memory_space<vmem>>, vector<1x1x128x128xf32>,
    return
  }
  func.func @transform_0(%arg0: i32, %arg1: i32) -> (i32, i32, i32, i32) {
    %c0_i32 = arith.constant 0 : i32
    %c0_i32_0 = arith.constant 0 : i32
    %c0_i32_1 = arith.constant 0 : i32
    return %arg0, %arg1, %c0_i32, %c0_i32_0 : i32, i32, i32, i32
  }
  func.func @transform_1(%arg0: i32, %arg1: i32) -> (i32, i32) {
    %c0_i32 = arith.constant 0 : i32
    %c0_i32_0 = arith.constant 0 : i32
    %c0_i32_1 = arith.constant 0 : i32
    return %c0_i32, %c0_i32_0 : i32, i32
  }
  func.func @transform_2(%arg0: i32, %arg1: i32) -> (i32, i32) {
    %c0_i32 = arith.constant 0 : i32
    %c0_i32_0 = arith.constant 0 : i32
    %c0_i32_1 = arith.constant 0 : i32
    return %c0_i32, %c0_i32_0 : i32, i32
  }
  func.func @transform_3(%arg0: i32, %arg1: i32) -> (i32, i32, i32) {
    %c0_i32 = arith.constant 0 : i32
    %c0_i32_0 = arith.constant 0 : i32
    %c0_i32_1 = arith.constant 0 : i32
    %c0_i32_2 = arith.constant 0 : i32
    return %c0_i32, %c0_i32_0, %c0_i32_1 : i32, i32, i32
  }
  func.func @transform_4(%arg0: i32, %arg1: i32) -> (i32, i32) {
    %c0_i32 = arith.constant 0 : i32
    %c0_i32_0 = arith.constant 0 : i32
    %c0_i32_1 = arith.constant 0 : i32
    return %c0_i32, %c0_i32_0 : i32, i32
  }
  func.func @transform_5(%arg0: i32, %arg1: i32) -> (i32, i32, i32, i32) {
    %c0_i32 = arith.constant 0 : i32
    %c0_i32_0 = arith.constant 0 : i32
    %c0_i32_1 = arith.constant 0 : i32
    return %arg0, %arg1, %c0_i32, %c0_i32_0 : i32, i32, i32, i32
  }
}

</mosaic_0001>

<bundles_post_ra>
// kernel: tpu_custom_call.1
= control target key start
LH: loop header
LB: loop body
LE: loop exit
PB: predicated region body
PF: predicated region fallthrough
CT: control target
= control target key end

     0   :  { %10 = vsyncpa [#allocation4], 0  ;;  %s16186_s0 = inlined_call_operand.vmem [shape: f32[2,1,432,3], index: 0, kind: input, shape index: {}]   ;;  %s16187_s1 = inlined_call_operand.vmem [shape: f32[2,256], index: 1, kind: input, shape index: {}]   ;;  %s16188_s2 = inlined_call_operand.vmem [shape: f32[1,256], index: 2, kind: input, shape index: {}]   ;;  %s16189_s3 = inlined_call_operand.hbm [shape: bf16[9,256,128], index: 3, kind: input, shape index: {}]   ;;  %s16190_s4 = inlined_call_operand.vmem [shape: f32[1,128], index: 4, kind: input, shape index: {}]   ;;  %s16191_s5 = inlined_call_operand.hbm [shape: f32[2,1,384,128], index: 5, kind: output, shape index: {}]  }
   0x1   :  { %11 = vsyncpa [#allocation5], 0 }
   0x2   :  { %13 = vsyncpa [#allocation5 + $0x1], 0  ;;  %s12334_s18 = smov 0   ;;  %s12336_s19 = smov 0  }
   0x3   :  { %s12338_s20 = smov 0   ;;  %s12340_s21 = smov 0  }
   0x4   :  { %s12342_s22 = smov 0   ;;  %s12344_s23 = smov 0  }
   0x5 LB: > { %s9795_s24 = sadd.s32 4294967295, %s12292_s23   ;;  %s9796_s25 = sadd.s32 4294967294, %s12292_s23   ;;  %s12292_s23 = sphi %s12344_s23, %s19_s23   ;;  %s12288_s22 = sphi %s12342_s22, %s16576_s22   ;;  %s12284_s21 = sphi %s12340_s21, %s16575_s21   ;;  %s12280_s20 = sphi %s12338_s20, %s16574_s20   ;;  %s12276_s19 = sphi %s12336_s19, %s16573_s19   ;;  %s12272_s18 = sphi %s12334_s18, %s16572_s18  }
   0x6   : > { %s31_s26 = sadd.s32 1, %s12288_s22  ;;  %s152_s27 = sadd.s32 1, %s12280_s20 }
   0x7   : > { %p33_p0 = scmp.ge.s32.totalorder %s31_s26, 2  ;;  %p162_p1 = scmp.ne.s32.totalorder %s12280_s20, %s12276_s19 }
   0x8   : > { %p163_p2 = scmp.eq.s32.totalorder %s9795_s24, 1  ;;  %p168_p3 = scmp.ne.s32.totalorder %s12276_s19, %s12272_s18 }
   0x9   : > { %s16578_s26 = smov (%p33_p0, %s31_s26), 0  ;;  %p169_p5 = scmp.eq.s32.totalorder %s9796_s25, 1 }
   0xa   : > { %p12374_p4 = por %p163_p2, %p162_p1  ;;  %s147_s29 = ssub.s32 %s12288_s22, %s16578_s26 }
   0xb   : > { %p9797_p6 = scmp.ge.s32.totalorder %s12292_s23, 1  ;;  %p150_p7 = scmp.eq.s32.totalorder %s147_s29, 0 }
   0xc   : > { %s16287_s28 = scalar_select %p12374_p4, 1, 0 }
   0xd   : > { %p12381_p8 = por %p169_p5, %p168_p3  ;;  %p176_p9 = scmp.lt.s32.totalorder %s12292_s23, 3 }
   0xe   : > { %s12387_s6 = scalar_select %p150_p7, %s12280_s20, %s152_s27  }
   0xf   : > { %s16288_s30 = scalar_select %p12381_p8, 1, 0 }
  0x10   : > { %p12389_p10 = pnand %p9797_p6, %p176_p9  ;;  %p12393_p11 = scmp.eq.s32.totalorder %s9795_s24, 0 }
  0x11   : > { %s12294_s9 = smov [#allocation3]   ;;  %s12182_s14 = scalar_lea.hbm %s16189_s3, 18432 }
  0x12   : > { %s16289_s7 = scalar_select %p12389_p10, 1, 0 }
  0x13   : > { %s16290_s8 = scalar_select %p12393_p11, 1, 0 }
  0x14   : > { %p11705_p12 = pneg %p12389_p10  ;;  %s194_s10 = sshll.u32 %s12294_s9, 4  ;;  %s195_s10 = int_to_ptr.vmem [resolvable:$true] %s194_s10 }
  0x15   : > { %p12183_p0 = scmp.ne.s32.totalorder %s16189_s3, %s12182_s14  ;;  %p12189_p5 = scmp.lt.u32.totalorder %s12182_s14, %s16189_s3 }
  0x16   : > { %p12401_p13 = pnand %p12393_p11, %p11705_p12 }
  0x18   : > { %p12184_p1 = pneg %p12401_p13 }
  0x1a   : > { %p12185_p2 = pnand %p12184_p1, %p12183_p0 }
  0x1c   : > { %p12186_p3 = pneg %p12185_p2 }
  0x1e   : > { %p12191_p6 = pnand %p12189_p5, %p12186_p3 }
  0x20   : > { %12194 = shalt.err (!%p12191_p6)
}
  0x21   : > { %s12195_s25 = scalar_lea.vmem %s195_s10, 18432  ;;  %p12203_p8 = scmp.lt.s32.totalorder %s195_s10, %s195_s10 }
  0x22   : > { %p12196_p7 = scmp.ne.s32.totalorder %s195_s10, %s12195_s25  ;;  %p12204_p4 = scmp.lt.s32.totalorder %s12195_s25, %s12195_s25 }
  0x24   : > { %p12198_p9 = pnand %p12196_p7, %p12184_p1  ;;  %p12205_p11 = por %p12204_p4, %p12203_p8 }
  0x26   : > { %p12199_p12 = pneg %p12198_p9 }
  0x28   : > { %p12206_p10 = pnand %p12205_p11, %p12199_p12 }
  0x2a   : > { %12209 = shalt.err (!%p12206_p10)
}
  0x2b   : > { %s12295_s27 = smov 64   ;;  %s12296_s29 = smov 4  }
  0x2c   : > { %11708 = dma.hbm_to_vmem [thread:$0]  (!%p12401_p13), %s16189_s3, 18432, %s195_s10, [#allocation4], %s12295_s27, %s12295_s27, %s12296_s29  }
  0x2d   : > { %p16292_p0 = scmp.ne.s32.totalorder %s16289_s7, 0 }
  0x2f   : > { %225 = sbr.rel (%p16292_p0) target bundleno = 1507 (0x5e3), region = 40 }
  0x36   : > { %p16293_p2 = scmp.ne.s32.totalorder %s16290_s8, 0 }
  0x38   : > { %12263 = dma.done.wait (%p16293_p2), [#allocation4], 18432  }
  0x39   : > { %12265 = vsyncadd (%p16293_p2), [#allocation4], 4294948864  ;;  %p257_p4 = scmp.lt.s32.totalorder %s12284_s21, 1  ;;  %v16202_v0 = vmov 1   ;;  %v16200_v7 = vmov 0   ;;  %v16204_v12 = vmov 2   ;;  %v593_v44 = vlaneseq }
  0x3a   : > { %11775 = vset.pattern.permute.xlu0 %v16202_v0  ;;  %11773 = vset.pattern.permute.xlu1 %v16202_v0  ;;  %v11870_v16 = vld [vmem:[#allocation3 + $0xc0] sm:$0xff]   ;;  %v11872_v19 = vld [vmem:[#allocation3 + $0xc8] sm:$0xff]   ;;  %v11874_v22 = vld [vmem:[#allocation3 + $0xd0] sm:$0xff]   ;;  %vm1988_vm0 = vsmask.f32 7424  ;;  %vm2874_vm1 = vcmask 1046528  }
  0x3b   : > { %s258_s11 = scalar_select %p257_p4, %s12284_s21, 1  ;;  %v11871_v17 = vld [vmem:[#allocation3 + $0x80] sm:$0xff]   ;;  %11680 = vmatprep.subr.bf16.mxu1 %v11870_v16  ;;  %10096 = vmatprep.subr.bf16.mxu0 %v11870_v16  ;;  %v11873_v20 = vld [vmem:[#allocation3 + $0x88] sm:$0xff]   ;;  %v11875_v23 = vld [vmem:[#allocation3 + $0x90] sm:$0xff]   ;;  %v594_v46 = vshrl.u32 %v593_v44, 7 }
  0x3c   : > { %11688 = vmatpush3.bf16.msra.mxu1 %v11871_v17  ;;  %10097 = vmatpush3.bf16.msra.mxu0 %v11871_v17  ;;  %v11876_v24 = vld [vmem:[#allocation3 + $0xd8] sm:$0xff]   ;;  %v11878_v26 = vld [vmem:[#allocation3 + $0xe0] sm:$0xff]   ;;  %v11880_v28 = vld [vmem:[#allocation3 + $0xe8] sm:$0xff]   ;;  %s254_s27 = sand.u32 1, %s12276_s19   ;;  %s11698_s8 = smul.u32 6144, %s12284_s21 }
  0x3d   : > { %s11697_s13 = smul.u32 432, %s258_s11  ;;  %11681 = vmatprep.subr.bf16.mxu1 %v11872_v19  ;;  %10098 = vmatprep.subr.bf16.mxu0 %v11872_v19  ;;  %v11877_v25 = vld [vmem:[#allocation3 + $0x98] sm:$0xff]   ;;  %v11879_v27 = vld [vmem:[#allocation3 + $0xa0] sm:$0xff]   ;;  %v11881_v29 = vld [vmem:[#allocation3 + $0xa8] sm:$0xff]   ;;  %v595_v50 = vsub.s32 0, %v594_v46  ;;  %v599_v62 = vsub.s32 1, %v594_v46 }
  0x3e   : > { %v11882_v30 = vld [vmem:[#allocation3 + $0xf0] sm:$0xff]   ;;  %v11884_v33 = vld [vmem:[#allocation3 + $0xf8] sm:$0xff]   ;;  %s15511_s29 = smul.u32 384, %s254_s27  ;;  %s16132_s24 = scalar_lea.hbm %s16191_s5, %s11698_s8 }
  0x3f   : > { %s12434_s7 = scalar_lea.vmem %s16186_s0, %s11697_s13  ;;  %v11883_v31 = vld [vmem:[#allocation3 + $0xb0] sm:$0xff]   ;;  %v11885_v34 = vld [vmem:[#allocation3 + $0xb8] sm:$0xff]   ;;  %s16140_s21 = scalar_lea.sflag [#allocation5], %s254_s27 }
  0x40   : > { %v291_v1 = vld [vmem:[%s12434_s7 + $0xc0] sm:$0xff]  ;;  %v12439_v3 = vld [vmem:[%s12434_s7 + $0xc8] sm:$0xff]  ;;  %v294_v4 = vld [vmem:[%s12434_s7 + $0xd8] sm:$0xff]  ;;  %11689 = vmatpush3.bf16.msra.mxu1 %v11873_v20  ;;  %10099 = vmatpush3.bf16.msra.mxu0 %v11873_v20  ;;  %s15547_s11 = scalar_lea.vmem [#allocation6], %s15511_s29  ;;  %p16570_p10 = scmp.ne.s32.totalorder %s16287_s28, 0 }
  0x41   : > { %v267_v2 = vld [vmem:[%s12434_s7] sm:$0xff]  ;;  %810 = vperm.xlu1 %11773, %v291_v1   ;;  %v12444_v5 = vld [vmem:[%s12434_s7 + $0x10] sm:$0xff]  ;;  %v12447_v6 = vld [vmem:[%s12434_s7 + $0x8] sm:$0xff]  ;;  %11682 = vmatprep.subr.bf16.mxu1 %v11874_v22  ;;  %s9701_s15 = sshll.u32 %s15547_s11, 4  ;;  %s12301_s29 = smov [#allocation6]   ;;  %s16135_s15 = int_to_ptr.vmem [resolvable:$true] %s9701_s15 }
  0x42   : > { %714 = vperm.xlu0 %11775, %v267_v2   ;;  %v12453_v8 = vld [vmem:[%s12434_s7 + $0xe8] sm:$0xff]  ;;  %v12457_v9 = vld [vmem:[%s12434_s7 + $0x20] sm:$0xff]  ;;  %v12461_v10 = vld [vmem:[%s12434_s7 + $0x30] sm:$0xff]  ;;  %10100 = vmatprep.subr.bf16.mxu0 %v11874_v22  ;;  %s12210_s25 = scalar_lea.vmem %s16135_s15, 6144  ;;  %s12214_s9 = sshll.u32 %s12301_s29, 4  ;;  %s12215_s9 = int_to_ptr.vmem [resolvable:$false] %s12214_s9 }
  0x43   : > { %v293_v11 = vld [vmem:[%s12434_s7 + $0xd0] sm:$0xff]  ;;  %v270_v13 = vld [vmem:[%s12434_s7 + $0x18] sm:$0xff]  ;;  %v12474_v14 = vld [vmem:[%s12434_s7 + $0xe0] sm:$0xff]  ;;  %p12211_p8 = scmp.ne.s32.totalorder %s16135_s15, %s12210_s25  ;;  %s12216_s12 = scalar_lea.vmem %s12215_s9, 12288 }
  0x44   : > { %v12478_v15 = vld [vmem:[%s12434_s7 + $0xf8] sm:$0xff]  ;;  %v12484_v18 = vld [vmem:[%s12434_s7 + $0x100] sm:$0xff]  ;;  %v12488_v21 = vld [vmem:[%s12434_s7 + $0x48] sm:$0xff]  ;;  %11690 = vmatpush3.bf16.msra.mxu1 %v11875_v23  ;;  %10101 = vmatpush3.bf16.msra.mxu0 %v11875_v23  ;;  %p12217_p1 = scmp.lt.s32.totalorder %s16135_s15, %s12215_s9  ;;  %p12218_p3 = scmp.lt.s32.totalorder %s12216_s12, %s12210_s25 }
  0x45   : > { %814 = vperm.xlu1 %11773, %v12439_v3   ;;  %11683 = vmatprep.subr.bf16.mxu1 %v11876_v24  ;;  %v272_v32 = vld [vmem:[%s12434_s7 + $0x28] sm:$0xff]  ;;  %v12507_v35 = vld [vmem:[%s12434_s7 + $0x58] sm:$0xff]  ;;  %v297_v37 = vld [vmem:[%s12434_s7 + $0xf0] sm:$0xff]  ;;  %p12212_p11 = pnand %p12211_p8, %p16570_p10 }
  0x46   : > { %822 = vperm.xlu0 %11775, %v294_v4   ;;  %10102 = vmatprep.subr.bf16.mxu0 %v11876_v24  ;;  %v12513_v36 = vld [vmem:[%s12434_s7 + $0x68] sm:$0xff]  ;;  %v12522_v38 = vld [vmem:[%s12434_s7 + $0x50] sm:$0xff]  ;;  %v12527_v39 = vld [vmem:[%s12434_s7 + $0x60] sm:$0xff]  ;;  %p12219_p5 = por %p12218_p3, %p12217_p1 }
  0x47   : > { %v274_v40 = vld [vmem:[%s12434_s7 + $0x38] sm:$0xff]  ;;  %v12533_v41 = vld [vmem:[%s12434_s7 + $0x70] sm:$0xff]  ;;  %v283_v42 = vld [vmem:[%s12434_s7 + $0x80] sm:$0xff]  ;;  %p12213_p13 = pneg %p12212_p11 }
  0x48   : > { %11691 = vmatpush3.bf16.msra.mxu1 %v11877_v25  ;;  %10103 = vmatpush3.bf16.msra.mxu0 %v11877_v25  ;;  %v285_v43 = vld [vmem:[%s12434_s7 + $0x90] sm:$0xff]  ;;  %v12543_v45 = vld [vmem:[%s12434_s7 + $0x78] sm:$0xff]  ;;  %v284_v47 = vld [vmem:[%s12434_s7 + $0x88] sm:$0xff] }
  0x49   : > { %11774 = vset.pattern.permute.xlu1 %v16200_v7  ;;  %11684 = vmatprep.subr.bf16.mxu1 %v11878_v26  ;;  %v286_v51 = vld [vmem:[%s12434_s7 + $0x98] sm:$0xff]  ;;  %v288_v54 = vld [vmem:[%s12434_s7 + $0xa8] sm:$0xff]  ;;  %v275_v55 = vld [vmem:[%s12434_s7 + $0x40] sm:$0xff]  ;;  %p12220_p6 = pnand %p12219_p5, %p12213_p13 }
  0x4a   : > { %722 = vperm.xlu0 %11775, %v12444_v5   ;;  %329 = vperm.xlu1 %11774, %v12447_v6   ;;  %v287_v58 = vld [vmem:[%s12434_s7 + $0xa0] sm:$0xff] }
  0x4b   : > { %10104 = vmatprep.subr.bf16.mxu0 %v11878_v26  ;;  %v9803_v63 = vld [vmem:[%s16187_s1 + $0x1] ss:$2 sm:$0x3] }
  0x4c   : > { %11692 = vmatpush3.bf16.msra.mxu1 %v11879_v27  ;;  %10105 = vmatpush3.bf16.msra.mxu0 %v11879_v27 }
  0x4d   : > { %11685 = vmatprep.subr.bf16.mxu1 %v11880_v28  ;;  %10106 = vmatprep.subr.bf16.mxu0 %v11880_v28 }
  0x4e   : > { %830 = vperm.xlu0 %11775, %v12453_v8   ;;  %459 = vperm.xlu1 %11774, %v294_v4  }
  0x50   : > { %11693 = vmatpush3.bf16.msra.mxu1 %v11881_v29  ;;  %10107 = vmatpush3.bf16.msra.mxu0 %v11881_v29 }
  0x51   : > { %11686 = vmatprep.subr.bf16.mxu1 %v11882_v30  ;;  %10108 = vmatprep.subr.bf16.mxu0 %v11882_v30 }
  0x52   : > { %730 = vperm.xlu0 %11775, %v12457_v9   ;;  %11776 = vset.pattern.permute.xlu1 %v16202_v0 }
  0x53   : > { %718 = vperm.xlu1 %11776, %v12447_v6  }
  0x54   : > { %11694 = vmatpush3.bf16.msra.mxu1 %v11883_v31  ;;  %10109 = vmatpush3.bf16.msra.mxu0 %v11883_v31 }
  0x55   : > { %11687 = vmatprep.subr.bf16.mxu1 %v11884_v33  ;;  %10110 = vmatprep.subr.bf16.mxu0 %v11884_v33 }
  0x56   : > { %738 = vperm.xlu0 %11775, %v12461_v10  }
  0x57   : > { %818 = vperm.xlu1 %11776, %v293_v11  }
  0x58   : > { %11695 = vmatpush3.bf16.msra.mxu1 %v11885_v34  ;;  %10111 = vmatpush3.bf16.msra.mxu0 %v11885_v34  ;;  %v300_v34 = vld [vmem:[%s12434_s7 + $0x108] sm:$0xff] }
  0x5a   : > { %11789 = vset.pattern.permute.xlu0 %v16200_v7 }
  0x5b   : > { %444 = vperm.xlu0 %11789, %v291_v1   ;;  %11777 = vset.pattern.permute.xlu1 %v16204_v12 }
  0x5c   : > { %1254 = vperm.xlu1 %11777, %v291_v1  }
  0x5f   : > { %449 = vperm.xlu0 %11789, %v12439_v3  }
  0x60   : > { %11778 = vset.pattern.permute.xlu1 %v16200_v7 }
  0x61   : > { %334 = vperm.xlu1 %11778, %v12444_v5  }
  0x63   : > { %324 = vperm.xlu0 %11789, %v267_v2  }
  0x65   : > { %339 = vperm.xlu1 %11778, %v270_v13  }
  0x67   : > { %454 = vperm.xlu0 %11789, %v293_v11  }
  0x69   : > { %11779 = vset.pattern.permute.xlu1 %v16202_v0 }
  0x6a   : > { %726 = vperm.xlu1 %11779, %v270_v13  }
  0x6b   : > { %464 = vperm.xlu0 %11789, %v12474_v14  }
  0x6e   : > { %11780 = vset.pattern.permute.xlu1 %v16204_v12 }
  0x6f   : > { %479 = vperm.xlu0 %11789, %v12478_v15   ;;  %1158 = vperm.xlu1 %11780, %v267_v2   ;;  %v289_v2 = vld [vmem:[%s12434_s7 + $0xb0] sm:$0xff] }
  0x73   : > { %354 = vperm.xlu0 %11789, %v12461_v10   ;;  %1262 = vperm.xlu1 %11780, %v293_v11  }
  0x77   : > { %484 = vperm.xlu0 %11789, %v12484_v18   ;;  %1266 = vperm.xlu1 %11780, %v294_v4   ;;  %v321_v4 = vld [vmem:[%s16187_s1] ss:$2 sm:$0x3] }
  0x7b   : > { %369 = vperm.xlu0 %11789, %v12488_v21   ;;  %1170 = vperm.xlu1 %11780, %v270_v13   ;;  %v12596_v13 = vrot.slane %v321_v4, %v595_v50 }
  0x7f   : > { %11794 = vset.pattern.permute.xlu0 %v16204_v12  ;;  %11781 = vset.pattern.permute.xlu1 %v16200_v7 }
  0x80   : > { %1258 = vperm.xlu0 %11794, %v12439_v3   ;;  %469 = vperm.xlu1 %11781, %v12453_v8   ;;  %v11886_v3 = vld [vmem:[#allocation3 + $0x40] sm:$0xff]  }
  0x81   : > { %10208 = vmatprep.subr.bf16.mxu1 %v11886_v3 }
  0x84   : > { %1162 = vperm.xlu0 %11794, %v12447_v6   ;;  %11782 = vset.pattern.permute.xlu1 %v16202_v0 }
  0x85   : > { %826 = vperm.xlu1 %11782, %v12474_v14  }
  0x88   : > { %1166 = vperm.xlu0 %11794, %v12444_v5   ;;  %v1156_v5 = vld [vmem:[%s16188_s2] sm:$0x3] }
  0x89   : > { %11783 = vset.pattern.permute.xlu1 %v16200_v7  ;;  %v12602_v16 = vrot.slane %v1156_v5, %v599_v62 }
  0x8a   : > { %344 = vperm.xlu1 %11783, %v12457_v9  }
  0x8b   : > { %16295 = vst [vmem:[#allocation10_spill] sm:$0xff] %v12602_v16 }
  0x8c   : > { %1270 = vperm.xlu0 %11794, %v12474_v14   ;;  %v12598_v14 = vrot.slane %v321_v4, %v599_v62 }
  0x8e   : > { %349 = vperm.xlu1 %11783, %v272_v32  }
  0x90   : > { %1178 = vperm.xlu0 %11794, %v272_v32  }
  0x92   : > { %11784 = vset.pattern.permute.xlu1 %v16202_v0 }
  0x93   : > { %734 = vperm.xlu1 %11784, %v272_v32  }
  0x94   : > { %1282 = vperm.xlu0 %11794, %v12478_v15  }
  0x97   : > { %11785 = vset.pattern.permute.xlu1 %v16204_v12 }
  0x98   : > { %1194 = vperm.xlu0 %11794, %v12488_v21   ;;  %1274 = vperm.xlu1 %11785, %v12453_v8   ;;  %v290_v8 = vld [vmem:[%s12434_s7 + $0xb8] sm:$0xff] }
  0x9c   : > { %1202 = vperm.xlu0 %11794, %v12507_v35   ;;  %1174 = vperm.xlu1 %11785, %v12457_v9   ;;  %v12591_v9 = vrot.slane %v9803_v63, %v595_v50 }
  0xa0   : > { %1210 = vperm.xlu0 %11794, %v12513_v36   ;;  %11786 = vset.pattern.permute.xlu1 %v16200_v7 }
  0xa1   : > { %474 = vperm.xlu1 %11786, %v297_v37  }
  0xa4   : > { %11803 = vset.pattern.permute.xlu0 %v16202_v0 }
  0xa5   : > { %750 = vperm.xlu0 %11803, %v12488_v21   ;;  %11787 = vset.pattern.permute.xlu1 %v16202_v0 }
  0xa6   : > { %834 = vperm.xlu1 %11787, %v297_v37  }
  0xa9   : > { %754 = vperm.xlu0 %11803, %v12522_v38  }
  0xaa   : > { %838 = vperm.xlu1 %11787, %v12478_v15   ;;  %v12600_v15 = vrot.slane %v1156_v5, %v595_v50 }
  0xac   : > { %16294 = vst [vmem:[#allocation9_spill] sm:$0xff] %v12600_v15 }
  0xad   : > { %762 = vperm.xlu0 %11803, %v12527_v39  }
  0xae   : > { %11788 = vset.pattern.permute.xlu1 %v16200_v7 }
  0xaf   : > { %359 = vperm.xlu1 %11788, %v274_v40  }
  0xb1   : > { %770 = vperm.xlu0 %11803, %v12533_v41  }
  0xb3   : > { %11790 = vset.pattern.permute.xlu1 %v16202_v0 }
  0xb4   : > { %742 = vperm.xlu1 %11790, %v274_v40  }
  0xb5   : > { %778 = vperm.xlu0 %11803, %v283_v42  }
  0xb8   : > { %11791 = vset.pattern.permute.xlu1 %v16204_v12 }
  0xb9   : > { %786 = vperm.xlu0 %11803, %v285_v43   ;;  %1278 = vperm.xlu1 %11791, %v297_v37  }
  0xbd   : > { %11811 = vset.pattern.permute.xlu0 %v16204_v12  ;;  %1182 = vperm.xlu1 %11791, %v12461_v10   ;;  %v12593_v10 = vrot.slane %v9803_v63, %v599_v62 }
  0xbe   : > { %1218 = vperm.xlu0 %11811, %v12543_v45  }
  0xc0   : > { %v811_v48 = vpop.permute.xlu1 %810 }
  0xc1   : > { %v12549_v49 = vpop.permute.xlu0 %714  ;;  %1186 = vperm.xlu1 %11791, %v274_v40   ;;  %v989_v19 = vmul.f32 %v12593_v10, %v811_v48 }
  0xc2   : > { %1226 = vperm.xlu0 %11811, %v284_v47   ;;  %v940_v42 = vmul.f32 %v12591_v9, %v12549_v49  ;;  %v941_v43 = vmul.f32 %v12593_v10, %v12549_v49 }
  0xc4   : > { %v12552_v52 = vpop.permute.xlu1 %814 }
  0xc5   : > { %v12554_v53 = vpop.permute.xlu0 %822  ;;  %11792 = vset.pattern.permute.xlu1 %v16202_v0 }
  0xc6   : > { %842 = vperm.xlu1 %11792, %v12484_v18   ;;  %1234 = vperm.xlu0 %11811, %v286_v51   ;;  %v995_v4 = vmul.f32 %v12593_v10, %v12554_v53 }
  0xc9   : > { %v12560_v56 = vpop.permute.xlu0 %722  ;;  %v12562_v57 = vpop.permute.xlu1 %329 }
  0xca   : > { %11793 = vset.pattern.permute.xlu1 %v16200_v7  ;;  %1242 = vperm.xlu0 %11811, %v288_v54   ;;  %v301_v54 = vld [vmem:[%s12434_s7 + $0x110] sm:$0xff] }
  0xcb   : > { %364 = vperm.xlu1 %11793, %v275_v55  }
  0xcd   : > { %v12566_v59 = vpop.permute.xlu0 %830  ;;  %v12568_v60 = vpop.permute.xlu1 %459 }
  0xce   : > { %11817 = vset.pattern.permute.xlu0 %v16202_v0 }
  0xcf   : > { %11795 = vset.pattern.permute.xlu1 %v16202_v0  ;;  %794 = vperm.xlu0 %11817, %v287_v58  }
  0xd0   : > { %746 = vperm.xlu1 %11795, %v275_v55  }
  0xd1   : > { %v12572_v61 = vpop.permute.xlu0 %730 }
  0xd2   : > { %v12577_v1 = vpop.permute.xlu1 %718 }
  0xd3   : > { %802 = vperm.xlu0 %11817, %v289_v2  }
  0xd4   : > { %11796 = vset.pattern.permute.xlu1 %v16204_v12 }
  0xd5   : > { %v12587_v6 = vpop.permute.xlu0 %738  ;;  %1286 = vperm.xlu1 %11796, %v12484_v18   ;;  %v988_v18 = vmul.f32 %v12591_v9, %v811_v48 }
  0xd6   : > { %v819_v11 = vpop.permute.xlu1 %818 }
  0xd7   : > { %11821 = vset.pattern.permute.xlu0 %v16204_v12  ;;  %v992_v2 = vmul.f32 %v12591_v9, %v819_v11  ;;  %v993_v3 = vmul.f32 %v12593_v10, %v819_v11  ;;  %v658_v11 = vmul.f32 %v12598_v14, %v12568_v60 }
  0xd8   : > { %1250 = vperm.xlu0 %11821, %v290_v8  }
  0xd9   : > { %1190 = vperm.xlu1 %11796, %v275_v55  }
  0xda   : > { %v445_v17 = vpop.permute.xlu0 %444 }
  0xdb   : > { %v651_v20 = vmul.f32 %v12596_v13, %v445_v17  ;;  %v652_v21 = vmul.f32 %v12598_v14, %v445_v17  ;;  %v1255_v22 = vpop.permute.xlu1 %1254 }
  0xdc   : > { %v1432_v25 = vmul.f32 %v12600_v15, %v1255_v22  ;;  %v1433_v26 = vmul.f32 %v12602_v16, %v1255_v22  ;;  %11823 = vset.pattern.permute.xlu0 %v16202_v0 }
  0xdd   : > { %v1096_v23 = vadd.f32 %v988_v18, %v651_v20  ;;  %v1097_v24 = vadd.f32 %v989_v19, %v652_v21  ;;  %11797 = vset.pattern.permute.xlu1 %v16200_v7  ;;  %846 = vperm.xlu0 %11823, %v300_v34   ;;  %v657_v18 = vmul.f32 %v12596_v13, %v12568_v60  ;;  %v302_v60 = vld [vmem:[%s12434_s7 + $0x118] sm:$0xff] }
  0xde   : > { %v12612_v27 = vpop.permute.xlu0 %449  ;;  %374 = vperm.xlu1 %11797, %v12522_v38  }
  0xdf   : > { %v12614_v28 = vadd.f32 %v1432_v25, %v1096_v23  ;;  %v12616_v29 = vadd.f32 %v1433_v26, %v1097_v24 }
  0xe0   : > { %v12621_v32 = vpop.permute.xlu1 %334 }
  0xe1   : > { %v1648_v30 = vmax.f32 %v12614_v28, 0.0  ;;  %v1649_v31 = vmax.f32 %v12616_v29, 0.0  ;;  %11826 = vset.pattern.permute.xlu0 %v16204_v12 }
  0xe2   : > { %v325_v33 = vpop.permute.xlu0 %324  ;;  %379 = vperm.xlu1 %11797, %v12507_v35   ;;  %1294 = vperm.xlu0 %11826, %v301_v54  }
  0xe3   : > { %1756 = vst [vmem:[#allocation2 + $0x180] sm:$0xff] %v1648_v30  ;;  %1757 = vst [vmem:[#allocation2 + $0x188] sm:$0xff] %v1649_v31  ;;  %v603_v44 = vmul.f32 %v12596_v13, %v325_v33  ;;  %v604_v46 = vmul.f32 %v12598_v14, %v325_v33 }
  0xe4   : > { %v340_v37 = vpop.permute.xlu1 %339 }
  0xe5   : > { %v1049_v50 = vadd.f32 %v941_v43, %v604_v46 }
  0xe6   : > { %v455_v40 = vpop.permute.xlu0 %454  ;;  %11798 = vset.pattern.permute.xlu1 %v16202_v0  ;;  %1298 = vperm.xlu0 %11826, %v302_v60  }
  0xe7   : > { %758 = vperm.xlu1 %11798, %v12507_v35   ;;  %v1048_v35 = vadd.f32 %v940_v42, %v603_v44  ;;  %v655_v55 = vmul.f32 %v12596_v13, %v455_v40  ;;  %v656_v49 = vmul.f32 %v12598_v14, %v455_v40  ;;  %v1103_v40 = vadd.f32 %v995_v4, %v658_v11 }
  0xe8   : > { %v990_v11 = vmul.f32 %v12591_v9, %v12552_v52 }
  0xe9   : > { %v727_v47 = vpop.permute.xlu1 %726  ;;  %v1100_v19 = vadd.f32 %v992_v2, %v655_v55  ;;  %v1101_v20 = vadd.f32 %v993_v3, %v656_v49  ;;  %v609_v55 = vmul.f32 %v12596_v13, %v340_v37  ;;  %v610_v49 = vmul.f32 %v12598_v14, %v340_v37 }
  0xea   : > { %v12638_v48 = vpop.permute.xlu0 %464  ;;  %v946_v42 = vmul.f32 %v12591_v9, %v727_v47  ;;  %v947_v43 = vmul.f32 %v12593_v10, %v727_v47  ;;  %v654_v2 = vmul.f32 %v12598_v14, %v12612_v27  ;;  %11830 = vset.pattern.permute.xlu0 %v16200_v7 }
  0xeb   : > { %11799 = vset.pattern.permute.xlu1 %v16204_v12 }
  0xec   : > { %1198 = vperm.xlu1 %11799, %v12522_v38   ;;  %v994_v38 = vmul.f32 %v12591_v9, %v12554_v53  ;;  %v1054_v3 = vadd.f32 %v946_v42, %v609_v55  ;;  %v944_v42 = vmul.f32 %v12591_v9, %v12560_v56  ;;  %v607_v55 = vmul.f32 %v12596_v13, %v12621_v32 }
  0xee   : > { %v12642_v51 = vpop.permute.xlu0 %479  ;;  %v1159_v58 = vpop.permute.xlu1 %1158  ;;  %v1102_v34 = vadd.f32 %v994_v38, %v657_v18  ;;  %v1055_v38 = vadd.f32 %v947_v43, %v610_v49  ;;  %v945_v43 = vmul.f32 %v12593_v10, %v12560_v56 }
  0xef   : > { %v1384_v62 = vmul.f32 %v12600_v15, %v1159_v58  ;;  %v1385_v63 = vmul.f32 %v12602_v16, %v1159_v58  ;;  %v653_v58 = vmul.f32 %v12596_v13, %v12612_v27 }
  0xf0   : > { %11800 = vset.pattern.permute.xlu1 %v16200_v7 }
  0xf1   : > { %v1492_v5 = vadd.f32 %v1384_v62, %v1048_v35  ;;  %v1493_v8 = vadd.f32 %v1385_v63, %v1049_v50  ;;  %384 = vperm.xlu1 %11800, %v12527_v39  }
  0xf2   : > { %v12657_v17 = vpop.permute.xlu0 %354  ;;  %v1263_v21 = vpop.permute.xlu1 %1262 }
  0xf3   : > { %v1600_v22 = vmax.f32 %v1492_v5, 0.0  ;;  %v1601_v23 = vmax.f32 %v1493_v8, 0.0  ;;  %v1436_v53 = vmul.f32 %v12600_v15, %v1263_v21  ;;  %v1437_v24 = vmul.f32 %v12602_v16, %v1263_v21 }
  0xf4   : > { %v943_v21 = vmul.f32 %v12593_v10, %v12577_v1 }
  0xf5   : > { %1708 = vst [vmem:[#allocation2] sm:$0xff] %v1600_v22  ;;  %1709 = vst [vmem:[#allocation2 + $0x8] sm:$0xff] %v1601_v23  ;;  %v12665_v25 = vadd.f32 %v1436_v53, %v1100_v19  ;;  %v12667_v26 = vadd.f32 %v1437_v24, %v1101_v20  ;;  %389 = vperm.xlu1 %11800, %v12513_v36   ;;  %v991_v19 = vmul.f32 %v12593_v10, %v12552_v52 }
  0xf6   : > { %v12670_v33 = vpop.permute.xlu0 %484  ;;  %v1267_v44 = vpop.permute.xlu1 %1266  ;;  %v942_v20 = vmul.f32 %v12591_v9, %v12577_v1  ;;  %v1098_v22 = vadd.f32 %v990_v11, %v653_v58  ;;  %v605_v1 = vmul.f32 %v12596_v13, %v12562_v57 }
  0xf7   : > { %v1652_v46 = vmax.f32 %v12665_v25, 0.0  ;;  %v1653_v35 = vmax.f32 %v12667_v26, 0.0  ;;  %v1438_v50 = vmul.f32 %v12600_v15, %v1267_v44  ;;  %v1439_v54 = vmul.f32 %v12602_v16, %v1267_v44 }
  0xf8   : > { %v1099_v23 = vadd.f32 %v991_v19, %v654_v2  ;;  %v659_v2 = vmul.f32 %v12596_v13, %v12638_v48 }
  0xf9   : > { %1760 = vst [vmem:[#allocation2 + $0x1a0] sm:$0xff] %v1652_v46  ;;  %1761 = vst [vmem:[#allocation2 + $0x1a8] sm:$0xff] %v1653_v35  ;;  %v1546_v47 = vadd.f32 %v1438_v50, %v1102_v34  ;;  %v1547_v62 = vadd.f32 %v1439_v54, %v1103_v40  ;;  %11801 = vset.pattern.permute.xlu1 %v16202_v0  ;;  %v606_v40 = vmul.f32 %v12598_v14, %v12562_v57 }
  0xfa   : > { %v12686_v63 = vpop.permute.xlu0 %369  ;;  %766 = vperm.xlu1 %11801, %v12513_v36   ;;  %v1171_v37 = vpop.permute.xlu1 %1170  ;;  %v1050_v50 = vadd.f32 %v942_v20, %v605_v1  ;;  %v608_v57 = vmul.f32 %v12598_v14, %v12621_v32 }
  0xfb   : > { %v1654_v4 = vmax.f32 %v1546_v47, 0.0  ;;  %v1655_v5 = vmax.f32 %v1547_v62, 0.0  ;;  %v1390_v8 = vmul.f32 %v12600_v15, %v1171_v37  ;;  %v1391_v18 = vmul.f32 %v12602_v16, %v1171_v37 }
  0xfc   : > { %v1051_v54 = vadd.f32 %v943_v21, %v606_v40  ;;  %v1947_v1 = vld [vmem:[#allocation2] sm:$0xfe] }
  0xfd   : > { %1762 = vst [vmem:[#allocation2 + $0x1b0] sm:$0xff] %v1654_v4  ;;  %1763 = vst [vmem:[#allocation2 + $0x1b8] sm:$0xff] %v1655_v5  ;;  %v12698_v27 = vadd.f32 %v1390_v8, %v1054_v3  ;;  %v12700_v36 = vadd.f32 %v1391_v18, %v1055_v38  ;;  %v660_v3 = vmul.f32 %v12598_v14, %v12638_v48 }
  0xfe   : > { %11802 = vset.pattern.permute.xlu1 %v16204_v12  ;;  %v12738_v37 = vpack.c.bf16 %v1655_v5, %v1653_v35  ;;  %v12742_v32 = vpack.c.bf16 %v1654_v4, %v1652_v46  ;;  %v12748_v48 = vmul.f32 %v12591_v9, %v12566_v59  ;;  %v1052_v46 = vadd.f32 %v944_v42, %v607_v55 }
  0xff   : > { %v1259_v53 = vpop.permute.xlu0 %1258  ;;  %v1606_v24 = vmax.f32 %v12698_v27, 0.0  ;;  %v1607_v52 = vmax.f32 %v12700_v36, 0.0  ;;  %1206 = vperm.xlu1 %11802, %v12527_v39   ;;  %v12712_v34 = vpop.permute.xlu1 %469  ;;  %v1053_v4 = vadd.f32 %v945_v43, %v608_v57 }
 0x100   : > { %v1434_v26 = vmul.f32 %v12600_v15, %v1259_v53  ;;  %v1435_v60 = vmul.f32 %v12602_v16, %v1259_v53  ;;  %v2201_v29 = vshll.u32 %v12738_v37, 16 }
 0x101   : > { %1714 = vst [vmem:[#allocation2 + $0x30] sm:$0xff] %v1606_v24  ;;  %1715 = vst [vmem:[#allocation2 + $0x38] sm:$0xff] %v1607_v52 }
 0x102   : > { %v1542_v39 = vadd.f32 %v1434_v26, %v1098_v22  ;;  %v1543_v44 = vadd.f32 %v1435_v60, %v1099_v23  ;;  %v2193_v26 = vshll.u32 %v12742_v32, 16  ;;  %v1948_v60 = vld [vmem:[#allocation2 + $0x8] sm:$0xfe] }
 0x103   : > { %v1163_v49 = vpop.permute.xlu0 %1162  ;;  %11804 = vset.pattern.permute.xlu1 %v16200_v7 }
 0x104   : > { %v1650_v58 = vmax.f32 %v1542_v39, 0.0  ;;  %v1651_v47 = vmax.f32 %v1543_v44, 0.0  ;;  %v1386_v56 = vmul.f32 %v12600_v15, %v1163_v49  ;;  %v1387_v62 = vmul.f32 %v12602_v16, %v1163_v49  ;;  %394 = vperm.xlu1 %11804, %v12533_v41   ;;  %v827_v38 = vpop.permute.xlu1 %826 }
 0x105   : > { %v996_v11 = vmul.f32 %v12591_v9, %v827_v38  ;;  %v997_v19 = vmul.f32 %v12593_v10, %v827_v38 }
 0x106   : > { %1758 = vst [vmem:[#allocation2 + $0x190] sm:$0xff] %v1650_v58  ;;  %1759 = vst [vmem:[#allocation2 + $0x198] sm:$0xff] %v1651_v47  ;;  %v1494_v8 = vadd.f32 %v1386_v56, %v1050_v50  ;;  %v1495_v18 = vadd.f32 %v1387_v62, %v1051_v54  ;;  %v12752_v35 = vpack.c.bf16 %v1651_v47, %v1649_v31 }
 0x107   : > { %v1167_v41 = vpop.permute.xlu0 %1166  ;;  %v12756_v25 = vpack.c.bf16 %v1650_v58, %v1648_v30  ;;  %v1104_v28 = vadd.f32 %v996_v11, %v659_v2  ;;  %v1105_v30 = vadd.f32 %v997_v19, %v660_v3  ;;  %v999_v11 = vmul.f32 %v12593_v10, %v12566_v59 }
 0x108   : > { %16296 = vst [vmem:[#allocation11_spill] sm:$0xff] %v12752_v35  ;;  %v1602_v5 = vmax.f32 %v1494_v8, 0.0  ;;  %v12758_v20 = vmax.f32 %v1495_v18, 0.0  ;;  %v1388_v21 = vmul.f32 %v12600_v15, %v1167_v41  ;;  %v1389_v22 = vmul.f32 %v12602_v16, %v1167_v41  ;;  %399 = vperm.xlu1 %11804, %v12543_v45   ;;  %v11887_v18 = vld [vmem:[#allocation3] sm:$0xff]  }
 0x109   : > { %v2185_v23 = vshll.u32 %v12752_v35, 16  ;;  %v12766_v31 = vpop.permute.xlu1 %344  ;;  %v2177_v53 = vshll.u32 %v12756_v25, 16  ;;  %v2197_v39 = vshrl.u32 %v12752_v35, 16  ;;  %v2189_v44 = vshrl.u32 %v12756_v25, 16 }
 0x10a   : > { %1710 = vst [vmem:[#allocation2 + $0x10] sm:$0xff] %v1602_v5  ;;  %1711 = vst [vmem:[#allocation2 + $0x18] sm:$0xff] %v12758_v20  ;;  %v1496_v40 = vadd.f32 %v1388_v21, %v1052_v46  ;;  %v1497_v42 = vadd.f32 %v1389_v22, %v1053_v4  ;;  %v1952_v47 = vpack.c.bf16 %v12758_v20, %v1948_v60  ;;  %v12789_v41 = vrot.slane %v2201_v29, 1  ;;  %v12158_v60 = vld [vmem:[%s12434_s7 + $0x70] sm:$0xff] }
 0x10b   : > { %v1271_v43 = vpop.permute.xlu0 %1270  ;;  %v12774_v55 = vrot.slane %v2185_v23, 1  ;;  %v12776_v57 = vrot.slane %v2177_v53, 1  ;;  %v1951_v56 = vpack.c.bf16 %v1602_v5, %v1947_v1  ;;  %v12791_v46 = vrot.slane %v2193_v26, 1  ;;  %v11888_v5 = vld [vmem:[#allocation3 + $0x48] sm:$0xff]  }
 0x10c   : > { %v1440_v50 = vmul.f32 %v12600_v15, %v1271_v43  ;;  %v1441_v54 = vmul.f32 %v12602_v16, %v1271_v43  ;;  %v1604_v49 = vmax.f32 %v1496_v40, 0.0  ;;  %v1605_v58 = vmax.f32 %v1497_v42, 0.0  ;;  %11805 = vset.pattern.permute.xlu1 %v16202_v0 }
 0x10d   : > { %774 = vperm.xlu1 %11805, %v12543_v45   ;;  %v350_v3 = vpop.permute.xlu1 %349  ;;  %v2199_v38 = vor.u32 %v2197_v39, %v12774_v55  ;;  %v2191_v8 = vor.u32 %v2189_v44, %v12776_v57  ;;  %v1990_v53 = vshrl.u32 %v1951_v56, 16  ;;  %v1992_v26 = vshll.u32 %v1951_v56, 16 }
 0x10e   : > { %v12780_v62 = vadd.f32 %v1440_v50, %v1104_v28  ;;  %v12782_v2 = vadd.f32 %v1441_v54, %v1105_v30  ;;  %v12795_v4 = vpack.c.bf16 %v1607_v52, %v1605_v58  ;;  %v613_v22 = vmul.f32 %v12596_v13, %v350_v3 }
 0x10f   : > { %v1179_v19 = vpop.permute.xlu0 %1178  ;;  %v614_v23 = vmul.f32 %v12598_v14, %v350_v3  ;;  %v2204_v59 = vsel %vm1988_vm0, %v2199_v38, %v12789_v41  ;;  %v2196_v29 = vsel %vm1988_vm0, %v2191_v8, %v12791_v46  ;;  %v2004_v28 = vshll.u32 %v1952_v47, 16 }
 0x110   : > { %v1656_v45 = vmax.f32 %v12780_v62, 0.0  ;;  %v1657_v21 = vmax.f32 %v12782_v2, 0.0  ;;  %v2009_v36 = vshll.u32 %v12795_v4, 16  ;;  %2509 = vmatprep.mubr.bf16.mxu1 %v2204_v59  ;;  %v2002_v52 = vshrl.u32 %v1952_v47, 16  ;;  %v11889_v59 = vld [vmem:[#allocation3 + $0x8] sm:$0xff]  }
 0x111   : > { %11806 = vset.pattern.permute.xlu1 %v16204_v12  ;;  %v12813_v30 = vpack.c.bf16 %v1606_v24, %v1604_v49  ;;  %v1394_v40 = vmul.f32 %v12600_v15, %v1179_v19  ;;  %v1395_v42 = vmul.f32 %v12602_v16, %v1179_v19  ;;  %2510 = vmatmul.mubr.bf16.vlgmr.msra.gmra.mrb[0].mxu1 %v2196_v29  ;;  %v2006_v43 = vrot.slane %v2004_v28, 1 }
 0x112   : > { %1764 = vst [vmem:[#allocation2 + $0x1c0] sm:$0xff] %v1656_v45  ;;  %1765 = vst [vmem:[#allocation2 + $0x1c8] sm:$0xff] %v1657_v21  ;;  %1214 = vperm.xlu1 %11806, %v12158_v60   ;;  %v735_v1 = vpop.permute.xlu1 %734  ;;  %v12818_v39 = vrot.slane %v2009_v36, 1  ;;  %v1994_v24 = vrot.slane %v1992_v26, 1  ;;  %10209 = vmatpush3.bf16.msra.mxu1 %v11887_v18  ;;  %v948_v49 = vmul.f32 %v12591_v9, %v12572_v61 }
 0x113   : > { %v12820_v44 = vpop.permute.xlu0 %1282  ;;  %v950_v50 = vmul.f32 %v12591_v9, %v735_v1  ;;  %v951_v27 = vmul.f32 %v12593_v10, %v735_v1  ;;  %v1997_v54 = vshll.u32 %v12813_v30, 16  ;;  %v661_v58 = vmul.f32 %v12596_v13, %v12712_v34  ;;  %10210 = vmatprep.subr.bf16.mxu1 %v11888_v5 }
 0x114   : > { %v662_v47 = vmul.f32 %v12598_v14, %v12712_v34  ;;  %v2007_v56 = vor.u32 %v2006_v43, %v2002_v52  ;;  %v1995_v8 = vor.u32 %v1994_v24, %v1990_v53  ;;  %v949_v18 = vmul.f32 %v12593_v10, %v12572_v61  ;;  %v12845_v52 = vld [vmem:[%s12434_s7 + $0x80] sm:$0xff] }
 0x115   : > { %v1058_v3 = vadd.f32 %v950_v50, %v613_v22  ;;  %v1059_v38 = vadd.f32 %v951_v27, %v614_v23  ;;  %v12831_v19 = vrot.slane %v1997_v54, 1  ;;  %v611_v29 = vmul.f32 %v12596_v13, %v12766_v31  ;;  %v11890_v22 = vld [vmem:[#allocation3 + $0x50] sm:$0xff]   ;;  %v11892_v54 = vld [vmem:[#allocation3 + $0x58] sm:$0xff]  }
 0x116   : > { %v612_v28 = vmul.f32 %v12598_v14, %v12766_v31  ;;  %11807 = vset.pattern.permute.xlu1 %v16200_v7  ;;  %v2012_v34 = vsel %vm1988_vm0, %v2007_v56, %v12818_v39  ;;  %v1106_v31 = vadd.f32 %v12748_v48, %v661_v58  ;;  %v1107_v26 = vadd.f32 %v999_v11, %v662_v47  ;;  %v11891_v43 = vld [vmem:[#allocation3 + $0x10] sm:$0xff]   ;;  %v12160_v48 = vld [vmem:[%s12434_s7 + $0x88] sm:$0xff] }
 0x117   : > { %v12842_v5 = vpop.permute.xlu0 %1194  ;;  %v1502_v23 = vadd.f32 %v1394_v40, %v1058_v3  ;;  %v1503_v36 = vadd.f32 %v1395_v42, %v1059_v38  ;;  %404 = vperm.xlu1 %11807, %v12845_v52   ;;  %v1275_v61 = vpop.permute.xlu1 %1274  ;;  %2413 = vmatprep.mubr.bf16.mxu0 %v2012_v34  ;;  %v2000_v53 = vsel %vm1988_vm0, %v1995_v8, %v12831_v19  ;;  %v11893_v58 = vld [vmem:[#allocation3 + $0x18] sm:$0xff]   ;;  %v11894_v34 = vld [vmem:[#allocation3 + $0x60] sm:$0xff]  }
 0x118   : > { %v1442_v60 = vmul.f32 %v12600_v15, %v1275_v61  ;;  %v1443_v1 = vmul.f32 %v12602_v16, %v1275_v61  ;;  %2414 = vmatmul.mubr.bf16.vlgmr.msra.gmra.mrb[0].mxu0 %v2000_v53  ;;  %10211 = vmatpush3.bf16.msra.mxu1 %v11889_v59  ;;  %v1056_v56 = vadd.f32 %v948_v49, %v611_v29 }
 0x119   : > { %v1610_v40 = vmax.f32 %v1502_v23, 0.0  ;;  %v1611_v42 = vmax.f32 %v1503_v36, 0.0  ;;  %10212 = vmatprep.subr.bf16.mxu1 %v11890_v22  ;;  %v1057_v3 = vadd.f32 %v949_v18, %v612_v28  ;;  %v2213_v23 = vshrl.u32 %v12738_v37, 16 }
 0x11a   : > { %v1550_v50 = vadd.f32 %v1442_v60, %v1106_v31  ;;  %v1551_v27 = vadd.f32 %v1443_v1, %v1107_v26  ;;  %v2205_v22 = vshrl.u32 %v12742_v32, 16 }
 0x11b   : > { %v12853_v24 = vpop.permute.xlu0 %1202  ;;  %1718 = vst [vmem:[#allocation2 + $0x50] sm:$0xff] %v1610_v40  ;;  %1719 = vst [vmem:[#allocation2 + $0x58] sm:$0xff] %v1611_v42  ;;  %409 = vperm.xlu1 %11807, %v12160_v48   ;;  %v1175_v11 = vpop.permute.xlu1 %1174 }
 0x11c   : > { %v1658_v47 = vmax.f32 %v1550_v50, 0.0  ;;  %v1659_v38 = vmax.f32 %v1551_v27, 0.0  ;;  %v1392_v8 = vmul.f32 %v12600_v15, %v1175_v11  ;;  %v1393_v59 = vmul.f32 %v12602_v16, %v1175_v11  ;;  %10213 = vmatpush3.bf16.msra.mxu1 %v11891_v43  ;;  %v11895_v50 = vld [vmem:[#allocation3 + $0x20] sm:$0xff]   ;;  %v11896_v27 = vld [vmem:[#allocation3 + $0x68] sm:$0xff]  }
 0x11d   : > { %10214 = vmatprep.subr.bf16.mxu1 %v11892_v54  ;;  %v2207_v62 = vor.u32 %v2205_v22, %v12791_v46  ;;  %v621_v54 = vmul.f32 %v12596_v13, %v12686_v63  ;;  %v2013_v46 = vshrl.u32 %v12813_v30, 16  ;;  %v622_v11 = vmul.f32 %v12598_v14, %v12686_v63  ;;  %v11897_v63 = vld [vmem:[#allocation3 + $0x28] sm:$0xff]  }
 0x11e   : > { %1766 = vst [vmem:[#allocation2 + $0x1d0] sm:$0xff] %v1658_v47  ;;  %1767 = vst [vmem:[#allocation2 + $0x1d8] sm:$0xff] %v1659_v38  ;;  %v1500_v49 = vadd.f32 %v1392_v8, %v1056_v56  ;;  %v1501_v18 = vadd.f32 %v1393_v59, %v1057_v3  ;;  %v12862_v29 = vpack.c.bf16 %v1659_v38, %v1657_v21 }
 0x11f   : > { %v12866_v28 = vpack.c.bf16 %v1658_v47, %v1656_v45  ;;  %v12868_v36 = vpop.permute.xlu0 %1210  ;;  %11808 = vset.pattern.permute.xlu1 %v16202_v0  ;;  %v2215_v21 = vor.u32 %v2213_v23, %v12789_v41  ;;  %v2021_v41 = vshrl.u32 %v12795_v4, 16  ;;  %v1402_v47 = vmul.f32 %v12600_v15, %v12842_v5 }
 0x120   : > { %v1608_v61 = vmax.f32 %v1500_v49, 0.0  ;;  %v1609_v53 = vmax.f32 %v1501_v18, 0.0  ;;  %782 = vperm.xlu1 %11808, %v12160_v48   ;;  %v12871_v31 = vpop.permute.xlu1 %474  ;;  %v2217_v26 = vshll.u32 %v12862_v29, 16  ;;  %10215 = vmatpush3.bf16.msra.mxu1 %v11893_v58  ;;  %v11898_v18 = vld [vmem:[#allocation3 + $0x70] sm:$0xff]  }
 0x121   : > { %v2209_v2 = vshll.u32 %v12866_v28, 16  ;;  %10216 = vmatprep.subr.bf16.mxu1 %v11894_v34  ;;  %v2023_v8 = vor.u32 %v2021_v41, %v12818_v39  ;;  %v2015_v34 = vor.u32 %v2013_v46, %v12831_v19  ;;  %v666_v39 = vmul.f32 %v12598_v14, %v12642_v51  ;;  %v12161_v41 = vld [vmem:[%s12434_s7 + $0x90] sm:$0xff]  ;;  %v11900_v46 = vld [vmem:[#allocation3 + $0x78] sm:$0xff]  }
 0x122   : > { %1716 = vst [vmem:[#allocation2 + $0x40] sm:$0xff] %v1608_v61  ;;  %1717 = vst [vmem:[#allocation2 + $0x48] sm:$0xff] %v1609_v53  ;;  %v12877_v45 = vrot.slane %v2217_v26, 1  ;;  %v12881_v1 = vpack.c.bf16 %v1611_v42, %v1609_v53  ;;  %v12883_v43 = vpack.c.bf16 %v1610_v40, %v1608_v61  ;;  %v665_v61 = vmul.f32 %v12596_v13, %v12642_v51 }
 0x123   : > { %v12879_v60 = vrot.slane %v2209_v2, 1  ;;  %v1446_v2 = vmul.f32 %v12600_v15, %v12820_v44 }
 0x124   : > { %v751_v56 = vpop.permute.xlu0 %750  ;;  %11809 = vset.pattern.permute.xlu1 %v16204_v12  ;;  %v2220_v3 = vsel %vm1988_vm0, %v2215_v21, %v12877_v45  ;;  %v2025_v42 = vshll.u32 %v12881_v1, 16  ;;  %v2017_v48 = vshll.u32 %v12883_v43, 16  ;;  %10217 = vmatpush3.bf16.msra.mxu1 %v11895_v50  ;;  %v11899_v50 = vld [vmem:[#allocation3 + $0x30] sm:$0xff]  }
 0x125   : > { %v2212_v40 = vsel %vm1988_vm0, %v2207_v62, %v12879_v60  ;;  %1222 = vperm.xlu1 %11809, %v12845_v52   ;;  %v12899_v58 = vpop.permute.xlu1 %834  ;;  %2517 = vmatprep.mubr.bf16.mxu1 %v2220_v3  ;;  %v958_v38 = vmul.f32 %v12591_v9, %v751_v56  ;;  %v1403_v52 = vmul.f32 %v12602_v16, %v12842_v5  ;;  %v11902_v5 = vld [vmem:[#allocation3 + $0x140] sm:$0xff]  }
 0x126   : > { %2518 = vmatmul.mubr.bf16.gmra.mrb[4].mxu1 %v2212_v40  ;;  %v12905_v59 = vrot.slane %v2025_v42, 1  ;;  %v12908_v23 = vrot.slane %v2017_v48, 1  ;;  %v959_v22 = vmul.f32 %v12593_v10, %v751_v56  ;;  %10218 = vmatprep.subr.bf16.mxu1 %v11896_v27  ;;  %v1447_v27 = vmul.f32 %v12602_v16, %v12820_v44  ;;  %v11903_v40 = vld [vmem:[#allocation3 + $0x100] sm:$0xff]  }
 0x127   : > { %v1066_v49 = vadd.f32 %v958_v38, %v621_v54  ;;  %10320 = vmatprep.subr.bf16.mxu0 %v11902_v5  ;;  %v12162_v38 = vld [vmem:[%s12434_s7 + $0x98] sm:$0xff]  ;;  %v615_v5 = vmul.f32 %v12596_v13, %v12657_v17 }
 0x128   : > { %v2028_v19 = vsel %vm1988_vm0, %v2023_v8, %v12905_v59  ;;  %v2020_v53 = vsel %vm1988_vm0, %v2015_v34, %v12908_v23  ;;  %v1067_v21 = vadd.f32 %v959_v22, %v622_v11  ;;  %10219 = vmatpush3.bf16.msra.mxu1 %v11897_v63  ;;  %10321 = vmatpush3.bf16.msra.mxu0 %v11903_v40  ;;  %v11901_v34 = vld [vmem:[#allocation3 + $0x38] sm:$0xff]   ;;  %v11905_v22 = vld [vmem:[#allocation3 + $0x108] sm:$0xff]  }
 0x129   : > { %11810 = vset.pattern.permute.xlu1 %v16200_v7  ;;  %v839_v26 = vpop.permute.xlu1 %838  ;;  %2421 = vmatprep.mubr.bf16.mxu0 %v2028_v19  ;;  %v12924_v62 = vadd.f32 %v1402_v47, %v1066_v49  ;;  %v952_v19 = vmul.f32 %v12591_v9, %v12587_v6 }
 0x12a   : > { %v1002_v51 = vmul.f32 %v12591_v9, %v839_v26  ;;  %v1003_v54 = vmul.f32 %v12593_v10, %v839_v26  ;;  %414 = vperm.xlu1 %11810, %v12161_v41   ;;  %2422 = vmatmul.mubr.bf16.gmra.mrb[4].mxu0 %v2020_v53  ;;  %v12931_v56 = vadd.f32 %v1403_v52, %v1067_v21  ;;  %v11904_v52 = vld [vmem:[#allocation3 + $0x148] sm:$0xff]  }
 0x12b   : > { %v1618_v3 = vmax.f32 %v12924_v62, 0.0  ;;  %10220 = vmatprep.subr.bf16.mxu1 %v11898_v18  ;;  %10322 = vmatprep.subr.bf16.mxu0 %v11904_v52  ;;  %v953_v53 = vmul.f32 %v12593_v10, %v12587_v6  ;;  %v616_v26 = vmul.f32 %v12598_v14, %v12657_v17  ;;  %v664_v21 = vmul.f32 %v12598_v14, %v12871_v31 }
 0x12c   : > { %v1110_v42 = vadd.f32 %v1002_v51, %v665_v61  ;;  %v1111_v48 = vadd.f32 %v1003_v54, %v666_v39  ;;  %v1619_v11 = vmax.f32 %v12931_v56, 0.0  ;;  %10221 = vmatpush3.bf16.msra.mxu1 %v11899_v50  ;;  %10323 = vmatpush3.bf16.msra.mxu0 %v11905_v22  ;;  %v1000_v61 = vmul.f32 %v12591_v9, %v12899_v58 }
 0x12d   : > { %1726 = vst [vmem:[#allocation2 + $0x90] sm:$0xff] %v1618_v3  ;;  %10222 = vmatprep.subr.bf16.mxu1 %v11900_v46  ;;  %v1001_v39 = vmul.f32 %v12593_v10, %v12899_v58  ;;  %v1061_v46 = vadd.f32 %v953_v53, %v616_v26 }
 0x12e   : > { %v1554_v44 = vadd.f32 %v1446_v2, %v1110_v42  ;;  %v1555_v47 = vadd.f32 %v1447_v27, %v1111_v48  ;;  %419 = vperm.xlu1 %11810, %v12162_v38   ;;  %v360_v8 = vpop.permute.xlu1 %359  ;;  %1727 = vst [vmem:[#allocation2 + $0x98] sm:$0xff] %v1619_v11  ;;  %v663_v2 = vmul.f32 %v12596_v13, %v12871_v31 }
 0x12f   : > { %v1109_v51 = vadd.f32 %v1001_v39, %v664_v21  ;;  %v1060_v27 = vadd.f32 %v952_v19, %v615_v5  ;;  %v617_v52 = vmul.f32 %v12596_v13, %v360_v8  ;;  %v618_v22 = vmul.f32 %v12598_v14, %v360_v8  ;;  %v11907_v39 = vld [vmem:[#allocation3 + $0x110] sm:$0xff]  }
 0x130   : > { %v1662_v63 = vmax.f32 %v1554_v44, 0.0  ;;  %v1663_v49 = vmax.f32 %v1555_v47, 0.0  ;;  %10223 = vmatpush3.bf16.msra.mxu1 %v11901_v34  ;;  %v1108_v50 = vadd.f32 %v1000_v61, %v663_v2  ;;  %v12163_v34 = vld [vmem:[%s12434_s7 + $0xa0] sm:$0xff] }
 0x131   : > { %v11906_v61 = vld [vmem:[#allocation3 + $0x150] sm:$0xff]  }
 0x132   : > { %1770 = vst [vmem:[#allocation2 + $0x1f0] sm:$0xff] %v1662_v63  ;;  %1771 = vst [vmem:[#allocation2 + $0x1f8] sm:$0xff] %v1663_v49  ;;  %11812 = vset.pattern.permute.xlu1 %v16202_v0  ;;  %10324 = vmatprep.subr.bf16.mxu0 %v11906_v61  ;;  %v2037_v61 = vshrl.u32 %v12881_v1, 16 }
 0x133   : > { %790 = vperm.xlu1 %11812, %v12162_v38   ;;  %v743_v18 = vpop.permute.xlu1 %742  ;;  %10325 = vmatpush3.bf16.msra.mxu0 %v11907_v39 }
 0x134   : > { %v954_v42 = vmul.f32 %v12591_v9, %v743_v18  ;;  %v955_v48 = vmul.f32 %v12593_v10, %v743_v18 }
 0x136   : > { %v1062_v26 = vadd.f32 %v954_v42, %v617_v52  ;;  %v1063_v2 = vadd.f32 %v955_v48, %v618_v22 }
 0x137   : > { %11813 = vset.pattern.permute.xlu1 %v16204_v12 }
 0x138   : > { %1230 = vperm.xlu1 %11813, %v12161_v41   ;;  %v1279_v58 = vpop.permute.xlu1 %1278 }
 0x139   : > { %v1444_v6 = vmul.f32 %v12600_v15, %v1279_v58  ;;  %v1445_v54 = vmul.f32 %v12602_v16, %v1279_v58 }
 0x13b   : > { %v1552_v17 = vadd.f32 %v1444_v6, %v1108_v50  ;;  %v1553_v40 = vadd.f32 %v1445_v54, %v1109_v51  ;;  %v12164_v6 = vld [vmem:[%s12434_s7 + $0xa8] sm:$0xff]  ;;  %v11908_v54 = vld [vmem:[#allocation3 + $0x1c0] sm:$0xff]  }
 0x13c   : > { %11814 = vset.pattern.permute.xlu1 %v16200_v7  ;;  %v1183_v31 = vpop.permute.xlu1 %1182  ;;  %10432 = vmatprep.subr.bf16.mxu1 %v11908_v54  ;;  %v11911_v54 = vld [vmem:[#allocation3 + $0x118] sm:$0xff]  }
 0x13d   : > { %v1660_v41 = vmax.f32 %v1552_v17, 0.0  ;;  %v1661_v44 = vmax.f32 %v1553_v40, 0.0  ;;  %v1396_v47 = vmul.f32 %v12600_v15, %v1183_v31  ;;  %v1397_v38 = vmul.f32 %v12602_v16, %v1183_v31  ;;  %424 = vperm.xlu1 %11814, %v12163_v34  }
 0x13f   : > { %1768 = vst [vmem:[#allocation2 + $0x1e0] sm:$0xff] %v1660_v41  ;;  %1769 = vst [vmem:[#allocation2 + $0x1e8] sm:$0xff] %v1661_v44  ;;  %v1504_v18 = vadd.f32 %v1396_v47, %v1060_v27  ;;  %v1505_v19 = vadd.f32 %v1397_v38, %v1061_v46  ;;  %v12968_v53 = vpack.c.bf16 %v1663_v49, %v1661_v44  ;;  %v2229_v27 = vshrl.u32 %v12862_v29, 16 }
 0x140   : > { %v12970_v5 = vpack.c.bf16 %v1662_v63, %v1660_v41  ;;  %v1187_v21 = vpop.permute.xlu1 %1186  ;;  %v2221_v63 = vshrl.u32 %v12866_v28, 16 }
 0x141   : > { %v1612_v58 = vmax.f32 %v1504_v18, 0.0  ;;  %v1613_v50 = vmax.f32 %v1505_v19, 0.0  ;;  %v1398_v51 = vmul.f32 %v12600_v15, %v1187_v21  ;;  %v1399_v8 = vmul.f32 %v12602_v16, %v1187_v21  ;;  %429 = vperm.xlu1 %11814, %v12164_v6  }
 0x142   : > { %v2233_v49 = vshll.u32 %v12968_v53, 16  ;;  %v2225_v46 = vshll.u32 %v12970_v5, 16  ;;  %v2231_v42 = vor.u32 %v2229_v27, %v12877_v45  ;;  %v2223_v31 = vor.u32 %v2221_v63, %v12879_v60 }
 0x143   : > { %1720 = vst [vmem:[#allocation2 + $0x60] sm:$0xff] %v1612_v58  ;;  %1721 = vst [vmem:[#allocation2 + $0x68] sm:$0xff] %v1613_v50  ;;  %v1506_v17 = vadd.f32 %v1398_v51, %v1062_v26  ;;  %v1507_v40 = vadd.f32 %v1399_v8, %v1063_v2  ;;  %v2029_v18 = vshrl.u32 %v12883_v43, 16  ;;  %v2039_v2 = vor.u32 %v2037_v61, %v12905_v59  ;;  %v12165_v59 = vld [vmem:[%s12434_s7 + $0xb0] sm:$0xff] }
 0x144   : > { %v12980_v48 = vrot.slane %v2233_v49, 1  ;;  %v12983_v41 = vrot.slane %v2225_v46, 1  ;;  %v668_v27 = vmul.f32 %v12598_v14, %v12670_v33  ;;  %v2237_v62 = vshrl.u32 %v12970_v5, 16 }
 0x145   : > { %v1614_v44 = vmax.f32 %v1506_v17, 0.0  ;;  %v1615_v47 = vmax.f32 %v1507_v40, 0.0  ;;  %11815 = vset.pattern.permute.xlu1 %v16202_v0  ;;  %v843_v38 = vpop.permute.xlu1 %842  ;;  %v12166_v40 = vld [vmem:[%s12434_s7 + $0xb8] sm:$0xff] }
 0x146   : > { %798 = vperm.xlu1 %11815, %v12164_v6   ;;  %v2236_v52 = vsel %vm1988_vm0, %v2231_v42, %v12980_v48  ;;  %v2228_v22 = vsel %vm1988_vm0, %v2223_v31, %v12983_v41  ;;  %v11910_v6 = vld [vmem:[#allocation3 + $0x158] sm:$0xff]   ;;  %v1004_v49 = vmul.f32 %v12591_v9, %v843_v38  ;;  %v1005_v63 = vmul.f32 %v12593_v10, %v843_v38  ;;  %v11914_v31 = vld [vmem:[#allocation3 + $0x160] sm:$0xff]  }
 0x147   : > { %1722 = vst [vmem:[#allocation2 + $0x70] sm:$0xff] %v1614_v44  ;;  %1723 = vst [vmem:[#allocation2 + $0x78] sm:$0xff] %v1615_v47  ;;  %2525 = vmatprep.mubr.bf16.mxu1 %v2236_v52  ;;  %v12990_v45 = vpack.c.bf16 %v1615_v47, %v1613_v50  ;;  %v12992_v60 = vpack.c.bf16 %v1614_v44, %v1612_v58  ;;  %v2031_v58 = vor.u32 %v2029_v18, %v12908_v23  ;;  %v11915_v44 = vld [vmem:[#allocation3 + $0x120] sm:$0xff]  }
 0x148   : > { %2526 = vmatmul.mubr.bf16.gmra.mrb[8].mxu1 %v2228_v22  ;;  %10326 = vmatprep.subr.bf16.mxu0 %v11910_v6  ;;  %v667_v23 = vmul.f32 %v12596_v13, %v12670_v33  ;;  %v1113_v52 = vadd.f32 %v1005_v63, %v668_v27 }
 0x149   : > { %v2041_v39 = vshll.u32 %v12990_v45, 16  ;;  %v2033_v19 = vshll.u32 %v12992_v60, 16  ;;  %10327 = vmatpush3.bf16.msra.mxu0 %v11911_v54 }
 0x14a   : > { %11816 = vset.pattern.permute.xlu1 %v16204_v12  ;;  %v365_v26 = vpop.permute.xlu1 %364  ;;  %v1112_v47 = vadd.f32 %v1004_v49, %v667_v23  ;;  %10328 = vmatprep.subr.bf16.mxu0 %v11914_v31  ;;  %v755_v31 = vpop.permute.xlu0 %754 }
 0x14b   : > { %1238 = vperm.xlu1 %11816, %v12163_v34   ;;  %v13000_v21 = vrot.slane %v2041_v39, 1  ;;  %v13003_v50 = vrot.slane %v2033_v19, 1  ;;  %v619_v61 = vmul.f32 %v12596_v13, %v365_v26  ;;  %v620_v38 = vmul.f32 %v12598_v14, %v365_v26 }
 0x14d   : > { %v2044_v51 = vsel %vm1988_vm0, %v2039_v2, %v13000_v21  ;;  %v2036_v8 = vsel %vm1988_vm0, %v2031_v58, %v13003_v50  ;;  %10329 = vmatpush3.bf16.msra.mxu0 %v11915_v44 }
 0x14e   : > { %2429 = vmatprep.mubr.bf16.mxu0 %v2044_v51 }
 0x14f   : > { %11818 = vset.pattern.permute.xlu1 %v16200_v7  ;;  %v747_v34 = vpop.permute.xlu1 %746  ;;  %2430 = vmatmul.mubr.bf16.gmra.mrb[8].mxu0 %v2036_v8 }
 0x150   : > { %434 = vperm.xlu1 %11818, %v12165_v59   ;;  %v956_v46 = vmul.f32 %v12591_v9, %v747_v34  ;;  %v957_v17 = vmul.f32 %v12593_v10, %v747_v34 }
 0x152   : > { %v1064_v19 = vadd.f32 %v956_v46, %v619_v61  ;;  %v1065_v2 = vadd.f32 %v957_v17, %v620_v38  ;;  %v1406_v17 = vmul.f32 %v12600_v15, %v12853_v24  ;;  %v13052_v38 = vld [vmem:[%s12434_s7 + $0x108] sm:$0xff] }
 0x154   : > { %439 = vperm.xlu1 %11818, %v12166_v40   ;;  %v1287_v42 = vpop.permute.xlu1 %1286 }
 0x155   : > { %v1448_v22 = vmul.f32 %v12600_v15, %v1287_v42  ;;  %v1449_v33 = vmul.f32 %v12602_v16, %v1287_v42  ;;  %v2045_v42 = vshrl.u32 %v12992_v60, 16 }
 0x157   : > { %v1556_v39 = vadd.f32 %v1448_v22, %v1112_v47  ;;  %v1557_v18 = vadd.f32 %v1449_v33, %v1113_v52  ;;  %v2047_v22 = vor.u32 %v2045_v42, %v13003_v50  ;;  %v16197_v33 = vrot.slane %v12990_v45, 1 }
 0x158   : > { %11819 = vset.pattern.permute.xlu1 %v16202_v0  ;;  %v1191_v58 = vpop.permute.xlu1 %1190  ;;  %v2239_v50 = vor.u32 %v2237_v62, %v12983_v41  ;;  %v12168_v62 = vld [vmem:[%s12434_s7 + $0x110] sm:$0xff] }
 0x159   : > { %v1664_v51 = vmax.f32 %v1556_v39, 0.0  ;;  %v1665_v8 = vmax.f32 %v1557_v18, 0.0  ;;  %v1400_v6 = vmul.f32 %v12600_v15, %v1191_v58  ;;  %v1401_v54 = vmul.f32 %v12602_v16, %v1191_v58  ;;  %806 = vperm.xlu1 %11819, %v12166_v40  }
 0x15a   : > { %v1407_v40 = vmul.f32 %v12602_v16, %v12853_v24  ;;  %v960_v58 = vmul.f32 %v12591_v9, %v755_v31 }
 0x15b   : > { %1772 = vst [vmem:[#allocation2 + $0x200] sm:$0xff] %v1664_v51  ;;  %1773 = vst [vmem:[#allocation2 + $0x208] sm:$0xff] %v1665_v8  ;;  %v1508_v34 = vadd.f32 %v1400_v6, %v1064_v19  ;;  %v1509_v26 = vadd.f32 %v1401_v54, %v1065_v2  ;;  %v11916_v51 = vld [vmem:[#allocation3 + $0x168] sm:$0xff]  }
 0x15c   : > { %v11917_v8 = vld [vmem:[#allocation3 + $0x128] sm:$0xff]   ;;  %10330 = vmatprep.subr.bf16.mxu0 %v11916_v51  ;;  %v1820_v51 = vld [vmem:[#allocation2 + $0x8] sm:$0xff] }
 0x15d   : > { %v1616_v23 = vmax.f32 %v1508_v34, 0.0  ;;  %v1617_v27 = vmax.f32 %v1509_v26, 0.0  ;;  %11820 = vset.pattern.permute.xlu1 %v16204_v12  ;;  %v375_v49 = vpop.permute.xlu1 %374  ;;  %10331 = vmatpush3.bf16.msra.mxu0 %v11917_v8 }
 0x15e   : > { %1246 = vperm.xlu1 %11820, %v12165_v59   ;;  %v2053_v59 = vshrl.u32 %v12990_v45, 16  ;;  %v623_v41 = vmul.f32 %v12596_v13, %v375_v49 }
 0x15f   : > { %1724 = vst [vmem:[#allocation2 + $0x80] sm:$0xff] %v1616_v23  ;;  %1725 = vst [vmem:[#allocation2 + $0x88] sm:$0xff] %v1617_v27  ;;  %v13030_v63 = vpack.c.bf16 %v1619_v11, %v1617_v27  ;;  %v13034_v46 = vpack.c.bf16 %v1618_v3, %v1616_v23  ;;  %v2245_v11 = vshrl.u32 %v12968_v53, 16 }
 0x160   : > { %v2055_v24 = vor.u32 %v2053_v59, %v13000_v21 }
 0x161   : > { %v380_v56 = vpop.permute.xlu1 %379  ;;  %v2057_v3 = vshll.u32 %v13030_v63, 16  ;;  %v2049_v44 = vshll.u32 %v13034_v46, 16  ;;  %v2891_v61 = vrot.slane %v13030_v63, 1  ;;  %v2247_v21 = vor.u32 %v2245_v11, %v12980_v48 }
 0x162   : > { %11822 = vset.pattern.permute.xlu1 %v16200_v7  ;;  %v1950_v47 = vld [vmem:[#allocation2 + $0x208] sm:$0x1]  ;;  %v1949_v52 = vld [vmem:[#allocation2 + $0x200] sm:$0x1]  ;;  %v625_v23 = vmul.f32 %v12596_v13, %v380_v56  ;;  %v626_v27 = vmul.f32 %v12598_v14, %v380_v56 }
 0x163   : > { %489 = vperm.xlu1 %11822, %v13052_v38   ;;  %v1954_v39 = vpack.c.bf16 %v1950_v47, %v1950_v47  ;;  %v1953_v18 = vpack.c.bf16 %v1949_v52, %v1949_v52  ;;  %v13055_v19 = vrot.slane %v2057_v3, 1  ;;  %v13057_v2 = vrot.slane %v2049_v44, 1  ;;  %v11920_v47 = vld [vmem:[#allocation3 + $0x170] sm:$0xff]  }
 0x164   : > { %v13067_v6 = vsel %vm2874_vm1, %v16197_v33, %v2891_v61  ;;  %v624_v52 = vmul.f32 %v12598_v14, %v375_v49  ;;  %10332 = vmatprep.subr.bf16.mxu0 %v11920_v47 }
 0x165   : > { %v2249_v54 = vshll.u32 %v1954_v39, 16  ;;  %v2241_v34 = vshll.u32 %v1953_v18, 16  ;;  %v2060_v26 = vsel %vm1988_vm0, %v2055_v24, %v13055_v19  ;;  %v2052_v48 = vsel %vm1988_vm0, %v2047_v22, %v13057_v2 }
 0x166   : > { %v759_v59 = vpop.permute.xlu1 %758  ;;  %2437 = vmatprep.mubr.bf16.mxu0 %v2060_v26  ;;  %v961_v24 = vmul.f32 %v12593_v10, %v755_v31  ;;  %v1884_v26 = vpack.c.bf16 %v12758_v20, %v1820_v51  ;;  %v11918_v51 = vld [vmem:[#allocation3 + $0x1d0] sm:$0xff]  }
 0x167   : > { %v962_v42 = vmul.f32 %v12591_v9, %v759_v59  ;;  %v963_v11 = vmul.f32 %v12593_v10, %v759_v59  ;;  %494 = vperm.xlu1 %11822, %v12168_v62   ;;  %v2251_v3 = vrot.slane %v2249_v54, 1  ;;  %v2243_v44 = vrot.slane %v2241_v34, 1  ;;  %2438 = vmatmul.mubr.bf16.gmra.mrb[12].mxu0 %v2052_v48 }
 0x168   : > { %v1068_v54 = vadd.f32 %v960_v58, %v623_v41  ;;  %v1069_v31 = vadd.f32 %v961_v24, %v624_v52  ;;  %v1819_v58 = vld [vmem:[#allocation2] sm:$0xff]  ;;  %v11909_v41 = vld [vmem:[#allocation3 + $0x180] sm:$0xff]  }
 0x169   : > { %v1070_v22 = vadd.f32 %v962_v42, %v625_v23  ;;  %v1071_v56 = vadd.f32 %v963_v11, %v626_v27  ;;  %v2252_v39 = vsel %vm1988_vm0, %v2247_v21, %v2251_v3  ;;  %v2244_v18 = vsel %vm1988_vm0, %v2239_v50, %v2243_v44  ;;  %v11921_v42 = vld [vmem:[#allocation3 + $0x130] sm:$0xff]   ;;  %v13089_v11 = vld [vmem:[#allocation2 + $0x10] sm:$0xff]  ;;  %v11912_v3 = vld [vmem:[#allocation3 + $0x1c8] sm:$0xff]   ;;  %v763_v44 = vpop.permute.xlu0 %762 }
 0x16a   : > { %2533 = vmatprep.mubr.bf16.mxu1 %v2252_v39  ;;  %10333 = vmatpush3.bf16.msra.mxu0 %v11921_v42  ;;  %v11919_v42 = vld [vmem:[#allocation3 + $0x190] sm:$0xff]  }
 0x16b   : > { %v1514_v34 = vadd.f32 %v1406_v17, %v1070_v22  ;;  %v1515_v48 = vadd.f32 %v1407_v40, %v1071_v56  ;;  %11824 = vset.pattern.permute.xlu1 %v16202_v0  ;;  %v1199_v49 = vpop.permute.xlu1 %1198  ;;  %2534 = vmatmul.mubr.bf16.gmra.mrb[12].mxu1 %v2244_v18  ;;  %v2069_v22 = vshrl.u32 %v13030_v63, 16  ;;  %v2061_v56 = vshrl.u32 %v13034_v46, 16  ;;  %v11913_v18 = vld [vmem:[#allocation3 + $0x188] sm:$0xff]  }
 0x16c   : > { %v1404_v8 = vmul.f32 %v12600_v15, %v1199_v49  ;;  %v1405_v23 = vmul.f32 %v12602_v16, %v1199_v49  ;;  %850 = vperm.xlu1 %11824, %v12168_v62   ;;  %2670 = vmatprep.mubr.bf16.mxu1 %v1884_v26  ;;  %v1883_v62 = vpack.c.bf16 %v13089_v11, %v1819_v58  ;;  %v16196_v26 = vrot.slane %v13034_v46, 1 }
 0x16d   : > { %v1622_v21 = vmax.f32 %v1514_v34, 0.0  ;;  %v1623_v50 = vmax.f32 %v1515_v48, 0.0  ;;  %v12170_v48 = vld [vmem:[%s12434_s7 + $0x118] sm:$0xff]  ;;  %v2071_v49 = vor.u32 %v2069_v22, %v13055_v19 }
 0x16e   : > { %v1512_v27 = vadd.f32 %v1404_v8, %v1068_v54  ;;  %v1513_v59 = vadd.f32 %v1405_v23, %v1069_v31  ;;  %v2063_v8 = vor.u32 %v2061_v56, %v13057_v2  ;;  %v1410_v2 = vmul.f32 %v12600_v15, %v12868_v36  ;;  %v11925_v56 = vld [vmem:[#allocation3 + $0x138] sm:$0xff]  }
 0x16f   : > { %1730 = vst [vmem:[#allocation2 + $0xb0] sm:$0xff] %v1622_v21  ;;  %1731 = vst [vmem:[#allocation2 + $0xb8] sm:$0xff] %v1623_v50 }
 0x170   : > { %v1620_v20 = vmax.f32 %v1512_v27, 0.0  ;;  %v1621_v17 = vmax.f32 %v1513_v59, 0.0  ;;  %11825 = vset.pattern.permute.xlu1 %v16204_v12  ;;  %v385_v40 = vpop.permute.xlu1 %384 }
 0x171   : > { %1290 = vperm.xlu1 %11825, %v13052_v38  }
 0x172   : > { %1728 = vst [vmem:[#allocation2 + $0xa0] sm:$0xff] %v1620_v20  ;;  %1729 = vst [vmem:[#allocation2 + $0xa8] sm:$0xff] %v1621_v17  ;;  %v13092_v47 = vpack.c.bf16 %v1623_v50, %v1621_v17  ;;  %v13094_v52 = vpack.c.bf16 %v1622_v21, %v1620_v20  ;;  %v13112_v21 = vpop.permute.xlu0 %770  ;;  %v964_v20 = vmul.f32 %v12591_v9, %v763_v44 }
 0x173   : > { %2671 = vmatmul.mubr.bf16.vlgmr.msra.gmra.mrb[16].mxu1 %v1883_v62  ;;  %v11924_v62 = vld [vmem:[#allocation3 + $0x178] sm:$0xff]  }
 0x174   : > { %v390_v24 = vpop.permute.xlu1 %389  ;;  %2678 = vmatprep.mubr.bf16.mxu1 %v12795_v4  ;;  %v2073_v38 = vshll.u32 %v13092_v47, 16  ;;  %v2065_v39 = vshll.u32 %v13094_v52, 16  ;;  %10433 = vmatpush3.bf16.msra.mxu1 %v11909_v41  ;;  %v2895_v54 = vrot.slane %v13092_v47, 1  ;;  %v2893_v34 = vrot.slane %v13094_v52, 1  ;;  %v11922_v41 = vld [vmem:[#allocation3 + $0x1d8] sm:$0xff]  }
 0x175   : > { %11827 = vset.pattern.permute.xlu1 %v16200_v7  ;;  %10434 = vmatprep.subr.bf16.mxu1 %v11912_v3  ;;  %v629_v17 = vmul.f32 %v12596_v13, %v390_v24  ;;  %v630_v3 = vmul.f32 %v12598_v14, %v390_v24 }
 0x176   : > { %499 = vperm.xlu1 %11827, %v12170_v48   ;;  %v13107_v31 = vrot.slane %v2073_v38, 1  ;;  %v13110_v23 = vrot.slane %v2065_v39, 1  ;;  %v13119_v50 = vsel %vm2874_vm1, %v2891_v61, %v2895_v54  ;;  %v13126_v19 = vsel %vm2874_vm1, %v16196_v26, %v2893_v34  ;;  %v13147_v24 = vpop.permute.xlu0 %778  ;;  %10334 = vmatprep.subr.bf16.mxu0 %v11924_v62  ;;  %v11926_v62 = vld [vmem:[#allocation3 + $0x1e0] sm:$0xff]  }
 0x177   : > { %v1411_v61 = vmul.f32 %v12602_v16, %v12868_v36  ;;  %v627_v36 = vmul.f32 %v12596_v13, %v385_v40  ;;  %v628_v39 = vmul.f32 %v12598_v14, %v385_v40  ;;  %10335 = vmatpush3.bf16.msra.mxu0 %v11925_v56  ;;  %v11928_v56 = vld [vmem:[#allocation3 + $0x240] sm:$0xff]  }
 0x178   : > { %v2076_v27 = vsel %vm1988_vm0, %v2071_v49, %v13107_v31  ;;  %v2068_v59 = vsel %vm1988_vm0, %v2063_v8, %v13110_v23  ;;  %10435 = vmatpush3.bf16.msra.mxu1 %v11913_v18  ;;  %v965_v18 = vmul.f32 %v12593_v10, %v763_v44  ;;  %v11923_v8 = vld [vmem:[#allocation3 + $0x198] sm:$0xff]   ;;  %10544 = vmatprep.subr.bf16.mxu0 %v11928_v56 }
 0x179   : > { %v767_v58 = vpop.permute.xlu1 %766  ;;  %2445 = vmatprep.mubr.bf16.mxu0 %v2076_v27  ;;  %10436 = vmatprep.subr.bf16.mxu1 %v11918_v51  ;;  %v1072_v40 = vadd.f32 %v964_v20, %v627_v36  ;;  %v11930_v36 = vld [vmem:[#allocation3 + $0x1e8] sm:$0xff]  }
 0x17a   : > { %v966_v22 = vmul.f32 %v12591_v9, %v767_v58  ;;  %v967_v38 = vmul.f32 %v12593_v10, %v767_v58  ;;  %11828 = vset.pattern.permute.xlu1 %v16202_v0  ;;  %2446 = vmatmul.mubr.bf16.gmra.mrb[16].mxu0 %v2068_v59  ;;  %v1073_v26 = vadd.f32 %v965_v18, %v628_v39  ;;  %v13161_v18 = vld [vmem:[%s12434_s7 + $0x120] sm:$0xff] }
 0x17b   : > { %854 = vperm.xlu1 %11828, %v12170_v48   ;;  %2679 = vmatmul.mubr.bf16.gmra.mrb[20].mxu1 %v12813_v30 }
 0x17c   : > { %v1074_v51 = vadd.f32 %v966_v22, %v629_v17  ;;  %v1075_v49 = vadd.f32 %v967_v38, %v630_v3  ;;  %2686 = vmatprep.mubr.bf16.mxu1 %v12881_v1  ;;  %10437 = vmatpush3.bf16.msra.mxu1 %v11919_v42  ;;  %v11927_v38 = vld [vmem:[#allocation3 + $0x1a0] sm:$0xff]  }
 0x17d   : > { %10438 = vmatprep.subr.bf16.mxu1 %v11922_v41  ;;  %v13152_v41 = vpop.permute.xlu0 %786 }
 0x17e   : > { %v1518_v27 = vadd.f32 %v1410_v2, %v1074_v51  ;;  %v1519_v59 = vadd.f32 %v1411_v61, %v1075_v49  ;;  %v1207_v58 = vpop.permute.xlu1 %1206  ;;  %v11931_v51 = vld [vmem:[#allocation3 + $0x1a8] sm:$0xff]  }
 0x17f   : > { %v1408_v44 = vmul.f32 %v12600_v15, %v1207_v58  ;;  %v1409_v48 = vmul.f32 %v12602_v16, %v1207_v58  ;;  %11829 = vset.pattern.permute.xlu1 %v16200_v7 }
 0x180   : > { %v1626_v17 = vmax.f32 %v1518_v27, 0.0  ;;  %v1627_v3 = vmax.f32 %v1519_v59, 0.0  ;;  %10439 = vmatpush3.bf16.msra.mxu1 %v11923_v8  ;;  %504 = vperm.xlu1 %11829, %v13161_v18   ;;  %v2085_v8 = vshrl.u32 %v13092_v47, 16  ;;  %v2077_v59 = vshrl.u32 %v13094_v52, 16 }
 0x181   : > { %v1516_v22 = vadd.f32 %v1408_v44, %v1072_v40  ;;  %v1517_v42 = vadd.f32 %v1409_v48, %v1073_v26  ;;  %10440 = vmatprep.subr.bf16.mxu1 %v11926_v62  ;;  %v1219_v40 = vpop.permute.xlu0 %1218 }
 0x182   : > { %1734 = vst [vmem:[#allocation2 + $0xd0] sm:$0xff] %v1626_v17  ;;  %1735 = vst [vmem:[#allocation2 + $0xd8] sm:$0xff] %v1627_v3 }
 0x183   : > { %v1624_v2 = vmax.f32 %v1516_v22, 0.0  ;;  %v1625_v61 = vmax.f32 %v1517_v42, 0.0  ;;  %v395_v20 = vpop.permute.xlu1 %394  ;;  %2687 = vmatmul.mubr.bf16.gmra.mrb[24].mxu1 %v12883_v43  ;;  %v2079_v22 = vor.u32 %v2077_v59, %v13110_v23  ;;  %v968_v23 = vmul.f32 %v12591_v9, %v13112_v21 }
 0x184   : > { %2694 = vmatprep.mubr.bf16.mxu1 %v12990_v45  ;;  %10441 = vmatpush3.bf16.msra.mxu1 %v11927_v38  ;;  %v1414_v38 = vmul.f32 %v12600_v15, %v1219_v40  ;;  %v632_v33 = vmul.f32 %v12598_v14, %v395_v20 }
 0x185   : > { %1732 = vst [vmem:[#allocation2 + $0xc0] sm:$0xff] %v1624_v2  ;;  %1733 = vst [vmem:[#allocation2 + $0xc8] sm:$0xff] %v1625_v61  ;;  %v13156_v39 = vpack.c.bf16 %v1627_v3, %v1625_v61  ;;  %v13158_v26 = vpack.c.bf16 %v1626_v17, %v1624_v2  ;;  %10442 = vmatprep.subr.bf16.mxu1 %v11930_v36  ;;  %v2087_v17 = vor.u32 %v2085_v8, %v13107_v31  ;;  %v11932_v2 = vld [vmem:[#allocation3 + $0x1f0] sm:$0xff]   ;;  %v11934_v36 = vld [vmem:[#allocation3 + $0x1f8] sm:$0xff]  }
 0x186   : > { %v11933_v61 = vld [vmem:[#allocation3 + $0x1b0] sm:$0xff]   ;;  %11831 = vset.pattern.permute.xlu1 %v16202_v0 }
 0x187   : > { %v400_v49 = vpop.permute.xlu1 %399  ;;  %v2089_v27 = vshll.u32 %v13156_v39, 16  ;;  %v2081_v58 = vshll.u32 %v13158_v26, 16  ;;  %v16199_v44 = vrot.slane %v13156_v39, 1  ;;  %v16198_v48 = vrot.slane %v13158_v26, 1  ;;  %858 = vperm.xlu1 %11831, %v13161_v18  }
 0x188   : > { %10443 = vmatpush3.bf16.msra.mxu1 %v11931_v51  ;;  %v631_v51 = vmul.f32 %v12596_v13, %v395_v20  ;;  %v633_v8 = vmul.f32 %v12596_v13, %v400_v49  ;;  %v634_v59 = vmul.f32 %v12598_v14, %v400_v49 }
 0x189   : > { %v13171_v3 = vrot.slane %v2089_v27, 1  ;;  %v13174_v42 = vrot.slane %v2081_v58, 1  ;;  %v13182_v62 = vsel %vm2874_vm1, %v2895_v54, %v16199_v44  ;;  %v13189_v31 = vsel %vm2874_vm1, %v2893_v34, %v16198_v48  ;;  %10444 = vmatprep.subr.bf16.mxu1 %v11932_v2 }
 0x18a   : > { %v1415_v27 = vmul.f32 %v12602_v16, %v1219_v40  ;;  %v1076_v49 = vadd.f32 %v968_v23, %v631_v51 }
 0x18b   : > { %2695 = vmatmul.mubr.bf16.gmra.mrb[28].mxu1 %v12992_v60  ;;  %v2092_v56 = vsel %vm1988_vm0, %v2087_v17, %v13171_v3  ;;  %v2084_v54 = vsel %vm1988_vm0, %v2079_v22, %v13174_v42  ;;  %v969_v22 = vmul.f32 %v12593_v10, %v13112_v21 }
 0x18c   : > { %v775_v34 = vpop.permute.xlu1 %774  ;;  %2702 = vmatprep.mubr.bf16.mxu1 %v13030_v63  ;;  %2453 = vmatprep.mubr.bf16.mxu0 %v2092_v56  ;;  %v11936_v63 = vld [vmem:[#allocation3 + $0x1b8] sm:$0xff]  }
 0x18d   : > { %v970_v58 = vmul.f32 %v12591_v9, %v775_v34  ;;  %v971_v17 = vmul.f32 %v12593_v10, %v775_v34  ;;  %2454 = vmatmul.mubr.bf16.gmra.mrb[20].mxu0 %v2084_v54  ;;  %10445 = vmatpush3.bf16.msra.mxu1 %v11933_v61  ;;  %v304_v56 = vld [vmem:[%s12434_s7 + $0x128] sm:$0xff]  ;;  %v1077_v54 = vadd.f32 %v969_v22, %v632_v33  ;;  %v1227_v22 = vpop.permute.xlu0 %1226 }
 0x18e   : > { %10446 = vmatprep.subr.bf16.mxu1 %v11934_v36  ;;  %509 = vperm.xlu0 %11830, %v304_v56   ;;  %v2093_v36 = vshrl.u32 %v13158_v26, 16 }
 0x18f   : > { %v1078_v48 = vadd.f32 %v970_v58, %v633_v8  ;;  %v1079_v40 = vadd.f32 %v971_v17, %v634_v59  ;;  %862 = vperm.xlu1 %11831, %v304_v56  }
 0x191   : > { %v1522_v44 = vadd.f32 %v1414_v38, %v1078_v48  ;;  %v1523_v7 = vadd.f32 %v1415_v27, %v1079_v40  ;;  %v1215_v34 = vpop.permute.xlu1 %1214  ;;  %10447 = vmatpush3.bf16.msra.mxu1 %v11936_v63  ;;  %v2101_v38 = vshrl.u32 %v13156_v39, 16  ;;  %v16297_v27 = vmov 0  }
 0x192   : > { %v1412_v2 = vmul.f32 %v12600_v15, %v1215_v34  ;;  %v1413_v21 = vmul.f32 %v12602_v16, %v1215_v34  ;;  %11832 = vset.pattern.permute.xlu0 %v16204_v12  ;;  %v305_v34 = vld [vmem:[%s12434_s7 + $0x130] sm:$0xff] }
 0x193   : > { %v1630_v20 = vmax.f32 %v1522_v44, 0.0  ;;  %v1631_v61 = vmax.f32 %v1523_v7, 0.0  ;;  %2703 = vmatmul.mubr.bf16.gmra.mrb[32].mxu1 %v13034_v46  ;;  %1302 = vperm.xlu0 %11832, %v13161_v18   ;;  %v2103_v63 = vor.u32 %v2101_v38, %v13171_v3  ;;  %v972_v38 = vmul.f32 %v12591_v9, %v13147_v24 }
 0x194   : > { %v1520_v8 = vadd.f32 %v1412_v2, %v1076_v49  ;;  %v1521_v59 = vadd.f32 %v1413_v21, %v1077_v54  ;;  %2710 = vmatprep.mubr.bf16.mxu1 %v13092_v47  ;;  %11833 = vset.pattern.permute.xlu1 %v16204_v12  ;;  %v16299_v2 = vrot.slane %v13158_v26, 1 }
 0x195   : > { %1738 = vst [vmem:[#allocation2 + $0xf0] sm:$0xff] %v1630_v20  ;;  %1739 = vst [vmem:[#allocation2 + $0xf8] sm:$0xff] %v1631_v61  ;;  %1306 = vperm.xlu1 %11833, %v304_v56   ;;  %v2095_v56 = vor.u32 %v2093_v36, %v13174_v42 }
 0x196   : > { %v1628_v33 = vmax.f32 %v1520_v8, 0.0  ;;  %v1629_v48 = vmax.f32 %v1521_v59, 0.0  ;;  %v405_v23 = vpop.permute.xlu1 %404 }
 0x197   : > { %11835 = vset.pattern.permute.xlu0 %v16202_v0  ;;  %v635_v36 = vmul.f32 %v12596_v13, %v405_v23 }
 0x198   : > { %1736 = vst [vmem:[#allocation2 + $0xe0] sm:$0xff] %v1628_v33  ;;  %1737 = vst [vmem:[#allocation2 + $0xe8] sm:$0xff] %v1629_v48  ;;  %v13218_v7 = vpack.c.bf16 %v1631_v61, %v1629_v48  ;;  %v13220_v44 = vpack.c.bf16 %v1630_v20, %v1628_v33  ;;  %v1418_v61 = vmul.f32 %v12600_v15, %v1227_v22  ;;  %866 = vperm.xlu0 %11835, %v305_v34  }
 0x199   : > { %11834 = vset.pattern.permute.xlu1 %v16297_v27 }
 0x19a   : > { %v410_v47 = vpop.permute.xlu1 %409  ;;  %v2105_v18 = vshll.u32 %v13218_v7, 16  ;;  %v2097_v51 = vshll.u32 %v13220_v44, 16  ;;  %v2903_v58 = vrot.slane %v13218_v7, 1  ;;  %v2901_v17 = vrot.slane %v13220_v44, 1  ;;  %514 = vperm.xlu1 %11834, %v305_v34  }
 0x19b   : > { %2711 = vmatmul.mubr.bf16.gmra.mrb[36].mxu1 %v13094_v52  ;;  %v16298_v52 = vrot.slane %v13156_v39, 1  ;;  %v637_v8 = vmul.f32 %v12596_v13, %v410_v47  ;;  %v638_v59 = vmul.f32 %v12598_v14, %v410_v47 }
 0x19c   : > { %2718 = vmatprep.mubr.bf16.mxu1 %v13156_v39  ;;  %v2107_v40 = vrot.slane %v2105_v18, 1  ;;  %v2099_v49 = vrot.slane %v2097_v51, 1  ;;  %v13247_v21 = vsel %vm2874_vm1, %v16299_v2, %v2901_v17  ;;  %v1419_v39 = vmul.f32 %v12602_v16, %v1227_v22  ;;  %11839 = vset.pattern.permute.xlu0 %v16297_v27 }
 0x19d   : > { %v13240_v54 = vsel %vm2874_vm1, %v16298_v52, %v2903_v58  ;;  %v973_v18 = vmul.f32 %v12593_v10, %v13147_v24  ;;  %v636_v51 = vmul.f32 %v12598_v14, %v405_v23  ;;  %v1080_v2 = vadd.f32 %v972_v38, %v635_v36 }
 0x19e   : > { %v2108_v3 = vsel %vm1988_vm0, %v2103_v63, %v2107_v40  ;;  %v2100_v42 = vsel %vm1988_vm0, %v2095_v56, %v2099_v49  ;;  %11836 = vset.pattern.permute.xlu1 %v16204_v12  ;;  %v2117_v38 = vshrl.u32 %v13218_v7, 16  ;;  %v2109_v36 = vshrl.u32 %v13220_v44, 16 }
 0x19f   : > { %v783_v20 = vpop.permute.xlu1 %782  ;;  %2461 = vmatprep.mubr.bf16.mxu0 %v2108_v3  ;;  %1310 = vperm.xlu1 %11836, %v305_v34   ;;  %v1081_v24 = vadd.f32 %v973_v18, %v636_v51 }
 0x1a0   : > { %v974_v33 = vmul.f32 %v12591_v9, %v783_v20  ;;  %v975_v48 = vmul.f32 %v12593_v10, %v783_v20  ;;  %2462 = vmatmul.mubr.bf16.gmra.mrb[24].mxu0 %v2100_v42 }
 0x1a2   : > { %v1082_v22 = vadd.f32 %v974_v33, %v637_v8  ;;  %v1083_v63 = vadd.f32 %v975_v48, %v638_v59 }
 0x1a3   : > { %2719 = vmatmul.mubr.bf16.gmra.mrb[40].mxu1 %v13158_v26  ;;  %11837 = vset.pattern.permute.xlu1 %v16297_v27 }
 0x1a4   : > { %v1526_v47 = vadd.f32 %v1418_v61, %v1082_v22  ;;  %v1527_v56 = vadd.f32 %v1419_v39, %v1083_v63  ;;  %v1223_v52 = vpop.permute.xlu1 %1222  ;;  %2726 = vmatprep.mubr.bf16.mxu1 %v13218_v7 }
 0x1a5   : > { %v1416_v3 = vmul.f32 %v12600_v15, %v1223_v52  ;;  %v1417_v23 = vmul.f32 %v12602_v16, %v1223_v52 }
 0x1a6   : > { %v1634_v42 = vmax.f32 %v1526_v47, 0.0  ;;  %v1635_v20 = vmax.f32 %v1527_v56, 0.0  ;;  %v1235_v47 = vpop.permute.xlu0 %1234  ;;  %v2119_v56 = vor.u32 %v2117_v38, %v2107_v40 }
 0x1a7   : > { %v1524_v8 = vadd.f32 %v1416_v3, %v1080_v2  ;;  %v1525_v59 = vadd.f32 %v1417_v23, %v1081_v24  ;;  %v2111_v2 = vor.u32 %v2109_v36, %v2099_v49  ;;  %v1423_v7 = vmul.f32 %v12602_v16, %v1235_v47 }
 0x1a8   : > { %1742 = vst [vmem:[#allocation2 + $0x110] sm:$0xff] %v1634_v42  ;;  %1743 = vst [vmem:[#allocation2 + $0x118] sm:$0xff] %v1635_v20  ;;  %v977_v36 = vmul.f32 %v12593_v10, %v13152_v41 }
 0x1a9   : > { %v1632_v26 = vmax.f32 %v1524_v8, 0.0  ;;  %v1633_v34 = vmax.f32 %v1525_v59, 0.0  ;;  %v415_v61 = vpop.permute.xlu1 %414  ;;  %v1422_v8 = vmul.f32 %v12600_v15, %v1235_v47 }
 0x1ab   : > { %1740 = vst [vmem:[#allocation2 + $0x100] sm:$0xff] %v1632_v26  ;;  %1741 = vst [vmem:[#allocation2 + $0x108] sm:$0xff] %v1633_v34  ;;  %2727 = vmatmul.mubr.bf16.gmra.mrb[44].mxu1 %v13220_v44  ;;  %v13271_v39 = vpack.c.bf16 %v1635_v20, %v1633_v34  ;;  %v13273_v33 = vpack.c.bf16 %v1634_v42, %v1632_v26  ;;  %v640_v26 = vmul.f32 %v12598_v14, %v415_v61 }
 0x1ad   : > { %v420_v48 = vpop.permute.xlu1 %419  ;;  %2734 = vmatprep.mubr.bf16.mxu1 %v13271_v39  ;;  %v2121_v18 = vshll.u32 %v13271_v39, 16  ;;  %v2113_v51 = vshll.u32 %v13273_v33, 16  ;;  %v2907_v22 = vrot.slane %v13271_v39, 1  ;;  %v2905_v63 = vrot.slane %v13273_v33, 1 }
 0x1ae   : > { %v641_v49 = vmul.f32 %v12596_v13, %v420_v48 }
 0x1af   : > { %v2123_v52 = vrot.slane %v2121_v18, 1  ;;  %v2115_v24 = vrot.slane %v2113_v51, 1  ;;  %v13287_v3 = vsel %vm2874_vm1, %v2903_v58, %v2907_v22  ;;  %v13294_v23 = vsel %vm2874_vm1, %v2901_v17, %v2905_v63 }
 0x1b0   : > { %v642_v58 = vmul.f32 %v12598_v14, %v420_v48  ;;  %v639_v17 = vmul.f32 %v12596_v13, %v415_v61  ;;  %v976_v18 = vmul.f32 %v12591_v9, %v13152_v41  ;;  %v1243_v41 = vpop.permute.xlu0 %1242 }
 0x1b1   : > { %v2124_v42 = vsel %vm1988_vm0, %v2119_v56, %v2123_v52  ;;  %v2116_v40 = vsel %vm1988_vm0, %v2111_v2, %v2115_v24  ;;  %v1085_v2 = vadd.f32 %v977_v36, %v640_v26  ;;  %v2133_v26 = vshrl.u32 %v13271_v39, 16 }
 0x1b2   : > { %v791_v20 = vpop.permute.xlu1 %790  ;;  %2469 = vmatprep.mubr.bf16.mxu0 %v2124_v42  ;;  %v1084_v56 = vadd.f32 %v976_v18, %v639_v17 }
 0x1b3   : > { %v978_v59 = vmul.f32 %v12591_v9, %v791_v20  ;;  %v979_v44 = vmul.f32 %v12593_v10, %v791_v20  ;;  %2735 = vmatmul.mubr.bf16.gmra.mrb[48].mxu1 %v13273_v33  ;;  %2470 = vmatmul.mubr.bf16.gmra.mrb[28].mxu0 %v2116_v40 }
 0x1b5   : > { %v1086_v34 = vadd.f32 %v978_v59, %v641_v49  ;;  %v1087_v38 = vadd.f32 %v979_v44, %v642_v58 }
 0x1b7   : > { %v1530_v48 = vadd.f32 %v1422_v8, %v1086_v34  ;;  %v1531_v51 = vadd.f32 %v1423_v7, %v1087_v38  ;;  %v1231_v47 = vpop.permute.xlu1 %1230  ;;  %v2125_v38 = vshrl.u32 %v13273_v33, 16 }
 0x1b8   : > { %v1420_v42 = vmul.f32 %v12600_v15, %v1231_v47  ;;  %v1421_v40 = vmul.f32 %v12602_v16, %v1231_v47 }
 0x1b9   : > { %v1638_v20 = vmax.f32 %v1530_v48, 0.0  ;;  %v1639_v0 = vmax.f32 %v1531_v51, 0.0  ;;  %v2135_v48 = vor.u32 %v2133_v26, %v2123_v52  ;;  %v2127_v47 = vor.u32 %v2125_v38, %v2115_v24 }
 0x1ba   : > { %v1528_v61 = vadd.f32 %v1420_v42, %v1084_v56  ;;  %v1529_v49 = vadd.f32 %v1421_v40, %v1085_v2  ;;  %v11942_v2 = vld [vmem:[#allocation3 + $0x2c0] sm:$0xff]   ;;  %v1427_v38 = vmul.f32 %v12602_v16, %v1243_v41 }
 0x1bb   : > { %1746 = vst [vmem:[#allocation2 + $0x130] sm:$0xff] %v1638_v20  ;;  %1747 = vst [vmem:[#allocation2 + $0x138] sm:$0xff] %v1639_v0  ;;  %10656 = vmatprep.subr.bf16.mxu1 %v11942_v2 }
 0x1bc   : > { %v1636_v58 = vmax.f32 %v1528_v61, 0.0  ;;  %v1637_v59 = vmax.f32 %v1529_v49, 0.0  ;;  %v425_v44 = vpop.permute.xlu1 %424 }
 0x1bd   : > { %v643_v33 = vmul.f32 %v12596_v13, %v425_v44 }
 0x1be   : > { %1744 = vst [vmem:[#allocation2 + $0x120] sm:$0xff] %v1636_v58  ;;  %1745 = vst [vmem:[#allocation2 + $0x128] sm:$0xff] %v1637_v59  ;;  %v13313_v8 = vpack.c.bf16 %v1639_v0, %v1637_v59  ;;  %v13315_v7 = vpack.c.bf16 %v1638_v20, %v1636_v58  ;;  %v795_v20 = vpop.permute.xlu0 %794 }
 0x1bf   : > { %v980_v59 = vmul.f32 %v12591_v9, %v795_v20  ;;  %v981_v26 = vmul.f32 %v12593_v10, %v795_v20 }
 0x1c0   : > { %v430_v17 = vpop.permute.xlu1 %429  ;;  %2742 = vmatprep.mubr.bf16.mxu1 %v13313_v8  ;;  %v2137_v34 = vshll.u32 %v13313_v8, 16  ;;  %v2129_v18 = vshll.u32 %v13315_v7, 16  ;;  %v16207_v36 = vrot.slane %v13313_v8, 1  ;;  %v16206_v0 = vrot.slane %v13315_v7, 1 }
 0x1c1   : > { %2743 = vmatmul.mubr.bf16.gmra.mrb[52].mxu1 %v13315_v7  ;;  %v645_v39 = vmul.f32 %v12596_v13, %v430_v17 }
 0x1c2   : > { %v2139_v51 = vrot.slane %v2137_v34, 1  ;;  %v2131_v56 = vrot.slane %v2129_v18, 1  ;;  %v13330_v42 = vsel %vm2874_vm1, %v2907_v22, %v16207_v36  ;;  %v13337_v40 = vsel %vm2874_vm1, %v2905_v63, %v16206_v0 }
 0x1c3   : > { %16300 = vst [vmem:[#allocation12_spill] sm:$0xff] %v13337_v40  ;;  %v646_v22 = vmul.f32 %v12598_v14, %v430_v17  ;;  %v644_v63 = vmul.f32 %v12598_v14, %v425_v44  ;;  %v1426_v34 = vmul.f32 %v12600_v15, %v1243_v41 }
 0x1c4   : > { %v2140_v52 = vsel %vm1988_vm0, %v2135_v48, %v2139_v51  ;;  %v2132_v24 = vsel %vm1988_vm0, %v2127_v47, %v2131_v56 }
 0x1c5   : > { %v799_v61 = vpop.permute.xlu1 %798  ;;  %2477 = vmatprep.mubr.bf16.mxu0 %v2140_v52  ;;  %v1088_v52 = vadd.f32 %v980_v59, %v643_v33 }
 0x1c6   : > { %v982_v49 = vmul.f32 %v12591_v9, %v799_v61  ;;  %v983_v58 = vmul.f32 %v12593_v10, %v799_v61  ;;  %2478 = vmatmul.mubr.bf16.gmra.mrb[32].mxu0 %v2132_v24  ;;  %v1089_v61 = vadd.f32 %v981_v26, %v644_v63 }
 0x1c8   : > { %v1090_v18 = vadd.f32 %v982_v49, %v645_v39  ;;  %v1091_v48 = vadd.f32 %v983_v58, %v646_v22  ;;  %v803_v39 = vpop.permute.xlu0 %802 }
 0x1ca   : > { %v1534_v17 = vadd.f32 %v1426_v34, %v1090_v18  ;;  %v1535_v47 = vadd.f32 %v1427_v38, %v1091_v48  ;;  %v1239_v2 = vpop.permute.xlu1 %1238  ;;  %v16302_v48 = vrot.slane %v13313_v8, 1 }
 0x1cb   : > { %v1424_v24 = vmul.f32 %v12600_v15, %v1239_v2  ;;  %v1425_v12 = vmul.f32 %v12602_v16, %v1239_v2 }
 0x1cc   : > { %v1642_v44 = vmax.f32 %v1534_v17, 0.0  ;;  %v1643_v0 = vmax.f32 %v1535_v47, 0.0  ;;  %v1251_v59 = vpop.permute.xlu0 %1250  ;;  %v16303_v47 = vrot.slane %v13315_v7, 1 }
 0x1cd   : > { %v1532_v36 = vadd.f32 %v1424_v24, %v1088_v52  ;;  %v1533_v27 = vadd.f32 %v1425_v12, %v1089_v61  ;;  %v2149_v12 = vshrl.u32 %v13313_v8, 16  ;;  %v1430_v61 = vmul.f32 %v12600_v15, %v1251_v59 }
 0x1ce   : > { %1750 = vst [vmem:[#allocation2 + $0x150] sm:$0xff] %v1642_v44  ;;  %1751 = vst [vmem:[#allocation2 + $0x158] sm:$0xff] %v1643_v0  ;;  %v1431_v24 = vmul.f32 %v12602_v16, %v1251_v59 }
 0x1cf   : > { %v1640_v20 = vmax.f32 %v1532_v36, 0.0  ;;  %v13353_v40 = vmax.f32 %v1533_v27, 0.0  ;;  %v435_v41 = vpop.permute.xlu1 %434  ;;  %v2141_v27 = vshrl.u32 %v13315_v7, 16  ;;  %v2151_v26 = vor.u32 %v2149_v12, %v2139_v51 }
 0x1d0   : > { %v647_v12 = vmul.f32 %v12596_v13, %v435_v41 }
 0x1d1   : > { %16301 = vst [vmem:[#allocation13_spill] sm:$0xff] %v13353_v40  ;;  %1748 = vst [vmem:[#allocation2 + $0x140] sm:$0xff] %v1640_v20  ;;  %v13357_v22 = vpack.c.bf16 %v1643_v0, %v13353_v40  ;;  %v13359_v49 = vpack.c.bf16 %v1642_v44, %v1640_v20  ;;  %v2143_v38 = vor.u32 %v2141_v27, %v2131_v56 }
 0x1d2   : > { %1749 = vst [vmem:[#allocation2 + $0x148] sm:$0xff] %v13353_v40  ;;  %v984_v27 = vmul.f32 %v12591_v9, %v803_v39 }
 0x1d3   : > { %v440_v58 = vpop.permute.xlu1 %439  ;;  %2750 = vmatprep.mubr.bf16.mxu1 %v13357_v22  ;;  %v2153_v33 = vshll.u32 %v13357_v22, 16  ;;  %v2145_v36 = vshll.u32 %v13359_v49, 16  ;;  %v16210_v63 = vrot.slane %v13357_v22, 1  ;;  %v16209_v0 = vrot.slane %v13359_v49, 1 }
 0x1d4   : > { %2751 = vmatmul.mubr.bf16.gmra.mrb[56].mxu1 %v13359_v49  ;;  %v649_v8 = vmul.f32 %v12596_v13, %v440_v58  ;;  %v650_v44 = vmul.f32 %v12598_v14, %v440_v58 }
 0x1d5   : > { %v2155_v34 = vrot.slane %v2153_v33, 1  ;;  %v2147_v18 = vrot.slane %v2145_v36, 1  ;;  %v13374_v17 = vsel %vm2874_vm1, %v16302_v48, %v16210_v63  ;;  %v13381_v2 = vsel %vm2874_vm1, %v16303_v47, %v16209_v0 }
 0x1d6   : > { %16304 = vst [vmem:[#allocation14_spill] sm:$0xff] %v13381_v2  ;;  %v648_v33 = vmul.f32 %v12598_v14, %v435_v41  ;;  %v985_v36 = vmul.f32 %v12593_v10, %v803_v39 }
 0x1d7   : > { %v2156_v52 = vsel %vm1988_vm0, %v2151_v26, %v2155_v34  ;;  %v2148_v51 = vsel %vm1988_vm0, %v2143_v38, %v2147_v18 }
 0x1d8   : > { %v807_v56 = vpop.permute.xlu1 %806  ;;  %2485 = vmatprep.mubr.bf16.mxu0 %v2156_v52  ;;  %v1092_v52 = vadd.f32 %v984_v27, %v647_v12  ;;  %v1093_v58 = vadd.f32 %v985_v36, %v648_v33 }
 0x1d9   : > { %v986_v20 = vmul.f32 %v12591_v9, %v807_v56  ;;  %v987_v7 = vmul.f32 %v12593_v10, %v807_v56  ;;  %2486 = vmatmul.mubr.bf16.gmra.mrb[36].mxu0 %v2148_v51 }
 0x1db   : > { %v1094_v26 = vadd.f32 %v986_v20, %v649_v8  ;;  %v1095_v59 = vadd.f32 %v987_v7, %v650_v44  ;;  %v2165_v20 = vshrl.u32 %v13357_v22, 16 }
 0x1dd   : > { %v1538_v38 = vadd.f32 %v1430_v61, %v1094_v26  ;;  %v1539_v48 = vadd.f32 %v1431_v24, %v1095_v59  ;;  %v1247_v47 = vpop.permute.xlu1 %1246  ;;  %v847_v61 = vpop.permute.xlu0 %846  ;;  %v2167_v26 = vor.u32 %v2165_v20, %v2155_v34  ;;  %v16310_v34 = vrot.slane %v13357_v22, 1 }
 0x1de   : > { %v1428_v0 = vmul.f32 %v12600_v15, %v1247_v47  ;;  %v1429_v56 = vmul.f32 %v12602_v16, %v1247_v47  ;;  %v1006_v12 = vmul.f32 %v12591_v9, %v847_v61 }
 0x1df   : > { %v1646_v51 = vmax.f32 %v1538_v38, 0.0  ;;  %v1647_v63 = vmax.f32 %v1539_v48, 0.0 }
 0x1e0   : > { %v1536_v40 = vadd.f32 %v1428_v0, %v1092_v52  ;;  %v1537_v2 = vadd.f32 %v1429_v56, %v1093_v58 }
 0x1e1   : > { %1754 = vst [vmem:[#allocation2 + $0x170] sm:$0xff] %v1646_v51  ;;  %1755 = vst [vmem:[#allocation2 + $0x178] sm:$0xff] %v1647_v63  ;;  %v1295_v47 = vpop.permute.xlu0 %1294 }
 0x1e2   : > { %v13397_v41 = vmax.f32 %v1536_v40, 0.0  ;;  %v13399_v39 = vmax.f32 %v1537_v2, 0.0  ;;  %v490_v8 = vpop.permute.xlu1 %489  ;;  %v2157_v40 = vshrl.u32 %v13359_v49, 16 }
 0x1e4   : > { %16305 = vst [vmem:[#allocation15_spill] sm:$0xff] %v13397_v41  ;;  %16306 = vst [vmem:[#allocation16_spill] sm:$0xff] %v13399_v39  ;;  %v13404_v24 = vpack.c.bf16 %v1647_v63, %v13399_v39  ;;  %v13407_v44 = vpack.c.bf16 %v1646_v51, %v13397_v41  ;;  %v10184_v0 = vpop.f32.mrb[0].mxu1  ;;  %v2159_v59 = vor.u32 %v2157_v40, %v2147_v18 }
 0x1e5   : > { %1752 = vst [vmem:[#allocation2 + $0x160] sm:$0xff] %v13397_v41  ;;  %1753 = vst [vmem:[#allocation2 + $0x168] sm:$0xff] %v13399_v39  ;;  %v10185_v2 = vpop.f32.mrb[1].mxu1  ;;  %v669_v51 = vmul.f32 %v12596_v13, %v490_v8  ;;  %v2800_v41 = vld [vmem:[#allocation2 + $0x8] sm:$0xfc] }
 0x1e6   : > { %16307 = vst [vmem:[#allocation17_spill] sm:$0xff] %v13404_v24  ;;  %v495_v7 = vpop.permute.xlu1 %494  ;;  %2758 = vmatprep.mubr.bf16.mxu1 %v13404_v24  ;;  %v2169_v33 = vshll.u32 %v13404_v24, 16  ;;  %v2161_v27 = vshll.u32 %v13407_v44, 16  ;;  %v13415_v63 = vadd.f32 %v10185_v2, %v10184_v0  ;;  %v10187_v36 = vpop.f32.mrb[2].mxu1  ;;  %v16212_v38 = vrot.slane %v13404_v24, 1 }
 0x1e7   : > { %2759 = vmatmul.mubr.bf16.gmra.mrb[60].mxu1 %v13407_v44  ;;  %v10188_v48 = vpop.f32.mrb[3].mxu1  ;;  %v2181_v56 = vshrl.u32 %v13404_v24, 16  ;;  %v671_v0 = vmul.f32 %v12596_v13, %v495_v7  ;;  %v1007_v2 = vmul.f32 %v12593_v10, %v847_v61  ;;  %v672_v20 = vmul.f32 %v12598_v14, %v495_v7  ;;  %v12171_v24 = vld [vmem:[#allocation2 + $0x18] sm:$0xff] }
 0x1e8   : > { %16308 = vst [vmem:[#allocation18_spill] sm:$0xff] %v13415_v63  ;;  %2766 = vmatprep.mubr.bf16.mxu1 %v12752_v35  ;;  %v2171_v52 = vrot.slane %v2169_v33, 1  ;;  %v2163_v58 = vrot.slane %v2161_v27, 1  ;;  %v13424_v63 = vadd.f32 %v10188_v48, %v10187_v36  ;;  %v13431_v18 = vsel %vm2874_vm1, %v16310_v34, %v16212_v38 }
 0x1e9   : > { %v670_v61 = vmul.f32 %v12598_v14, %v490_v8  ;;  %v16311_v22 = vrot.slane %v13407_v44, 1  ;;  %v16312_v34 = vrot.slane %v13359_v49, 1  ;;  %v2173_v49 = vshrl.u32 %v13407_v44, 16 }
 0x1ea   : > { %16309 = vst [vmem:[#allocation19_spill] sm:$0xff] %v13424_v63  ;;  %v2172_v40 = vsel %vm1988_vm0, %v2167_v26, %v2171_v52  ;;  %v2164_v33 = vsel %vm1988_vm0, %v2159_v59, %v2163_v58  ;;  %v2183_v27 = vor.u32 %v2181_v56, %v2171_v52  ;;  %v1452_v63 = vmul.f32 %v12600_v15, %v1295_v47 }
 0x1eb   : > { %v851_v36 = vpop.permute.xlu1 %850  ;;  %v10112_v48 = vpop.f32.mrb[0].mxu0  ;;  %2493 = vmatprep.mubr.bf16.mxu0 %v2172_v40  ;;  %v13444_v7 = vsel %vm2874_vm1, %v16312_v34, %v16311_v22  ;;  %v1453_v52 = vmul.f32 %v12602_v16, %v1295_v47  ;;  %v1115_v35 = vadd.f32 %v1007_v2, %v670_v61 }
 0x1ec   : > { %16313 = vst [vmem:[#allocation20_spill] sm:$0xff] %v13444_v7  ;;  %v1008_v26 = vmul.f32 %v12591_v9, %v851_v36  ;;  %v1009_v59 = vmul.f32 %v12593_v10, %v851_v36  ;;  %v10113_v56 = vpop.f32.mrb[1].mxu0  ;;  %2494 = vmatmul.mubr.bf16.gmra.mrb[40].mxu0 %v2164_v33  ;;  %v2188_v8 = vsel %vm1988_vm0, %v2183_v27, %v12774_v55 }
 0x1ed   : > { %v13451_v38 = vadd.f32 %v10113_v56, %v10112_v48  ;;  %v10115_v40 = vpop.f32.mrb[2].mxu0  ;;  %2501 = vmatprep.mubr.bf16.mxu0 %v2188_v8  ;;  %v2804_v7 = vpack.c.bf16 %v12171_v24, %v2800_v41  ;;  %v1114_v36 = vadd.f32 %v1006_v12, %v669_v51  ;;  %v2175_v33 = vor.u32 %v2173_v49, %v2163_v58  ;;  %v2799_v58 = vld [vmem:[#allocation2] sm:$0xfc]  ;;  %v11929_v49 = vld [vmem:[#allocation3 + $0x200] sm:$0xff]  }
 0x1ee   : > { %v1116_v22 = vadd.f32 %v1008_v26, %v671_v0  ;;  %v1117_v34 = vadd.f32 %v1009_v59, %v672_v20  ;;  %v10116_v39 = vpop.f32.mrb[3].mxu0  ;;  %v2879_v56 = vrot.slane %v12795_v4, 1  ;;  %v2803_v4 = vpack.c.bf16 %v13089_v11, %v2799_v58 }
 0x1ef   : > { %v13454_v47 = vadd.f32 %v10116_v39, %v10115_v40  ;;  %2767 = vmatmul.mubr.bf16.gmra.mrb[64].mxu1 %v12756_v25  ;;  %v2878_v24 = vrot.slane %v2804_v7, 1  ;;  %v2180_v51 = vsel %vm1988_vm0, %v2175_v33, %v12776_v57  ;;  %v2883_v7 = vrot.slane %v12881_v1, 1  ;;  %v11935_v33 = vld [vmem:[#allocation3 + $0x248] sm:$0xff]  }
 0x1f0   : > { %v1291_v55 = vpop.permute.xlu1 %1290  ;;  %v1560_v27 = vadd.f32 %v1452_v63, %v1116_v22  ;;  %v1561_v48 = vadd.f32 %v1453_v52, %v1117_v34  ;;  %2774 = vmatprep.mubr.bf16.mxu1 %v12738_v37  ;;  %v2876_v52 = vrot.slane %v12813_v30, 1  ;;  %v2875_v57 = vrot.slane %v2803_v4, 1 }
 0x1f1   : > { %v1450_v0 = vmul.f32 %v12600_v15, %v1291_v55  ;;  %v1451_v20 = vmul.f32 %v12602_v16, %v1291_v55  ;;  %v2880_v63 = vsel %vm2874_vm1, %v2878_v24, %v2879_v56 }
 0x1f2   : > { %v1668_v26 = vmax.f32 %v1560_v27, 0.0  ;;  %v1669_v41 = vmax.f32 %v1561_v48, 0.0 }
 0x1f3   : > { %v1558_v12 = vadd.f32 %v1450_v0, %v1114_v36  ;;  %v1559_v39 = vadd.f32 %v1451_v20, %v1115_v35  ;;  %v1299_v35 = vpop.permute.xlu0 %1298  ;;  %v2877_v36 = vsel %vm2874_vm1, %v2875_v57, %v2876_v52 }
 0x1f4   : > { %1776 = vst [vmem:[#allocation2 + $0x220] sm:$0xff] %v1668_v26  ;;  %1777 = vst [vmem:[#allocation2 + $0x228] sm:$0xff] %v1669_v41  ;;  %2502 = vmatmul.mubr.bf16.gmra.mrb[44].mxu0 %v2180_v51  ;;  %v1454_v34 = vmul.f32 %v12600_v15, %v1299_v35  ;;  %v1455_v48 = vmul.f32 %v12602_v16, %v1299_v35  ;;  %v2884_v26 = vsel %vm2874_vm1, %v2879_v56, %v2883_v7  ;;  %v11937_v51 = vld [vmem:[#allocation3 + $0x208] sm:$0xff]  }
 0x1f5   : > { %v1666_v2 = vmax.f32 %v1558_v12, 0.0  ;;  %v1667_v61 = vmax.f32 %v1559_v39, 0.0  ;;  %v500_v59 = vpop.permute.xlu1 %499  ;;  %3101 = vmatprep.mubr.bf16.mxu0 %v2880_v63  ;;  %v11938_v63 = vld [vmem:[#allocation3 + $0x250] sm:$0xff]   ;;  %v2881_v56 = vrot.slane %v12883_v43, 1  ;;  %v16314_v43 = vrot.slane %v12990_v45, 1  ;;  %v11948_v45 = vld [vmem:[#allocation3 + $0x268] sm:$0xff]  }
 0x1f6   : > { %v673_v8 = vmul.f32 %v12596_v13, %v500_v59  ;;  %v674_v11 = vmul.f32 %v12598_v14, %v500_v59 }
 0x1f7   : > { %1774 = vst [vmem:[#allocation2 + $0x210] sm:$0xff] %v1666_v2  ;;  %1775 = vst [vmem:[#allocation2 + $0x218] sm:$0xff] %v1667_v61  ;;  %2775 = vmatmul.mubr.bf16.gmra.mrb[68].mxu1 %v12742_v32 }
 0x1f8   : > { %2782 = vmatprep.mubr.bf16.mxu1 %v12862_v29 }
 0x1f9   : > { %v10190_v40 = vpop.f32.mrb[4].mxu1 }
 0x1fa   : > { %v855_v22 = vpop.permute.xlu1 %854  ;;  %v10191_v30 = vpop.f32.mrb[5].mxu1 }
 0x1fb   : > { %v1010_v55 = vmul.f32 %v12591_v9, %v855_v22  ;;  %v1011_v27 = vmul.f32 %v12593_v10, %v855_v22  ;;  %v13476_v1 = vadd.f32 %v10191_v30, %v10190_v40  ;;  %v10193_v0 = vpop.f32.mrb[6].mxu1  ;;  %v11939_v40 = vld [vmem:[#allocation3 + $0x210] sm:$0xff]   ;;  %v2882_v22 = vsel %vm2874_vm1, %v2876_v52, %v2881_v56  ;;  %v11945_v52 = vld [vmem:[#allocation3 + $0x220] sm:$0xff]  }
 0x1fc   : > { %v10194_v20 = vpop.f32.mrb[7].mxu1  ;;  %3102 = vmatmul.mubr.bf16.vlgmr.msra.gmra.mrb[48].mxu0 %v2877_v36  ;;  %v2888_v30 = vsel %vm2874_vm1, %v2883_v7, %v16314_v43  ;;  %v3263_v36 = vld [vmem:[#allocation2 + $0x38] sm:$0xff]  ;;  %v11950_v43 = vld [vmem:[#allocation3 + $0x2d0] sm:$0xff]  }
 0x1fd   : > { %v1118_v41 = vadd.f32 %v1010_v55, %v673_v8  ;;  %v1119_v24 = vadd.f32 %v1011_v27, %v674_v11  ;;  %v13479_v12 = vadd.f32 %v10194_v20, %v10193_v0  ;;  %10545 = vmatpush3.bf16.msra.mxu0 %v11929_v49  ;;  %v10118_v39 = vpop.f32.mrb[4].mxu0  ;;  %3109 = vmatprep.mubr.bf16.mxu0 %v2884_v26  ;;  %v11940_v49 = vld [vmem:[#allocation3 + $0x258] sm:$0xff]   ;;  %v11944_v27 = vld [vmem:[#allocation3 + $0x260] sm:$0xff]   ;;  %v13502_v0 = vld [vmem:[#allocation2 + $0x40] sm:$0xff] }
 0x1fe   : > { %v10119_v58 = vpop.f32.mrb[5].mxu0  ;;  %10546 = vmatprep.subr.bf16.mxu0 %v11935_v33  ;;  %v11941_v33 = vld [vmem:[#allocation3 + $0x218] sm:$0xff]  }
 0x1ff   : > { %v13481_v4 = vadd.f32 %v1454_v34, %v1118_v41  ;;  %v1563_v2 = vadd.f32 %v1455_v48, %v1119_v24  ;;  %v13483_v61 = vadd.f32 %v10119_v58, %v10118_v39  ;;  %v10121_v59 = vpop.f32.mrb[6].mxu0  ;;  %2783 = vmatmul.mubr.bf16.gmra.mrb[72].mxu1 %v12866_v28  ;;  %v13494_v34 = vld [vmem:[#allocation2 + $0x48] sm:$0xff]  ;;  %v2885_v48 = vrot.slane %v12992_v60, 1  ;;  %v505_v7 = vpop.permute.xlu1 %504  ;;  %v3262_v41 = vld [vmem:[#allocation2 + $0x30] sm:$0xff]  ;;  %v11946_v60 = vld [vmem:[#allocation3 + $0x2c8] sm:$0xff]  }
 0x200   : > { %v10122_v35 = vpop.f32.mrb[7].mxu0  ;;  %2790 = vmatprep.mubr.bf16.mxu1 %v12968_v53  ;;  %v3327_v55 = vpack.c.bf16 %v13494_v34, %v3263_v36  ;;  %v3269_v26 = vld [vmem:[#allocation2 + $0x68] sm:$0xff]  ;;  %v11943_v24 = vld [vmem:[#allocation3 + $0x280] sm:$0xff]   ;;  %v3326_v39 = vpack.c.bf16 %v13502_v0, %v3262_v41  ;;  %v11949_v58 = vld [vmem:[#allocation3 + $0x228] sm:$0xff]  }
 0x201   : > { %v1670_v57 = vmax.f32 %v13481_v4, 0.0  ;;  %v1671_v8 = vmax.f32 %v1563_v2, 0.0  ;;  %v13489_v11 = vadd.f32 %v10122_v35, %v10121_v59  ;;  %10547 = vmatpush3.bf16.msra.mxu0 %v11937_v51  ;;  %v2886_v20 = vsel %vm2874_vm1, %v2881_v56, %v2885_v48  ;;  %v3267_v51 = vld [vmem:[#allocation2 + $0x58] sm:$0xff]  ;;  %v11952_v2 = vld [vmem:[#allocation3 + $0x270] sm:$0xff]  }
 0x202   : > { %10548 = vmatprep.subr.bf16.mxu0 %v11938_v63  ;;  %v13507_v63 = vpack.c.bf16 %v3269_v26, %v3267_v51  ;;  %v675_v56 = vmul.f32 %v12596_v13, %v505_v7  ;;  %v11953_v36 = vld [vmem:[#allocation3 + $0x230] sm:$0xff]  }
 0x203   : > { %1778 = vst [vmem:[#allocation2 + $0x230] sm:$0xff] %v1670_v57  ;;  %1779 = vst [vmem:[#allocation2 + $0x238] sm:$0xff] %v1671_v8  ;;  %v676_v8 = vmul.f32 %v12598_v14, %v505_v7  ;;  %v3273_v7 = vld [vmem:[#allocation2 + $0x88] sm:$0xff]  ;;  %v11951_v51 = vld [vmem:[#allocation3 + $0x290] sm:$0xff]  }
 0x204   : > { %3110 = vmatmul.mubr.bf16.gmra.mrb[52].mxu0 %v2882_v22  ;;  %v3268_v22 = vld [vmem:[#allocation2 + $0x60] sm:$0xff] }
 0x205   : > { %3117 = vmatprep.mubr.bf16.mxu0 %v2888_v30  ;;  %10549 = vmatpush3.bf16.msra.mxu0 %v11939_v40 }
 0x206   : > { %10550 = vmatprep.subr.bf16.mxu0 %v11940_v49  ;;  %v859_v59 = vpop.permute.xlu1 %858 }
 0x207   : > { %2791 = vmatmul.mubr.bf16.gmra.mrb[76].mxu1 %v12970_v5  ;;  %v1012_v35 = vmul.f32 %v12591_v9, %v859_v59  ;;  %v1013_v40 = vmul.f32 %v12593_v10, %v859_v59 }
 0x208   : > { %3519 = vmatprep.mubr.bf16.mxu1 %v3327_v55 }
 0x209   : > { %10551 = vmatpush3.bf16.msra.mxu0 %v11941_v33  ;;  %v1120_v26 = vadd.f32 %v1012_v35, %v675_v56 }
 0x20a   : > { %10552 = vmatprep.subr.bf16.mxu0 %v11944_v27  ;;  %v16315_v27 = vrot.slane %v13034_v46, 1  ;;  %v3271_v46 = vld [vmem:[#allocation2 + $0x78] sm:$0xff] }
 0x20b   : > { %v13525_v35 = vpack.c.bf16 %v3273_v7, %v3271_v46  ;;  %v11959_v46 = vld [vmem:[#allocation3 + $0x2a0] sm:$0xff]  }
 0x20c   : > { %3118 = vmatmul.mubr.bf16.gmra.mrb[56].mxu0 %v2886_v20  ;;  %v11956_v20 = vld [vmem:[#allocation3 + $0x278] sm:$0xff]  }
 0x20d   : > { %3125 = vmatprep.mubr.bf16.mxu0 %v13067_v6  ;;  %10553 = vmatpush3.bf16.msra.mxu0 %v11945_v52  ;;  %v11947_v6 = vld [vmem:[#allocation3 + $0x288] sm:$0xff]   ;;  %v510_v49 = vpop.permute.xlu0 %509  ;;  %v2890_v52 = vsel %vm2874_vm1, %v2885_v48, %v16315_v27  ;;  %v11954_v48 = vld [vmem:[#allocation3 + $0x2d8] sm:$0xff]  }
 0x20e   : > { %10554 = vmatprep.subr.bf16.mxu0 %v11948_v45  ;;  %v677_v30 = vmul.f32 %v12596_v13, %v510_v49  ;;  %v863_v33 = vpop.permute.xlu1 %862  ;;  %v678_v55 = vmul.f32 %v12598_v14, %v510_v49  ;;  %v3266_v45 = vld [vmem:[#allocation2 + $0x50] sm:$0xff]  ;;  %v11957_v49 = vld [vmem:[#allocation3 + $0x238] sm:$0xff]  }
 0x20f   : > { %3520 = vmatmul.mubr.bf16.vlgmr.msra.gmra.mrb[80].mxu1 %v3326_v39  ;;  %v1014_v41 = vmul.f32 %v12591_v9, %v863_v33  ;;  %v13521_v39 = vpack.c.bf16 %v3268_v22, %v3266_v45  ;;  %v3272_v45 = vld [vmem:[#allocation2 + $0x80] sm:$0xff] }
 0x210   : > { %3527 = vmatprep.mubr.bf16.mxu1 %v13507_v63  ;;  %10657 = vmatpush3.bf16.msra.mxu1 %v11943_v24  ;;  %v1015_v24 = vmul.f32 %v12593_v10, %v863_v33 }
 0x211   : > { %10658 = vmatprep.subr.bf16.mxu1 %v11946_v60  ;;  %10555 = vmatpush3.bf16.msra.mxu0 %v11949_v58  ;;  %v1121_v60 = vadd.f32 %v1013_v40, %v676_v8 }
 0x212   : > { %10556 = vmatprep.subr.bf16.mxu0 %v11952_v2  ;;  %v1303_v58 = vpop.permute.xlu0 %1302  ;;  %v1122_v2 = vadd.f32 %v1014_v41, %v677_v30  ;;  %v1123_v59 = vadd.f32 %v1015_v24, %v678_v55  ;;  %v3277_v41 = vld [vmem:[#allocation2 + $0xa8] sm:$0xff] }
 0x213   : > { %v1456_v56 = vmul.f32 %v12600_v15, %v1303_v58  ;;  %v1457_v22 = vmul.f32 %v12602_v16, %v1303_v58 }
 0x214   : > { %3126 = vmatmul.mubr.bf16.gmra.mrb[60].mxu0 %v2890_v52  ;;  %10659 = vmatpush3.bf16.msra.mxu1 %v11947_v6  ;;  %v1307_v33 = vpop.permute.xlu1 %1306  ;;  %v11960_v6 = vld [vmem:[#allocation3 + $0x340] sm:$0xff]  }
 0x215   : > { %3133 = vmatprep.mubr.bf16.mxu0 %v13119_v50  ;;  %10660 = vmatprep.subr.bf16.mxu1 %v11950_v43  ;;  %v1458_v50 = vmul.f32 %v12600_v15, %v1307_v33  ;;  %v1459_v8 = vmul.f32 %v12602_v16, %v1307_v33  ;;  %v1564_v40 = vadd.f32 %v1456_v56, %v1120_v26  ;;  %v11955_v43 = vld [vmem:[#allocation3 + $0x298] sm:$0xff]   ;;  %v3275_v56 = vld [vmem:[#allocation2 + $0x98] sm:$0xff] }
 0x216   : > { %10557 = vmatpush3.bf16.msra.mxu0 %v11953_v36  ;;  %v1565_v30 = vadd.f32 %v1457_v22, %v1121_v60  ;;  %v11958_v36 = vld [vmem:[#allocation3 + $0x2e0] sm:$0xff]   ;;  %v13542_v33 = vpack.c.bf16 %v3277_v41, %v3275_v56  ;;  %v3279_v56 = vld [vmem:[#allocation2 + $0xb8] sm:$0xff] }
 0x217   : > { %3528 = vmatmul.mubr.bf16.gmra.mrb[84].mxu1 %v13521_v39  ;;  %10558 = vmatprep.subr.bf16.mxu0 %v11956_v20  ;;  %v1566_v55 = vadd.f32 %v1458_v50, %v1122_v2  ;;  %v1567_v27 = vadd.f32 %v1459_v8, %v1123_v59  ;;  %v1672_v52 = vmax.f32 %v1564_v40, 0.0  ;;  %v3270_v60 = vld [vmem:[#allocation2 + $0x70] sm:$0xff]  ;;  %v11963_v50 = vld [vmem:[#allocation3 + $0x2a8] sm:$0xff]  }
 0x218   : > { %3535 = vmatprep.mubr.bf16.mxu1 %v13525_v35  ;;  %10661 = vmatpush3.bf16.msra.mxu1 %v11951_v51  ;;  %v1673_v7 = vmax.f32 %v1565_v30, 0.0  ;;  %v13540_v59 = vpack.c.bf16 %v3272_v45, %v3270_v60  ;;  %v11965_v60 = vld [vmem:[#allocation3 + $0x2b0] sm:$0xff]  }
 0x219   : > { %10662 = vmatprep.subr.bf16.mxu1 %v11954_v48  ;;  %v1674_v24 = vmax.f32 %v1566_v55, 0.0  ;;  %v1675_v58 = vmax.f32 %v1567_v27, 0.0  ;;  %1780 = vst [vmem:[#allocation2 + $0x240] sm:$0xff] %v1672_v52  ;;  %v13534_v26 = vpack.c.bf16 %v1672_v52, %v1670_v57  ;;  %v515_v4 = vpop.permute.xlu1 %514 }
 0x21a   : > { %10559 = vmatpush3.bf16.msra.mxu0 %v11957_v49  ;;  %1781 = vst [vmem:[#allocation2 + $0x248] sm:$0xff] %v1673_v7  ;;  %v11962_v49 = vld [vmem:[#allocation3 + $0x2e8] sm:$0xff]   ;;  %v680_v22 = vmul.f32 %v12598_v14, %v515_v4  ;;  %v3281_v7 = vld [vmem:[#allocation2 + $0xc8] sm:$0xff] }
 0x21b   : > { %v10196_v20 = vpop.f32.mrb[8].mxu1  ;;  %10768 = vmatprep.subr.bf16.mxu0 %v11960_v6  ;;  %16316 = vst [vmem:[#allocation21_spill] sm:$0xff] %v13534_v26  ;;  %1782 = vst [vmem:[#allocation2 + $0x250] sm:$0xff] %v1674_v24  ;;  %v11961_v26 = vld [vmem:[#allocation3 + $0x300] sm:$0xff]  }
 0x21c   : > { %v10197_v51 = vpop.f32.mrb[9].mxu1  ;;  %3134 = vmatmul.mubr.bf16.gmra.mrb[64].mxu0 %v13126_v19  ;;  %10663 = vmatpush3.bf16.msra.mxu1 %v11955_v43  ;;  %1783 = vst [vmem:[#allocation2 + $0x258] sm:$0xff] %v1675_v58  ;;  %v679_v19 = vmul.f32 %v12596_v13, %v515_v4  ;;  %v11964_v43 = vld [vmem:[#allocation3 + $0x2f0] sm:$0xff]  }
 0x21d   : > { %v13537_v48 = vadd.f32 %v10197_v51, %v10196_v20  ;;  %v10199_v2 = vpop.f32.mrb[10].mxu1  ;;  %3141 = vmatprep.mubr.bf16.mxu0 %v13182_v62  ;;  %10664 = vmatprep.subr.bf16.mxu1 %v11958_v36  ;;  %v867_v62 = vpop.permute.xlu0 %866  ;;  %v3276_v36 = vld [vmem:[#allocation2 + $0xa0] sm:$0xff]  ;;  %v3274_v51 = vld [vmem:[#allocation2 + $0x90] sm:$0xff] }
 0x21e   : > { %v10200_v57 = vpop.f32.mrb[11].mxu1  ;;  %v1016_v8 = vmul.f32 %v12591_v9, %v867_v62  ;;  %v1017_v40 = vmul.f32 %v12593_v10, %v867_v62  ;;  %v1311_v52 = vpop.permute.xlu1 %1310 }
 0x21f   : > { %v13546_v6 = vadd.f32 %v10200_v57, %v10199_v2  ;;  %3536 = vmatmul.mubr.bf16.gmra.mrb[88].mxu1 %v13540_v59  ;;  %v1460_v20 = vmul.f32 %v12600_v15, %v1311_v52  ;;  %v1461_v41 = vmul.f32 %v12602_v16, %v1311_v52  ;;  %v13558_v2 = vpack.c.bf16 %v3276_v36, %v3274_v51  ;;  %v3282_v52 = vld [vmem:[#allocation2 + $0xd0] sm:$0xff]  ;;  %v3293_v51 = vld [vmem:[#allocation2 + $0x128] sm:$0xff] }
 0x220   : > { %3543 = vmatprep.mubr.bf16.mxu1 %v13542_v33  ;;  %10665 = vmatpush3.bf16.msra.mxu1 %v11959_v46  ;;  %v1124_v55 = vadd.f32 %v1016_v8, %v679_v19  ;;  %v1125_v27 = vadd.f32 %v1017_v40, %v680_v22  ;;  %v13562_v22 = vpack.c.bf16 %v3281_v7, %v3279_v56  ;;  %v3285_v8 = vld [vmem:[#allocation2 + $0xe8] sm:$0xff]  ;;  %v3278_v40 = vld [vmem:[#allocation2 + $0xb0] sm:$0xff] }
 0x221   : > { %10666 = vmatprep.subr.bf16.mxu1 %v11962_v49  ;;  %v11966_v49 = vld [vmem:[#allocation3 + $0x2f8] sm:$0xff]  }
 0x222   : > { %v10124_v30 = vpop.f32.mrb[8].mxu0  ;;  %v1568_v4 = vadd.f32 %v1460_v20, %v1124_v55  ;;  %v1569_v57 = vadd.f32 %v1461_v41, %v1125_v27  ;;  %v3284_v55 = vld [vmem:[#allocation2 + $0xe0] sm:$0xff]  ;;  %v3289_v27 = vld [vmem:[#allocation2 + $0x108] sm:$0xff] }
 0x223   : > { %v10125_v45 = vpop.f32.mrb[9].mxu0  ;;  %v3288_v41 = vld [vmem:[#allocation2 + $0x100] sm:$0xff]  ;;  %v16317_v56 = vld [vmem:[#allocation12_spill] sm:$0xff] }
 0x224   : > { %v13554_v24 = vadd.f32 %v10125_v45, %v10124_v30  ;;  %v10127_v58 = vpop.f32.mrb[10].mxu0  ;;  %3142 = vmatmul.mubr.bf16.gmra.mrb[68].mxu0 %v13189_v31  ;;  %10667 = vmatpush3.bf16.msra.mxu1 %v11963_v50  ;;  %v1676_v31 = vmax.f32 %v1568_v4, 0.0  ;;  %v1677_v62 = vmax.f32 %v1569_v57, 0.0  ;;  %v11968_v50 = vld [vmem:[#allocation3 + $0x2b8] sm:$0xff]   ;;  %v3283_v30 = vld [vmem:[#allocation2 + $0xd8] sm:$0xff] }
 0x225   : > { %v10128_v46 = vpop.f32.mrb[11].mxu0  ;;  %3149 = vmatprep.mubr.bf16.mxu0 %v13240_v54  ;;  %10668 = vmatprep.subr.bf16.mxu1 %v11964_v43  ;;  %v3280_v54 = vld [vmem:[#allocation2 + $0xc0] sm:$0xff]  ;;  %v13570_v36 = vpack.c.bf16 %v3285_v8, %v3283_v30  ;;  %v3287_v45 = vld [vmem:[#allocation2 + $0xf8] sm:$0xff] }
 0x226   : > { %v13560_v19 = vadd.f32 %v10128_v46, %v10127_v58  ;;  %1784 = vst [vmem:[#allocation2 + $0x260] sm:$0xff] %v1676_v31  ;;  %1785 = vst [vmem:[#allocation2 + $0x268] sm:$0xff] %v1677_v62  ;;  %v13568_v43 = vpack.c.bf16 %v3280_v54, %v3278_v40  ;;  %v3339_v7 = vpack.c.bf16 %v3289_v27, %v3287_v45  ;;  %v3291_v4 = vld [vmem:[#allocation2 + $0x118] sm:$0xff] }
 0x227   : > { %3544 = vmatmul.mubr.bf16.gmra.mrb[92].mxu1 %v13558_v2  ;;  %v3341_v62 = vpack.c.bf16 %v3293_v51, %v3291_v4  ;;  %v16318_v27 = vld [vmem:[#allocation14_spill] sm:$0xff] }
 0x228   : > { %3551 = vmatprep.mubr.bf16.mxu1 %v13562_v22  ;;  %10669 = vmatpush3.bf16.msra.mxu1 %v11965_v60  ;;  %v306_v51 = vld [vmem:[%s12434_s7 + $0x138] sm:$0xff] }
 0x229   : > { %10670 = vmatprep.subr.bf16.mxu1 %v11966_v49  ;;  %519 = vperm.xlu1 %11837, %v306_v51  }
 0x22c   : > { %3150 = vmatmul.mubr.bf16.gmra.mrb[72].mxu0 %v13247_v21  ;;  %10671 = vmatpush3.bf16.msra.mxu1 %v11968_v50  ;;  %v3336_v21 = vpack.c.bf16 %v3284_v55, %v3282_v52  ;;  %v3292_v55 = vld [vmem:[#allocation2 + $0x120] sm:$0xff] }
 0x22d   : > { %3157 = vmatprep.mubr.bf16.mxu0 %v13287_v3  ;;  %v11974_v3 = vld [vmem:[#allocation3 + $0x3c0] sm:$0xff]  }
 0x22e   : > { %10880 = vmatprep.subr.bf16.mxu1 %v11974_v3 }
 0x22f   : > { %3552 = vmatmul.mubr.bf16.gmra.mrb[96].mxu1 %v13568_v43 }
 0x230   : > { %3559 = vmatprep.mubr.bf16.mxu1 %v13570_v36 }
 0x234   : > { %3158 = vmatmul.mubr.bf16.gmra.mrb[76].mxu0 %v13294_v23  ;;  %v3286_v23 = vld [vmem:[#allocation2 + $0xf0] sm:$0xff] }
 0x235   : > { %3165 = vmatprep.mubr.bf16.mxu0 %v13330_v42  ;;  %v3338_v42 = vpack.c.bf16 %v3288_v41, %v3286_v23 }
 0x237   : > { %3560 = vmatmul.mubr.bf16.gmra.mrb[100].mxu1 %v3336_v21  ;;  %v3295_v21 = vld [vmem:[#allocation2 + $0x138] sm:$0xff] }
 0x238   : > { %3567 = vmatprep.mubr.bf16.mxu1 %v3339_v7  ;;  %v16319_v7 = vld [vmem:[#allocation13_spill] sm:$0xff] }
 0x239   : > { %v3343_v3 = vpack.c.bf16 %v16319_v7, %v3295_v21 }
 0x23a   : > { %v10130_v20 = vpop.f32.mrb[12].mxu0 }
 0x23b   : > { %v10131_v58 = vpop.f32.mrb[13].mxu0 }
 0x23c   : > { %v13576_v60 = vadd.f32 %v10131_v58, %v10130_v20  ;;  %v10133_v46 = vpop.f32.mrb[14].mxu0  ;;  %3166 = vmatmul.mubr.bf16.gmra.mrb[80].mxu0 %v16317_v56 }
 0x23d   : > { %v10134_v49 = vpop.f32.mrb[15].mxu0  ;;  %3173 = vmatprep.mubr.bf16.mxu0 %v13374_v17  ;;  %v3290_v17 = vld [vmem:[#allocation2 + $0x110] sm:$0xff] }
 0x23e   : > { %v10202_v57 = vpop.f32.mrb[12].mxu1  ;;  %v13580_v31 = vadd.f32 %v10134_v49, %v10133_v46  ;;  %v3340_v52 = vpack.c.bf16 %v3292_v55, %v3290_v17  ;;  %v16320_v49 = vld [vmem:[#allocation11_spill] sm:$0xff]  ;;  %v16324_v17 = vmov 2  }
 0x23f   : > { %v10203_v50 = vpop.f32.mrb[13].mxu1  ;;  %3568 = vmatmul.mubr.bf16.gmra.mrb[104].mxu1 %v3338_v42  ;;  %v2923_v42 = vrot.slane %v16320_v49, 1  ;;  %11838 = vset.pattern.permute.xlu1 %v16324_v17 }
 0x240   : > { %v13582_v54 = vadd.f32 %v10203_v50, %v10202_v57  ;;  %v10205_v8 = vpop.f32.mrb[14].mxu1  ;;  %3575 = vmatprep.mubr.bf16.mxu1 %v3341_v62  ;;  %v16321_v57 = vld [vmem:[#allocation20_spill] sm:$0xff]  ;;  %v16322_v62 = vld [vmem:[#allocation17_spill] sm:$0xff]  ;;  %1314 = vperm.xlu1 %11838, %v306_v51  }
 0x241   : > { %v10206_v40 = vpop.f32.mrb[15].mxu1  ;;  %v16323_v50 = vrot.slane %v16322_v62, 1 }
 0x242   : > { %v13584_v30 = vadd.f32 %v10206_v40, %v10205_v8  ;;  %v3294_v40 = vld [vmem:[#allocation2 + $0x130] sm:$0xff] }
 0x243   : > { %v2924_v8 = vsel %vm2874_vm1, %v16323_v50, %v2923_v42 }
 0x244   : > { %3174 = vmatmul.mubr.bf16.gmra.mrb[84].mxu0 %v16318_v27 }
 0x245   : > { %3181 = vmatprep.mubr.bf16.mxu0 %v13431_v18  ;;  %v3296_v18 = vld [vmem:[#allocation2 + $0x140] sm:$0xff] }
 0x246   : > { %v10224_v45 = vpop.f32.mrb[16].mxu1  ;;  %v3342_v27 = vpack.c.bf16 %v3296_v18, %v3294_v40  ;;  %v16326_v40 = vmov 0  }
 0x247   : > { %v10225_v20 = vpop.f32.mrb[17].mxu1  ;;  %3576 = vmatmul.mubr.bf16.gmra.mrb[108].mxu1 %v3340_v52  ;;  %11841 = vset.pattern.permute.xlu1 %v16326_v40 }
 0x248   : > { %v10226_v41 = vadd.f32 %v10225_v20, %v10224_v45  ;;  %v10227_v58 = vpop.f32.mrb[18].mxu1  ;;  %3583 = vmatprep.mubr.bf16.mxu1 %v3343_v3  ;;  %v16325_v45 = vld [vmem:[#allocation16_spill] sm:$0xff] }
 0x249   : > { %v10228_v46 = vpop.f32.mrb[19].mxu1 }
 0x24a   : > { %v13591_v56 = vadd.f32 %v10226_v41, %v13451_v38  ;;  %v10229_v23 = vadd.f32 %v10228_v46, %v10227_v58  ;;  %v3299_v38 = vld [vmem:[#allocation2 + $0x158] sm:$0xff] }
 0x24b   : > { %v3345_v7 = vpack.c.bf16 %v16325_v45, %v3299_v38  ;;  %v3303_v38 = vld [vmem:[#allocation2 + $0x178] sm:$0xff]  ;;  %v3298_v45 = vld [vmem:[#allocation2 + $0x150] sm:$0xff] }
 0x24c   : > { %v13595_v4 = vadd.f32 %v10229_v23, %v13454_v47  ;;  %3182 = vmatmul.mubr.bf16.gmra.mrb[88].mxu0 %v16321_v57  ;;  %v307_v23 = vld [vmem:[%s12434_s7 + $0x140] sm:$0xff]  ;;  %v2921_v57 = vrot.slane %v12756_v25, 1 }
 0x24d   : > { %v10136_v55 = vpop.f32.mrb[16].mxu0  ;;  %3189 = vmatprep.mubr.bf16.mxu0 %v2924_v8  ;;  %524 = vperm.xlu0 %11839, %v307_v23   ;;  %v2927_v8 = vrot.slane %v12738_v37, 1  ;;  %v3305_v37 = vld [vmem:[#allocation2 + $0x188] sm:$0xff] }
 0x24e   : > { %v10230_v52 = vpop.f32.mrb[20].mxu1  ;;  %v10137_v21 = vpop.f32.mrb[17].mxu0 }
 0x24f   : > { %v10231_v47 = vpop.f32.mrb[21].mxu1  ;;  %v13603_v3 = vadd.f32 %v10137_v21, %v10136_v55  ;;  %v10139_v20 = vpop.f32.mrb[18].mxu0  ;;  %3584 = vmatmul.mubr.bf16.gmra.mrb[112].mxu1 %v3342_v27  ;;  %v16327_v55 = vrot.slane %v13407_v44, 1  ;;  %v2928_v25 = vsel %vm2874_vm1, %v2923_v42, %v2927_v8  ;;  %v3347_v44 = vpack.c.bf16 %v3305_v37, %v3303_v38  ;;  %v3307_v38 = vld [vmem:[#allocation2 + $0x198] sm:$0xff] }
 0x250   : > { %v10232_v41 = vadd.f32 %v10231_v47, %v10230_v52  ;;  %v10233_v58 = vpop.f32.mrb[22].mxu1  ;;  %v10140_v46 = vpop.f32.mrb[19].mxu0  ;;  %3591 = vmatprep.mubr.bf16.mxu1 %v3345_v7  ;;  %v308_v52 = vld [vmem:[%s12434_s7 + $0x148] sm:$0xff]  ;;  %v16329_v47 = vmov 1  }
 0x251   : > { %v10234_v49 = vpop.f32.mrb[23].mxu1  ;;  %v13606_v18 = vadd.f32 %v10140_v46, %v10139_v20  ;;  %v2922_v27 = vsel %vm2874_vm1, %v16327_v55, %v2921_v57  ;;  %529 = vperm.xlu1 %11841, %v308_v52   ;;  %11840 = vset.pattern.permute.xlu0 %v16329_v47 }
 0x252   : > { %v13610_v62 = vadd.f32 %v10232_v41, %v13483_v61  ;;  %v10235_v50 = vadd.f32 %v10234_v49, %v10233_v58  ;;  %v16328_v61 = vld [vmem:[#allocation15_spill] sm:$0xff]  ;;  %870 = vperm.xlu0 %11840, %v306_v51   ;;  %v2925_v49 = vrot.slane %v12742_v32, 1  ;;  %v3309_v32 = vld [vmem:[#allocation2 + $0x1a8] sm:$0xff] }
 0x253   : > { %v3344_v7 = vpack.c.bf16 %v16328_v61, %v3298_v45  ;;  %v3304_v45 = vld [vmem:[#allocation2 + $0x180] sm:$0xff] }
 0x254   : > { %v13619_v21 = vadd.f32 %v10235_v50, %v13489_v11  ;;  %3190 = vmatmul.mubr.bf16.gmra.mrb[92].mxu0 %v2922_v27  ;;  %v2931_v11 = vrot.slane %v12862_v29, 1  ;;  %v3302_v27 = vld [vmem:[#allocation2 + $0x170] sm:$0xff]  ;;  %v2926_v51 = vsel %vm2874_vm1, %v2921_v57, %v2925_v49  ;;  %v2929_v57 = vrot.slane %v12866_v28, 1 }
 0x255   : > { %3197 = vmatprep.mubr.bf16.mxu0 %v2928_v25  ;;  %11842 = vset.pattern.permute.xlu1 %v16329_v47  ;;  %v3346_v61 = vpack.c.bf16 %v3304_v45, %v3302_v27 }
 0x256   : > { %v10236_v20 = vpop.f32.mrb[24].mxu1  ;;  %874 = vperm.xlu1 %11842, %v307_v23   ;;  %878 = vperm.xlu0 %11840, %v308_v52   ;;  %v2932_v29 = vsel %vm2874_vm1, %v2927_v8, %v2931_v11  ;;  %v2930_v28 = vsel %vm2874_vm1, %v2925_v49, %v2929_v57 }
 0x257   : > { %v10237_v41 = vpop.f32.mrb[25].mxu1  ;;  %3592 = vmatmul.mubr.bf16.gmra.mrb[116].mxu1 %v3344_v7  ;;  %v3349_v7 = vpack.c.bf16 %v3309_v32, %v3307_v38 }
 0x258   : > { %v10238_v58 = vadd.f32 %v10237_v41, %v10236_v20  ;;  %v10239_v46 = vpop.f32.mrb[26].mxu1  ;;  %3599 = vmatprep.mubr.bf16.mxu1 %v3347_v44  ;;  %v2935_v41 = vrot.slane %v12968_v53, 1 }
 0x259   : > { %v10240_v42 = vpop.f32.mrb[27].mxu1 }
 0x25a   : > { %v13628_v50 = vadd.f32 %v10238_v58, %v13554_v24  ;;  %v10241_v55 = vadd.f32 %v10240_v42, %v10239_v46  ;;  %11843 = vset.pattern.permute.xlu1 %v16324_v17  ;;  %v2802_v46 = vld [vmem:[#allocation2 + $0x208] sm:$0x3] }
 0x25b   : > { %1318 = vperm.xlu1 %11843, %v307_v23   ;;  %v2806_v32 = vpack.c.bf16 %v2802_v46, %v2802_v46 }
 0x25c   : > { %v13632_v25 = vadd.f32 %v10241_v55, %v13560_v19  ;;  %3198 = vmatmul.mubr.bf16.gmra.mrb[96].mxu0 %v2926_v51  ;;  %v3306_v51 = vld [vmem:[#allocation2 + $0x190] sm:$0xff] }
 0x25d   : > { %3205 = vmatprep.mubr.bf16.mxu0 %v2932_v29  ;;  %v3313_v29 = vld [vmem:[#allocation2 + $0x1c8] sm:$0xff] }
 0x25e   : > { %v10242_v24 = vpop.f32.mrb[28].mxu1 }
 0x25f   : > { %v10243_v37 = vpop.f32.mrb[29].mxu1  ;;  %3600 = vmatmul.mubr.bf16.gmra.mrb[120].mxu1 %v3346_v61  ;;  %1322 = vperm.xlu1 %11843, %v308_v52   ;;  %v2936_v61 = vsel %vm2874_vm1, %v2931_v11, %v2935_v41  ;;  %v2939_v11 = vrot.slane %v2806_v32, 1  ;;  %v3833_v32 = vshll.u32 %v13507_v63, 16 }
 0x260   : > { %v10244_v20 = vadd.f32 %v10243_v37, %v10242_v24  ;;  %v10245_v44 = vpop.f32.mrb[30].mxu1  ;;  %v10142_v19 = vpop.f32.mrb[20].mxu0  ;;  %3607 = vmatprep.mubr.bf16.mxu1 %v3349_v7  ;;  %v3311_v7 = vld [vmem:[#allocation2 + $0x1b8] sm:$0xff] }
 0x261   : > { %v10246_v8 = vpop.f32.mrb[31].mxu1  ;;  %v10143_v58 = vpop.f32.mrb[21].mxu0  ;;  %v3681_v37 = vld [vmem:[#allocation2 + $0x38] sm:$0xfe]  ;;  %v3351_v52 = vpack.c.bf16 %v3313_v29, %v3311_v7  ;;  %v3317_v29 = vld [vmem:[#allocation2 + $0x1e8] sm:$0xff] }
 0x262   : > { %v13639_v42 = vadd.f32 %v10244_v20, %v13576_v60  ;;  %v10247_v55 = vadd.f32 %v10246_v8, %v10245_v44  ;;  %v13641_v27 = vadd.f32 %v10143_v58, %v10142_v19  ;;  %v10145_v23 = vpop.f32.mrb[22].mxu0  ;;  %v3308_v60 = vld [vmem:[#allocation2 + $0x1a0] sm:$0xff]  ;;  %v3747_v44 = vpack.c.bf16 %v13494_v34, %v3681_v37  ;;  %v3680_v7 = vld [vmem:[#allocation2 + $0x30] sm:$0xfe]  ;;  %v3315_v37 = vld [vmem:[#allocation2 + $0x1d8] sm:$0xff] }
 0x263   : > { %v10146_v38 = vpop.f32.mrb[23].mxu0  ;;  %v3348_v24 = vpack.c.bf16 %v3308_v60, %v3306_v51  ;;  %11844 = vset.pattern.permute.xlu1 %v16326_v40  ;;  %v2801_v58 = vld [vmem:[#allocation2 + $0x200] sm:$0x3] }
 0x264   : > { %v13645_v45 = vadd.f32 %v10247_v55, %v13580_v31  ;;  %v13647_v53 = vadd.f32 %v10146_v38, %v10145_v23  ;;  %3206 = vmatmul.mubr.bf16.gmra.mrb[100].mxu0 %v2930_v28  ;;  %v2933_v31 = vrot.slane %v12970_v5, 1  ;;  %v3312_v51 = vld [vmem:[#allocation2 + $0x1c0] sm:$0xff]  ;;  %v3828_v38 = vshll.u32 %v3747_v44, 16 }
 0x265   : > { %3213 = vmatprep.mubr.bf16.mxu0 %v2936_v61  ;;  %v2805_v61 = vpack.c.bf16 %v2801_v58, %v2801_v58  ;;  %v2940_v5 = vsel %vm2874_vm1, %v2935_v41, %v2939_v11  ;;  %v3826_v41 = vshrl.u32 %v3747_v44, 16  ;;  %v3835_v11 = vrot.slane %v3833_v32, 1 }
 0x266   : > { %v10248_v20 = vpop.f32.mrb[32].mxu1  ;;  %v2934_v28 = vsel %vm2874_vm1, %v2929_v57, %v2933_v31  ;;  %v3353_v57 = vpack.c.bf16 %v3317_v29, %v3315_v37  ;;  %v3821_v44 = vshll.u32 %v13521_v39, 16 }
 0x267   : > { %v10249_v49 = vpop.f32.mrb[33].mxu1  ;;  %3608 = vmatmul.mubr.bf16.gmra.mrb[124].mxu1 %v3348_v24  ;;  %v3310_v24 = vld [vmem:[#allocation2 + $0x1b0] sm:$0xff] }
 0x268   : > { %v10250_v19 = vadd.f32 %v10249_v49, %v10248_v20  ;;  %v10251_v8 = vpop.f32.mrb[34].mxu1  ;;  %3615 = vmatprep.mubr.bf16.mxu1 %v3351_v52  ;;  %v3746_v20 = vpack.c.bf16 %v13502_v0, %v3680_v7  ;;  %v3830_v49 = vrot.slane %v3828_v38, 1  ;;  %v3321_v7 = vld [vmem:[#allocation2 + $0x208] sm:$0xff] }
 0x269   : > { %v10252_v46 = vpop.f32.mrb[35].mxu1 }
 0x26a   : > { %v13654_v55 = vadd.f32 %v10250_v19, %v13603_v3  ;;  %v10253_v23 = vadd.f32 %v10252_v46, %v10251_v8  ;;  %v3350_v3 = vpack.c.bf16 %v3312_v51, %v3310_v24  ;;  %v13664_v46 = vld [vmem:[%s12434_s7 + $0x158] sm:$0xff]  ;;  %v3831_v29 = vor.u32 %v3830_v49, %v3826_v41  ;;  %v13680_v41 = vld [vmem:[%s12434_s7 + $0x150] sm:$0xff] }
 0x26b   : > { %539 = vperm.xlu1 %11844, %v13664_v46   ;;  %886 = vperm.xlu0 %11840, %v13664_v46  }
 0x26c   : > { %v13658_v60 = vadd.f32 %v10253_v23, %v13606_v18  ;;  %3214 = vmatmul.mubr.bf16.gmra.mrb[104].mxu0 %v2934_v28  ;;  %v2937_v18 = vrot.slane %v2805_v61, 1  ;;  %v3816_v28 = vshll.u32 %v3746_v20, 16  ;;  %v3836_v37 = vsel %vm1988_vm0, %v3831_v29, %v3835_v11 }
 0x26d   : > { %3221 = vmatprep.mubr.bf16.mxu0 %v2940_v5  ;;  %v3316_v5 = vld [vmem:[#allocation2 + $0x1e0] sm:$0xff]  ;;  %v3814_v29 = vshrl.u32 %v3746_v20, 16  ;;  %v11967_v20 = vld [vmem:[#allocation3 + $0x348] sm:$0xff]  }
 0x26e   : > { %16330 = vst [vmem:[#allocation12_spill] sm:$0xff] %v13658_v60  ;;  %v10254_v52 = vpop.f32.mrb[36].mxu1  ;;  %v2938_v24 = vsel %vm2874_vm1, %v2933_v31, %v2937_v18  ;;  %v3818_v31 = vrot.slane %v3816_v28, 1 }
 0x26f   : > { %v10255_v19 = vpop.f32.mrb[37].mxu1  ;;  %3616 = vmatmul.mubr.bf16.gmra.mrb[128].mxu1 %v3350_v3  ;;  %11845 = vset.pattern.permute.xlu1 %v16329_v47 }
 0x270   : > { %v10256_v8 = vadd.f32 %v10255_v19, %v10254_v52  ;;  %v10257_v58 = vpop.f32.mrb[38].mxu1  ;;  %3623 = vmatprep.mubr.bf16.mxu1 %v3353_v57  ;;  %v3314_v52 = vld [vmem:[#allocation2 + $0x1d0] sm:$0xff]  ;;  %882 = vperm.xlu1 %11845, %v13680_v41  }
 0x271   : > { %v10258_v23 = vpop.f32.mrb[39].mxu1  ;;  %v3352_v19 = vpack.c.bf16 %v3316_v5, %v3314_v52  ;;  %v3845_v5 = vshrl.u32 %v13507_v63, 16  ;;  %v3819_v52 = vor.u32 %v3818_v31, %v3814_v29  ;;  %v3318_v31 = vld [vmem:[#allocation2 + $0x1f0] sm:$0xff] }
 0x272   : > { %v13669_v51 = vadd.f32 %v10256_v8, %v13641_v27  ;;  %v10259_v38 = vadd.f32 %v10258_v23, %v10257_v58  ;;  %v3849_v27 = vshll.u32 %v13525_v35, 16  ;;  %v3319_v8 = vld [vmem:[#allocation2 + $0x1f8] sm:$0xff] }
 0x273   : > { %v10148_v61 = vpop.f32.mrb[24].mxu0 }
 0x274   : > { %16331 = vst [vmem:[#allocation14_spill] sm:$0xff] %v13669_v51  ;;  %v13674_v32 = vadd.f32 %v10259_v38, %v13647_v53  ;;  %v10149_v3 = vpop.f32.mrb[25].mxu0  ;;  %3222 = vmatmul.mubr.bf16.gmra.mrb[108].mxu0 %v2938_v24  ;;  %v3355_v53 = vpack.c.bf16 %v3321_v7, %v3319_v8  ;;  %v3823_v24 = vrot.slane %v3821_v44, 1  ;;  %v3851_v28 = vrot.slane %v3849_v27, 1  ;;  %v3325_v7 = vld [vmem:[#allocation2 + $0x228] sm:$0xff]  ;;  %11846 = vset.pattern.permute.xlu1 %v16324_v17 }
 0x275   : > { %v10150_v57 = vadd.f32 %v10149_v3, %v10148_v61  ;;  %v10151_v49 = vpop.f32.mrb[26].mxu0  ;;  %4237 = vmatprep.mubr.bf16.mxu0 %v3836_v37  ;;  %1326 = vperm.xlu1 %11846, %v13680_v41  }
 0x276   : > { %16332 = vst [vmem:[#allocation13_spill] sm:$0xff] %v13674_v32  ;;  %v10260_v18 = vpop.f32.mrb[40].mxu1  ;;  %v10152_v58 = vpop.f32.mrb[27].mxu0  ;;  %v3323_v32 = vld [vmem:[#allocation2 + $0x218] sm:$0xff]  ;;  %v3824_v44 = vsel %vm1988_vm0, %v3819_v52, %v3823_v24 }
 0x277   : > { %v10261_v23 = vpop.f32.mrb[41].mxu1  ;;  %v10153_v38 = vadd.f32 %v10152_v58, %v10151_v49  ;;  %3624 = vmatmul.mubr.bf16.gmra.mrb[132].mxu1 %v3352_v19  ;;  %v3847_v49 = vor.u32 %v3845_v5, %v3835_v11  ;;  %v3320_v19 = vld [vmem:[#allocation2 + $0x200] sm:$0xff]  ;;  %v3837_v5 = vshrl.u32 %v13521_v39, 16  ;;  %v4399_v52 = vld [vmem:[#allocation2 + $0x38] sm:$0xfc] }
 0x278   : > { %v10262_v61 = vadd.f32 %v10261_v23, %v10260_v18  ;;  %v10263_v3 = vpop.f32.mrb[42].mxu1  ;;  %3631 = vmatprep.mubr.bf16.mxu1 %v3355_v53  ;;  %v3841_v18 = vshll.u32 %v13540_v59, 16  ;;  %v3865_v53 = vshll.u32 %v13542_v33, 16  ;;  %v3354_v11 = vpack.c.bf16 %v3320_v19, %v3318_v31  ;;  %v11969_v23 = vld [vmem:[#allocation3 + $0x308] sm:$0xff]   ;;  %v3324_v19 = vld [vmem:[#allocation2 + $0x220] sm:$0xff] }
 0x279   : > { %v10264_v37 = vpop.f32.mrb[43].mxu1  ;;  %v3852_v27 = vsel %vm1988_vm0, %v3847_v49, %v3851_v28  ;;  %v3322_v49 = vld [vmem:[#allocation2 + $0x210] sm:$0xff]  ;;  %1330 = vperm.xlu1 %11846, %v13664_v46   ;;  %v11971_v31 = vld [vmem:[#allocation3 + $0x310] sm:$0xff]  }
 0x27a   : > { %v10265_v8 = vadd.f32 %v10264_v37, %v10263_v3  ;;  %v13684_v51 = vadd.f32 %v10262_v61, %v10150_v57  ;;  %v3357_v57 = vpack.c.bf16 %v3325_v7, %v3323_v32  ;;  %v11970_v61 = vld [vmem:[#allocation3 + $0x350] sm:$0xff]   ;;  %v13695_v3 = vld [vmem:[%s12434_s7 + $0x168] sm:$0xff]  ;;  %v3843_v37 = vrot.slane %v3841_v18, 1 }
 0x27b   : > { %894 = vperm.xlu0 %11840, %v13695_v3  }
 0x27c   : > { %16333 = vst [vmem:[#allocation11_spill] sm:$0xff] %v13684_v51  ;;  %v13689_v58 = vadd.f32 %v10265_v8, %v10153_v38  ;;  %4238 = vmatmul.mubr.bf16.vlgmr.msra.gmra.mrb[112].mxu0 %v3824_v44  ;;  %v3867_v8 = vrot.slane %v3865_v53, 1  ;;  %v3839_v44 = vor.u32 %v3837_v5, %v3823_v24  ;;  %v16217_v53 = vrot.slane %v13507_v63, 1  ;;  %v4398_v5 = vld [vmem:[#allocation2 + $0x30] sm:$0xfc] }
 0x27d   : > { %10769 = vmatpush3.bf16.msra.mxu0 %v11961_v26  ;;  %4245 = vmatprep.mubr.bf16.mxu0 %v3852_v27  ;;  %v3861_v26 = vshrl.u32 %v13525_v35, 16  ;;  %v4403_v27 = vpack.c.bf16 %v13494_v34, %v4399_v52  ;;  %v3881_v34 = vshll.u32 %v13562_v22, 16  ;;  %v11976_v52 = vld [vmem:[#allocation3 + $0x360] sm:$0xff]  }
 0x27e   : > { %16334 = vst [vmem:[#allocation20_spill] sm:$0xff] %v13689_v58  ;;  %v10266_v29 = vpop.f32.mrb[44].mxu1  ;;  %10770 = vmatprep.subr.bf16.mxu0 %v11967_v20  ;;  %v11972_v58 = vld [vmem:[#allocation3 + $0x358] sm:$0xff]   ;;  %11847 = vset.pattern.permute.xlu1 %v16326_v40 }
 0x27f   : > { %v10267_v38 = vpop.f32.mrb[45].mxu1  ;;  %3632 = vmatmul.mubr.bf16.gmra.mrb[136].mxu1 %v3354_v11  ;;  %v3863_v11 = vor.u32 %v3861_v26, %v3851_v28  ;;  %11849 = vset.pattern.permute.xlu0 %v16326_v40  ;;  %v4476_v24 = vrot.slane %v4403_v27, 1  ;;  %v11973_v28 = vld [vmem:[#allocation3 + $0x318] sm:$0xff]  }
 0x280   : > { %v10268_v32 = vadd.f32 %v10267_v38, %v10266_v29  ;;  %v10269_v7 = vpop.f32.mrb[46].mxu1  ;;  %3639 = vmatprep.mubr.bf16.mxu1 %v3357_v57  ;;  %v3844_v29 = vsel %vm1988_vm0, %v3839_v44, %v3843_v37  ;;  %v3356_v38 = vpack.c.bf16 %v3324_v19, %v3322_v49  ;;  %v3857_v57 = vshll.u32 %v13558_v2, 16  ;;  %534 = vperm.xlu0 %11849, %v13680_v41  }
 0x281   : > { %v10270_v20 = vpop.f32.mrb[47].mxu1  ;;  %10771 = vmatpush3.bf16.msra.mxu0 %v11969_v23  ;;  %v3868_v46 = vsel %vm1988_vm0, %v3863_v11, %v3867_v8  ;;  %v4478_v49 = vsel %vm2874_vm1, %v4476_v24, %v16217_v53  ;;  %v3853_v41 = vshrl.u32 %v13540_v59, 16  ;;  %549 = vperm.xlu1 %11847, %v13695_v3   ;;  %v3877_v11 = vshrl.u32 %v13542_v33, 16 }
 0x282   : > { %v10271_v18 = vadd.f32 %v10270_v20, %v10269_v7  ;;  %10772 = vmatprep.subr.bf16.mxu0 %v11970_v61  ;;  %v3859_v19 = vrot.slane %v3857_v57, 1  ;;  %v4402_v20 = vpack.c.bf16 %v13502_v0, %v4398_v5  ;;  %v16218_v53 = vrot.slane %v13521_v39, 1  ;;  %v11977_v57 = vld [vmem:[#allocation3 + $0x320] sm:$0xff]  }
 0x283   : > { %v3855_v24 = vor.u32 %v3853_v41, %v3843_v37 }
 0x284   : > { %4246 = vmatmul.mubr.bf16.gmra.mrb[116].mxu0 %v3844_v29  ;;  %v3883_v29 = vrot.slane %v3881_v34, 1  ;;  %v16219_v34 = vrot.slane %v13525_v35, 1  ;;  %v4473_v41 = vrot.slane %v4402_v20, 1  ;;  %v16337_v20 = vrot.slane %v13507_v63, 1  ;;  %v11982_v63 = vld [vmem:[#allocation3 + $0x3d0] sm:$0xff]  }
 0x285   : > { %4253 = vmatprep.mubr.bf16.mxu0 %v3868_v46  ;;  %10773 = vmatpush3.bf16.msra.mxu0 %v11971_v31 }
 0x286   : > { %v10272_v23 = vpop.f32.mrb[48].mxu1  ;;  %v10154_v61 = vpop.f32.mrb[28].mxu0  ;;  %10774 = vmatprep.subr.bf16.mxu0 %v11972_v58  ;;  %11848 = vset.pattern.permute.xlu1 %v16329_v47 }
 0x287   : > { %v10273_v7 = vpop.f32.mrb[49].mxu1  ;;  %v10155_v26 = vpop.f32.mrb[29].mxu0  ;;  %3640 = vmatmul.mubr.bf16.gmra.mrb[140].mxu1 %v3356_v38  ;;  %v311_v38 = vld [vmem:[%s12434_s7 + $0x160] sm:$0xff] }
 0x288   : > { %v13716_v44 = vadd.f32 %v10273_v7, %v10272_v23  ;;  %v10275_v58 = vpop.f32.mrb[50].mxu1  ;;  %v10156_v27 = vadd.f32 %v10155_v26, %v10154_v61  ;;  %v10157_v31 = vpop.f32.mrb[30].mxu0  ;;  %4699 = vmatprep.mubr.bf16.mxu1 %v4478_v49  ;;  %544 = vperm.xlu0 %11849, %v311_v38   ;;  %v3879_v61 = vor.u32 %v3877_v11, %v3867_v8  ;;  %v11980_v7 = vld [vmem:[#allocation3 + $0x368] sm:$0xff]   ;;  %v3873_v49 = vshll.u32 %v13568_v43, 16  ;;  %v11975_v8 = vld [vmem:[#allocation3 + $0x380] sm:$0xff]   ;;  %v11984_v11 = vld [vmem:[#allocation3 + $0x370] sm:$0xff]  }
 0x289   : > { %v10276_v46 = vpop.f32.mrb[51].mxu1  ;;  %v10158_v51 = vpop.f32.mrb[31].mxu0  ;;  %10775 = vmatpush3.bf16.msra.mxu0 %v11973_v28  ;;  %v3860_v26 = vsel %vm1988_vm0, %v3855_v24, %v3859_v19  ;;  %890 = vperm.xlu1 %11848, %v311_v38   ;;  %v3869_v24 = vshrl.u32 %v13558_v2, 16 }
 0x28a   : > { %v13721_v0 = vadd.f32 %v10276_v46, %v10275_v58  ;;  %v13723_v23 = vadd.f32 %v10268_v32, %v10156_v27  ;;  %v10159_v5 = vadd.f32 %v10158_v51, %v10157_v31  ;;  %10776 = vmatprep.subr.bf16.mxu0 %v11976_v52  ;;  %v3884_v28 = vsel %vm1988_vm0, %v3879_v61, %v3883_v29  ;;  %v3702_v51 = vld [vmem:[#allocation2 + $0xe0] sm:$0xff]  ;;  %v3707_v52 = vld [vmem:[#allocation2 + $0x108] sm:$0xff]  ;;  %v11978_v58 = vld [vmem:[#allocation3 + $0x3c8] sm:$0xff]  }
 0x28b   : > { %v3897_v32 = vshll.u32 %v13570_v36, 16  ;;  %v11981_v27 = vld [vmem:[#allocation3 + $0x328] sm:$0xff]   ;;  %v4475_v31 = vsel %vm2874_vm1, %v4473_v41, %v16218_v53  ;;  %v4482_v46 = vsel %vm2874_vm1, %v16337_v20, %v16219_v34  ;;  %v16220_v20 = vrot.slane %v13540_v59, 1 }
 0x28c   : > { %16335 = vst [vmem:[#allocation17_spill] sm:$0xff] %v13723_v23  ;;  %v13729_v37 = vadd.f32 %v10271_v18, %v10159_v5  ;;  %4254 = vmatmul.mubr.bf16.gmra.mrb[120].mxu0 %v3860_v26  ;;  %v3700_v18 = vld [vmem:[#allocation2 + $0xd0] sm:$0xff]  ;;  %v3875_v5 = vrot.slane %v3873_v49, 1  ;;  %v3705_v61 = vld [vmem:[#allocation2 + $0xf8] sm:$0xff]  ;;  %v3893_v26 = vshrl.u32 %v13562_v22, 16  ;;  %v11985_v49 = vld [vmem:[#allocation3 + $0x330] sm:$0xff]  }
 0x28d   : > { %4261 = vmatprep.mubr.bf16.mxu0 %v3884_v28  ;;  %10777 = vmatpush3.bf16.msra.mxu0 %v11977_v57  ;;  %v13742_v57 = vpack.c.bf16 %v3702_v51, %v3700_v18  ;;  %v3899_v28 = vrot.slane %v3897_v32, 1  ;;  %v13745_v41 = vpack.c.bf16 %v3707_v52, %v3705_v61  ;;  %v16221_v18 = vrot.slane %v13542_v33, 1  ;;  %v11988_v52 = vld [vmem:[#allocation3 + $0x378] sm:$0xff]  }
 0x28e   : > { %16336 = vst [vmem:[#allocation16_spill] sm:$0xff] %v13729_v37  ;;  %10778 = vmatprep.subr.bf16.mxu0 %v11980_v7  ;;  %v11979_v7 = vld [vmem:[#allocation3 + $0x388] sm:$0xff]   ;;  %v3895_v53 = vor.u32 %v3893_v26, %v3883_v29  ;;  %11850 = vset.pattern.permute.xlu1 %v16324_v17 }
 0x28f   : > { %4700 = vmatmul.mubr.bf16.vlgmr.msra.gmra.mrb[144].mxu1 %v4475_v31  ;;  %v3871_v31 = vor.u32 %v3869_v24, %v3859_v19  ;;  %v3889_v32 = vshll.u32 %v13742_v57, 16  ;;  %1334 = vperm.xlu1 %11850, %v311_v38   ;;  %v3913_v29 = vshll.u32 %v13745_v41, 16  ;;  %v11986_v24 = vld [vmem:[#allocation3 + $0x3d8] sm:$0xff]   ;;  %v16338_v38 = vrot.slane %v13521_v39, 1  ;;  %v3709_v37 = vld [vmem:[#allocation2 + $0x118] sm:$0xff]  ;;  %v11992_v39 = vld [vmem:[#allocation3 + $0x440] sm:$0xff]  }
 0x290   : > { %4707 = vmatprep.mubr.bf16.mxu1 %v4482_v46  ;;  %10881 = vmatpush3.bf16.msra.mxu1 %v11975_v8  ;;  %v3900_v19 = vsel %vm1988_vm0, %v3895_v53, %v3899_v28  ;;  %v3711_v46 = vld [vmem:[#allocation2 + $0x128] sm:$0xff]  ;;  %v3704_v53 = vld [vmem:[#allocation2 + $0xf0] sm:$0xff] }
 0x291   : > { %10882 = vmatprep.subr.bf16.mxu1 %v11978_v58  ;;  %10779 = vmatpush3.bf16.msra.mxu0 %v11981_v27  ;;  %v3876_v51 = vsel %vm1988_vm0, %v3871_v31, %v3875_v5  ;;  %v3706_v58 = vld [vmem:[#allocation2 + $0x100] sm:$0xff]  ;;  %v4480_v31 = vsel %vm2874_vm1, %v16338_v38, %v16220_v20  ;;  %v13772_v20 = vpack.c.bf16 %v3711_v46, %v3709_v37 }
 0x292   : > { %10780 = vmatprep.subr.bf16.mxu0 %v11984_v11  ;;  %v11983_v27 = vld [vmem:[#allocation3 + $0x390] sm:$0xff]  }
 0x293   : > { %1338 = vperm.xlu1 %11850, %v13695_v3   ;;  %v3710_v46 = vld [vmem:[#allocation2 + $0x120] sm:$0xff] }
 0x294   : > { %v10278_v8 = vpop.f32.mrb[52].mxu1  ;;  %4262 = vmatmul.mubr.bf16.gmra.mrb[124].mxu0 %v3876_v51  ;;  %10883 = vmatpush3.bf16.msra.mxu1 %v11979_v7  ;;  %v11989_v51 = vld [vmem:[#allocation3 + $0x338] sm:$0xff]   ;;  %v16339_v7 = vrot.slane %v13525_v35, 1 }
 0x295   : > { %v10279_v11 = vpop.f32.mrb[53].mxu1  ;;  %4269 = vmatprep.mubr.bf16.mxu0 %v3900_v19  ;;  %10884 = vmatprep.subr.bf16.mxu1 %v11982_v63  ;;  %v3891_v19 = vrot.slane %v3889_v32, 1  ;;  %v11987_v35 = vld [vmem:[#allocation3 + $0x398] sm:$0xff]  }
 0x296   : > { %v13754_v61 = vadd.f32 %v10279_v11, %v10278_v8  ;;  %v10281_v26 = vpop.f32.mrb[54].mxu1  ;;  %10781 = vmatpush3.bf16.msra.mxu0 %v11985_v49  ;;  %v4486_v63 = vsel %vm2874_vm1, %v16339_v7, %v16221_v18  ;;  %v3885_v8 = vshrl.u32 %v13568_v43, 16  ;;  %v13767_v11 = vpack.c.bf16 %v3706_v58, %v3704_v53  ;;  %v11990_v18 = vld [vmem:[#allocation3 + $0x3e0] sm:$0xff]   ;;  %v13782_v53 = vld [vmem:[%s12434_s7 + $0x178] sm:$0xff] }
 0x297   : > { %v10282_v34 = vpop.f32.mrb[55].mxu1  ;;  %4708 = vmatmul.mubr.bf16.gmra.mrb[148].mxu1 %v4480_v31  ;;  %10782 = vmatprep.subr.bf16.mxu0 %v11988_v52  ;;  %v3909_v49 = vshrl.u32 %v13570_v36, 16  ;;  %v3915_v31 = vrot.slane %v3913_v29, 1  ;;  %v4489_v52 = vrot.slane %v13562_v22, 1 }
 0x298   : > { %v13769_v38 = vadd.f32 %v10282_v34, %v10281_v26  ;;  %4715 = vmatprep.mubr.bf16.mxu1 %v4486_v63  ;;  %10885 = vmatpush3.bf16.msra.mxu1 %v11983_v27  ;;  %v3887_v7 = vor.u32 %v3885_v8, %v3875_v5  ;;  %v4483_v34 = vrot.slane %v13558_v2, 1  ;;  %v3905_v27 = vshll.u32 %v13767_v11, 16  ;;  %v3715_v63 = vld [vmem:[#allocation2 + $0x148] sm:$0xff]  ;;  %v11994_v8 = vld [vmem:[#allocation3 + $0x3e8] sm:$0xff]  }
 0x299   : > { %v10160_v23 = vpop.f32.mrb[32].mxu0  ;;  %10886 = vmatprep.subr.bf16.mxu1 %v11986_v24  ;;  %v3911_v58 = vor.u32 %v3909_v49, %v3899_v28  ;;  %v3929_v28 = vshll.u32 %v13772_v20, 16  ;;  %v11991_v24 = vld [vmem:[#allocation3 + $0x3a0] sm:$0xff]   ;;  %v16341_v49 = vrot.slane %v13540_v59, 1  ;;  %11851 = vset.pattern.permute.xlu1 %v16326_v40 }
 0x29a   : > { %v10161_v32 = vpop.f32.mrb[33].mxu0  ;;  %10783 = vmatpush3.bf16.msra.mxu0 %v11989_v51  ;;  %v3892_v37 = vsel %vm1988_vm0, %v3887_v7, %v3891_v19  ;;  %v3907_v59 = vrot.slane %v3905_v27, 1  ;;  %559 = vperm.xlu1 %11851, %v13782_v53  }
 0x29b   : > { %v10162_v26 = vadd.f32 %v10161_v32, %v10160_v23  ;;  %v10163_v29 = vpop.f32.mrb[34].mxu0  ;;  %10992 = vmatprep.subr.bf16.mxu0 %v11992_v39  ;;  %v3916_v3 = vsel %vm1988_vm0, %v3911_v58, %v3915_v31  ;;  %v13788_v39 = vld [vmem:[%s12434_s7 + $0x170] sm:$0xff]  ;;  %v4484_v7 = vsel %vm2874_vm1, %v16341_v49, %v4483_v34  ;;  %v3901_v58 = vshrl.u32 %v13742_v57, 16 }
 0x29c   : > { %v10164_v5 = vpop.f32.mrb[35].mxu0  ;;  %4270 = vmatmul.mubr.bf16.gmra.mrb[128].mxu0 %v3892_v37  ;;  %10887 = vmatpush3.bf16.msra.mxu1 %v11987_v35  ;;  %v16342_v35 = vrot.slane %v13542_v33, 1  ;;  %v3708_v32 = vld [vmem:[#allocation2 + $0x110] sm:$0xff]  ;;  %v3925_v33 = vshrl.u32 %v13745_v41, 16  ;;  %v3931_v37 = vrot.slane %v3929_v28, 1 }
 0x29d   : > { %v13785_v23 = vadd.f32 %v13716_v44, %v10162_v26  ;;  %v10165_v51 = vadd.f32 %v10164_v5, %v10163_v29  ;;  %4277 = vmatprep.mubr.bf16.mxu0 %v3916_v3  ;;  %10888 = vmatprep.subr.bf16.mxu1 %v11990_v18  ;;  %v13806_v26 = vpack.c.bf16 %v3710_v46, %v3708_v32  ;;  %v3713_v29 = vld [vmem:[#allocation2 + $0x138] sm:$0xff]  ;;  %v4493_v46 = vrot.slane %v13570_v36, 1 }
 0x29e   : > { %v4490_v44 = vsel %vm2874_vm1, %v16342_v35, %v4489_v52  ;;  %554 = vperm.xlu0 %11849, %v13788_v39   ;;  %v13810_v5 = vpack.c.bf16 %v3715_v63, %v3713_v29  ;;  %v11995_v3 = vld [vmem:[#allocation3 + $0x3a8] sm:$0xff]   ;;  %v3903_v49 = vor.u32 %v3901_v58, %v3891_v19  ;;  %11852 = vset.pattern.permute.xlu1 %v16329_v47  ;;  %v11998_v63 = vld [vmem:[#allocation3 + $0x3f8] sm:$0xff]   ;;  %v3917_v58 = vshrl.u32 %v13767_v11, 16 }
 0x29f   : > { %16340 = vst [vmem:[#allocation15_spill] sm:$0xff] %v13785_v23  ;;  %v13803_v18 = vadd.f32 %v13721_v0, %v10165_v51  ;;  %4716 = vmatmul.mubr.bf16.gmra.mrb[152].mxu1 %v4484_v7  ;;  %v11996_v0 = vld [vmem:[#allocation3 + $0x3f0] sm:$0xff]   ;;  %v3927_v51 = vor.u32 %v3925_v33, %v3915_v31  ;;  %v4487_v7 = vrot.slane %v13568_v43, 1  ;;  %v3921_v35 = vshll.u32 %v13806_v26, 16  ;;  %898 = vperm.xlu1 %11852, %v13788_v39  }
 0x2a0   : > { %4723 = vmatprep.mubr.bf16.mxu1 %v4490_v44  ;;  %10889 = vmatpush3.bf16.msra.mxu1 %v11991_v24  ;;  %v3908_v27 = vsel %vm1988_vm0, %v3903_v49, %v3907_v59  ;;  %v3945_v28 = vshll.u32 %v13810_v5, 16  ;;  %v3714_v31 = vld [vmem:[#allocation2 + $0x140] sm:$0xff]  ;;  %v3719_v24 = vld [vmem:[#allocation2 + $0x168] sm:$0xff]  ;;  %v4494_v32 = vsel %vm2874_vm1, %v4489_v52, %v4493_v46 }
 0x2a1   : > { %16343 = vst [vmem:[#allocation22_spill] sm:$0xff] %v13803_v18  ;;  %10890 = vmatprep.subr.bf16.mxu1 %v11994_v8  ;;  %v3932_v19 = vsel %vm1988_vm0, %v3927_v51, %v3931_v37  ;;  %v11997_v43 = vld [vmem:[#allocation3 + $0x3b0] sm:$0xff]   ;;  %v4488_v36 = vsel %vm2874_vm1, %v4483_v34, %v4487_v7  ;;  %v3712_v8 = vld [vmem:[#allocation2 + $0x130] sm:$0xff]  ;;  %v3923_v29 = vrot.slane %v3921_v35, 1  ;;  %v3941_v34 = vshrl.u32 %v13772_v20, 16  ;;  %v12000_v51 = vld [vmem:[#allocation3 + $0x3b8] sm:$0xff]  }
 0x2a2   : > { %11853 = vset.pattern.permute.xlu0 %v16329_v47  ;;  %v13829_v33 = vpack.c.bf16 %v3714_v31, %v3712_v8  ;;  %v3947_v49 = vrot.slane %v3945_v28, 1  ;;  %v4491_v31 = vrot.slane %v13742_v57, 1  ;;  %v4497_v28 = vrot.slane %v13745_v41, 1  ;;  %v3716_v41 = vld [vmem:[#allocation2 + $0x150] sm:$0xff] }
 0x2a3   : > { %902 = vperm.xlu0 %11853, %v13782_v53   ;;  %11854 = vset.pattern.permute.xlu1 %v16324_v17 }
 0x2a4   : > { %4278 = vmatmul.mubr.bf16.gmra.mrb[132].mxu0 %v3908_v27  ;;  %10891 = vmatpush3.bf16.msra.mxu1 %v11995_v3  ;;  %v3717_v3 = vld [vmem:[#allocation2 + $0x158] sm:$0xff]  ;;  %v3919_v27 = vor.u32 %v3917_v58, %v3907_v59  ;;  %v4492_v58 = vsel %vm2874_vm1, %v4487_v7, %v4491_v31  ;;  %v3957_v7 = vshrl.u32 %v13810_v5, 16  ;;  %v16224_v60 = vrot.slane %v13829_v33, 1 }
 0x2a5   : > { %4285 = vmatprep.mubr.bf16.mxu0 %v3932_v19  ;;  %10892 = vmatprep.subr.bf16.mxu1 %v11996_v0  ;;  %v13833_v0 = vpack.c.bf16 %v3719_v24, %v3717_v3  ;;  %v3943_v19 = vor.u32 %v3941_v34, %v3931_v37 }
 0x2a6   : > { %v3924_v8 = vsel %vm1988_vm0, %v3919_v27, %v3923_v29  ;;  %1342 = vperm.xlu1 %11854, %v13788_v39   ;;  %v4498_v39 = vsel %vm2874_vm1, %v4493_v46, %v4497_v28  ;;  %v3721_v27 = vld [vmem:[#allocation2 + $0x178] sm:$0xff]  ;;  %v3723_v46 = vld [vmem:[#allocation2 + $0x188] sm:$0xff] }
 0x2a7   : > { %v10284_v44 = vpop.f32.mrb[56].mxu1  ;;  %4724 = vmatmul.mubr.bf16.gmra.mrb[156].mxu1 %v4488_v36  ;;  %11855 = vset.pattern.permute.xlu0 %v16326_v40  ;;  %v3948_v59 = vsel %vm1988_vm0, %v3943_v19, %v3947_v49  ;;  %v3961_v37 = vshll.u32 %v13833_v0, 16 }
 0x2a8   : > { %v10285_v2 = vpop.f32.mrb[57].mxu1  ;;  %4731 = vmatprep.mubr.bf16.mxu1 %v4494_v32  ;;  %10893 = vmatpush3.bf16.msra.mxu1 %v11997_v43  ;;  %v3937_v43 = vshll.u32 %v13829_v33, 16 }
 0x2a9   : > { %v13835_v22 = vadd.f32 %v10285_v2, %v10284_v44  ;;  %v10287_v52 = vpop.f32.mrb[58].mxu1  ;;  %10894 = vmatprep.subr.bf16.mxu1 %v11998_v63  ;;  %v3718_v63 = vld [vmem:[#allocation2 + $0x160] sm:$0xff]  ;;  %v3933_v2 = vshrl.u32 %v13806_v26, 16 }
 0x2aa   : > { %v10288_v35 = vpop.f32.mrb[59].mxu1  ;;  %v3939_v34 = vrot.slane %v3937_v43, 1  ;;  %1346 = vperm.xlu1 %11854, %v13782_v53   ;;  %v3959_v43 = vor.u32 %v3957_v7, %v3947_v49  ;;  %v3973_v49 = vshrl.u32 %v13833_v0, 16 }
 0x2ab   : > { %v13839_v36 = vadd.f32 %v10288_v35, %v10287_v52  ;;  %v13850_v52 = vpack.c.bf16 %v3718_v63, %v3716_v41  ;;  %v4495_v63 = vrot.slane %v13767_v11, 1  ;;  %v3725_v41 = vld [vmem:[#allocation2 + $0x198] sm:$0xff] }
 0x2ac   : > { %v10166_v24 = vpop.f32.mrb[36].mxu0  ;;  %4286 = vmatmul.mubr.bf16.gmra.mrb[136].mxu0 %v3924_v8  ;;  %10895 = vmatpush3.bf16.msra.mxu1 %v12000_v51  ;;  %v315_v51 = vld [vmem:[%s12434_s7 + $0x180] sm:$0xff]  ;;  %v3963_v8 = vrot.slane %v3961_v37, 1  ;;  %v3720_v37 = vld [vmem:[#allocation2 + $0x170] sm:$0xff] }
 0x2ad   : > { %v10167_v57 = vpop.f32.mrb[37].mxu0  ;;  %4293 = vmatprep.mubr.bf16.mxu0 %v3948_v59  ;;  %564 = vperm.xlu0 %11855, %v315_v51  }
 0x2ae   : > { %v10168_v44 = vadd.f32 %v10167_v57, %v10166_v24  ;;  %v10169_v32 = vpop.f32.mrb[38].mxu0  ;;  %v3935_v24 = vor.u32 %v3933_v2, %v3923_v29  ;;  %v13862_v57 = vpack.c.bf16 %v3723_v46, %v3721_v27  ;;  %11856 = vset.pattern.permute.xlu1 %v16329_v47  ;;  %v3964_v29 = vsel %vm1988_vm0, %v3959_v43, %v3963_v8  ;;  %v3727_v27 = vld [vmem:[#allocation2 + $0x1a8] sm:$0xff] }
 0x2af   : > { %v10170_v3 = vpop.f32.mrb[39].mxu0  ;;  %4732 = vmatmul.mubr.bf16.gmra.mrb[160].mxu1 %v4492_v58  ;;  %906 = vperm.xlu1 %11856, %v315_v51  }
 0x2b0   : > { %v13855_v35 = vadd.f32 %v13754_v61, %v10168_v44  ;;  %v10171_v19 = vadd.f32 %v10170_v3, %v10169_v32  ;;  %4739 = vmatprep.mubr.bf16.mxu1 %v4498_v39  ;;  %v3940_v53 = vsel %vm1988_vm0, %v3935_v24, %v3939_v34  ;;  %v4501_v61 = vrot.slane %v13772_v20, 1  ;;  %v3722_v39 = vld [vmem:[#allocation2 + $0x180] sm:$0xff] }
 0x2b1   : > { %v3953_v44 = vshll.u32 %v13850_v52, 16  ;;  %v3977_v11 = vshll.u32 %v13862_v57, 16  ;;  %v3949_v20 = vshrl.u32 %v13829_v33, 16  ;;  %v3975_v3 = vor.u32 %v3973_v49, %v3963_v8  ;;  %v12006_v8 = vld [vmem:[#allocation3 + $0xc0] sm:$0xff]  }
 0x2b2   : > { %16344 = vst [vmem:[#allocation23_spill] sm:$0xff] %v13855_v35  ;;  %v13859_v59 = vadd.f32 %v13769_v38, %v10171_v19  ;;  %v4496_v38 = vsel %vm2874_vm1, %v4491_v31, %v4495_v63  ;;  %v4502_v32 = vsel %vm2874_vm1, %v4497_v28, %v4501_v61  ;;  %v13875_v31 = vpack.c.bf16 %v3722_v39, %v3720_v37  ;;  %v3731_v37 = vld [vmem:[#allocation2 + $0x1c8] sm:$0xff] }
 0x2b3   : > { %v3955_v58 = vrot.slane %v3953_v44, 1  ;;  %11857 = vset.pattern.permute.xlu1 %v16324_v17  ;;  %v3951_v2 = vor.u32 %v3949_v20, %v3939_v34  ;;  %v3979_v7 = vrot.slane %v3977_v11, 1  ;;  %v16222_v24 = vrot.slane %v13806_v26, 1  ;;  %v13883_v44 = vld [vmem:[%s12434_s7 + $0x190] sm:$0xff]  ;;  %11104 = vmatprep.subr.bf16.mxu1 %v12006_v8 }
 0x2b4   : > { %16345 = vst [vmem:[#allocation24_spill] sm:$0xff] %v13859_v59  ;;  %4294 = vmatmul.mubr.bf16.gmra.mrb[140].mxu0 %v3940_v53  ;;  %1350 = vperm.xlu1 %11857, %v315_v51   ;;  %v13878_v28 = vpack.c.bf16 %v3727_v27, %v3725_v41  ;;  %v16223_v53 = vrot.slane %v13810_v5, 1  ;;  %v3965_v49 = vshrl.u32 %v13850_v52, 16  ;;  %v3969_v11 = vshll.u32 %v13875_v31, 16 }
 0x2b5   : > { %4301 = vmatprep.mubr.bf16.mxu0 %v3964_v29  ;;  %v3956_v43 = vsel %vm1988_vm0, %v3951_v2, %v3955_v58  ;;  %v3980_v51 = vsel %vm1988_vm0, %v3975_v3, %v3979_v7  ;;  %v4500_v20 = vsel %vm2874_vm1, %v4495_v63, %v16222_v24  ;;  %v3989_v41 = vshrl.u32 %v13862_v57, 16  ;;  %v3724_v3 = vld [vmem:[#allocation2 + $0x190] sm:$0xff]  ;;  %v316_v2 = vld [vmem:[%s12434_s7 + $0x188] sm:$0xff] }
 0x2b6   : > { %v3993_v39 = vshll.u32 %v13878_v28, 16  ;;  %569 = vperm.xlu0 %11855, %v316_v2   ;;  %v3971_v59 = vrot.slane %v3969_v11, 1  ;;  %v3735_v11 = vld [vmem:[#allocation2 + $0x1e8] sm:$0xff] }
 0x2b7   : > { %4740 = vmatmul.mubr.bf16.gmra.mrb[164].mxu1 %v4496_v38  ;;  %v3991_v63 = vor.u32 %v3989_v41, %v3979_v7  ;;  %v4509_v41 = vrot.slane %v13833_v0, 1  ;;  %v3738_v0 = vld [vmem:[#allocation2 + $0x200] sm:$0xff] }
 0x2b8   : > { %4747 = vmatprep.mubr.bf16.mxu1 %v4502_v32  ;;  %11858 = vset.pattern.permute.xlu1 %v16326_v40  ;;  %v3995_v23 = vrot.slane %v3993_v39, 1 }
 0x2b9   : > { %574 = vperm.xlu1 %11858, %v13883_v44  }
 0x2ba   : > { %v10290_v19 = vpop.f32.mrb[60].mxu1  ;;  %11859 = vset.pattern.permute.xlu0 %v16329_v47 }
 0x2bb   : > { %v10291_v46 = vpop.f32.mrb[61].mxu1  ;;  %910 = vperm.xlu0 %11859, %v316_v2  }
 0x2bc   : > { %v13885_v29 = vadd.f32 %v10291_v46, %v10290_v19  ;;  %v10293_v34 = vpop.f32.mrb[62].mxu1  ;;  %4302 = vmatmul.mubr.bf16.gmra.mrb[144].mxu0 %v3956_v43  ;;  %v4506_v19 = vsel %vm2874_vm1, %v4501_v61, %v16223_v53  ;;  %v3967_v46 = vor.u32 %v3965_v49, %v3955_v58  ;;  %v3729_v43 = vld [vmem:[#allocation2 + $0x1b8] sm:$0xff]  ;;  %v3730_v61 = vld [vmem:[#allocation2 + $0x1c0] sm:$0xff] }
 0x2bd   : > { %v10294_v38 = vpop.f32.mrb[63].mxu1  ;;  %4309 = vmatprep.mubr.bf16.mxu0 %v3980_v51  ;;  %v3726_v51 = vld [vmem:[#allocation2 + $0x1a0] sm:$0xff]  ;;  %11860 = vset.pattern.permute.xlu1 %v16329_v47 }
 0x2be   : > { %v13891_v32 = vadd.f32 %v10294_v38, %v10293_v34  ;;  %v13903_v38 = vpack.c.bf16 %v3731_v37, %v3729_v43  ;;  %v13905_v35 = vpack.c.bf16 %v3726_v51, %v3724_v3  ;;  %v3972_v37 = vsel %vm1988_vm0, %v3967_v46, %v3971_v59  ;;  %914 = vperm.xlu1 %11860, %v13883_v44   ;;  %v3733_v51 = vld [vmem:[#allocation2 + $0x1d8] sm:$0xff] }
 0x2bf   : > { %v10172_v27 = vpop.f32.mrb[40].mxu0  ;;  %4748 = vmatmul.mubr.bf16.gmra.mrb[168].mxu1 %v4500_v20  ;;  %v3981_v46 = vshrl.u32 %v13875_v31, 16  ;;  %11862 = vset.pattern.permute.xlu0 %v16324_v17 }
 0x2c0   : > { %v10173_v34 = vpop.f32.mrb[41].mxu0  ;;  %4755 = vmatprep.mubr.bf16.mxu1 %v4506_v19  ;;  %v4009_v19 = vshll.u32 %v13903_v38, 16  ;;  %v3985_v43 = vshll.u32 %v13905_v35, 16  ;;  %1358 = vperm.xlu0 %11862, %v13883_v44  }
 0x2c1   : > { %v10174_v24 = vadd.f32 %v10173_v34, %v10172_v27  ;;  %v10175_v8 = vpop.f32.mrb[42].mxu0  ;;  %v3996_v27 = vsel %vm1988_vm0, %v3991_v63, %v3995_v23 }
 0x2c2   : > { %v10176_v18 = vpop.f32.mrb[43].mxu0  ;;  %v10296_v20 = vpop.f32.mrb[64].mxu1  ;;  %11861 = vset.pattern.permute.xlu1 %v16324_v17 }
 0x2c3   : > { %v13910_v58 = vadd.f32 %v13835_v22, %v10174_v24  ;;  %v10177_v7 = vadd.f32 %v10176_v18, %v10175_v8  ;;  %v10297_v49 = vpop.f32.mrb[65].mxu1  ;;  %v3728_v22 = vld [vmem:[#allocation2 + $0x1b0] sm:$0xff]  ;;  %v3734_v8 = vld [vmem:[#allocation2 + $0x1e0] sm:$0xff]  ;;  %1354 = vperm.xlu1 %11861, %v316_v2  }
 0x2c4   : > { %v10298_v39 = vadd.f32 %v10297_v49, %v10296_v20  ;;  %v10299_v3 = vpop.f32.mrb[66].mxu1  ;;  %4310 = vmatmul.mubr.bf16.gmra.mrb[148].mxu0 %v3972_v37  ;;  %v13923_v34 = vpack.c.bf16 %v3730_v61, %v3728_v22  ;;  %v16346_v20 = vld [vmem:[#allocation18_spill] sm:$0xff]  ;;  %v16348_v37 = vrot.slane %v13806_v26, 1  ;;  %v16349_v61 = vrot.slane %v13810_v5, 1 }
 0x2c5   : > { %v13919_v18 = vadd.f32 %v13839_v36, %v10177_v7  ;;  %v10300_v24 = vpop.f32.mrb[67].mxu1  ;;  %4317 = vmatprep.mubr.bf16.mxu0 %v3996_v27  ;;  %v13933_v7 = vpack.c.bf16 %v3735_v11, %v3733_v51  ;;  %v3739_v27 = vld [vmem:[#allocation2 + $0x208] sm:$0xff]  ;;  %v4005_v11 = vshrl.u32 %v13878_v28, 16  ;;  %v4011_v51 = vrot.slane %v4009_v19, 1 }
 0x2c6   : > { %v13926_v49 = vadd.f32 %v10298_v39, %v16346_v20  ;;  %v10301_v63 = vadd.f32 %v10300_v24, %v10299_v3  ;;  %v4504_v36 = vsel %vm2874_vm1, %v16348_v37, %v16224_v60  ;;  %v4510_v22 = vsel %vm2874_vm1, %v16349_v61, %v4509_v41  ;;  %v3732_v20 = vld [vmem:[#allocation2 + $0x1d0] sm:$0xff]  ;;  %v16350_v3 = vld [vmem:[#allocation19_spill] sm:$0xff] }
 0x2c7   : > { %v10178_v53 = vpop.f32.mrb[44].mxu0  ;;  %4756 = vmatmul.mubr.bf16.gmra.mrb[172].mxu1 %v4504_v36  ;;  %v3983_v39 = vor.u32 %v3981_v46, %v3971_v59  ;;  %v13945_v37 = vpack.c.bf16 %v3734_v8, %v3732_v20  ;;  %v3737_v36 = vld [vmem:[#allocation2 + $0x1f8] sm:$0xff]  ;;  %v4001_v59 = vshll.u32 %v13923_v34, 16  ;;  %v4025_v19 = vshll.u32 %v13933_v7, 16  ;;  %11863 = vset.pattern.permute.xlu1 %v16326_v40 }
 0x2c8   : > { %16347 = vst [vmem:[#allocation18_spill] sm:$0xff] %v13926_v49  ;;  %v13942_v24 = vadd.f32 %v10301_v63, %v16350_v3  ;;  %v10179_v26 = vpop.f32.mrb[45].mxu0  ;;  %4763 = vmatprep.mubr.bf16.mxu1 %v4510_v22  ;;  %v3987_v49 = vrot.slane %v3985_v43, 1  ;;  %v13948_v46 = vpack.c.bf16 %v3739_v27, %v3737_v36  ;;  %v4007_v3 = vor.u32 %v4005_v11, %v3995_v23 }
 0x2c9   : > { %v10180_v60 = vadd.f32 %v10179_v26, %v10178_v53  ;;  %v10181_v5 = vpop.f32.mrb[46].mxu0  ;;  %v16225_v22 = vrot.slane %v13850_v52, 1  ;;  %v3997_v27 = vshrl.u32 %v13905_v35, 16  ;;  %v4021_v11 = vshrl.u32 %v13903_v38, 16 }
 0x2ca   : > { %16351 = vst [vmem:[#allocation19_spill] sm:$0xff] %v13942_v24  ;;  %v10182_v63 = vpop.f32.mrb[47].mxu0  ;;  %v10302_v61 = vpop.f32.mrb[68].mxu1  ;;  %v3988_v8 = vsel %vm1988_vm0, %v3983_v39, %v3987_v49  ;;  %v4012_v23 = vsel %vm1988_vm0, %v4007_v3, %v4011_v51  ;;  %v4017_v36 = vshll.u32 %v13945_v37, 16  ;;  %v4003_v39 = vrot.slane %v4001_v59, 1 }
 0x2cb   : > { %v13955_v2 = vadd.f32 %v13885_v29, %v10180_v60  ;;  %v10183_v53 = vadd.f32 %v10182_v63, %v10181_v5  ;;  %v10303_v43 = vpop.f32.mrb[69].mxu1  ;;  %v4513_v29 = vrot.slane %v13862_v57, 1  ;;  %v4041_v5 = vshll.u32 %v13948_v46, 16  ;;  %v520_v63 = vpop.permute.xlu1 %519 }
 0x2cc   : > { %v10304_v20 = vadd.f32 %v10303_v43, %v10302_v61  ;;  %v10305_v26 = vpop.f32.mrb[70].mxu1  ;;  %4318 = vmatmul.mubr.bf16.gmra.mrb[152].mxu0 %v3988_v8  ;;  %v16355_v43 = vrot.slane %v13829_v33, 1  ;;  %v3999_v59 = vor.u32 %v3997_v27, %v3987_v49  ;;  %v525_v17 = vpop.permute.xlu0 %524 }
 0x2cd   : > { %16352 = vst [vmem:[#allocation25_spill] sm:$0xff] %v13955_v2  ;;  %v13964_v60 = vadd.f32 %v13891_v32, %v10183_v53  ;;  %v10306_v44 = vpop.f32.mrb[71].mxu1  ;;  %4325 = vmatprep.mubr.bf16.mxu0 %v4012_v23  ;;  %v4027_v32 = vrot.slane %v4025_v19, 1  ;;  %v4514_v57 = vsel %vm2874_vm1, %v4509_v41, %v4513_v29  ;;  %v4037_v19 = vshrl.u32 %v13933_v7, 16 }
 0x2ce   : > { %v13969_v61 = vadd.f32 %v10304_v20, %v13476_v1  ;;  %v10307_v3 = vadd.f32 %v10306_v44, %v10305_v26  ;;  %v4508_v8 = vsel %vm2874_vm1, %v16355_v43, %v16225_v22  ;;  %v4023_v20 = vor.u32 %v4021_v11, %v4011_v51  ;;  %v3736_v22 = vld [vmem:[#allocation2 + $0x1f0] sm:$0xff] }
 0x2cf   : > { %16353 = vst [vmem:[#allocation26_spill] sm:$0xff] %v13964_v60  ;;  %v10336_v53 = vpop.f32.mrb[48].mxu0  ;;  %4764 = vmatmul.mubr.bf16.gmra.mrb[176].mxu1 %v4508_v8  ;;  %v4013_v26 = vshrl.u32 %v13923_v34, 16  ;;  %v13983_v44 = vrot.slane %v4017_v36, 1  ;;  %v13986_v8 = vrot.slane %v4041_v5, 1  ;;  %v1315_v41 = vpop.permute.xlu1 %1314  ;;  %v16227_v51 = vrot.slane %v13878_v28, 1 }
 0x2d0   : > { %16354 = vst [vmem:[#allocation27_spill] sm:$0xff] %v13969_v61  ;;  %v13980_v23 = vadd.f32 %v10307_v3, %v13479_v12  ;;  %v10337_v1 = vpop.f32.mrb[49].mxu0  ;;  %4771 = vmatprep.mubr.bf16.mxu1 %v4514_v57  ;;  %v4004_v12 = vsel %vm1988_vm0, %v3999_v59, %v4003_v39  ;;  %v4028_v3 = vsel %vm1988_vm0, %v4023_v20, %v4027_v32  ;;  %v4511_v5 = vrot.slane %v13875_v31, 1 }
 0x2d1   : > { %v10338_v33 = vadd.f32 %v10337_v1, %v10336_v53  ;;  %v10339_v43 = vpop.f32.mrb[50].mxu0  ;;  %v4015_v11 = vor.u32 %v4013_v26, %v4003_v39  ;;  %v4039_v1 = vor.u32 %v4037_v19, %v4027_v32  ;;  %v13999_v39 = vpack.c.bf16 %v3738_v0, %v3736_v22  ;;  %v3743_v26 = vld [vmem:[#allocation2 + $0x228] sm:$0xff] }
 0x2d2   : > { %16356 = vst [vmem:[#allocation28_spill] sm:$0xff] %v13980_v23  ;;  %v10308_v49 = vpop.f32.mrb[72].mxu1  ;;  %v10340_v27 = vpop.f32.mrb[51].mxu0  ;;  %v318_v23 = vld [vmem:[%s12434_s7 + $0x198] sm:$0xff]  ;;  %v16357_v32 = vrot.slane %v13850_v52, 1  ;;  %v4518_v52 = vsel %vm2874_vm1, %v4513_v29, %v16227_v51 }
 0x2d3   : > { %v13992_v36 = vadd.f32 %v10338_v33, %v13591_v56  ;;  %v10341_v53 = vadd.f32 %v10340_v27, %v10339_v43  ;;  %v10309_v57 = vpop.f32.mrb[73].mxu1  ;;  %v4020_v59 = vsel %vm1988_vm0, %v4015_v11, %v13983_v44  ;;  %v3741_v56 = vld [vmem:[#allocation2 + $0x218] sm:$0xff]  ;;  %579 = vperm.xlu1 %11863, %v318_v23   ;;  %v4044_v19 = vsel %vm1988_vm0, %v4039_v1, %v13986_v8  ;;  %v14010_v27 = vpop.permute.xlu1 %529 }
 0x2d4   : > { %v10310_v61 = vadd.f32 %v10309_v57, %v10308_v49  ;;  %v10311_v24 = vpop.f32.mrb[74].mxu1  ;;  %4326 = vmatmul.mubr.bf16.gmra.mrb[156].mxu0 %v4004_v12  ;;  %v4512_v43 = vsel %vm2874_vm1, %v16357_v32, %v4511_v5  ;;  %1362 = vperm.xlu0 %11862, %v318_v23   ;;  %v682_v12 = vmul.f32 %v12598_v14, %v520_v63  ;;  %v871_v1 = vpop.permute.xlu0 %870 }
 0x2d5   : > { %v14002_v33 = vadd.f32 %v10341_v53, %v13595_v4  ;;  %v10312_v31 = vpop.f32.mrb[75].mxu1  ;;  %4333 = vmatprep.mubr.bf16.mxu0 %v4028_v3  ;;  %v681_v4 = vmul.f32 %v12596_v13, %v520_v63  ;;  %v14020_v11 = vpack.c.bf16 %v3743_v26, %v3741_v56  ;;  %v1462_v53 = vmul.f32 %v12600_v15, %v1315_v41 }
 0x2d6   : > { %v14013_v22 = vadd.f32 %v10310_v61, %v13537_v48  ;;  %v10313_v0 = vadd.f32 %v10312_v31, %v10311_v24  ;;  %v1463_v57 = vmul.f32 %v12602_v16, %v1315_v41  ;;  %v4029_v63 = vshrl.u32 %v13945_v37, 16  ;;  %v3740_v61 = vld [vmem:[#allocation2 + $0x210] sm:$0xff]  ;;  %v3742_v31 = vld [vmem:[#allocation2 + $0x220] sm:$0xff] }
 0x2d7   : > { %v10342_v3 = vpop.f32.mrb[52].mxu0  ;;  %4772 = vmatmul.mubr.bf16.gmra.mrb[180].mxu1 %v4512_v43  ;;  %v1018_v32 = vmul.f32 %v12591_v9, %v871_v1  ;;  %v1019_v29 = vmul.f32 %v12593_v10, %v871_v1  ;;  %11864 = vset.pattern.permute.xlu1 %v16329_v47  ;;  %v4033_v41 = vshll.u32 %v13999_v39, 16  ;;  %v683_v43 = vmul.f32 %v12596_v13, %v525_v17 }
 0x2d8   : > { %16358 = vst [vmem:[#allocation29_spill] sm:$0xff] %v14013_v22  ;;  %v14025_v48 = vadd.f32 %v10313_v0, %v13546_v6  ;;  %v10343_v24 = vpop.f32.mrb[53].mxu0  ;;  %4779 = vmatprep.mubr.bf16.mxu1 %v4518_v52  ;;  %v684_v6 = vmul.f32 %v12598_v14, %v525_v17  ;;  %918 = vperm.xlu1 %11864, %v318_v23   ;;  %v875_v0 = vpop.permute.xlu1 %874  ;;  %v16360_v22 = vrot.slane %v13905_v35, 1 }
 0x2d9   : > { %v10344_v56 = vadd.f32 %v10343_v24, %v10342_v3  ;;  %v10345_v26 = vpop.f32.mrb[54].mxu0  ;;  %11866 = vset.pattern.permute.xlu0 %v16326_v40  ;;  %v1126_v49 = vadd.f32 %v1018_v32, %v681_v4  ;;  %v1127_v20 = vadd.f32 %v1019_v29, %v682_v12  ;;  %v1020_v1 = vmul.f32 %v12591_v9, %v875_v0 }
 0x2da   : > { %16359 = vst [vmem:[#allocation30_spill] sm:$0xff] %v14025_v48  ;;  %v10314_v52 = vpop.f32.mrb[76].mxu1  ;;  %v10346_v51 = vpop.f32.mrb[55].mxu0  ;;  %v1021_v48 = vmul.f32 %v12593_v10, %v875_v0  ;;  %v4516_v17 = vsel %vm2874_vm1, %v4511_v5, %v16360_v22  ;;  %v14043_v23 = vpack.c.bf16 %v3742_v31, %v3740_v61  ;;  %v4057_v4 = vshll.u32 %v14020_v11, 16 }
 0x2db   : > { %v14038_v3 = vadd.f32 %v10344_v56, %v13610_v62  ;;  %v10347_v24 = vadd.f32 %v10346_v51, %v10345_v26  ;;  %v10315_v47 = vpop.f32.mrb[77].mxu1  ;;  %v1570_v12 = vadd.f32 %v1462_v53, %v1126_v49  ;;  %v1571_v32 = vadd.f32 %v1463_v57, %v1127_v20  ;;  %v3745_v56 = vld [vmem:[#allocation2 + $0x238] sm:$0x1] }
 0x2dc   : > { %v10316_v60 = vadd.f32 %v10315_v47, %v10314_v52  ;;  %v10317_v2 = vpop.f32.mrb[78].mxu1  ;;  %4334 = vmatmul.mubr.bf16.gmra.mrb[160].mxu0 %v4020_v59  ;;  %v14049_v51 = vrot.slane %v4033_v41, 1  ;;  %v1128_v26 = vadd.f32 %v1020_v1, %v683_v43  ;;  %v1129_v0 = vadd.f32 %v1021_v48, %v684_v6  ;;  %v1319_v5 = vpop.permute.xlu1 %1318  ;;  %11865 = vset.pattern.permute.xlu1 %v16326_v40 }
 0x2dd   : > { %v14047_v29 = vadd.f32 %v10347_v24, %v13619_v21  ;;  %v10318_v62 = vpop.f32.mrb[79].mxu1  ;;  %4341 = vmatprep.mubr.bf16.mxu0 %v4044_v19  ;;  %v1678_v22 = vmax.f32 %v1570_v12, 0.0  ;;  %v1679_v49 = vmax.f32 %v1571_v32, 0.0  ;;  %v16361_v21 = vrot.slane %v13903_v38, 1 }
 0x2de   : > { %v14053_v47 = vadd.f32 %v10316_v60, %v13582_v54  ;;  %v10319_v59 = vadd.f32 %v10318_v62, %v10317_v2  ;;  %v16362_v19 = vrot.slane %v13878_v28, 1  ;;  %v4031_v57 = vor.u32 %v4029_v63, %v13983_v44 }
 0x2df   : > { %v10348_v20 = vpop.f32.mrb[56].mxu0  ;;  %4780 = vmatmul.mubr.bf16.gmra.mrb[184].mxu1 %v4516_v17  ;;  %v1464_v48 = vmul.f32 %v12600_v15, %v1319_v5  ;;  %v1465_v40 = vmul.f32 %v12602_v16, %v1319_v5  ;;  %v4053_v60 = vshrl.u32 %v13948_v46, 16  ;;  %v4059_v61 = vrot.slane %v4057_v4, 1  ;;  %1786 = vst [vmem:[#allocation2 + $0x270] sm:$0xff] %v1678_v22  ;;  %1787 = vst [vmem:[#allocation2 + $0x278] sm:$0xff] %v1679_v49 }
 0x2e0   : > { %v4522_v53 = vsel %vm2874_vm1, %v16362_v19, %v16361_v21  ;;  %v14064_v54 = vadd.f32 %v10319_v59, %v13584_v30  ;;  %v10349_v2 = vpop.f32.mrb[57].mxu0  ;;  %v3779_v31 = vpack.c.bf16 %v3745_v56, %v3745_v56  ;;  %v4519_v43 = vrot.slane %v13923_v34, 1 }
 0x2e1   : > { %4787 = vmatprep.mubr.bf16.mxu1 %v4522_v53  ;;  %v10350_v28 = vadd.f32 %v10349_v2, %v10348_v20  ;;  %v10351_v41 = vpop.f32.mrb[58].mxu0  ;;  %v1572_v44 = vadd.f32 %v1464_v48, %v1128_v26  ;;  %v1573_v63 = vadd.f32 %v1465_v40, %v1129_v0  ;;  %v4036_v30 = vsel %vm1988_vm0, %v4031_v57, %v14049_v51 }
 0x2e2   : > { %v10352_v6 = vpop.f32.mrb[59].mxu0  ;;  %v10448_v52 = vpop.f32.mrb[80].mxu1  ;;  %v4055_v1 = vor.u32 %v4053_v60, %v13986_v8  ;;  %v4525_v24 = vrot.slane %v13933_v7, 1  ;;  %v4049_v17 = vshll.u32 %v14043_v23, 16  ;;  %v4069_v59 = vshrl.u32 %v14020_v11, 16 }
 0x2e3   : > { %v14074_v4 = vadd.f32 %v10350_v28, %v13628_v50  ;;  %v10353_v12 = vadd.f32 %v10352_v6, %v10351_v41  ;;  %v10449_v32 = vpop.f32.mrb[81].mxu1  ;;  %v1680_v62 = vmax.f32 %v1572_v44, 0.0  ;;  %v1681_v56 = vmax.f32 %v1573_v63, 0.0  ;;  %v3744_v8 = vld [vmem:[#allocation2 + $0x230] sm:$0x1] }
 0x2e4   : > { %v10450_v26 = vadd.f32 %v10449_v32, %v10448_v52  ;;  %v10451_v0 = vpop.f32.mrb[82].mxu1  ;;  %4342 = vmatmul.mubr.bf16.gmra.mrb[164].mxu0 %v4036_v30  ;;  %v4060_v5 = vsel %vm1988_vm0, %v4055_v1, %v4059_v61  ;;  %v4073_v22 = vshll.u32 %v3779_v31, 16  ;;  %v16363_v50 = vrot.slane %v13905_v35, 1 }
 0x2e5   : > { %v14079_v7 = vadd.f32 %v10353_v12, %v13632_v25  ;;  %v10452_v49 = vpop.f32.mrb[83].mxu1  ;;  %4349 = vmatprep.mubr.bf16.mxu0 %v4060_v5  ;;  %1788 = vst [vmem:[#allocation2 + $0x280] sm:$0xff] %v1680_v62  ;;  %1789 = vst [vmem:[#allocation2 + $0x288] sm:$0xff] %v1681_v56  ;;  %v4045_v53 = vshrl.u32 %v13999_v39, 16  ;;  %v4051_v57 = vrot.slane %v4049_v17, 1  ;;  %v16364_v25 = vrot.slane %v13903_v38, 1 }
 0x2e6   : > { %v4520_v20 = vsel %vm2874_vm1, %v16363_v50, %v4519_v43  ;;  %v14087_v21 = vadd.f32 %v10450_v26, %v13992_v36  ;;  %v10453_v19 = vadd.f32 %v10452_v49, %v10451_v0  ;;  %v3778_v2 = vpack.c.bf16 %v3744_v8, %v3744_v8  ;;  %v5279_v49 = vld [vmem:[#allocation2 + $0x68] sm:$0xfe]  ;;  %v1323_v50 = vpop.permute.xlu1 %1322 }
 0x2e7   : > { %v10354_v48 = vpop.f32.mrb[60].mxu0  ;;  %4788 = vmatmul.mubr.bf16.gmra.mrb[188].mxu1 %v4520_v20  ;;  %v4526_v40 = vsel %vm2874_vm1, %v16364_v25, %v4525_v24  ;;  %v4047_v31 = vor.u32 %v4045_v53, %v14049_v51  ;;  %v4071_v36 = vor.u32 %v4069_v59, %v4059_v61  ;;  %v4075_v28 = vrot.slane %v4073_v22, 1 }
 0x2e8   : > { %v14094_v35 = vadd.f32 %v10453_v19, %v14002_v33  ;;  %v10355_v60 = vpop.f32.mrb[61].mxu0  ;;  %4795 = vmatprep.mubr.bf16.mxu1 %v4526_v40  ;;  %v4523_v38 = vrot.slane %v13945_v37, 1  ;;  %v4529_v30 = vrot.slane %v13948_v46, 1  ;;  %v4061_v12 = vshrl.u32 %v14043_v23, 16  ;;  %v4863_v37 = vld [vmem:[#allocation2 + $0x78] sm:$0xff]  ;;  %v14120_v19 = vld [vmem:[#allocation2 + $0x70] sm:$0xff] }
 0x2e9   : > { %v10356_v41 = vadd.f32 %v10355_v60, %v10354_v48  ;;  %v10357_v44 = vpop.f32.mrb[62].mxu0  ;;  %v4052_v52 = vsel %vm1988_vm0, %v4047_v31, %v4051_v57  ;;  %v4065_v51 = vshll.u32 %v3778_v2, 16  ;;  %v4076_v62 = vsel %vm1988_vm0, %v4071_v36, %v4075_v28  ;;  %v4861_v48 = vld [vmem:[#allocation2 + $0x68] sm:$0xff] }
 0x2ea   : > { %v10358_v63 = vpop.f32.mrb[63].mxu0  ;;  %v10454_v6 = vpop.f32.mrb[84].mxu1  ;;  %v4524_v5 = vsel %vm2874_vm1, %v4519_v43, %v4523_v38  ;;  %v4530_v22 = vsel %vm2874_vm1, %v4525_v24, %v4529_v30  ;;  %v4063_v8 = vor.u32 %v4061_v12, %v4051_v57  ;;  %v14122_v34 = vpack.c.bf16 %v4863_v37, %v5279_v49  ;;  %v4865_v40 = vld [vmem:[#allocation2 + $0x88] sm:$0xff]  ;;  %v4867_v24 = vld [vmem:[#allocation2 + $0x98] sm:$0xff] }
 0x2eb   : > { %v14101_v1 = vadd.f32 %v10356_v41, %v13639_v42  ;;  %v10359_v33 = vadd.f32 %v10358_v63, %v10357_v44  ;;  %v10455_v17 = vpop.f32.mrb[85].mxu1  ;;  %v4527_v25 = vrot.slane %v13999_v39, 1  ;;  %v4925_v60 = vpack.c.bf16 %v4863_v37, %v4861_v48  ;;  %v879_v49 = vpop.permute.xlu0 %878 }
 0x2ec   : > { %v10456_v61 = vadd.f32 %v10455_v17, %v10454_v6  ;;  %v10457_v32 = vpop.f32.mrb[86].mxu1  ;;  %4350 = vmatmul.mubr.bf16.gmra.mrb[168].mxu0 %v4052_v52  ;;  %v4533_v31 = vrot.slane %v14020_v11, 1  ;;  %v4401_v6 = vld [vmem:[#allocation2 + $0x238] sm:$0x3]  ;;  %v5278_v52 = vld [vmem:[#allocation2 + $0x60] sm:$0xfe]  ;;  %v14134_v12 = vpack.c.bf16 %v4867_v24, %v4865_v40  ;;  %v685_v37 = vmul.f32 %v12596_v13, %v14010_v27 }
 0x2ed   : > { %v14106_v56 = vadd.f32 %v10359_v33, %v13645_v45  ;;  %v10458_v26 = vpop.f32.mrb[87].mxu1  ;;  %4357 = vmatprep.mubr.bf16.mxu0 %v4076_v62  ;;  %v4067_v45 = vrot.slane %v4065_v51, 1  ;;  %v5426_v51 = vshll.u32 %v14122_v34, 16  ;;  %v5424_v46 = vshrl.u32 %v14122_v34, 16 }
 0x2ee   : > { %v14109_v0 = vadd.f32 %v10456_v61, %v14038_v3  ;;  %v10459_v42 = vadd.f32 %v10458_v26, %v10457_v32  ;;  %16365 = vst [vmem:[#allocation31_spill] sm:$0xff] %v14134_v12  ;;  %v14138_v61 = vpack.c.bf16 %v14120_v19, %v5278_v52  ;;  %v4528_v26 = vsel %vm2874_vm1, %v4523_v38, %v4527_v25 }
 0x2ef   : > { %v10360_v59 = vpop.f32.mrb[64].mxu0  ;;  %4796 = vmatmul.mubr.bf16.gmra.mrb[192].mxu1 %v4524_v5  ;;  %v4068_v44 = vsel %vm1988_vm0, %v4063_v8, %v4067_v45  ;;  %v540_v5 = vpop.permute.xlu1 %539  ;;  %v4534_v8 = vsel %vm2874_vm1, %v4529_v30, %v4533_v31  ;;  %v4405_v45 = vpack.c.bf16 %v4401_v6, %v4401_v6  ;;  %v5428_v30 = vrot.slane %v5426_v51, 1 }
 0x2f0   : > { %v14118_v20 = vadd.f32 %v10459_v42, %v14047_v29  ;;  %v10361_v3 = vpop.f32.mrb[65].mxu0  ;;  %4803 = vmatprep.mubr.bf16.mxu1 %v4530_v22  ;;  %v14126_v29 = vld [vmem:[#allocation2 + $0x60] sm:$0xff]  ;;  %v686_v42 = vmul.f32 %v12598_v14, %v14010_v27  ;;  %v1467_v27 = vmul.f32 %v12602_v16, %v1323_v50  ;;  %v5414_v40 = vshll.u32 %v14138_v61, 16 }
 0x2f1   : > { %v10362_v43 = vadd.f32 %v10361_v3, %v10360_v59  ;;  %v10363_v53 = vpop.f32.mrb[66].mxu0  ;;  %v4924_v63 = vpack.c.bf16 %v14120_v19, %v14126_v29  ;;  %v4400_v3 = vld [vmem:[#allocation2 + $0x230] sm:$0x3]  ;;  %v1466_v19 = vmul.f32 %v12600_v15, %v1323_v50  ;;  %v5431_v50 = vshll.u32 %v14134_v12, 16 }
 0x2f2   : > { %v10364_v57 = vpop.f32.mrb[67].mxu0  ;;  %v10460_v2 = vpop.f32.mrb[88].mxu1  ;;  %v4531_v6 = vrot.slane %v14043_v23, 1  ;;  %v4537_v52 = vrot.slane %v4405_v45, 1  ;;  %v4404_v34 = vpack.c.bf16 %v4400_v3, %v4400_v3  ;;  %v689_v51 = vmul.f32 %v12596_v13, %v540_v5 }
 0x2f3   : > { %v14129_v36 = vadd.f32 %v10362_v43, %v13654_v55  ;;  %v10365_v28 = vadd.f32 %v10364_v57, %v10363_v53  ;;  %v10461_v41 = vpop.f32.mrb[89].mxu1  ;;  %v16366_v55 = vld [vmem:[#allocation12_spill] sm:$0xff]  ;;  %v1022_v43 = vmul.f32 %v12591_v9, %v879_v49 }
 0x2f4   : > { %v10462_v33 = vadd.f32 %v10461_v41, %v10460_v2  ;;  %v10463_v17 = vpop.f32.mrb[90].mxu1  ;;  %4358 = vmatmul.mubr.bf16.gmra.mrb[172].mxu0 %v4068_v44  ;;  %v11993_v2 = vld [vmem:[#allocation3 + $0x400] sm:$0xff]   ;;  %v14168_v41 = vpop.permute.xlu1 %882 }
 0x2f5   : > { %v14141_v32 = vadd.f32 %v10365_v28, %v16366_v55  ;;  %v10464_v62 = vpop.f32.mrb[91].mxu1  ;;  %5117 = vmatprep.mubr.bf16.mxu0 %v4925_v60  ;;  %v4866_v60 = vld [vmem:[#allocation2 + $0x90] sm:$0xff]  ;;  %v1130_v29 = vadd.f32 %v1022_v43, %v685_v37  ;;  %v16367_v55 = vld [vmem:[#allocation14_spill] sm:$0xff]  ;;  %v690_v43 = vmul.f32 %v12598_v14, %v540_v5 }
 0x2f6   : > { %v14151_v59 = vadd.f32 %v10462_v33, %v14074_v4  ;;  %v10465_v22 = vadd.f32 %v10464_v62, %v10463_v17  ;;  %v1023_v4 = vmul.f32 %v12593_v10, %v879_v49  ;;  %v4864_v33 = vld [vmem:[#allocation2 + $0x80] sm:$0xff]  ;;  %v11999_v17 = vld [vmem:[#allocation3 + $0x448] sm:$0xff]  }
 0x2f7   : > { %v10366_v38 = vpop.f32.mrb[68].mxu0  ;;  %4804 = vmatmul.mubr.bf16.gmra.mrb[196].mxu1 %v4528_v26 }
 0x2f8   : > { %v14163_v53 = vadd.f32 %v10465_v22, %v14079_v7  ;;  %v10367_v48 = vpop.f32.mrb[69].mxu0  ;;  %4811 = vmatprep.mubr.bf16.mxu1 %v4534_v8  ;;  %v1131_v28 = vadd.f32 %v1023_v4, %v686_v42  ;;  %v1574_v8 = vadd.f32 %v1466_v19, %v1130_v29  ;;  %v887_v42 = vpop.permute.xlu0 %886  ;;  %v16368_v4 = vld [vmem:[#allocation13_spill] sm:$0xff]  ;;  %v12001_v19 = vld [vmem:[#allocation3 + $0x408] sm:$0xff]  }
 0x2f9   : > { %v10368_v24 = vadd.f32 %v10367_v48, %v10366_v38  ;;  %v10369_v57 = vpop.f32.mrb[70].mxu0  ;;  %v1026_v45 = vmul.f32 %v12591_v9, %v887_v42  ;;  %v1027_v3 = vmul.f32 %v12593_v10, %v887_v42 }
 0x2fa   : > { %v10370_v44 = vpop.f32.mrb[71].mxu0  ;;  %v10466_v7 = vpop.f32.mrb[92].mxu1  ;;  %v1575_v37 = vadd.f32 %v1467_v27, %v1131_v28  ;;  %v1682_v27 = vmax.f32 %v1574_v8, 0.0  ;;  %v5429_v8 = vor.u32 %v5428_v30, %v5424_v46 }
 0x2fb   : > { %v14173_v62 = vadd.f32 %v10368_v24, %v16367_v55  ;;  %v10371_v26 = vadd.f32 %v10370_v44, %v10369_v57  ;;  %v10467_v22 = vpop.f32.mrb[93].mxu1  ;;  %v14182_v57 = vpack.c.bf16 %v4866_v60, %v4864_v33  ;;  %v14184_v28 = vpop.permute.xlu1 %1326  ;;  %v4869_v44 = vld [vmem:[#allocation2 + $0xa8] sm:$0xff]  ;;  %v12002_v60 = vld [vmem:[#allocation3 + $0x450] sm:$0xff]   ;;  %v4538_v55 = vsel %vm2874_vm1, %v4533_v31, %v4537_v52  ;;  %v4870_v52 = vld [vmem:[#allocation2 + $0xb0] sm:$0xff] }
 0x2fc   : > { %v10468_v49 = vadd.f32 %v10467_v22, %v10466_v7  ;;  %v10469_v38 = vpop.f32.mrb[94].mxu1  ;;  %5118 = vmatmul.mubr.bf16.vlgmr.msra.gmra.mrb[176].mxu0 %v4924_v63  ;;  %v1683_v29 = vmax.f32 %v1575_v37, 0.0  ;;  %v14194_v7 = vrot.slane %v5431_v50, 1  ;;  %v5412_v22 = vshrl.u32 %v14138_v61, 16  ;;  %1790 = vst [vmem:[#allocation2 + $0x290] sm:$0xff] %v1682_v27  ;;  %v14200_v39 = vpop.permute.xlu0 %894 }
 0x2fd   : > { %v14179_v48 = vadd.f32 %v10371_v26, %v16368_v4  ;;  %10993 = vmatpush3.bf16.msra.mxu0 %v11993_v2  ;;  %v10470_v24 = vpop.f32.mrb[95].mxu1  ;;  %5125 = vmatprep.mubr.bf16.mxu0 %v14134_v12  ;;  %16369 = vst [vmem:[#allocation12_spill] sm:$0xff] %v14182_v57  ;;  %v4532_v2 = vsel %vm2874_vm1, %v4527_v25, %v4531_v6  ;;  %v4868_v26 = vld [vmem:[#allocation2 + $0xa0] sm:$0xff] }
 0x2fe   : > { %v14187_v63 = vadd.f32 %v10468_v49, %v14101_v1  ;;  %v10471_v5 = vadd.f32 %v10470_v24, %v10469_v38  ;;  %10994 = vmatprep.subr.bf16.mxu0 %v11999_v17  ;;  %v4535_v1 = vrot.slane %v4404_v34, 1  ;;  %1791 = vst [vmem:[#allocation2 + $0x298] sm:$0xff] %v1683_v29  ;;  %v4871_v17 = vld [vmem:[#allocation2 + $0xb8] sm:$0xff]  ;;  %v1134_v37 = vadd.f32 %v1026_v45, %v689_v51  ;;  %v12003_v4 = vld [vmem:[#allocation3 + $0x410] sm:$0xff]   ;;  %v12004_v51 = vld [vmem:[#allocation3 + $0x458] sm:$0xff]  }
 0x2ff   : > { %v10372_v33 = vpop.f32.mrb[72].mxu0  ;;  %4812 = vmatmul.mubr.bf16.gmra.mrb[200].mxu1 %v4532_v2  ;;  %v1135_v42 = vadd.f32 %v1027_v3, %v690_v43  ;;  %v14205_v31 = vpack.c.bf16 %v4871_v17, %v4869_v44  ;;  %v5416_v34 = vrot.slane %v5414_v40, 1  ;;  %v5419_v38 = vshll.u32 %v14182_v57, 16  ;;  %v16372_v3 = vld [vmem:[#allocation11_spill] sm:$0xff]  ;;  %v16373_v17 = vld [vmem:[#allocation20_spill] sm:$0xff] }
 0x300   : > { %v14203_v25 = vadd.f32 %v10471_v5, %v14106_v56  ;;  %v10373_v50 = vpop.f32.mrb[73].mxu0  ;;  %4819 = vmatprep.mubr.bf16.mxu1 %v4538_v55  ;;  %v1331_v56 = vpop.permute.xlu1 %1330  ;;  %v5434_v46 = vsel %vm1988_vm0, %v5429_v8, %v14194_v7  ;;  %v14212_v30 = vpack.c.bf16 %v4870_v52, %v4868_v26  ;;  %v4536_v5 = vsel %vm2874_vm1, %v4531_v6, %v4535_v1  ;;  %v12005_v1 = vld [vmem:[#allocation3 + $0x418] sm:$0xff]   ;;  %v12008_v52 = vld [vmem:[#allocation3 + $0x460] sm:$0xff]  }
 0x301   : > { %v10374_v11 = vadd.f32 %v10373_v50, %v10372_v33  ;;  %v10375_v49 = vpop.f32.mrb[74].mxu0  ;;  %16371 = vst [vmem:[#allocation13_spill] sm:$0xff] %v14205_v31  ;;  %10995 = vmatpush3.bf16.msra.mxu0 %v12001_v19  ;;  %v1470_v43 = vmul.f32 %v12600_v15, %v1331_v56  ;;  %v1471_v45 = vmul.f32 %v12602_v16, %v1331_v56  ;;  %v535_v44 = vpop.permute.xlu0 %534  ;;  %v5421_v6 = vrot.slane %v5419_v38, 1 }
 0x302   : > { %16370 = vst [vmem:[#allocation14_spill] sm:$0xff] %v14203_v25  ;;  %v10376_v24 = vpop.f32.mrb[75].mxu0  ;;  %v10472_v27 = vpop.f32.mrb[96].mxu1  ;;  %10996 = vmatprep.subr.bf16.mxu0 %v12002_v60  ;;  %v1024_v2 = vmul.f32 %v12591_v9, %v14168_v41  ;;  %v1025_v55 = vmul.f32 %v12593_v10, %v14168_v41 }
 0x303   : > { %v14217_v19 = vadd.f32 %v10374_v11, %v16372_v3  ;;  %v10377_v40 = vadd.f32 %v10376_v24, %v10375_v49  ;;  %v10473_v29 = vpop.f32.mrb[97].mxu1  ;;  %v14227_v26 = vadd.f32 %v1470_v43, %v1134_v37  ;;  %v14229_v50 = vadd.f32 %v1471_v45, %v1135_v42  ;;  %v4873_v42 = vld [vmem:[#allocation2 + $0xc8] sm:$0xff] }
 0x304   : > { %v10474_v33 = vadd.f32 %v10473_v29, %v10472_v27  ;;  %v10475_v60 = vpop.f32.mrb[98].mxu1  ;;  %5126 = vmatmul.mubr.bf16.gmra.mrb[180].mxu0 %v14182_v57  ;;  %v1468_v11 = vmul.f32 %v12600_v15, %v14184_v28  ;;  %v687_v49 = vmul.f32 %v12596_v13, %v535_v44  ;;  %v14243_v27 = vpop.permute.xlu1 %549  ;;  %v1469_v43 = vmul.f32 %v12602_v16, %v14184_v28 }
 0x305   : > { %v14232_v8 = vadd.f32 %v10377_v40, %v16373_v17  ;;  %v10476_v23 = vpop.f32.mrb[99].mxu1  ;;  %5133 = vmatprep.mubr.bf16.mxu0 %v14205_v31  ;;  %10997 = vmatpush3.bf16.msra.mxu0 %v12003_v4  ;;  %v16229_v56 = vmax.f32 %v14227_v26, 0.0  ;;  %v16230_v24 = vmax.f32 %v14229_v50, 0.0  ;;  %v5447_v4 = vshll.u32 %v14205_v31, 16  ;;  %v4875_v40 = vld [vmem:[#allocation2 + $0xd8] sm:$0xff] }
 0x306   : > { %v14239_v41 = vadd.f32 %v10474_v33, %v14129_v36  ;;  %v10477_v37 = vadd.f32 %v10476_v23, %v10475_v60  ;;  %10998 = vmatprep.subr.bf16.mxu0 %v12004_v51  ;;  %v688_v36 = vmul.f32 %v12598_v14, %v535_v44  ;;  %v1132_v45 = vadd.f32 %v1024_v2, %v687_v49  ;;  %v12012_v49 = vld [vmem:[#allocation3 + $0x468] sm:$0xff]  }
 0x307   : > { %v10378_v38 = vpop.f32.mrb[76].mxu0  ;;  %4820 = vmatmul.mubr.bf16.gmra.mrb[204].mxu1 %v4536_v5  ;;  %v5417_v29 = vor.u32 %v5416_v34, %v5412_v22  ;;  %v5443_v33 = vshrl.u32 %v14134_v12, 16  ;;  %v5439_v5 = vshll.u32 %v14212_v30, 16  ;;  %1794 = vst [vmem:[#allocation2 + $0x2b0] sm:$0xff] %v16229_v56  ;;  %1795 = vst [vmem:[#allocation2 + $0x2b8] sm:$0xff] %v16230_v24  ;;  %v5435_v23 = vshrl.u32 %v14182_v57, 16 }
 0x308   : > { %16374 = vst [vmem:[#allocation11_spill] sm:$0xff] %v14239_v41  ;;  %v14250_v3 = vadd.f32 %v10477_v37, %v14141_v32  ;;  %v10379_v51 = vpop.f32.mrb[77].mxu0  ;;  %5835 = vmatprep.mubr.bf16.mxu1 %v5434_v46  ;;  %v14260_v32 = vpack.c.bf16 %v4875_v40, %v4873_v42  ;;  %v12009_v46 = vld [vmem:[#allocation3 + $0x420] sm:$0xff]   ;;  %v1133_v44 = vadd.f32 %v1025_v55, %v688_v36  ;;  %v5459_v57 = vshrl.u32 %v14205_v31, 16 }
 0x309   : > { %v10380_v28 = vadd.f32 %v10379_v51, %v10378_v38  ;;  %v10381_v2 = vpop.f32.mrb[78].mxu0  ;;  %10999 = vmatpush3.bf16.msra.mxu0 %v12005_v1  ;;  %v14262_v60 = vadd.f32 %v1468_v11, %v1132_v45  ;;  %v5422_v34 = vsel %vm1988_vm0, %v5417_v29, %v5421_v6  ;;  %v5445_v17 = vor.u32 %v5443_v33, %v14194_v7  ;;  %v16376_v37 = vld [vmem:[#allocation17_spill] sm:$0xff]  ;;  %v16377_v33 = vld [vmem:[#allocation16_spill] sm:$0xff] }
 0x30a   : > { %16375 = vst [vmem:[#allocation20_spill] sm:$0xff] %v14250_v3  ;;  %v10382_v61 = vpop.f32.mrb[79].mxu0  ;;  %v10478_v22 = vpop.f32.mrb[100].mxu1  ;;  %11000 = vmatprep.subr.bf16.mxu0 %v12008_v52  ;;  %v5449_v1 = vrot.slane %v5447_v4, 1  ;;  %v14270_v40 = vadd.f32 %v1469_v43, %v1133_v44  ;;  %v5437_v36 = vor.u32 %v5435_v23, %v5421_v6  ;;  %v14273_v45 = vrot.slane %v5439_v5, 1  ;;  %v12007_v7 = vld [vmem:[#allocation3 + $0x80] sm:$0xff]  }
 0x30b   : > { %v14268_v38 = vadd.f32 %v10380_v28, %v16376_v37  ;;  %v10383_v42 = vadd.f32 %v10382_v61, %v10381_v2  ;;  %v10479_v51 = vpop.f32.mrb[101].mxu1  ;;  %v16233_v29 = vmax.f32 %v14262_v60, 0.0  ;;  %v891_v52 = vpop.permute.xlu1 %890  ;;  %v4872_v4 = vld [vmem:[#allocation2 + $0xc0] sm:$0xff]  ;;  %v5463_v43 = vshll.u32 %v14260_v32, 16  ;;  %v12010_v2 = vld [vmem:[#allocation3 + $0xc8] sm:$0xff]   ;;  %v4877_v37 = vld [vmem:[#allocation2 + $0xe8] sm:$0xff] }
 0x30c   : > { %v10480_v55 = vadd.f32 %v10479_v51, %v10478_v22  ;;  %v10481_v11 = vpop.f32.mrb[102].mxu1  ;;  %5134 = vmatmul.mubr.bf16.gmra.mrb[184].mxu0 %v14212_v30  ;;  %v12013_v44 = vld [vmem:[#allocation3 + $0x428] sm:$0xff]   ;;  %v1028_v5 = vmul.f32 %v12591_v9, %v891_v52  ;;  %v545_v61 = vpop.permute.xlu0 %544  ;;  %v1029_v51 = vmul.f32 %v12593_v10, %v891_v52  ;;  %v5450_v24 = vsel %vm1988_vm0, %v5445_v17, %v5449_v1  ;;  %v4874_v6 = vld [vmem:[#allocation2 + $0xd0] sm:$0xff] }
 0x30d   : > { %v14277_v56 = vadd.f32 %v10383_v42, %v16377_v33  ;;  %v10482_v28 = vpop.f32.mrb[103].mxu1  ;;  %5141 = vmatprep.mubr.bf16.mxu0 %v14260_v32  ;;  %11001 = vmatpush3.bf16.msra.mxu0 %v12009_v46  ;;  %v12016_v42 = vld [vmem:[#allocation3 + $0x470] sm:$0xff]   ;;  %1792 = vst [vmem:[#allocation2 + $0x2a0] sm:$0xff] %v16233_v29  ;;  %v691_v46 = vmul.f32 %v12596_v13, %v545_v61  ;;  %v12011_v17 = vld [vmem:[#allocation3 + $0x88] sm:$0xff]   ;;  %v14304_v3 = vrot.slane %v5463_v43, 1  ;;  %v5451_v12 = vshrl.u32 %v14212_v30, 16 }
 0x30e   : > { %v14284_v22 = vadd.f32 %v10480_v55, %v14173_v62  ;;  %v10483_v23 = vadd.f32 %v10482_v28, %v10481_v11  ;;  %11002 = vmatprep.subr.bf16.mxu0 %v12012_v49  ;;  %v16379_v62 = vmax.f32 %v14270_v40, 0.0  ;;  %v692_v49 = vmul.f32 %v12598_v14, %v545_v61  ;;  %v4879_v28 = vld [vmem:[#allocation2 + $0xf8] sm:$0xff] }
 0x30f   : > { %v10384_v33 = vpop.f32.mrb[80].mxu0  ;;  %5836 = vmatmul.mubr.bf16.vlgmr.msra.gmra.mrb[208].mxu1 %v5422_v34  ;;  %v14298_v52 = vpack.c.bf16 %v4874_v6, %v4872_v4  ;;  %v5442_v34 = vsel %vm1988_vm0, %v5437_v36, %v14273_v45  ;;  %v14302_v31 = vpack.c.bf16 %v4879_v28, %v4877_v37  ;;  %v4876_v4 = vld [vmem:[#allocation2 + $0xe0] sm:$0xff]  ;;  %v1030_v36 = vmul.f32 %v12591_v9, %v14200_v39 }
 0x310   : > { %16378 = vst [vmem:[#allocation17_spill] sm:$0xff] %v14284_v22  ;;  %1793 = vst [vmem:[#allocation2 + $0x2a8] sm:$0xff] %v16379_v62  ;;  %v14296_v55 = vadd.f32 %v10483_v23, %v14179_v48  ;;  %v10385_v11 = vpop.f32.mrb[81].mxu0  ;;  %5843 = vmatprep.mubr.bf16.mxu1 %v5450_v24  ;;  %11105 = vmatpush3.bf16.msra.mxu1 %v12007_v7  ;;  %v5461_v62 = vor.u32 %v5459_v57, %v5449_v1  ;;  %v12014_v48 = vld [vmem:[#allocation3 + $0xd0] sm:$0xff]  }
 0x311   : > { %16381 = vst [vmem:[#allocation32_spill] sm:$0xff] %v14298_v52  ;;  %v10386_v29 = vadd.f32 %v10385_v11, %v10384_v33  ;;  %v10387_v22 = vpop.f32.mrb[82].mxu0  ;;  %16382 = vst [vmem:[#allocation33_spill] sm:$0xff] %v14302_v31  ;;  %11106 = vmatprep.subr.bf16.mxu1 %v12010_v2  ;;  %11003 = vmatpush3.bf16.msra.mxu0 %v12013_v44  ;;  %v12017_v6 = vld [vmem:[#allocation3 + $0x430] sm:$0xff]   ;;  %v1031_v7 = vmul.f32 %v12593_v10, %v14200_v39  ;;  %v12020_v2 = vld [vmem:[#allocation3 + $0x478] sm:$0xff]   ;;  %v1335_v11 = vpop.permute.xlu1 %1334 }
 0x312   : > { %16380 = vst [vmem:[#allocation16_spill] sm:$0xff] %v14296_v55  ;;  %v10388_v61 = vpop.f32.mrb[83].mxu0  ;;  %v10484_v24 = vpop.f32.mrb[104].mxu1  ;;  %11004 = vmatprep.subr.bf16.mxu0 %v12016_v42  ;;  %v1136_v23 = vadd.f32 %v1028_v5, %v691_v46  ;;  %v1137_v37 = vadd.f32 %v1029_v51, %v692_v49  ;;  %v16383_v33 = vld [vmem:[#allocation15_spill] sm:$0xff]  ;;  %v693_v44 = vmul.f32 %v12596_v13, %v14243_v27  ;;  %v4878_v39 = vld [vmem:[#allocation2 + $0xf0] sm:$0xff]  ;;  %v16384_v51 = vld [vmem:[#allocation22_spill] sm:$0xff] }
 0x313   : > { %v14311_v57 = vadd.f32 %v10386_v29, %v16383_v33  ;;  %v10389_v1 = vadd.f32 %v10388_v61, %v10387_v22  ;;  %v10485_v43 = vpop.f32.mrb[105].mxu1  ;;  %v694_v42 = vmul.f32 %v12598_v14, %v14243_v27  ;;  %v12015_v5 = vld [vmem:[#allocation3 + $0x90] sm:$0xff]   ;;  %v1472_v29 = vmul.f32 %v12600_v15, %v1335_v11  ;;  %v12018_v33 = vld [vmem:[#allocation3 + $0xd8] sm:$0xff]  }
 0x314   : > { %v10486_v28 = vadd.f32 %v10485_v43, %v10484_v24  ;;  %v10487_v55 = vpop.f32.mrb[106].mxu1  ;;  %5142 = vmatmul.mubr.bf16.gmra.mrb[188].mxu0 %v14298_v52  ;;  %11107 = vmatpush3.bf16.msra.mxu1 %v12011_v17  ;;  %v1473_v22 = vmul.f32 %v12602_v16, %v1335_v11  ;;  %v14324_v61 = vpack.c.bf16 %v4878_v39, %v4876_v4  ;;  %v5455_v27 = vshll.u32 %v14298_v52, 16  ;;  %v12021_v11 = vld [vmem:[#allocation3 + $0x438] sm:$0xff]  }
 0x315   : > { %v14321_v46 = vadd.f32 %v10389_v1, %v16384_v51  ;;  %v10488_v49 = vpop.f32.mrb[107].mxu1  ;;  %5149 = vmatprep.mubr.bf16.mxu0 %v14302_v31  ;;  %v5479_v24 = vshll.u32 %v14302_v31, 16  ;;  %11108 = vmatprep.subr.bf16.mxu1 %v12014_v48  ;;  %v14331_v41 = vadd.f32 %v1472_v29, %v1136_v23  ;;  %v5466_v4 = vsel %vm1988_vm0, %v5461_v62, %v14304_v3  ;;  %v4881_v39 = vld [vmem:[#allocation2 + $0x108] sm:$0xff]  ;;  %v12024_v48 = vld [vmem:[#allocation3 + $0x140] sm:$0xff]  }
 0x316   : > { %16385 = vst [vmem:[#allocation15_spill] sm:$0xff] %v14324_v61  ;;  %v14329_v17 = vadd.f32 %v10486_v28, %v14217_v19  ;;  %v10489_v43 = vadd.f32 %v10488_v49, %v10487_v55  ;;  %11005 = vmatpush3.bf16.msra.mxu0 %v12017_v6  ;;  %v14333_v1 = vadd.f32 %v1473_v22, %v1137_v37  ;;  %v5475_v23 = vshrl.u32 %v14260_v32, 16  ;;  %v12019_v37 = vld [vmem:[#allocation3 + $0x98] sm:$0xff]   ;;  %v1339_v28 = vpop.permute.xlu1 %1338 }
 0x317   : > { %v10390_v51 = vpop.f32.mrb[84].mxu0  ;;  %5844 = vmatmul.mubr.bf16.gmra.mrb[212].mxu1 %v5442_v34  ;;  %11006 = vmatprep.subr.bf16.mxu0 %v12020_v2  ;;  %v1138_v25 = vadd.f32 %v1030_v36, %v693_v44  ;;  %v1139_v19 = vadd.f32 %v1031_v7, %v694_v42  ;;  %v4883_v2 = vld [vmem:[#allocation2 + $0x118] sm:$0xff]  ;;  %v5457_v49 = vrot.slane %v5455_v27, 1  ;;  %v4880_v36 = vld [vmem:[#allocation2 + $0x100] sm:$0xff]  ;;  %v12022_v7 = vld [vmem:[#allocation3 + $0xe0] sm:$0xff]   ;;  %v1475_v44 = vmul.f32 %v12602_v16, %v1339_v28 }
 0x318   : > { %16386 = vst [vmem:[#allocation22_spill] sm:$0xff] %v14329_v17  ;;  %v14339_v55 = vadd.f32 %v10489_v43, %v14232_v8  ;;  %v10391_v6 = vpop.f32.mrb[85].mxu0  ;;  %5851 = vmatprep.mubr.bf16.mxu1 %v5466_v4  ;;  %11109 = vmatpush3.bf16.msra.mxu1 %v12015_v5  ;;  %v1474_v8 = vmul.f32 %v12600_v15, %v1339_v28  ;;  %v5481_v34 = vrot.slane %v5479_v24, 1  ;;  %v5471_v62 = vshll.u32 %v14324_v61, 16  ;;  %v4882_v17 = vld [vmem:[#allocation2 + $0x110] sm:$0xff] }
 0x319   : > { %v10392_v29 = vadd.f32 %v10391_v6, %v10390_v51  ;;  %v10393_v22 = vpop.f32.mrb[86].mxu0  ;;  %11110 = vmatprep.subr.bf16.mxu1 %v12018_v33  ;;  %v14346_v5 = vpack.c.bf16 %v4883_v2, %v4881_v39  ;;  %v5453_v4 = vor.u32 %v5451_v12, %v14273_v45  ;;  %v16389_v51 = vmax.f32 %v14331_v41, 0.0  ;;  %v16391_v33 = vld [vmem:[#allocation23_spill] sm:$0xff] }
 0x31a   : > { %16387 = vst [vmem:[#allocation34_spill] sm:$0xff] %v14339_v55  ;;  %v10394_v42 = vpop.f32.mrb[87].mxu0  ;;  %v10490_v43 = vpop.f32.mrb[108].mxu1  ;;  %11007 = vmatpush3.bf16.msra.mxu0 %v12021_v11  ;;  %v16390_v27 = vmax.f32 %v14333_v1, 0.0  ;;  %v14357_v39 = vadd.f32 %v1474_v8, %v1138_v25  ;;  %v14359_v12 = vadd.f32 %v1475_v44, %v1139_v19  ;;  %v5477_v11 = vor.u32 %v5475_v23, %v14304_v3  ;;  %v4885_v23 = vld [vmem:[#allocation2 + $0x128] sm:$0xff] }
 0x31b   : > { %16388 = vst [vmem:[#allocation35_spill] sm:$0xff] %v14346_v5  ;;  %1796 = vst [vmem:[#allocation2 + $0x2c0] sm:$0xff] %v16389_v51  ;;  %v14355_v6 = vadd.f32 %v10392_v29, %v16391_v33  ;;  %v10395_v28 = vadd.f32 %v10394_v42, %v10393_v22  ;;  %v10491_v55 = vpop.f32.mrb[109].mxu1  ;;  %11232 = vmatprep.subr.bf16.mxu0 %v12024_v48  ;;  %v14363_v2 = vpack.c.bf16 %v4882_v17, %v4880_v36  ;;  %v12023_v51 = vld [vmem:[#allocation3 + $0xa0] sm:$0xff]   ;;  %v16393_v29 = vld [vmem:[#allocation24_spill] sm:$0xff] }
 0x31c   : > { %1797 = vst [vmem:[#allocation2 + $0x2c8] sm:$0xff] %v16390_v27  ;;  %v10492_v45 = vadd.f32 %v10491_v55, %v10490_v43  ;;  %v10493_v24 = vpop.f32.mrb[110].mxu1  ;;  %5150 = vmatmul.mubr.bf16.gmra.mrb[192].mxu0 %v14324_v61  ;;  %11111 = vmatpush3.bf16.msra.mxu1 %v12019_v37  ;;  %v5458_v25 = vsel %vm1988_vm0, %v5453_v4, %v5457_v49  ;;  %v12026_v48 = vld [vmem:[#allocation3 + $0xe8] sm:$0xff]   ;;  %v16238_v19 = vmax.f32 %v14357_v39, 0.0  ;;  %v16239_v55 = vmax.f32 %v14359_v12, 0.0 }
 0x31d   : > { %16392 = vst [vmem:[#allocation23_spill] sm:$0xff] %v14363_v2  ;;  %v14366_v27 = vadd.f32 %v10395_v28, %v16393_v29  ;;  %v10494_v22 = vpop.f32.mrb[111].mxu1  ;;  %5157 = vmatprep.mubr.bf16.mxu0 %v14346_v5  ;;  %11112 = vmatprep.subr.bf16.mxu1 %v12022_v7  ;;  %v5467_v37 = vshrl.u32 %v14298_v52, 16  ;;  %v5473_v36 = vrot.slane %v5471_v62, 1  ;;  %v5482_v44 = vsel %vm1988_vm0, %v5477_v11, %v5481_v34  ;;  %v14382_v7 = vpop.permute.xlu1 %559  ;;  %v4887_v62 = vld [vmem:[#allocation2 + $0x138] sm:$0xff] }
 0x31e   : > { %v14373_v3 = vadd.f32 %v10492_v45, %v14268_v38  ;;  %v10495_v17 = vadd.f32 %v10494_v22, %v10493_v24  ;;  %v5495_v42 = vshll.u32 %v14346_v5, 16  ;;  %1798 = vst [vmem:[#allocation2 + $0x2d0] sm:$0xff] %v16238_v19  ;;  %1799 = vst [vmem:[#allocation2 + $0x2d8] sm:$0xff] %v16239_v55  ;;  %v5491_v33 = vshrl.u32 %v14302_v31, 16  ;;  %v12027_v45 = vld [vmem:[#allocation3 + $0xa8] sm:$0xff]   ;;  %v4884_v22 = vld [vmem:[#allocation2 + $0x120] sm:$0xff] }
 0x31f   : > { %v10396_v8 = vpop.f32.mrb[88].mxu0  ;;  %5852 = vmatmul.mubr.bf16.gmra.mrb[216].mxu1 %v5458_v25  ;;  %v5469_v4 = vor.u32 %v5467_v37, %v5457_v49  ;;  %v5487_v28 = vshll.u32 %v14363_v2, 16  ;;  %v14389_v29 = vpack.c.bf16 %v4887_v62, %v4885_v23  ;;  %v5483_v25 = vshrl.u32 %v14324_v61, 16 }
 0x320   : > { %16394 = vst [vmem:[#allocation24_spill] sm:$0xff] %v14373_v3  ;;  %v14385_v38 = vadd.f32 %v10495_v17, %v14277_v56  ;;  %v10397_v43 = vpop.f32.mrb[89].mxu0  ;;  %5859 = vmatprep.mubr.bf16.mxu1 %v5482_v44  ;;  %11113 = vmatpush3.bf16.msra.mxu1 %v12023_v51  ;;  %v12028_v56 = vld [vmem:[#allocation3 + $0xf0] sm:$0xff]   ;;  %v555_v17 = vpop.permute.xlu0 %554  ;;  %v5493_v37 = vor.u32 %v5491_v33, %v5481_v34  ;;  %v5507_v31 = vshrl.u32 %v14346_v5, 16 }
 0x321   : > { %v10398_v24 = vadd.f32 %v10397_v43, %v10396_v8  ;;  %v10399_v11 = vpop.f32.mrb[90].mxu0  ;;  %11114 = vmatprep.subr.bf16.mxu1 %v12026_v48  ;;  %v5474_v49 = vsel %vm1988_vm0, %v5469_v4, %v5473_v36  ;;  %v5497_v8 = vrot.slane %v5495_v42, 1  ;;  %v4886_v43 = vld [vmem:[#allocation2 + $0x130] sm:$0xff]  ;;  %v5485_v23 = vor.u32 %v5483_v25, %v5473_v36  ;;  %v12029_v4 = vld [vmem:[#allocation3 + $0xb0] sm:$0xff]   ;;  %v12030_v36 = vld [vmem:[#allocation3 + $0xf8] sm:$0xff]   ;;  %v899_v42 = vpop.permute.xlu1 %898 }
 0x322   : > { %16395 = vst [vmem:[#allocation36_spill] sm:$0xff] %v14385_v38  ;;  %v10400_v19 = vpop.f32.mrb[91].mxu0  ;;  %v10496_v44 = vpop.f32.mrb[112].mxu1  ;;  %v14397_v48 = vpack.c.bf16 %v4886_v43, %v4884_v22  ;;  %v5489_v61 = vrot.slane %v5487_v28, 1  ;;  %v696_v33 = vmul.f32 %v12598_v14, %v555_v17 }
 0x323   : > { %v14394_v55 = vadd.f32 %v10398_v24, %v13910_v58  ;;  %v10401_v51 = vadd.f32 %v10400_v19, %v10399_v11  ;;  %v10497_v38 = vpop.f32.mrb[113].mxu1  ;;  %v5511_v19 = vshll.u32 %v14389_v29, 16  ;;  %v4889_v24 = vld [vmem:[#allocation2 + $0x148] sm:$0xff]  ;;  %v1033_v11 = vmul.f32 %v12593_v10, %v899_v42 }
 0x324   : > { %v10498_v62 = vadd.f32 %v10497_v38, %v10496_v44  ;;  %v10499_v3 = vpop.f32.mrb[114].mxu1  ;;  %5158 = vmatmul.mubr.bf16.gmra.mrb[196].mxu0 %v14363_v2  ;;  %11115 = vmatpush3.bf16.msra.mxu1 %v12027_v45  ;;  %v695_v38 = vmul.f32 %v12596_v13, %v555_v17  ;;  %v5498_v25 = vsel %vm1988_vm0, %v5493_v37, %v5497_v8  ;;  %v4891_v17 = vld [vmem:[#allocation2 + $0x158] sm:$0xff]  ;;  %v5503_v43 = vshll.u32 %v14397_v48, 16 }
 0x325   : > { %v14401_v34 = vadd.f32 %v10401_v51, %v13919_v18  ;;  %v10500_v58 = vpop.f32.mrb[115].mxu1  ;;  %5165 = vmatprep.mubr.bf16.mxu0 %v14389_v29  ;;  %11116 = vmatprep.subr.bf16.mxu1 %v12028_v56  ;;  %v1032_v18 = vmul.f32 %v12591_v9, %v899_v42  ;;  %v5499_v56 = vshrl.u32 %v14363_v2, 16  ;;  %v14424_v2 = vrot.slane %v5511_v19, 1  ;;  %v1343_v5 = vpop.permute.xlu1 %1342 }
 0x326   : > { %v14408_v28 = vadd.f32 %v10498_v62, %v14311_v57  ;;  %v10501_v45 = vadd.f32 %v10500_v58, %v10499_v3  ;;  %v5490_v57 = vsel %vm1988_vm0, %v5485_v23, %v5489_v61  ;;  %v5509_v3 = vor.u32 %v5507_v31, %v5497_v8  ;;  %v12032_v62 = vld [vmem:[#allocation3 + $0xb8] sm:$0xff]   ;;  %v903_v58 = vpop.permute.xlu0 %902 }
 0x327   : > { %v10402_v22 = vpop.f32.mrb[92].mxu0  ;;  %5860 = vmatmul.mubr.bf16.gmra.mrb[220].mxu1 %v5474_v49  ;;  %v1034_v37 = vmul.f32 %v12591_v9, %v903_v58  ;;  %v1140_v31 = vadd.f32 %v1032_v18, %v695_v38  ;;  %v1141_v8 = vadd.f32 %v1033_v11, %v696_v33  ;;  %v16398_v23 = vmax.f32 %v14270_v40, 0.0  ;;  %v16401_v33 = vld [vmem:[#allocation26_spill] sm:$0xff] }
 0x328   : > { %16396 = vst [vmem:[#allocation37_spill] sm:$0xff] %v14408_v28  ;;  %v14415_v44 = vadd.f32 %v10501_v45, %v14321_v46  ;;  %v10403_v51 = vpop.f32.mrb[93].mxu0  ;;  %5867 = vmatprep.mubr.bf16.mxu1 %v5498_v25  ;;  %11117 = vmatpush3.bf16.msra.mxu1 %v12029_v4  ;;  %v14419_v28 = vpack.c.bf16 %v4891_v17, %v4889_v24  ;;  %v16399_v4 = vmax.f32 %v14229_v50, 0.0  ;;  %v16400_v24 = vld [vmem:[#allocation25_spill] sm:$0xff] }
 0x329   : > { %v10404_v42 = vadd.f32 %v10403_v51, %v10402_v22  ;;  %v10405_v49 = vpop.f32.mrb[94].mxu0  ;;  %11118 = vmatprep.subr.bf16.mxu1 %v12030_v36  ;;  %v697_v46 = vmul.f32 %v12596_v13, %v14382_v7  ;;  %v1035_v19 = vmul.f32 %v12593_v10, %v903_v58  ;;  %v1476_v50 = vmul.f32 %v12600_v15, %v1343_v5 }
 0x32a   : > { %16397 = vst [vmem:[#allocation38_spill] sm:$0xff] %v14415_v44  ;;  %v10406_v45 = vpop.f32.mrb[95].mxu0  ;;  %v10502_v25 = vpop.f32.mrb[116].mxu1  ;;  %v14430_v22 = vpack.c.bf16 %v16399_v4, %v16398_v23  ;;  %v698_v44 = vmul.f32 %v12598_v14, %v14382_v7  ;;  %v1477_v40 = vmul.f32 %v12602_v16, %v1343_v5  ;;  %v5527_v7 = vshll.u32 %v14419_v28, 16 }
 0x32b   : > { %v14433_v51 = vadd.f32 %v10404_v42, %v16400_v24  ;;  %v10407_v36 = vadd.f32 %v10406_v45, %v10405_v49  ;;  %v10503_v17 = vpop.f32.mrb[117].mxu1  ;;  %v5501_v42 = vor.u32 %v5499_v56, %v5489_v61  ;;  %v1142_v49 = vadd.f32 %v1034_v37, %v697_v46  ;;  %v4893_v24 = vld [vmem:[#allocation2 + $0x168] sm:$0xff]  ;;  %v1347_v46 = vpop.permute.xlu1 %1346  ;;  %v4890_v37 = vld [vmem:[#allocation2 + $0x150] sm:$0xff] }
 0x32c   : > { %v10504_v52 = vadd.f32 %v10503_v17, %v10502_v25  ;;  %v10505_v38 = vpop.f32.mrb[118].mxu1  ;;  %5166 = vmatmul.mubr.bf16.gmra.mrb[200].mxu0 %v14397_v48  ;;  %11119 = vmatpush3.bf16.msra.mxu1 %v12032_v62  ;;  %v4888_v25 = vld [vmem:[#allocation2 + $0x140] sm:$0xff]  ;;  %v14449_v62 = vadd.f32 %v1476_v50, %v1140_v31  ;;  %v14451_v23 = vadd.f32 %v1477_v40, %v1141_v8  ;;  %v5523_v61 = vshrl.u32 %v14389_v29, 16  ;;  %v12038_v17 = vld [vmem:[#allocation3 + $0x40] sm:$0xff]  }
 0x32d   : > { %v14442_v18 = vadd.f32 %v10407_v36, %v16401_v33  ;;  %v10506_v11 = vpop.f32.mrb[119].mxu1  ;;  %5173 = vmatprep.mubr.bf16.mxu0 %v14419_v28  ;;  %v5514_v4 = vsel %vm1988_vm0, %v5509_v3, %v14424_v2  ;;  %v14455_v36 = vrot.slane %v5503_v43, 1  ;;  %v1143_v56 = vadd.f32 %v1035_v19, %v698_v44  ;;  %v565_v3 = vpop.permute.xlu0 %564  ;;  %v4895_v44 = vld [vmem:[#allocation2 + $0x178] sm:$0xff]  ;;  %11168 = vmatprep.subr.bf16.mxu1 %v12038_v17 }
 0x32e   : > { %v14447_v58 = vadd.f32 %v10504_v52, %v14355_v6  ;;  %v10507_v45 = vadd.f32 %v10506_v11, %v10505_v38  ;;  %v16250_v31 = vmax.f32 %v14449_v62, 0.0  ;;  %v1478_v8 = vmul.f32 %v12600_v15, %v1347_v46 }
 0x32f   : > { %v10408_v5 = vpop.f32.mrb[96].mxu0  ;;  %5868 = vmatmul.mubr.bf16.gmra.mrb[224].mxu1 %v5490_v57  ;;  %v16251_v57 = vmax.f32 %v14451_v23, 0.0  ;;  %v14464_v50 = vpack.c.bf16 %v4890_v37, %v4888_v25  ;;  %v14466_v19 = vrot.slane %v5527_v7, 1  ;;  %v14469_v11 = vpack.c.bf16 %v4895_v44, %v4893_v24 }
 0x330   : > { %v14459_v52 = vadd.f32 %v10507_v45, %v14366_v27  ;;  %v10409_v6 = vpop.f32.mrb[97].mxu0  ;;  %5875 = vmatprep.mubr.bf16.mxu1 %v5514_v4  ;;  %v1479_v27 = vmul.f32 %v12602_v16, %v1347_v46  ;;  %1800 = vst [vmem:[#allocation2 + $0x2e0] sm:$0xff] %v16250_v31  ;;  %v14475_v45 = vadd.f32 %v1478_v8, %v1142_v49  ;;  %v16405_v7 = vmax.f32 %v14227_v26, 0.0  ;;  %v16407_v46 = vld [vmem:[#allocation18_spill] sm:$0xff]  ;;  %v907_v31 = vpop.permute.xlu1 %906 }
 0x331   : > { %v10410_v43 = vadd.f32 %v10409_v6, %v10408_v5  ;;  %v10411_v38 = vpop.f32.mrb[98].mxu0  ;;  %16402 = vst [vmem:[#allocation25_spill] sm:$0xff] %v14464_v50  ;;  %16403 = vst [vmem:[#allocation26_spill] sm:$0xff] %v14469_v11  ;;  %v699_v25 = vmul.f32 %v12596_v13, %v565_v3  ;;  %v16404_v5 = vmax.f32 %v14262_v60, 0.0  ;;  %v700_v49 = vmul.f32 %v12598_v14, %v565_v3 }
 0x332   : > { %v10412_v40 = vpop.f32.mrb[99].mxu0  ;;  %v10508_v33 = vpop.f32.mrb[120].mxu1  ;;  %1801 = vst [vmem:[#allocation2 + $0x2e8] sm:$0xff] %v16251_v57  ;;  %v14487_v44 = vadd.f32 %v1479_v27, %v1143_v56  ;;  %v16252_v60 = vmax.f32 %v14475_v45, 0.0  ;;  %v1036_v26 = vmul.f32 %v12591_v9, %v907_v31  ;;  %v1037_v17 = vmul.f32 %v12593_v10, %v907_v31  ;;  %v4899_v27 = vld [vmem:[#allocation2 + $0x198] sm:$0xff] }
 0x333   : > { %v14482_v4 = vpack.c.bf16 %v16405_v7, %v16404_v5  ;;  %v14485_v24 = vadd.f32 %v10410_v43, %v16407_v46  ;;  %v10413_v6 = vadd.f32 %v10412_v40, %v10411_v38  ;;  %v10509_v37 = vpop.f32.mrb[121].mxu1  ;;  %v16408_v5 = vld [vmem:[#allocation19_spill] sm:$0xff]  ;;  %v5506_v56 = vsel %vm1988_vm0, %v5501_v42, %v14455_v36 }
 0x334   : > { %v10510_v8 = vadd.f32 %v10509_v37, %v10508_v33  ;;  %v10511_v57 = vpop.f32.mrb[122].mxu1  ;;  %5174 = vmatmul.mubr.bf16.gmra.mrb[204].mxu0 %v14464_v50  ;;  %v5525_v3 = vor.u32 %v5523_v61, %v14424_v2  ;;  %v16254_v40 = vmax.f32 %v14487_v44, 0.0  ;;  %v5519_v31 = vshll.u32 %v14464_v50, 16  ;;  %1802 = vst [vmem:[#allocation2 + $0x2f0] sm:$0xff] %v16252_v60  ;;  %v4892_v2 = vld [vmem:[#allocation2 + $0x160] sm:$0xff]  ;;  %v4897_v61 = vld [vmem:[#allocation2 + $0x188] sm:$0xff] }
 0x335   : > { %16406 = vst [vmem:[#allocation39_spill] sm:$0xff] %v14482_v4  ;;  %v14495_v43 = vadd.f32 %v10413_v6, %v16408_v5  ;;  %v10512_v38 = vpop.f32.mrb[123].mxu1  ;;  %5181 = vmatprep.mubr.bf16.mxu0 %v14469_v11  ;;  %v5543_v46 = vshll.u32 %v14469_v11, 16  ;;  %v1145_v37 = vadd.f32 %v1037_v17, %v700_v49  ;;  %v14516_v5 = vpack.c.bf16 %v4899_v27, %v4897_v61 }
 0x336   : > { %v14503_v33 = vadd.f32 %v10510_v8, %v14394_v55  ;;  %v10513_v7 = vadd.f32 %v10512_v38, %v10511_v57  ;;  %v5530_v42 = vsel %vm1988_vm0, %v5525_v3, %v14466_v19  ;;  %1803 = vst [vmem:[#allocation2 + $0x2f8] sm:$0xff] %v16254_v40  ;;  %v1144_v55 = vadd.f32 %v1036_v26, %v699_v25  ;;  %v1351_v38 = vpop.permute.xlu1 %1350  ;;  %v4894_v26 = vld [vmem:[#allocation2 + $0x170] sm:$0xff] }
 0x337   : > { %v10414_v6 = vpop.f32.mrb[100].mxu0  ;;  %5876 = vmatmul.mubr.bf16.gmra.mrb[228].mxu1 %v5506_v56  ;;  %v16411_v56 = vmax.f32 %v14333_v1, 0.0  ;;  %v16412_v60 = vmax.f32 %v14359_v12, 0.0  ;;  %v16414_v4 = vmax.f32 %v14331_v41, 0.0  ;;  %v16415_v40 = vmax.f32 %v14357_v39, 0.0  ;;  %v16417_v39 = vld [vmem:[#allocation27_spill] sm:$0xff] }
 0x338   : > { %16409 = vst [vmem:[#allocation18_spill] sm:$0xff] %v14503_v33  ;;  %v14514_v57 = vadd.f32 %v10513_v7, %v14401_v34  ;;  %v10415_v8 = vpop.f32.mrb[101].mxu0  ;;  %5883 = vmatprep.mubr.bf16.mxu1 %v5530_v42  ;;  %v5515_v17 = vshrl.u32 %v14397_v48, 16  ;;  %v1480_v27 = vmul.f32 %v12600_v15, %v1351_v38  ;;  %v1481_v7 = vmul.f32 %v12602_v16, %v1351_v38 }
 0x339   : > { %v14522_v3 = vpack.c.bf16 %v16412_v60, %v16411_v56  ;;  %v14528_v25 = vpack.c.bf16 %v16415_v40, %v16414_v4  ;;  %v10416_v49 = vadd.f32 %v10415_v8, %v10414_v6  ;;  %v10417_v34 = vpop.f32.mrb[102].mxu0  ;;  %v14533_v12 = vpack.c.bf16 %v4894_v26, %v4892_v2  ;;  %v4903_v2 = vld [vmem:[#allocation2 + $0x1b8] sm:$0xff]  ;;  %v16418_v26 = vld [vmem:[#allocation28_spill] sm:$0xff] }
 0x33a   : > { %16410 = vst [vmem:[#allocation19_spill] sm:$0xff] %v14514_v57  ;;  %v10418_v1 = vpop.f32.mrb[103].mxu0  ;;  %v10514_v42 = vpop.f32.mrb[124].mxu1  ;;  %v5521_v60 = vrot.slane %v5519_v31, 1  ;;  %v5539_v41 = vshrl.u32 %v14419_v28, 16  ;;  %v5545_v61 = vrot.slane %v5543_v46, 1  ;;  %v1588_v8 = vadd.f32 %v1480_v27, %v1144_v55 }
 0x33b   : > { %16413 = vst [vmem:[#allocation40_spill] sm:$0xff] %v14522_v3  ;;  %16416 = vst [vmem:[#allocation41_spill] sm:$0xff] %v14528_v25  ;;  %v14537_v4 = vadd.f32 %v10416_v49, %v16417_v39  ;;  %v10419_v40 = vadd.f32 %v10418_v1, %v10417_v34  ;;  %v10515_v6 = vpop.f32.mrb[125].mxu1  ;;  %v1589_v56 = vadd.f32 %v1481_v7, %v1145_v37  ;;  %v4898_v57 = vld [vmem:[#allocation2 + $0x190] sm:$0xff]  ;;  %v5559_v31 = vshll.u32 %v14516_v5, 16  ;;  %v4896_v37 = vld [vmem:[#allocation2 + $0x180] sm:$0xff]  ;;  %v575_v1 = vpop.permute.xlu1 %574 }
 0x33c   : > { %v10516_v25 = vadd.f32 %v10515_v6, %v10514_v42  ;;  %v10517_v3 = vpop.f32.mrb[126].mxu1  ;;  %5182 = vmatmul.mubr.bf16.gmra.mrb[208].mxu0 %v14533_v12  ;;  %v5517_v38 = vor.u32 %v5515_v17, %v14455_v36  ;;  %v5541_v55 = vor.u32 %v5539_v41, %v14466_v19  ;;  %v4901_v34 = vld [vmem:[#allocation2 + $0x1a8] sm:$0xff]  ;;  %v1696_v27 = vmax.f32 %v1588_v8, 0.0  ;;  %v4907_v6 = vld [vmem:[#allocation2 + $0x1d8] sm:$0xff] }
 0x33d   : > { %v14543_v46 = vadd.f32 %v10419_v40, %v16418_v26  ;;  %v10518_v49 = vpop.f32.mrb[127].mxu1  ;;  %5189 = vmatprep.mubr.bf16.mxu0 %v14516_v5  ;;  %v1697_v7 = vmax.f32 %v1589_v56, 0.0  ;;  %v5535_v39 = vshll.u32 %v14533_v12, 16  ;;  %v4902_v40 = vld [vmem:[#allocation2 + $0x1b0] sm:$0xff]  ;;  %v14553_v26 = vld [vmem:[%s12434_s7 + $0x1a0] sm:$0xff]  ;;  %v14556_v41 = vpack.c.bf16 %v4898_v57, %v4896_v37 }
 0x33e   : > { %v14548_v36 = vadd.f32 %v10516_v25, %v14433_v51  ;;  %v10519_v17 = vadd.f32 %v10518_v49, %v10517_v3  ;;  %v5522_v42 = vsel %vm1988_vm0, %v5517_v38, %v5521_v60  ;;  %v5546_v19 = vsel %vm1988_vm0, %v5541_v55, %v5545_v61  ;;  %1804 = vst [vmem:[#allocation2 + $0x300] sm:$0xff] %v1696_v27  ;;  %v4900_v38 = vld [vmem:[#allocation2 + $0x1a0] sm:$0xff]  ;;  %v4905_v49 = vld [vmem:[#allocation2 + $0x1c8] sm:$0xff]  ;;  %v570_v55 = vpop.permute.xlu0 %569 }
 0x33f   : > { %v10420_v33 = vpop.f32.mrb[104].mxu0  ;;  %5884 = vmatmul.mubr.bf16.gmra.mrb[232].mxu1 %v5522_v42  ;;  %v14558_v8 = vpack.c.bf16 %v4903_v2, %v4901_v34  ;;  %v5531_v51 = vshrl.u32 %v14464_v50, 16  ;;  %1805 = vst [vmem:[#allocation2 + $0x308] sm:$0xff] %v1697_v7  ;;  %584 = vperm.xlu1 %11865, %v14553_v26   ;;  %v5555_v56 = vshrl.u32 %v14469_v11, 16  ;;  %v16421_v57 = vmax.f32 %v14451_v23, 0.0 }
 0x340   : > { %16419 = vst [vmem:[#allocation27_spill] sm:$0xff] %v14548_v36  ;;  %v14563_v3 = vadd.f32 %v10519_v17, %v14442_v18  ;;  %v10421_v25 = vpop.f32.mrb[105].mxu0  ;;  %5891 = vmatprep.mubr.bf16.mxu1 %v5546_v19  ;;  %v16422_v2 = vmax.f32 %v14487_v44, 0.0  ;;  %v16424_v34 = vmax.f32 %v14449_v62, 0.0  ;;  %v16425_v27 = vmax.f32 %v14475_v45, 0.0  ;;  %v16427_v62 = vld [vmem:[#allocation29_spill] sm:$0xff] }
 0x341   : > { %v10422_v18 = vadd.f32 %v10421_v25, %v10420_v33  ;;  %v10423_v17 = vpop.f32.mrb[106].mxu0  ;;  %v14578_v42 = vrot.slane %v5559_v31, 1  ;;  %v14580_v19 = vpack.c.bf16 %v4902_v40, %v4900_v38  ;;  %v5533_v11 = vor.u32 %v5531_v51, %v5521_v60  ;;  %v915_v40 = vpop.permute.xlu1 %914  ;;  %v16429_v51 = vld [vmem:[#allocation30_spill] sm:$0xff] }
 0x342   : > { %16420 = vst [vmem:[#allocation28_spill] sm:$0xff] %v14563_v3  ;;  %v14570_v37 = vpack.c.bf16 %v16422_v2, %v16421_v57  ;;  %v14576_v7 = vpack.c.bf16 %v16425_v27, %v16424_v34  ;;  %v14582_v3 = vpack.c.bf16 %v4907_v6, %v4905_v49  ;;  %v10424_v36 = vpop.f32.mrb[107].mxu0  ;;  %v10520_v23 = vpop.f32.mrb[128].mxu1  ;;  %v5537_v44 = vrot.slane %v5535_v39, 1 }
 0x343   : > { %v5557_v57 = vor.u32 %v5555_v56, %v5545_v61  ;;  %v703_v2 = vmul.f32 %v12596_v13, %v575_v1  ;;  %v10425_v45 = vadd.f32 %v10424_v36, %v10423_v17  ;;  %v10521_v34 = vpop.f32.mrb[129].mxu1  ;;  %v701_v33 = vmul.f32 %v12596_v13, %v570_v55  ;;  %v911_v36 = vpop.permute.xlu0 %910 }
 0x344   : > { %16423 = vst [vmem:[#allocation42_spill] sm:$0xff] %v14570_v37  ;;  %16426 = vst [vmem:[#allocation43_spill] sm:$0xff] %v14576_v7  ;;  %v14586_v37 = vadd.f32 %v10422_v18, %v16427_v62  ;;  %v702_v31 = vmul.f32 %v12598_v14, %v570_v55  ;;  %v16428_v25 = vmov 1   ;;  %v10522_v6 = vadd.f32 %v10521_v34, %v10520_v23  ;;  %v10523_v38 = vpop.f32.mrb[130].mxu1  ;;  %5190 = vmatmul.mubr.bf16.gmra.mrb[212].mxu0 %v14556_v41  ;;  %v320_v34 = vld [vmem:[%s12434_s7 + $0x1a8] sm:$0xff] }
 0x345   : > { %11867 = vset.pattern.permute.xlu1 %v16428_v25  ;;  %v5551_v60 = vshll.u32 %v14556_v41, 16  ;;  %v704_v61 = vmul.f32 %v12598_v14, %v575_v1  ;;  %v1040_v39 = vmul.f32 %v12591_v9, %v915_v40  ;;  %v14597_v56 = vadd.f32 %v10425_v45, %v16429_v51  ;;  %v10524_v49 = vpop.f32.mrb[131].mxu1  ;;  %5197 = vmatprep.mubr.bf16.mxu0 %v14558_v8  ;;  %v1355_v50 = vpop.permute.xlu1 %1354 }
 0x346   : > { %922 = vperm.xlu1 %11867, %v14553_v26   ;;  %v1041_v55 = vmul.f32 %v12593_v10, %v915_v40  ;;  %v1038_v27 = vmul.f32 %v12591_v9, %v911_v36  ;;  %v1039_v18 = vmul.f32 %v12593_v10, %v911_v36  ;;  %v14604_v17 = vadd.f32 %v10522_v6, %v14485_v24 }
 0x347   : > { %v10525_v1 = vadd.f32 %v10524_v49, %v10523_v38  ;;  %v5538_v23 = vsel %vm1988_vm0, %v5533_v11, %v5537_v44  ;;  %v5547_v62 = vshrl.u32 %v14533_v12, 16  ;;  %v10426_v45 = vpop.f32.mrb[108].mxu0  ;;  %v5562_v25 = vsel %vm1988_vm0, %v5557_v57, %v14578_v42  ;;  %589 = vperm.xlu0 %11866, %v320_v34  }
 0x348   : > { %16430 = vst [vmem:[#allocation29_spill] sm:$0xff] %v14604_v17  ;;  %5892 = vmatmul.mubr.bf16.gmra.mrb[236].mxu1 %v5538_v23  ;;  %v1148_v51 = vadd.f32 %v1040_v39, %v703_v2  ;;  %v1146_v40 = vadd.f32 %v1038_v27, %v701_v33  ;;  %v1147_v7 = vadd.f32 %v1039_v18, %v702_v31  ;;  %v10427_v24 = vpop.f32.mrb[109].mxu0  ;;  %v5575_v6 = vshll.u32 %v14558_v8, 16  ;;  %v1359_v33 = vpop.permute.xlu0 %1358 }
 0x349   : > { %v14612_v36 = vadd.f32 %v10525_v1, %v14495_v43  ;;  %5899 = vmatprep.mubr.bf16.mxu1 %v5562_v25  ;;  %v1482_v11 = vmul.f32 %v12600_v15, %v1355_v50  ;;  %v1483_v38 = vmul.f32 %v12602_v16, %v1355_v50  ;;  %v10428_v49 = vadd.f32 %v10427_v24, %v10426_v45  ;;  %v10429_v23 = vpop.f32.mrb[110].mxu0 }
 0x34a   : > { %926 = vperm.xlu1 %11867, %v320_v34   ;;  %v5549_v17 = vor.u32 %v5547_v62, %v5537_v44  ;;  %v5571_v57 = vshrl.u32 %v14516_v5, 16  ;;  %v1149_v2 = vadd.f32 %v1041_v55, %v704_v61  ;;  %v10430_v31 = vpop.f32.mrb[111].mxu0  ;;  %v10526_v43 = vpop.f32.mrb[132].mxu1  ;;  %v1484_v18 = vmul.f32 %v12600_v15, %v1359_v33 }
 0x34b   : > { %16431 = vst [vmem:[#allocation30_spill] sm:$0xff] %v14612_v36  ;;  %v1590_v39 = vadd.f32 %v1482_v11, %v1146_v40  ;;  %v1591_v27 = vadd.f32 %v1483_v38, %v1147_v7  ;;  %v1485_v1 = vmul.f32 %v12602_v16, %v1359_v33  ;;  %v14621_v25 = vadd.f32 %v10428_v49, %v14053_v47  ;;  %v10527_v45 = vpop.f32.mrb[133].mxu1 }
 0x34c   : > { %v10431_v50 = vadd.f32 %v10430_v31, %v10429_v23  ;;  %v5553_v24 = vrot.slane %v5551_v60, 1  ;;  %v5573_v44 = vor.u32 %v5571_v57, %v14578_v42  ;;  %v10528_v62 = vadd.f32 %v10527_v45, %v10526_v43  ;;  %v10529_v61 = vpop.f32.mrb[134].mxu1  ;;  %5198 = vmatmul.mubr.bf16.gmra.mrb[216].mxu0 %v14580_v19  ;;  %v4906_v57 = vld [vmem:[#allocation2 + $0x1d0] sm:$0xff] }
 0x34d   : > { %v1698_v55 = vmax.f32 %v1590_v39, 0.0  ;;  %v1699_v36 = vmax.f32 %v1591_v27, 0.0  ;;  %v1592_v40 = vadd.f32 %v1484_v18, %v1148_v51  ;;  %v16432_v7 = vmov 2   ;;  %v10530_v38 = vpop.f32.mrb[135].mxu1  ;;  %5205 = vmatprep.mubr.bf16.mxu0 %v14582_v3  ;;  %v4911_v18 = vld [vmem:[#allocation2 + $0x1f8] sm:$0xff] }
 0x34e   : > { %11869 = vset.pattern.permute.xlu1 %v16432_v7  ;;  %v14627_v11 = vadd.f32 %v10431_v50, %v14064_v54  ;;  %v5577_v47 = vrot.slane %v5575_v6, 1  ;;  %v1593_v49 = vadd.f32 %v1485_v1, %v1149_v2  ;;  %11868 = vset.pattern.permute.xlu0 %v16432_v7  ;;  %v14632_v42 = vadd.f32 %v10528_v62, %v14537_v4  ;;  %v4909_v2 = vld [vmem:[#allocation2 + $0x1e8] sm:$0xff] }
 0x34f   : > { %v10531_v60 = vadd.f32 %v10530_v38, %v10529_v61  ;;  %v5554_v23 = vsel %vm1988_vm0, %v5549_v17, %v5553_v24  ;;  %1806 = vst [vmem:[#allocation2 + $0x310] sm:$0xff] %v1698_v55  ;;  %1807 = vst [vmem:[#allocation2 + $0x318] sm:$0xff] %v1699_v36  ;;  %v1700_v51 = vmax.f32 %v1592_v40, 0.0  ;;  %1370 = vperm.xlu1 %11869, %v320_v34   ;;  %1366 = vperm.xlu0 %11868, %v14553_v26   ;;  %v10560_v54 = vpop.f32.mrb[112].mxu0  ;;  %v4904_v17 = vld [vmem:[#allocation2 + $0x1c0] sm:$0xff] }
 0x350   : > { %5900 = vmatmul.mubr.bf16.gmra.mrb[240].mxu1 %v5554_v23  ;;  %v5578_v6 = vsel %vm1988_vm0, %v5573_v44, %v5577_v47  ;;  %v5591_v33 = vshll.u32 %v14582_v3, 16  ;;  %v1701_v31 = vmax.f32 %v1593_v49, 0.0  ;;  %v10561_v43 = vpop.f32.mrb[113].mxu0  ;;  %v5563_v36 = vshrl.u32 %v14556_v41, 16 }
 0x351   : > { %v14639_v4 = vadd.f32 %v10531_v60, %v14543_v46  ;;  %5907 = vmatprep.mubr.bf16.mxu1 %v5578_v6  ;;  %v5567_v34 = vshll.u32 %v14580_v19, 16  ;;  %1808 = vst [vmem:[#allocation2 + $0x320] sm:$0xff] %v1700_v51  ;;  %v10562_v26 = vadd.f32 %v10561_v43, %v10560_v54  ;;  %v10563_v39 = vpop.f32.mrb[114].mxu0  ;;  %v14643_v27 = vpack.c.bf16 %v4906_v57, %v4904_v17  ;;  %v4910_v43 = vld [vmem:[#allocation2 + $0x1f0] sm:$0xff]  ;;  %v14663_v17 = vld [vmem:[#allocation2 + $0x218] sm:$0xff] }
 0x352   : > { %1809 = vst [vmem:[#allocation2 + $0x328] sm:$0xff] %v1701_v31  ;;  %v10532_v1 = vpop.f32.mrb[136].mxu1  ;;  %v10564_v50 = vpop.f32.mrb[115].mxu0  ;;  %v14645_v45 = vpack.c.bf16 %v4911_v18, %v4909_v2  ;;  %v5565_v46 = vor.u32 %v5563_v36, %v5553_v24  ;;  %v5587_v55 = vshrl.u32 %v14558_v8, 16  ;;  %v5593_v40 = vrot.slane %v5591_v33, 1 }
 0x353   : > { %v14648_v44 = vadd.f32 %v10562_v26, %v14087_v21  ;;  %v10565_v62 = vadd.f32 %v10564_v50, %v10563_v39  ;;  %v10533_v61 = vpop.f32.mrb[137].mxu1  ;;  %v580_v7 = vpop.permute.xlu1 %579  ;;  %v5569_v60 = vrot.slane %v5567_v34, 1  ;;  %v4908_v21 = vld [vmem:[#allocation2 + $0x1e0] sm:$0xff]  ;;  %v5583_v51 = vshll.u32 %v14643_v27, 16 }
 0x354   : > { %v10534_v38 = vadd.f32 %v10533_v61, %v10532_v1  ;;  %v10535_v49 = vpop.f32.mrb[138].mxu1  ;;  %5206 = vmatmul.mubr.bf16.gmra.mrb[220].mxu0 %v14643_v27  ;;  %v5589_v24 = vor.u32 %v5587_v55, %v5577_v47  ;;  %v5607_v33 = vshll.u32 %v14645_v45, 16  ;;  %v705_v47 = vmul.f32 %v12596_v13, %v580_v7 }
 0x355   : > { %v14653_v23 = vadd.f32 %v10565_v62, %v14094_v35  ;;  %v10536_v57 = vpop.f32.mrb[139].mxu1  ;;  %5213 = vmatprep.mubr.bf16.mxu0 %v14645_v45  ;;  %v5570_v2 = vsel %vm1988_vm0, %v5565_v46, %v5569_v60  ;;  %v706_v36 = vmul.f32 %v12598_v14, %v580_v7  ;;  %v14670_v26 = vpack.c.bf16 %v4910_v43, %v4908_v21  ;;  %v4913_v46 = vld [vmem:[#allocation2 + $0x208] sm:$0xff] }
 0x356   : > { %v14658_v54 = vadd.f32 %v10534_v38, %v14586_v37  ;;  %v10537_v6 = vadd.f32 %v10536_v57, %v10535_v49  ;;  %v5594_v35 = vsel %vm1988_vm0, %v5589_v24, %v5593_v40  ;;  %v5579_v39 = vshrl.u32 %v14580_v19, 16 }
 0x357   : > { %v10566_v31 = vpop.f32.mrb[116].mxu0  ;;  %16433 = vst [vmem:[#allocation44_spill] sm:$0xff] %v14670_v26  ;;  %v919_v18 = vpop.permute.xlu1 %918  ;;  %v5585_v62 = vrot.slane %v5583_v51, 1  ;;  %v5603_v57 = vshrl.u32 %v14582_v3, 16  ;;  %v5609_v24 = vrot.slane %v5607_v33, 1 }
 0x358   : > { %5908 = vmatmul.mubr.bf16.gmra.mrb[244].mxu1 %v5570_v2  ;;  %v14668_v34 = vadd.f32 %v10537_v6, %v14597_v56  ;;  %v10567_v37 = vpop.f32.mrb[117].mxu0  ;;  %v1042_v61 = vmul.f32 %v12591_v9, %v919_v18  ;;  %v1043_v55 = vmul.f32 %v12593_v10, %v919_v18  ;;  %v14676_v56 = vpack.c.bf16 %v14663_v17, %v4913_v46 }
 0x359   : > { %5915 = vmatprep.mubr.bf16.mxu1 %v5594_v35  ;;  %v10568_v1 = vadd.f32 %v10567_v37, %v10566_v31  ;;  %v10569_v50 = vpop.f32.mrb[118].mxu0  ;;  %v5581_v49 = vor.u32 %v5579_v39, %v5569_v60  ;;  %v1363_v35 = vpop.permute.xlu0 %1362  ;;  %v5605_v39 = vor.u32 %v5603_v57, %v5593_v40  ;;  %v4917_v57 = vld [vmem:[#allocation2 + $0x228] sm:$0xff] }
 0x35a   : > { %v10538_v38 = vpop.f32.mrb[140].mxu1  ;;  %v10570_v7 = vpop.f32.mrb[119].mxu0  ;;  %16434 = vst [vmem:[#allocation45_spill] sm:$0xff] %v14676_v56  ;;  %v1150_v31 = vadd.f32 %v1042_v61, %v705_v47  ;;  %v1151_v51 = vadd.f32 %v1043_v55, %v706_v36  ;;  %v1486_v18 = vmul.f32 %v12600_v15, %v1363_v35  ;;  %v1487_v46 = vmul.f32 %v12602_v16, %v1363_v35 }
 0x35b   : > { %v14680_v21 = vadd.f32 %v10568_v1, %v14109_v0  ;;  %v10571_v6 = vadd.f32 %v10570_v7, %v10569_v50  ;;  %v10539_v2 = vpop.f32.mrb[141].mxu1  ;;  %v5586_v0 = vsel %vm1988_vm0, %v5581_v49, %v5585_v62  ;;  %v5599_v47 = vshll.u32 %v14670_v26, 16  ;;  %v14694_v50 = vld [vmem:[#allocation2 + $0x210] sm:$0xff]  ;;  %v4912_v49 = vld [vmem:[#allocation2 + $0x200] sm:$0xff] }
 0x35c   : > { %v10540_v43 = vadd.f32 %v10539_v2, %v10538_v38  ;;  %v10541_v37 = vpop.f32.mrb[142].mxu1  ;;  %5214 = vmatmul.mubr.bf16.gmra.mrb[224].mxu0 %v14670_v26  ;;  %v1594_v61 = vadd.f32 %v1486_v18, %v1150_v31  ;;  %v1595_v55 = vadd.f32 %v1487_v46, %v1151_v51  ;;  %v5623_v7 = vshll.u32 %v14676_v56, 16 }
 0x35d   : > { %v14686_v60 = vadd.f32 %v10571_v6, %v14118_v20  ;;  %v10542_v33 = vpop.f32.mrb[143].mxu1  ;;  %5221 = vmatprep.mubr.bf16.mxu0 %v14676_v56  ;;  %v5610_v20 = vsel %vm1988_vm0, %v5605_v39, %v5609_v24  ;;  %v14702_v31 = vpack.c.bf16 %v14694_v50, %v4912_v49  ;;  %v5595_v46 = vshrl.u32 %v14643_v27, 16 }
 0x35e   : > { %v14692_v36 = vadd.f32 %v10540_v43, %v14621_v25  ;;  %v10543_v1 = vadd.f32 %v10542_v33, %v10541_v37  ;;  %v4919_v25 = vld [vmem:[#allocation2 + $0x238] sm:$0xff]  ;;  %v1702_v2 = vmax.f32 %v1594_v61, 0.0  ;;  %v1703_v35 = vmax.f32 %v1595_v55, 0.0 }
 0x35f   : > { %v10572_v38 = vpop.f32.mrb[120].mxu0  ;;  %16437 = vst [vmem:[#allocation48_spill] sm:$0xff] %v14702_v31  ;;  %v5601_v33 = vrot.slane %v5599_v47, 1  ;;  %v14709_v61 = vpack.c.bf16 %v4919_v25, %v4917_v57  ;;  %v5625_v55 = vrot.slane %v5623_v7, 1 }
 0x360   : > { %16435 = vst [vmem:[#allocation46_spill] sm:$0xff] %v14692_v36  ;;  %5916 = vmatmul.mubr.bf16.gmra.mrb[248].mxu1 %v5586_v0  ;;  %v14699_v6 = vadd.f32 %v10543_v1, %v14627_v11  ;;  %v10573_v40 = vpop.f32.mrb[121].mxu0  ;;  %v5619_v11 = vshrl.u32 %v14645_v45, 16  ;;  %1810 = vst [vmem:[#allocation2 + $0x330] sm:$0xff] %v1702_v2 }
 0x361   : > { %5923 = vmatprep.mubr.bf16.mxu1 %v5610_v20  ;;  %v10574_v43 = vadd.f32 %v10573_v40, %v10572_v38  ;;  %v10575_v37 = vpop.f32.mrb[122].mxu0  ;;  %1811 = vst [vmem:[#allocation2 + $0x338] sm:$0xff] %v1703_v35  ;;  %16438 = vst [vmem:[#allocation49_spill] sm:$0xff] %v14709_v61  ;;  %v5597_v40 = vor.u32 %v5595_v46, %v5585_v62  ;;  %v4916_v62 = vld [vmem:[#allocation2 + $0x220] sm:$0xff]  ;;  %v4923_v46 = vld [vmem:[#allocation2 + $0x258] sm:$0xff] }
 0x362   : > { %16436 = vst [vmem:[#allocation47_spill] sm:$0xff] %v14699_v6  ;;  %v10576_v51 = vpop.f32.mrb[123].mxu0  ;;  %v10672_v18 = vpop.f32.mrb[144].mxu1  ;;  %v5621_v2 = vor.u32 %v5619_v11, %v5609_v24  ;;  %v4921_v24 = vld [vmem:[#allocation2 + $0x248] sm:$0xff]  ;;  %v16455_v6 = vld [vmem:[#allocation17_spill] sm:$0xff] }
 0x363   : > { %v14707_v0 = vadd.f32 %v10574_v43, %v14151_v59  ;;  %v10577_v39 = vadd.f32 %v10576_v51, %v10575_v37  ;;  %v10673_v1 = vpop.f32.mrb[145].mxu1  ;;  %v5615_v59 = vshll.u32 %v14702_v31, 16  ;;  %v5602_v43 = vsel %vm1988_vm0, %v5597_v40, %v5601_v33  ;;  %v4918_v37 = vld [vmem:[#allocation2 + $0x230] sm:$0xff] }
 0x364   : > { %v10674_v38 = vadd.f32 %v10673_v1, %v10672_v18  ;;  %v10675_v20 = vpop.f32.mrb[146].mxu1  ;;  %5222 = vmatmul.mubr.bf16.gmra.mrb[228].mxu0 %v14702_v31  ;;  %v5626_v25 = vsel %vm1988_vm0, %v5621_v2, %v5625_v55  ;;  %v5611_v51 = vshrl.u32 %v14670_v26, 16  ;;  %v5635_v2 = vshrl.u32 %v14676_v56, 16 }
 0x365   : > { %v14713_v49 = vadd.f32 %v10577_v39, %v14163_v53  ;;  %v10676_v47 = vpop.f32.mrb[147].mxu1  ;;  %5229 = vmatprep.mubr.bf16.mxu0 %v14709_v61  ;;  %v5639_v53 = vshll.u32 %v14709_v61, 16  ;;  %v5617_v1 = vrot.slane %v5615_v59, 1  ;;  %v14733_v16 = vpack.c.bf16 %v4923_v46, %v4921_v24  ;;  %v16443_v59 = vld [vmem:[#allocation14_spill] sm:$0xff]  ;;  %v4920_v46 = vld [vmem:[#allocation2 + $0x240] sm:$0xff] }
 0x366   : > { %v10677_v35 = vadd.f32 %v10676_v47, %v10675_v20  ;;  %v14719_v57 = vadd.f32 %v10674_v38, %v14648_v44  ;;  %v5613_v38 = vor.u32 %v5611_v51, %v5601_v33  ;;  %v14727_v47 = vpack.c.bf16 %v4918_v37, %v4916_v62  ;;  %v5997_v33 = vld [vmem:[#allocation2 + $0x68] sm:$0xfc]  ;;  %v12172_v51 = vld [vmem:[#allocation2 + $0x78] sm:$0xff] }
 0x367   : > { %v10578_v7 = vpop.f32.mrb[124].mxu0  ;;  %16442 = vst [vmem:[#allocation53_spill] sm:$0xff] %v14733_v16  ;;  %v14735_v15 = vrot.slane %v5639_v53, 1  ;;  %v5637_v37 = vor.u32 %v5635_v2, %v5625_v55  ;;  %v4922_v53 = vld [vmem:[#allocation2 + $0x250] sm:$0xff]  ;;  %v16445_v2 = vld [vmem:[#allocation31_spill] sm:$0xff] }
 0x368   : > { %16439 = vst [vmem:[#allocation50_spill] sm:$0xff] %v14719_v57  ;;  %5924 = vmatmul.mubr.bf16.gmra.mrb[252].mxu1 %v5602_v43  ;;  %v10579_v18 = vpop.f32.mrb[125].mxu0  ;;  %v14725_v11 = vadd.f32 %v10677_v35, %v14653_v23  ;;  %16441 = vst [vmem:[#allocation52_spill] sm:$0xff] %v14727_v47 }
 0x369   : > { %5931 = vmatprep.mubr.bf16.mxu1 %v5626_v25  ;;  %v10580_v39 = vadd.f32 %v10579_v18, %v10578_v7  ;;  %v10581_v44 = vpop.f32.mrb[126].mxu0  ;;  %v6001_v18 = vpack.c.bf16 %v12172_v51, %v5997_v33  ;;  %v14755_v51 = vpack.c.bf16 %v4922_v53, %v4920_v46 }
 0x36a   : > { %16440 = vst [vmem:[#allocation51_spill] sm:$0xff] %v14725_v11  ;;  %v10582_v20 = vpop.f32.mrb[127].mxu0  ;;  %v10678_v40 = vpop.f32.mrb[148].mxu1 }
 0x36b   : > { %v14731_v43 = vadd.f32 %v10580_v39, %v14187_v63  ;;  %v10583_v57 = vadd.f32 %v10582_v20, %v10581_v44  ;;  %v10679_v25 = vpop.f32.mrb[149].mxu1  ;;  %v5618_v63 = vsel %vm1988_vm0, %v5613_v38, %v5617_v1  ;;  %v5631_v39 = vshll.u32 %v14727_v47, 16 }
 0x36c   : > { %v10680_v23 = vadd.f32 %v10679_v25, %v10678_v40  ;;  %v10681_v35 = vpop.f32.mrb[150].mxu1  ;;  %5230 = vmatmul.mubr.bf16.gmra.mrb[232].mxu0 %v14727_v47  ;;  %v5651_v44 = vshrl.u32 %v14709_v61, 16  ;;  %v5642_v40 = vsel %vm1988_vm0, %v5637_v37, %v14735_v15  ;;  %v5655_v38 = vshll.u32 %v14733_v16, 16 }
 0x36d   : > { %v14739_v7 = vadd.f32 %v10583_v57, %v16443_v59  ;;  %v10682_v62 = vpop.f32.mrb[151].mxu1  ;;  %5237 = vmatprep.mubr.bf16.mxu0 %v14733_v16  ;;  %v14758_v37 = vrot.slane %v5631_v39, 1 }
 0x36e   : > { %v10683_v24 = vadd.f32 %v10682_v62, %v10681_v35  ;;  %v14746_v20 = vadd.f32 %v10680_v23, %v14680_v21  ;;  %v5343_v35 = vld [vmem:[#allocation2 + $0x268] sm:$0x1]  ;;  %v5653_v11 = vor.u32 %v5651_v44, %v14735_v15 }
 0x36f   : > { %v10584_v57 = vpop.f32.mrb[128].mxu0  ;;  %v16449_v44 = vld [vmem:[#allocation20_spill] sm:$0xff] }
 0x370   : > { %16444 = vst [vmem:[#allocation14_spill] sm:$0xff] %v14746_v20  ;;  %5932 = vmatmul.mubr.bf16.gmra.mrb[0].mxu1 %v5618_v63  ;;  %v10585_v55 = vpop.f32.mrb[129].mxu0  ;;  %v14753_v33 = vadd.f32 %v10683_v24, %v14686_v60  ;;  %v6074_v63 = vrot.slane %v6001_v18, 1  ;;  %v5627_v20 = vshrl.u32 %v14702_v31, 16  ;;  %v5657_v60 = vrot.slane %v5655_v38, 1 }
 0x371   : > { %5939 = vmatprep.mubr.bf16.mxu1 %v5642_v40  ;;  %v10586_v59 = vadd.f32 %v10585_v55, %v10584_v57  ;;  %v10587_v62 = vpop.f32.mrb[130].mxu0  ;;  %v16447_v40 = vld [vmem:[#allocation11_spill] sm:$0xff]  ;;  %v5377_v57 = vpack.c.bf16 %v5343_v35, %v5343_v35  ;;  %v16448_v18 = vrot.slane %v16445_v2, 1  ;;  %v5643_v38 = vshrl.u32 %v14727_v47, 16  ;;  %v12031_v47 = vld [vmem:[#allocation3 + $0x148] sm:$0xff]  }
 0x372   : > { %16446 = vst [vmem:[#allocation31_spill] sm:$0xff] %v14753_v33  ;;  %v10588_v21 = vpop.f32.mrb[131].mxu0  ;;  %v10684_v23 = vpop.f32.mrb[152].mxu1  ;;  %v5996_v24 = vld [vmem:[#allocation2 + $0x60] sm:$0xfc]  ;;  %v5629_v39 = vor.u32 %v5627_v20, %v5617_v1  ;;  %v12173_v33 = vld [vmem:[#allocation2 + $0x70] sm:$0xff]  ;;  %v14780_v20 = vsel %vm1988_vm0, %v5653_v11, %v5657_v60 }
 0x373   : > { %v14762_v56 = vadd.f32 %v10586_v59, %v16447_v40  ;;  %v10589_v25 = vadd.f32 %v10588_v21, %v10587_v62  ;;  %v10685_v61 = vpop.f32.mrb[153].mxu1  ;;  %v6076_v53 = vsel %vm2874_vm1, %v6074_v63, %v16448_v18  ;;  %v6000_v31 = vpack.c.bf16 %v12173_v33, %v5996_v24  ;;  %v16450_v21 = vld [vmem:[#allocation12_spill] sm:$0xff]  ;;  %v5342_v40 = vld [vmem:[#allocation2 + $0x260] sm:$0x1]  ;;  %v16452_v18 = vld [vmem:[#allocation13_spill] sm:$0xff] }
 0x374   : > { %v10686_v55 = vadd.f32 %v10685_v61, %v10684_v23  ;;  %v10687_v46 = vpop.f32.mrb[154].mxu1  ;;  %5238 = vmatmul.mubr.bf16.gmra.mrb[236].mxu0 %v14755_v51  ;;  %v5647_v35 = vshll.u32 %v14755_v51, 16  ;;  %v5634_v62 = vsel %vm1988_vm0, %v5629_v39, %v14758_v37  ;;  %v5671_v33 = vshll.u32 %v5377_v57, 16  ;;  %v6641_v39 = vld [vmem:[#allocation2 + $0x208] sm:$0xfe] }
 0x375   : > { %v14769_v26 = vadd.f32 %v10589_v25, %v16449_v44  ;;  %v10688_v59 = vpop.f32.mrb[155].mxu1  ;;  %6297 = vmatprep.mubr.bf16.mxu0 %v6076_v53  ;;  %v5667_v25 = vshrl.u32 %v14733_v16, 16  ;;  %v5645_v11 = vor.u32 %v5643_v38, %v14758_v37  ;;  %v14790_v23 = vpack.c.bf16 %v14663_v17, %v6641_v39 }
 0x376   : > { %v10689_v61 = vadd.f32 %v10688_v59, %v10687_v46  ;;  %v14777_v63 = vadd.f32 %v10686_v55, %v14707_v0  ;;  %v6071_v46 = vrot.slane %v6000_v31, 1  ;;  %v12025_v59 = vld [vmem:[#allocation3 + $0x100] sm:$0xff]   ;;  %v16454_v16 = vrot.slane %v16450_v21, 1 }
 0x377   : > { %v10590_v1 = vpop.f32.mrb[132].mxu0  ;;  %v5376_v53 = vpack.c.bf16 %v5342_v40, %v5342_v40  ;;  %v5673_v38 = vrot.slane %v5671_v33, 1  ;;  %v16456_v17 = vrot.slane %v16452_v18, 1  ;;  %v16457_v39 = vrot.slane %v16445_v2, 1  ;;  %v6640_v40 = vld [vmem:[#allocation2 + $0x200] sm:$0xfe] }
 0x378   : > { %16451 = vst [vmem:[#allocation11_spill] sm:$0xff] %v14777_v63  ;;  %5940 = vmatmul.mubr.bf16.gmra.mrb[4].mxu1 %v5634_v62  ;;  %v10591_v24 = vpop.f32.mrb[133].mxu0  ;;  %v14786_v44 = vadd.f32 %v10689_v61, %v14713_v49  ;;  %v5649_v62 = vrot.slane %v5647_v35, 1  ;;  %v6073_v31 = vsel %vm2874_vm1, %v6071_v46, %v16454_v16  ;;  %v6077_v16 = vrot.slane %v14212_v30, 1  ;;  %v16458_v46 = vld [vmem:[#allocation16_spill] sm:$0xff] }
 0x379   : > { %5947 = vmatprep.mubr.bf16.mxu1 %v14780_v20  ;;  %v10592_v0 = vadd.f32 %v10591_v24, %v10590_v1  ;;  %v10593_v55 = vpop.f32.mrb[134].mxu0  ;;  %v14798_v24 = vor.u32 %v5667_v25, %v5657_v60  ;;  %v6080_v36 = vsel %vm2874_vm1, %v16457_v39, %v16456_v17  ;;  %v12033_v25 = vld [vmem:[#allocation3 + $0x108] sm:$0xff]   ;;  %v14814_v33 = vpack.c.bf16 %v14694_v50, %v6640_v40 }
 0x37a   : > { %16453 = vst [vmem:[#allocation20_spill] sm:$0xff] %v14786_v44  ;;  %v10594_v57 = vpop.f32.mrb[135].mxu0  ;;  %v10690_v63 = vpop.f32.mrb[156].mxu1  ;;  %v14810_v60 = vsel %vm1988_vm0, %v5645_v11, %v5649_v62 }
 0x37b   : > { %v14796_v49 = vadd.f32 %v10592_v0, %v16455_v6  ;;  %v10595_v61 = vadd.f32 %v10594_v57, %v10593_v55  ;;  %v10691_v1 = vpop.f32.mrb[157].mxu1  ;;  %v5659_v55 = vshrl.u32 %v14755_v51, 16  ;;  %v5663_v57 = vshll.u32 %v5376_v53, 16 }
 0x37c   : > { %v10692_v35 = vadd.f32 %v10691_v1, %v10690_v63  ;;  %v10693_v44 = vpop.f32.mrb[158].mxu1  ;;  %6298 = vmatmul.mubr.bf16.vlgmr.msra.gmra.mrb[240].mxu0 %v6073_v31  ;;  %v6695_v63 = vshll.u32 %v14790_v23, 16  ;;  %v12034_v31 = vld [vmem:[#allocation3 + $0x150] sm:$0xff]  }
 0x37d   : > { %v14807_v6 = vadd.f32 %v10595_v61, %v16458_v46  ;;  %11233 = vmatpush3.bf16.msra.mxu0 %v12025_v59  ;;  %v10694_v0 = vpop.f32.mrb[159].mxu1  ;;  %6305 = vmatprep.mubr.bf16.mxu0 %v6080_v36  ;;  %v5674_v36 = vsel %vm1988_vm0, %v14798_v24, %v5673_v38  ;;  %v16460_v38 = vrot.slane %v16450_v21, 1  ;;  %v14833_v46 = vor.u32 %v5659_v55, %v5649_v62  ;;  %v16464_v55 = vld [vmem:[#allocation32_spill] sm:$0xff] }
 0x37e   : > { %v10695_v2 = vadd.f32 %v10694_v0, %v10693_v44  ;;  %11234 = vmatprep.subr.bf16.mxu0 %v12031_v47  ;;  %v14818_v61 = vadd.f32 %v10692_v35, %v14731_v43  ;;  %v6697_v47 = vrot.slane %v6695_v63, 1  ;;  %v6683_v43 = vshll.u32 %v14814_v33, 16  ;;  %v12035_v35 = vld [vmem:[#allocation3 + $0x110] sm:$0xff]  }
 0x37f   : > { %v10596_v59 = vpop.f32.mrb[136].mxu0  ;;  %v6078_v40 = vsel %vm2874_vm1, %v16460_v38, %v6077_v16  ;;  %v5665_v0 = vrot.slane %v5663_v57, 1  ;;  %v16463_v21 = vrot.slane %v16452_v18, 1  ;;  %v6081_v57 = vrot.slane %v16464_v55, 1 }
 0x380   : > { %5948 = vmatmul.mubr.bf16.gmra.mrb[8].mxu1 %v14810_v60  ;;  %v10597_v11 = vpop.f32.mrb[137].mxu0  ;;  %v14825_v44 = vadd.f32 %v10695_v2, %v14739_v7  ;;  %v12036_v7 = vld [vmem:[#allocation3 + $0x158] sm:$0xff]   ;;  %v16461_v2 = vld [vmem:[#allocation22_spill] sm:$0xff] }
 0x381   : > { %5955 = vmatprep.mubr.bf16.mxu1 %v5674_v36  ;;  %v10598_v1 = vadd.f32 %v10597_v11, %v10596_v59  ;;  %v10599_v53 = vpop.f32.mrb[138].mxu0  ;;  %11235 = vmatpush3.bf16.msra.mxu0 %v12033_v25  ;;  %v6693_v36 = vshrl.u32 %v14790_v23, 16  ;;  %v12037_v23 = vld [vmem:[#allocation3 + $0x118] sm:$0xff]  }
 0x382   : > { %16459 = vst [vmem:[#allocation12_spill] sm:$0xff] %v14825_v44  ;;  %v10600_v17 = vpop.f32.mrb[139].mxu0  ;;  %v10696_v39 = vpop.f32.mrb[160].mxu1  ;;  %11236 = vmatprep.subr.bf16.mxu0 %v12034_v31  ;;  %v16462_v44 = vrot.slane %v14260_v32, 1  ;;  %v16465_v31 = vld [vmem:[#allocation34_spill] sm:$0xff] }
 0x383   : > { %v14836_v59 = vadd.f32 %v10598_v1, %v16461_v2  ;;  %v10601_v63 = vadd.f32 %v10600_v17, %v10599_v53  ;;  %v10697_v25 = vpop.f32.mrb[161].mxu1  ;;  %v6698_v53 = vor.u32 %v6697_v47, %v6693_v36  ;;  %v6685_v17 = vrot.slane %v6683_v43, 1  ;;  %v12045_v2 = vld [vmem:[#allocation3 + $0x160] sm:$0xff]   ;;  %v6575_v36 = vld [vmem:[#allocation2 + $0x278] sm:$0xff] }
 0x384   : > { %v10698_v11 = vadd.f32 %v10697_v25, %v10696_v39  ;;  %v10699_v50 = vpop.f32.mrb[162].mxu1  ;;  %6306 = vmatmul.mubr.bf16.gmra.mrb[244].mxu0 %v6078_v40  ;;  %v6084_v62 = vsel %vm2874_vm1, %v16463_v21, %v16462_v44  ;;  %v5666_v40 = vsel %vm1988_vm0, %v14833_v46, %v5665_v0  ;;  %v16466_v47 = vld [vmem:[#allocation33_spill] sm:$0xff] }
 0x385   : > { %v14846_v38 = vadd.f32 %v10601_v63, %v16465_v31  ;;  %v10700_v1 = vpop.f32.mrb[163].mxu1  ;;  %6313 = vmatprep.mubr.bf16.mxu0 %v6084_v62  ;;  %11237 = vmatpush3.bf16.msra.mxu0 %v12035_v35  ;;  %v6703_v63 = vsel %vm1988_vm0, %v6698_v53, %v14735_v15  ;;  %v16277_v43 = vrot.slane %v16466_v47, 1  ;;  %v6681_v35 = vshrl.u32 %v14814_v33, 16  ;;  %v12055_v33 = vld [vmem:[#allocation3 + $0x168] sm:$0xff]  }
 0x386   : > { %v10701_v39 = vadd.f32 %v10700_v1, %v10699_v50  ;;  %11238 = vmatprep.subr.bf16.mxu0 %v12036_v7  ;;  %v14851_v18 = vadd.f32 %v10698_v11, %v14762_v56  ;;  %v6573_v50 = vld [vmem:[#allocation2 + $0x268] sm:$0xff]  ;;  %v12047_v56 = vld [vmem:[#allocation3 + $0x120] sm:$0xff]   ;;  %v6082_v15 = vsel %vm2874_vm1, %v6077_v16, %v6081_v57  ;;  %v16475_v55 = vrot.slane %v16466_v47, 1 }
 0x387   : > { %v10602_v44 = vpop.f32.mrb[140].mxu0  ;;  %v6686_v31 = vor.u32 %v6685_v17, %v6681_v35  ;;  %v16467_v1 = vld [vmem:[#allocation24_spill] sm:$0xff]  ;;  %v12039_v16 = vld [vmem:[#allocation3] sm:$0xff]  }
 0x388   : > { %5956 = vmatmul.mubr.bf16.gmra.mrb[12].mxu1 %v5666_v40  ;;  %v10603_v25 = vpop.f32.mrb[141].mxu0  ;;  %v14858_v0 = vadd.f32 %v10701_v39, %v14769_v26  ;;  %v14868_v40 = vpack.c.bf16 %v6575_v36, %v6573_v50  ;;  %v16469_v17 = vld [vmem:[#allocation36_spill] sm:$0xff]  ;;  %v16470_v50 = vld [vmem:[#allocation15_spill] sm:$0xff] }
 0x389   : > { %6960 = vmatprep.mubr.bf16.mxu1 %v6703_v63  ;;  %v10604_v7 = vadd.f32 %v10603_v25, %v10602_v44  ;;  %v10605_v21 = vpop.f32.mrb[142].mxu0  ;;  %11239 = vmatpush3.bf16.msra.mxu0 %v12037_v23  ;;  %v16468_v63 = vrot.slane %v14260_v32, 1  ;;  %v6691_v35 = vsel %vm1988_vm0, %v6686_v31, %v14758_v37  ;;  %v6085_v36 = vrot.slane %v16470_v50, 1  ;;  %v12058_v32 = vld [vmem:[#allocation3 + $0x170] sm:$0xff]  }
 0x38a   : > { %v10606_v11 = vpop.f32.mrb[143].mxu0  ;;  %v10702_v62 = vpop.f32.mrb[164].mxu1  ;;  %11240 = vmatprep.subr.bf16.mxu0 %v12045_v2  ;;  %v16471_v37 = vld [vmem:[#allocation35_spill] sm:$0xff]  ;;  %v16479_v50 = vrot.slane %v14389_v29, 1 }
 0x38b   : > { %v14866_v53 = vadd.f32 %v10604_v7, %v16467_v1  ;;  %v10607_v26 = vadd.f32 %v10606_v11, %v10605_v21  ;;  %v10703_v39 = vpop.f32.mrb[165].mxu1  ;;  %v6088_v30 = vsel %vm2874_vm1, %v16468_v63, %v16277_v43  ;;  %v12040_v7 = vld [vmem:[#allocation3 + $0x48] sm:$0xff]  }
 0x38c   : > { %v10704_v23 = vadd.f32 %v10703_v39, %v10702_v62  ;;  %v10705_v44 = vpop.f32.mrb[166].mxu1  ;;  %6314 = vmatmul.mubr.bf16.gmra.mrb[248].mxu0 %v6082_v15  ;;  %v12057_v21 = vld [vmem:[#allocation3 + $0x128] sm:$0xff]   ;;  %v6572_v62 = vld [vmem:[#allocation2 + $0x260] sm:$0xff]  ;;  %v6574_v15 = vld [vmem:[#allocation2 + $0x270] sm:$0xff]  ;;  %v6732_v39 = vshll.u32 %v14868_v40, 16 }
 0x38d   : > { %v14876_v2 = vadd.f32 %v10607_v26, %v16469_v17  ;;  %v10706_v25 = vpop.f32.mrb[167].mxu1  ;;  %6321 = vmatprep.mubr.bf16.mxu0 %v6088_v30  ;;  %11241 = vmatpush3.bf16.msra.mxu0 %v12047_v56  ;;  %v6577_v30 = vld [vmem:[#allocation2 + $0x288] sm:$0xff]  ;;  %v12041_v56 = vld [vmem:[#allocation3 + $0x8] sm:$0xff]  }
 0x38e   : > { %v10707_v11 = vadd.f32 %v10706_v25, %v10705_v44  ;;  %11242 = vmatprep.subr.bf16.mxu0 %v12055_v33  ;;  %v14882_v1 = vadd.f32 %v10704_v23, %v14796_v49  ;;  %v14890_v25 = vpack.c.bf16 %v6574_v15, %v6572_v62  ;;  %v12042_v49 = vld [vmem:[#allocation3 + $0x50] sm:$0xff]   ;;  %v16473_v62 = vld [vmem:[#allocation37_spill] sm:$0xff] }
 0x38f   : > { %v10608_v26 = vpop.f32.mrb[144].mxu0 }
 0x390   : > { %6961 = vmatmul.mubr.bf16.vlgmr.msra.gmra.mrb[16].mxu1 %v6691_v35  ;;  %v10609_v63 = vpop.f32.mrb[145].mxu0  ;;  %v14888_v44 = vadd.f32 %v10707_v11, %v14807_v6  ;;  %v6734_v11 = vrot.slane %v6732_v39, 1  ;;  %v6724_v39 = vshll.u32 %v14890_v25, 16 }
 0x391   : > { %6968 = vmatprep.mubr.bf16.mxu1 %v14780_v20  ;;  %11169 = vmatpush3.bf16.msra.mxu1 %v12039_v16  ;;  %v10610_v33 = vadd.f32 %v10609_v63, %v10608_v26  ;;  %v10611_v17 = vpop.f32.mrb[146].mxu0  ;;  %v6086_v20 = vsel %vm2874_vm1, %v6081_v57, %v6085_v36  ;;  %v12059_v16 = vld [vmem:[#allocation3 + $0x130] sm:$0xff]   ;;  %v12174_v26 = vld [vmem:[#allocation2 + $0x298] sm:$0xff] }
 0x392   : > { %16472 = vst [vmem:[#allocation13_spill] sm:$0xff] %v14888_v44  ;;  %11170 = vmatprep.subr.bf16.mxu1 %v12040_v7  ;;  %11243 = vmatpush3.bf16.msra.mxu0 %v12057_v21  ;;  %v10612_v23 = vpop.f32.mrb[147].mxu0  ;;  %v10708_v35 = vpop.f32.mrb[168].mxu1  ;;  %v14897_v63 = vpack.c.bf16 %v12174_v26, %v6577_v30  ;;  %v12060_v21 = vld [vmem:[#allocation3 + $0x178] sm:$0xff]   ;;  %v16474_v44 = vrot.slane %v16471_v37, 1  ;;  %v16476_v30 = vld [vmem:[#allocation38_spill] sm:$0xff] }
 0x393   : > { %11244 = vmatprep.subr.bf16.mxu0 %v12058_v32  ;;  %v10613_v43 = vadd.f32 %v10612_v23, %v10611_v17  ;;  %v10709_v6 = vpop.f32.mrb[169].mxu1  ;;  %v14900_v7 = vadd.f32 %v10610_v33, %v16473_v62  ;;  %v12043_v32 = vld [vmem:[#allocation3 + $0x10] sm:$0xff]   ;;  %v12044_v33 = vld [vmem:[#allocation3 + $0x58] sm:$0xff]   ;;  %v6744_v62 = vshrl.u32 %v14868_v40, 16 }
 0x394   : > { %v10710_v15 = vadd.f32 %v10709_v6, %v10708_v35  ;;  %v10711_v31 = vpop.f32.mrb[170].mxu1  ;;  %6322 = vmatmul.mubr.bf16.gmra.mrb[252].mxu0 %v6086_v20  ;;  %v6092_v57 = vsel %vm2874_vm1, %v16475_v55, %v16474_v44  ;;  %v16477_v35 = vld [vmem:[#allocation23_spill] sm:$0xff]  ;;  %v12061_v26 = vld [vmem:[#allocation3 + $0x138] sm:$0xff]   ;;  %v12069_v55 = vld [vmem:[#allocation3 + $0x240] sm:$0xff]  }
 0x395   : > { %11171 = vmatpush3.bf16.msra.mxu1 %v12041_v56  ;;  %v10712_v17 = vpop.f32.mrb[171].mxu1  ;;  %6329 = vmatprep.mubr.bf16.mxu0 %v6092_v57  ;;  %v14909_v23 = vadd.f32 %v10613_v43, %v16476_v30  ;;  %v16278_v6 = vrot.slane %v16477_v35, 1  ;;  %v6735_v56 = vsel %vm1988_vm0, %v14798_v24, %v6734_v11  ;;  %v6748_v43 = vshll.u32 %v14897_v63, 16  ;;  %v12048_v24 = vld [vmem:[#allocation3 + $0x60] sm:$0xff]  }
 0x396   : > { %11172 = vmatprep.subr.bf16.mxu1 %v12042_v49  ;;  %v10713_v20 = vadd.f32 %v10712_v17, %v10711_v31  ;;  %11245 = vmatpush3.bf16.msra.mxu0 %v12059_v16  ;;  %v14913_v47 = vadd.f32 %v10710_v15, %v14836_v59  ;;  %v6576_v49 = vld [vmem:[#allocation2 + $0x280] sm:$0xff]  ;;  %v12046_v59 = vld [vmem:[#allocation3 + $0x18] sm:$0xff]   ;;  %v6726_v17 = vrot.slane %v6724_v39, 1 }
 0x397   : > { %v10614_v44 = vpop.f32.mrb[148].mxu0  ;;  %11246 = vmatprep.subr.bf16.mxu0 %v12060_v21  ;;  %v6090_v21 = vsel %vm2874_vm1, %v6085_v36, %v16278_v6  ;;  %v16480_v36 = vrot.slane %v16471_v37, 1 }
 0x398   : > { %16478 = vst [vmem:[#allocation17_spill] sm:$0xff] %v14913_v47  ;;  %6969 = vmatmul.mubr.bf16.gmra.mrb[20].mxu1 %v14810_v60  ;;  %v10615_v57 = vpop.f32.mrb[149].mxu0  ;;  %v14922_v16 = vadd.f32 %v10713_v20, %v14846_v38  ;;  %v12175_v47 = vld [vmem:[#allocation2 + $0x290] sm:$0xff]  ;;  %v6746_v20 = vor.u32 %v6744_v62, %v6734_v11  ;;  %v12050_v62 = vld [vmem:[#allocation3 + $0x68] sm:$0xff]  }
 0x399   : > { %6976 = vmatprep.mubr.bf16.mxu1 %v6735_v56  ;;  %11173 = vmatpush3.bf16.msra.mxu1 %v12043_v32  ;;  %v10616_v60 = vadd.f32 %v10615_v57, %v10614_v44  ;;  %v10617_v15 = vpop.f32.mrb[150].mxu0  ;;  %v14929_v31 = vpack.c.bf16 %v12175_v47, %v6576_v49  ;;  %v6750_v44 = vrot.slane %v6748_v43, 1  ;;  %v6096_v6 = vsel %vm2874_vm1, %v16480_v36, %v16479_v50  ;;  %v12049_v47 = vld [vmem:[#allocation3 + $0x20] sm:$0xff]  }
 0x39a   : > { %11174 = vmatprep.subr.bf16.mxu1 %v12044_v33  ;;  %v10618_v30 = vpop.f32.mrb[151].mxu0  ;;  %v10714_v56 = vpop.f32.mrb[172].mxu1  ;;  %11247 = vmatpush3.bf16.msra.mxu0 %v12061_v26  ;;  %v16280_v26 = vrot.slane %v14397_v48, 1 }
 0x39b   : > { %v10619_v32 = vadd.f32 %v10618_v30, %v10617_v15  ;;  %v10715_v38 = vpop.f32.mrb[173].mxu1  ;;  %v14932_v39 = vadd.f32 %v10616_v60, %v14447_v58  ;;  %11360 = vmatprep.subr.bf16.mxu0 %v12069_v55  ;;  %v6727_v58 = vsel %vm1988_vm0, %v14833_v46, %v6726_v17  ;;  %v6736_v55 = vshrl.u32 %v14890_v25, 16 }
 0x39c   : > { %v10716_v33 = vadd.f32 %v10715_v38, %v10714_v56  ;;  %v10717_v57 = vpop.f32.mrb[174].mxu1  ;;  %6330 = vmatmul.mubr.bf16.gmra.mrb[0].mxu0 %v6090_v21  ;;  %v6740_v37 = vshll.u32 %v14929_v31, 16  ;;  %v6760_v15 = vshrl.u32 %v14897_v63, 16  ;;  %v6764_v46 = vshll.u32 %v14430_v22, 16  ;;  %v12051_v21 = vld [vmem:[#allocation3 + $0x28] sm:$0xff]  }
 0x39d   : > { %11175 = vmatpush3.bf16.msra.mxu1 %v12046_v59  ;;  %v10718_v49 = vpop.f32.mrb[175].mxu1  ;;  %6337 = vmatprep.mubr.bf16.mxu0 %v6096_v6  ;;  %v14943_v11 = vadd.f32 %v10619_v32, %v14459_v52  ;;  %v6751_v6 = vsel %vm1988_vm0, %v6746_v20, %v6750_v44  ;;  %v12052_v32 = vld [vmem:[#allocation3 + $0x70] sm:$0xff]   ;;  %v16482_v20 = vrot.slane %v16477_v35, 1  ;;  %v6738_v50 = vor.u32 %v6736_v55, %v6726_v17 }
 0x39e   : > { %11176 = vmatprep.subr.bf16.mxu1 %v12048_v24  ;;  %v10719_v43 = vadd.f32 %v10718_v49, %v10717_v57  ;;  %v14948_v59 = vadd.f32 %v10716_v33, %v14866_v53  ;;  %v16279_v24 = vrot.slane %v14419_v28, 1  ;;  %v6742_v36 = vrot.slane %v6740_v37, 1 }
 0x39f   : > { %v10620_v60 = vpop.f32.mrb[152].mxu0  ;;  %v6094_v57 = vsel %vm2874_vm1, %v16482_v20, %v16280_v26  ;;  %v12053_v20 = vld [vmem:[#allocation3 + $0x30] sm:$0xff]   ;;  %v6752_v55 = vshrl.u32 %v14929_v31, 16 }
 0x3a0   : > { %6977 = vmatmul.mubr.bf16.gmra.mrb[24].mxu1 %v6727_v58  ;;  %v10621_v52 = vpop.f32.mrb[153].mxu0  ;;  %v14955_v30 = vadd.f32 %v10719_v43, %v14876_v2  ;;  %v6762_v58 = vor.u32 %v6760_v15, %v6750_v44  ;;  %v16483_v2 = vld [vmem:[#allocation18_spill] sm:$0xff]  ;;  %v16485_v44 = vld [vmem:[#allocation39_spill] sm:$0xff] }
 0x3a1   : > { %6984 = vmatprep.mubr.bf16.mxu1 %v6751_v6  ;;  %11177 = vmatpush3.bf16.msra.mxu1 %v12049_v47  ;;  %v10622_v56 = vadd.f32 %v10621_v52, %v10620_v60  ;;  %v10623_v53 = vpop.f32.mrb[154].mxu0  ;;  %v6766_v6 = vrot.slane %v6764_v46, 1  ;;  %v16484_v52 = vrot.slane %v14389_v29, 1  ;;  %v6756_v37 = vshll.u32 %v16485_v44, 16  ;;  %v16486_v15 = vld [vmem:[#allocation19_spill] sm:$0xff] }
 0x3a2   : > { %16481 = vst [vmem:[#allocation16_spill] sm:$0xff] %v14955_v30  ;;  %11178 = vmatprep.subr.bf16.mxu1 %v12050_v62  ;;  %v10624_v38 = vpop.f32.mrb[155].mxu0  ;;  %v10720_v33 = vpop.f32.mrb[176].mxu1 }
 0x3a3   : > { %v10625_v49 = vadd.f32 %v10624_v38, %v10623_v53  ;;  %v10721_v47 = vpop.f32.mrb[177].mxu1  ;;  %v14963_v43 = vadd.f32 %v10622_v56, %v16483_v2  ;;  %v6100_v35 = vsel %vm2874_vm1, %v16484_v52, %v16279_v24  ;;  %v12054_v56 = vld [vmem:[#allocation3 + $0x78] sm:$0xff]   ;;  %v16487_v53 = vld [vmem:[#allocation25_spill] sm:$0xff]  ;;  %v6776_v2 = vshrl.u32 %v14430_v22, 16 }
 0x3a4   : > { %v10722_v60 = vadd.f32 %v10721_v47, %v10720_v33  ;;  %v10723_v62 = vpop.f32.mrb[178].mxu1  ;;  %6338 = vmatmul.mubr.bf16.gmra.mrb[4].mxu0 %v6094_v57  ;;  %v16281_v38 = vrot.slane %v16487_v53, 1  ;;  %v6767_v47 = vsel %vm1988_vm0, %v6762_v58, %v6766_v6  ;;  %v16489_v52 = vld [vmem:[#allocation40_spill] sm:$0xff] }
 0x3a5   : > { %11179 = vmatpush3.bf16.msra.mxu1 %v12051_v21  ;;  %v10724_v17 = vpop.f32.mrb[179].mxu1  ;;  %6345 = vmatprep.mubr.bf16.mxu0 %v6100_v35  ;;  %v14973_v46 = vadd.f32 %v10625_v49, %v16486_v15  ;;  %v6743_v21 = vsel %vm1988_vm0, %v6738_v50, %v6742_v36  ;;  %v6780_v35 = vshll.u32 %v16489_v52, 16  ;;  %v16491_v15 = vld [vmem:[#allocation26_spill] sm:$0xff]  ;;  %v6754_v50 = vor.u32 %v6752_v55, %v6742_v36 }
 0x3a6   : > { %11180 = vmatprep.subr.bf16.mxu1 %v12052_v32  ;;  %v14977_v33 = vadd.f32 %v10722_v60, %v14900_v7  ;;  %v10725_v29 = vadd.f32 %v10724_v17, %v10723_v62  ;;  %v6103_v24 = vrot.slane %v16491_v15, 1  ;;  %v12056_v7 = vld [vmem:[#allocation3 + $0x38] sm:$0xff]   ;;  %v6758_v17 = vrot.slane %v6756_v37, 1 }
 0x3a7   : > { %v10626_v57 = vpop.f32.mrb[156].mxu0  ;;  %v6782_v15 = vrot.slane %v6780_v35, 1  ;;  %v16494_v55 = vrot.slane %v14419_v28, 1  ;;  %v6768_v28 = vshrl.u32 %v16485_v44, 16 }
 0x3a8   : > { %16488 = vst [vmem:[#allocation22_spill] sm:$0xff] %v14977_v33  ;;  %6985 = vmatmul.mubr.bf16.gmra.mrb[28].mxu1 %v6743_v21  ;;  %v14984_v49 = vadd.f32 %v10725_v29, %v14909_v23  ;;  %v10627_v32 = vpop.f32.mrb[157].mxu0  ;;  %v12062_v21 = vld [vmem:[#allocation3 + $0x1c0] sm:$0xff]   ;;  %v16492_v33 = vrot.slane %v14397_v48, 1  ;;  %v6759_v48 = vsel %vm1988_vm0, %v6754_v50, %v6758_v17 }
 0x3a9   : > { %6992 = vmatprep.mubr.bf16.mxu1 %v6767_v47  ;;  %11181 = vmatpush3.bf16.msra.mxu1 %v12053_v20  ;;  %v10628_v60 = vadd.f32 %v10627_v32, %v10626_v57  ;;  %v10629_v62 = vpop.f32.mrb[158].mxu0  ;;  %v16493_v20 = vld [vmem:[#allocation27_spill] sm:$0xff]  ;;  %v6104_v37 = vsel %vm2874_vm1, %v16494_v55, %v6103_v24 }
 0x3aa   : > { %16490 = vst [vmem:[#allocation32_spill] sm:$0xff] %v14984_v49  ;;  %11182 = vmatprep.subr.bf16.mxu1 %v12054_v56  ;;  %v10630_v58 = vpop.f32.mrb[159].mxu0  ;;  %v10726_v26 = vpop.f32.mrb[180].mxu1  ;;  %v6098_v23 = vsel %vm2874_vm1, %v16492_v33, %v16281_v38  ;;  %v6778_v49 = vor.u32 %v6776_v2, %v6766_v6  ;;  %v16495_v33 = vld [vmem:[#allocation28_spill] sm:$0xff]  ;;  %v6792_v6 = vshrl.u32 %v16489_v52, 16  ;;  %v16496_v2 = vld [vmem:[#allocation42_spill] sm:$0xff]  ;;  %v6770_v38 = vor.u32 %v6768_v28, %v6758_v17 }
 0x3ab   : > { %v10631_v29 = vadd.f32 %v10630_v58, %v10629_v62  ;;  %v10727_v47 = vpop.f32.mrb[181].mxu1  ;;  %v14993_v30 = vadd.f32 %v10628_v60, %v16493_v20  ;;  %v6796_v35 = vshll.u32 %v16496_v2, 16  ;;  %v16498_v62 = vld [vmem:[#allocation41_spill] sm:$0xff]  ;;  %v6643_v58 = vld [vmem:[#allocation2 + $0x308] sm:$0x1] }
 0x3ac   : > { %v10728_v57 = vadd.f32 %v10727_v47, %v10726_v26  ;;  %v10729_v36 = vpop.f32.mrb[182].mxu1  ;;  %6346 = vmatmul.mubr.bf16.gmra.mrb[8].mxu0 %v6098_v23  ;;  %v6101_v23 = vrot.slane %v14533_v12, 1  ;;  %v6647_v55 = vpack.c.bf16 %v6643_v58, %v6643_v58  ;;  %v6808_v58 = vshrl.u32 %v16496_v2, 16 }
 0x3ad   : > { %11183 = vmatpush3.bf16.msra.mxu1 %v12056_v7  ;;  %v10730_v56 = vpop.f32.mrb[183].mxu1  ;;  %6353 = vmatprep.mubr.bf16.mxu0 %v6104_v37  ;;  %v15000_v32 = vadd.f32 %v10631_v29, %v16495_v33  ;;  %v6772_v7 = vshll.u32 %v16498_v62, 16  ;;  %v6783_v29 = vsel %vm1988_vm0, %v6778_v49, %v6782_v15  ;;  %v6107_v33 = vrot.slane %v14516_v5, 1 }
 0x3ae   : > { %11296 = vmatprep.subr.bf16.mxu1 %v12062_v21  ;;  %v15005_v26 = vadd.f32 %v10728_v57, %v14932_v39  ;;  %v10731_v60 = vadd.f32 %v10730_v56, %v10729_v36  ;;  %v6794_v57 = vor.u32 %v6792_v6, %v6782_v15  ;;  %v6798_v36 = vrot.slane %v6796_v35, 1  ;;  %v16502_v35 = vld [vmem:[#allocation43_spill] sm:$0xff] }
 0x3af   : > { %v10632_v50 = vpop.f32.mrb[160].mxu0  ;;  %v6774_v12 = vrot.slane %v6772_v7, 1  ;;  %v16500_v49 = vrot.slane %v16487_v53, 1  ;;  %v6108_v15 = vsel %vm2874_vm1, %v6103_v24, %v6107_v33  ;;  %v6784_v6 = vshrl.u32 %v16498_v62, 16  ;;  %v16503_v7 = vld [vmem:[#allocation30_spill] sm:$0xff] }
 0x3b0   : > { %16497 = vst [vmem:[#allocation34_spill] sm:$0xff] %v15005_v26  ;;  %6993 = vmatmul.mubr.bf16.gmra.mrb[32].mxu1 %v6759_v48  ;;  %v15012_v47 = vadd.f32 %v10731_v60, %v14943_v11  ;;  %v10633_v20 = vpop.f32.mrb[161].mxu0  ;;  %v16501_v60 = vld [vmem:[#allocation29_spill] sm:$0xff]  ;;  %v6788_v5 = vshll.u32 %v16502_v35, 16  ;;  %v6799_v28 = vsel %vm1988_vm0, %v6794_v57, %v6798_v36 }
 0x3b1   : > { %7000 = vmatprep.mubr.bf16.mxu1 %v6783_v29  ;;  %v10634_v21 = vadd.f32 %v10633_v20, %v10632_v50  ;;  %v10635_v39 = vpop.f32.mrb[162].mxu0  ;;  %v6102_v11 = vsel %vm2874_vm1, %v16500_v49, %v6101_v23  ;;  %v6812_v20 = vshll.u32 %v6647_v55, 16  ;;  %v6775_v24 = vsel %vm1988_vm0, %v6770_v38, %v6774_v12 }
 0x3b2   : > { %16499 = vst [vmem:[#allocation33_spill] sm:$0xff] %v15012_v47  ;;  %v10636_v37 = vpop.f32.mrb[163].mxu0  ;;  %v10732_v56 = vpop.f32.mrb[184].mxu1 }
 0x3b3   : > { %v10637_v26 = vadd.f32 %v10636_v37, %v10635_v39  ;;  %v10733_v48 = vpop.f32.mrb[185].mxu1  ;;  %v15019_v47 = vadd.f32 %v10634_v21, %v16501_v60  ;;  %v6642_v21 = vld [vmem:[#allocation2 + $0x300] sm:$0x1] }
 0x3b4   : > { %v10734_v50 = vadd.f32 %v10733_v48, %v10732_v56  ;;  %v10735_v29 = vpop.f32.mrb[186].mxu1  ;;  %6354 = vmatmul.mubr.bf16.gmra.mrb[12].mxu0 %v6102_v11  ;;  %v6105_v56 = vrot.slane %v14556_v41, 1  ;;  %v6790_v11 = vrot.slane %v6788_v5, 1  ;;  %v6646_v60 = vpack.c.bf16 %v6642_v21, %v6642_v21 }
 0x3b5   : > { %v10736_v17 = vpop.f32.mrb[187].mxu1  ;;  %6361 = vmatprep.mubr.bf16.mxu0 %v6108_v15  ;;  %v15026_v53 = vadd.f32 %v10637_v26, %v16503_v7  ;;  %v6786_v26 = vor.u32 %v6784_v6, %v6774_v12 }
 0x3b6   : > { %v15030_v39 = vadd.f32 %v10734_v50, %v14963_v43  ;;  %v10737_v37 = vadd.f32 %v10736_v17, %v10735_v29  ;;  %v6111_v43 = vrot.slane %v14558_v8, 1  ;;  %v6810_v50 = vor.u32 %v6808_v58, %v6798_v36 }
 0x3b7   : > { %v10638_v48 = vpop.f32.mrb[164].mxu0  ;;  %v6814_v29 = vrot.slane %v6812_v20, 1  ;;  %v6791_v5 = vsel %vm1988_vm0, %v6786_v26, %v6790_v11  ;;  %v6800_v8 = vshrl.u32 %v16502_v35, 16  ;;  %v6804_v36 = vshll.u32 %v6646_v60, 16 }
 0x3b8   : > { %7001 = vmatmul.mubr.bf16.gmra.mrb[36].mxu1 %v6775_v24  ;;  %v15035_v49 = vadd.f32 %v10737_v37, %v14973_v46  ;;  %v10639_v57 = vpop.f32.mrb[165].mxu0  ;;  %v6106_v24 = vsel %vm2874_vm1, %v6101_v23, %v6105_v56  ;;  %v6112_v46 = vsel %vm2874_vm1, %v6107_v33, %v6111_v43  ;;  %v6115_v26 = vrot.slane %v14582_v3, 1 }
 0x3b9   : > { %7008 = vmatprep.mubr.bf16.mxu1 %v6799_v28  ;;  %v10640_v55 = vadd.f32 %v10639_v57, %v10638_v48  ;;  %v10641_v15 = vpop.f32.mrb[166].mxu0  ;;  %v6815_v58 = vsel %vm1988_vm0, %v6810_v50, %v6814_v29  ;;  %v6802_v60 = vor.u32 %v6800_v8, %v6790_v11 }
 0x3ba   : > { %v10642_v17 = vpop.f32.mrb[167].mxu0  ;;  %v10738_v38 = vpop.f32.mrb[188].mxu1  ;;  %v6116_v3 = vsel %vm2874_vm1, %v6111_v43, %v6115_v26  ;;  %v16282_v43 = vrot.slane %v14645_v45, 1 }
 0x3bb   : > { %v10643_v7 = vadd.f32 %v10642_v17, %v10641_v15  ;;  %v10739_v41 = vpop.f32.mrb[189].mxu1  ;;  %v15041_v37 = vadd.f32 %v10640_v55, %v14632_v42  ;;  %v6806_v55 = vrot.slane %v6804_v36, 1  ;;  %v6109_v15 = vrot.slane %v14580_v19, 1 }
 0x3bc   : > { %v10740_v12 = vadd.f32 %v10739_v41, %v10738_v38  ;;  %v10741_v6 = vpop.f32.mrb[190].mxu1  ;;  %6362 = vmatmul.mubr.bf16.gmra.mrb[16].mxu0 %v6106_v24  ;;  %v6113_v36 = vrot.slane %v14643_v27, 1 }
 0x3bd   : > { %v10742_v28 = vpop.f32.mrb[191].mxu1  ;;  %6369 = vmatprep.mubr.bf16.mxu0 %v6112_v46  ;;  %v15047_v20 = vadd.f32 %v10643_v7, %v14639_v4  ;;  %v6110_v7 = vsel %vm2874_vm1, %v6105_v56, %v6109_v15  ;;  %v6807_v11 = vsel %vm1988_vm0, %v6802_v60, %v6806_v55 }
 0x3be   : > { %v15050_v23 = vadd.f32 %v10740_v12, %v14993_v30  ;;  %v10743_v42 = vadd.f32 %v10742_v28, %v10741_v6  ;;  %v585_v33 = vpop.permute.xlu1 %584  ;;  %v6561_v12 = vld [vmem:[#allocation2 + $0x208] sm:$0xff] }
 0x3bf   : > { %v10644_v21 = vpop.f32.mrb[168].mxu0 }
 0x3c0   : > { %7009 = vmatmul.mubr.bf16.gmra.mrb[40].mxu1 %v6791_v5  ;;  %v15053_v48 = vadd.f32 %v10743_v42, %v15000_v32  ;;  %v10645_v57 = vpop.f32.mrb[169].mxu0 }
 0x3c1   : > { %7016 = vmatprep.mubr.bf16.mxu1 %v6815_v58  ;;  %v10646_v4 = vadd.f32 %v10645_v57, %v10644_v21  ;;  %v10647_v50 = vpop.f32.mrb[170].mxu0  ;;  %v708_v21 = vmul.f32 %v12598_v14, %v585_v33 }
 0x3c2   : > { %v10648_v29 = vpop.f32.mrb[171].mxu0  ;;  %v10744_v30 = vpop.f32.mrb[192].mxu1 }
 0x3c3   : > { %v10649_v17 = vadd.f32 %v10648_v29, %v10647_v50  ;;  %v10745_v38 = vpop.f32.mrb[193].mxu1  ;;  %v15059_v41 = vadd.f32 %v10646_v4, %v14658_v54  ;;  %v15069_v54 = vld [vmem:[#allocation2 + $0x218] sm:$0xff] }
 0x3c4   : > { %v10746_v24 = vadd.f32 %v10745_v38, %v10744_v30  ;;  %v10747_v46 = vpop.f32.mrb[194].mxu1  ;;  %6370 = vmatmul.mubr.bf16.gmra.mrb[20].mxu0 %v6110_v7  ;;  %v6593_v8 = vpack.c.bf16 %v15069_v54, %v6561_v12 }
 0x3c5   : > { %v923_v32 = vpop.permute.xlu1 %922  ;;  %v10748_v19 = vpop.f32.mrb[195].mxu1  ;;  %6377 = vmatprep.mubr.bf16.mxu0 %v6116_v3  ;;  %v15064_v6 = vadd.f32 %v10649_v17, %v14668_v34  ;;  %v16504_v3 = vld [vmem:[#allocation46_spill] sm:$0xff] }
 0x3c6   : > { %v15067_v5 = vadd.f32 %v10746_v24, %v15019_v47  ;;  %v10749_v56 = vadd.f32 %v10748_v19, %v10747_v46  ;;  %v707_v47 = vmul.f32 %v12596_v13, %v585_v33  ;;  %v590_v60 = vpop.permute.xlu0 %589  ;;  %v1044_v50 = vmul.f32 %v12591_v9, %v923_v32 }
 0x3c7   : > { %v10650_v28 = vpop.f32.mrb[172].mxu0  ;;  %v1045_v29 = vmul.f32 %v12593_v10, %v923_v32  ;;  %v709_v38 = vmul.f32 %v12596_v13, %v590_v60  ;;  %v710_v7 = vmul.f32 %v12598_v14, %v590_v60  ;;  %v6114_v33 = vsel %vm2874_vm1, %v6109_v15, %v6113_v36  ;;  %v12063_v32 = vld [vmem:[#allocation3 + $0x180] sm:$0xff]   ;;  %v16505_v14 = vld [vmem:[#allocation47_spill] sm:$0xff]  ;;  %v16506_v60 = vld [vmem:[#allocation44_spill] sm:$0xff] }
 0x3c8   : > { %7017 = vmatmul.mubr.bf16.gmra.mrb[44].mxu1 %v6807_v11  ;;  %v15075_v42 = vadd.f32 %v10749_v56, %v15026_v53  ;;  %v10651_v34 = vpop.f32.mrb[173].mxu0 }
 0x3c9   : > { %v927_v58 = vpop.permute.xlu1 %926  ;;  %7153 = vmatprep.mubr.bf16.mxu1 %v6593_v8  ;;  %v10652_v55 = vadd.f32 %v10651_v34, %v10650_v28  ;;  %v10653_v4 = vpop.f32.mrb[174].mxu0  ;;  %v12064_v8 = vld [vmem:[#allocation3 + $0x1c8] sm:$0xff]   ;;  %v1152_v28 = vadd.f32 %v1044_v50, %v707_v47  ;;  %v1153_v15 = vadd.f32 %v1045_v29, %v708_v21  ;;  %v16510_v29 = vld [vmem:[#allocation49_spill] sm:$0xff] }
 0x3ca   : > { %v1046_v57 = vmul.f32 %v12591_v9, %v927_v58  ;;  %v1047_v30 = vmul.f32 %v12593_v10, %v927_v58  ;;  %v10654_v17 = vpop.f32.mrb[175].mxu0  ;;  %v10750_v53 = vpop.f32.mrb[196].mxu1  ;;  %v6120_v10 = vsel %vm2874_vm1, %v6115_v26, %v16282_v43 }
 0x3cb   : > { %v10655_v24 = vadd.f32 %v10654_v17, %v10653_v4  ;;  %v10751_v46 = vpop.f32.mrb[197].mxu1  ;;  %v15089_v11 = vadd.f32 %v10652_v55, %v16504_v3  ;;  %v6117_v55 = vrot.slane %v16506_v60, 1 }
 0x3cc   : > { %v10752_v9 = vadd.f32 %v10751_v46, %v10750_v53  ;;  %v10753_v19 = vpop.f32.mrb[198].mxu1  ;;  %6378 = vmatmul.mubr.bf16.gmra.mrb[24].mxu0 %v6114_v33  ;;  %v1154_v13 = vadd.f32 %v1046_v57, %v709_v38  ;;  %v1155_v58 = vadd.f32 %v1047_v30, %v710_v7  ;;  %v16507_v53 = vld [vmem:[#allocation9_spill] sm:$0xff]  ;;  %v16508_v38 = vld [vmem:[#allocation48_spill] sm:$0xff]  ;;  %v16509_v33 = vld [vmem:[#allocation10_spill] sm:$0xff] }
 0x3cd   : > { %v10754_v12 = vpop.f32.mrb[199].mxu1  ;;  %6385 = vmatprep.mubr.bf16.mxu0 %v6120_v10  ;;  %v15095_v56 = vadd.f32 %v10655_v24, %v16505_v14  ;;  %v12065_v7 = vld [vmem:[#allocation3 + $0x188] sm:$0xff]  }
 0x3ce   : > { %v1371_v34 = vpop.permute.xlu1 %1370  ;;  %v15099_v4 = vadd.f32 %v10752_v9, %v15041_v37  ;;  %v10755_v17 = vadd.f32 %v10754_v12, %v10753_v19  ;;  %v1367_v46 = vpop.permute.xlu0 %1366  ;;  %v16511_v37 = vld [vmem:[#allocation45_spill] sm:$0xff]  ;;  %v12066_v12 = vld [vmem:[#allocation3 + $0x1d0] sm:$0xff]  }
 0x3cf   : > { %v1490_v26 = vmul.f32 %v16507_v53, %v1371_v34  ;;  %v10784_v57 = vpop.f32.mrb[176].mxu0  ;;  %v1491_v24 = vmul.f32 %v16509_v33, %v1371_v34  ;;  %v1488_v3 = vmul.f32 %v16507_v53, %v1367_v46  ;;  %v1489_v47 = vmul.f32 %v16509_v33, %v1367_v46  ;;  %v16512_v33 = vld [vmem:[#allocation50_spill] sm:$0xff] }
 0x3d0   : > { %7154 = vmatmul.mubr.bf16.vlgmr.msra.gmra.mrb[48].mxu1 %v16508_v38  ;;  %v15107_v21 = vadd.f32 %v10755_v17, %v15047_v20  ;;  %v10785_v50 = vpop.f32.mrb[177].mxu0  ;;  %v6123_v30 = vrot.slane %v16511_v37, 1  ;;  %v6118_v20 = vsel %vm2874_vm1, %v6113_v36, %v6117_v55  ;;  %v16514_v36 = vld [vmem:[#allocation51_spill] sm:$0xff]  ;;  %v12068_v37 = vld [vmem:[#allocation3 + $0x1d8] sm:$0xff]  }
 0x3d1   : > { %7161 = vmatprep.mubr.bf16.mxu1 %v16510_v29  ;;  %11297 = vmatpush3.bf16.msra.mxu1 %v12063_v32  ;;  %v1598_v9 = vadd.f32 %v1490_v26, %v1154_v13  ;;  %v10786_v19 = vadd.f32 %v10785_v50, %v10784_v57  ;;  %v10787_v10 = vpop.f32.mrb[178].mxu0  ;;  %v1599_v14 = vadd.f32 %v1491_v24, %v1155_v58  ;;  %v12067_v24 = vld [vmem:[#allocation3 + $0x190] sm:$0xff]  }
 0x3d2   : > { %11298 = vmatprep.subr.bf16.mxu1 %v12064_v8  ;;  %v1596_v34 = vadd.f32 %v1488_v3, %v1152_v28  ;;  %v1597_v53 = vadd.f32 %v1489_v47, %v1153_v15  ;;  %v10756_v43 = vpop.f32.mrb[200].mxu1  ;;  %v10788_v46 = vpop.f32.mrb[179].mxu0  ;;  %v16513_v28 = vrot.slane %v14645_v45, 1 }
 0x3d3   : > { %v1706_v17 = vmax.f32 %v1598_v9, 0.0  ;;  %v15117_v32 = vadd.f32 %v10786_v19, %v16512_v33  ;;  %v10789_v13 = vadd.f32 %v10788_v46, %v10787_v10  ;;  %v10757_v26 = vpop.f32.mrb[201].mxu1  ;;  %v1707_v57 = vmax.f32 %v1599_v14, 0.0  ;;  %v16515_v19 = vld [vmem:[#allocation52_spill] sm:$0xff] }
 0x3d4   : > { %v1704_v8 = vmax.f32 %v1596_v34, 0.0  ;;  %v10758_v50 = vadd.f32 %v10757_v26, %v10756_v43  ;;  %v10759_v58 = vpop.f32.mrb[202].mxu1  ;;  %6386 = vmatmul.mubr.bf16.gmra.mrb[28].mxu0 %v6118_v20  ;;  %v6124_v15 = vsel %vm2874_vm1, %v16513_v28, %v6123_v30  ;;  %v1705_v27 = vmax.f32 %v1597_v53, 0.0  ;;  %v16516_v34 = vld [vmem:[#allocation53_spill] sm:$0xff]  ;;  %v12070_v53 = vld [vmem:[#allocation3 + $0x198] sm:$0xff]   ;;  %v16518_v28 = vld [vmem:[#allocation31_spill] sm:$0xff] }
 0x3d5   : > { %11299 = vmatpush3.bf16.msra.mxu1 %v12065_v7  ;;  %1814 = vst [vmem:[#allocation2 + $0x350] sm:$0xff] %v1706_v17  ;;  %v15123_v3 = vadd.f32 %v10789_v13, %v16514_v36  ;;  %v10760_v47 = vpop.f32.mrb[203].mxu1  ;;  %6393 = vmatprep.mubr.bf16.mxu0 %v6124_v15  ;;  %1815 = vst [vmem:[#allocation2 + $0x358] sm:$0xff] %v1707_v57  ;;  %v6121_v7 = vrot.slane %v16508_v38, 1  ;;  %v12072_v20 = vld [vmem:[#allocation3 + $0x1e0] sm:$0xff]   ;;  %v16517_v13 = vld [vmem:[#allocation14_spill] sm:$0xff] }
 0x3d6   : > { %11300 = vmatprep.subr.bf16.mxu1 %v12066_v12  ;;  %1812 = vst [vmem:[#allocation2 + $0x340] sm:$0xff] %v1704_v8  ;;  %v15126_v43 = vadd.f32 %v10758_v50, %v15059_v41  ;;  %v10761_v9 = vadd.f32 %v10760_v47, %v10759_v58  ;;  %1813 = vst [vmem:[#allocation2 + $0x348] sm:$0xff] %v1705_v27  ;;  %v15135_v12 = vrot.slane %v16510_v29, 1  ;;  %v12073_v58 = vld [vmem:[#allocation3 + $0x1a0] sm:$0xff]   ;;  %v12074_v27 = vld [vmem:[#allocation3 + $0x1e8] sm:$0xff]   ;;  %v15153_v47 = vrot.slane %v16515_v19, 1 }
 0x3d7   : > { %v10790_v45 = vpop.f32.mrb[180].mxu0  ;;  %v6122_v57 = vsel %vm2874_vm1, %v6117_v55, %v6121_v7 }
 0x3d8   : > { %7162 = vmatmul.mubr.bf16.gmra.mrb[52].mxu1 %v16515_v19  ;;  %v15131_v10 = vadd.f32 %v10761_v9, %v15064_v6  ;;  %v10791_v14 = vpop.f32.mrb[181].mxu0  ;;  %v6128_v50 = vsel %vm2874_vm1, %v6123_v30, %v15135_v12  ;;  %v15160_v9 = vrot.slane %v16516_v34, 1  ;;  %v16519_v19 = vld [vmem:[#allocation11_spill] sm:$0xff] }
 0x3d9   : > { %7169 = vmatprep.mubr.bf16.mxu1 %v16516_v34  ;;  %11301 = vmatpush3.bf16.msra.mxu1 %v12067_v24  ;;  %v10792_v41 = vadd.f32 %v10791_v14, %v10790_v45  ;;  %v10793_v46 = vpop.f32.mrb[182].mxu0  ;;  %v12076_v45 = vld [vmem:[#allocation3 + $0x1a8] sm:$0xff]  }
 0x3da   : > { %11302 = vmatprep.subr.bf16.mxu1 %v12068_v37  ;;  %v10762_v17 = vpop.f32.mrb[204].mxu1  ;;  %v10794_v33 = vpop.f32.mrb[183].mxu0 }
 0x3db   : > { %v15138_v26 = vadd.f32 %v10792_v41, %v16517_v13  ;;  %v10795_v38 = vadd.f32 %v10794_v33, %v10793_v46  ;;  %v10763_v6 = vpop.f32.mrb[205].mxu1  ;;  %v12078_v41 = vld [vmem:[#allocation3 + $0x1f0] sm:$0xff]   ;;  %v6126_v13 = vsel %vm2874_vm1, %v6121_v7, %v15153_v47 }
 0x3dc   : > { %v10764_v8 = vadd.f32 %v10763_v6, %v10762_v17  ;;  %v10765_v29 = vpop.f32.mrb[206].mxu1  ;;  %6394 = vmatmul.mubr.bf16.gmra.mrb[32].mxu0 %v6122_v57  ;;  %v15170_v6 = vsel %vm2874_vm1, %v15135_v12, %v15160_v9 }
 0x3dd   : > { %11303 = vmatpush3.bf16.msra.mxu1 %v12070_v53  ;;  %v15146_v15 = vadd.f32 %v10795_v38, %v16518_v28  ;;  %v10766_v24 = vpop.f32.mrb[207].mxu1  ;;  %6401 = vmatprep.mubr.bf16.mxu0 %v6128_v50  ;;  %v5999_v53 = vld [vmem:[#allocation2 + $0x268] sm:$0x3] }
 0x3de   : > { %11304 = vmatprep.subr.bf16.mxu1 %v12072_v20  ;;  %v15149_v36 = vadd.f32 %v10764_v8, %v15089_v11  ;;  %v10767_v60 = vadd.f32 %v10766_v24, %v10765_v29  ;;  %v6003_v57 = vpack.c.bf16 %v5999_v53, %v5999_v53  ;;  %v12079_v8 = vld [vmem:[#allocation3 + $0x1b0] sm:$0xff]   ;;  %v16520_v29 = vld [vmem:[#allocation20_spill] sm:$0xff] }
 0x3df   : > { %v10796_v55 = vpop.f32.mrb[184].mxu0  ;;  %v12080_v28 = vld [vmem:[#allocation3 + $0x1f8] sm:$0xff]  }
 0x3e0   : > { %7170 = vmatmul.mubr.bf16.gmra.mrb[56].mxu1 %v14755_v51  ;;  %v15156_v30 = vadd.f32 %v10767_v60, %v15095_v56  ;;  %v10797_v37 = vpop.f32.mrb[185].mxu0  ;;  %v15181_v60 = vrot.slane %v14755_v51, 1 }
 0x3e1   : > { %7177 = vmatprep.mubr.bf16.mxu1 %v14868_v40  ;;  %11305 = vmatpush3.bf16.msra.mxu1 %v12073_v58  ;;  %v10798_v11 = vadd.f32 %v10797_v37, %v10796_v55  ;;  %v10799_v14 = vpop.f32.mrb[186].mxu0 }
 0x3e2   : > { %11306 = vmatprep.subr.bf16.mxu1 %v12074_v27  ;;  %v10800_v46 = vpop.f32.mrb[187].mxu0  ;;  %v10896_v20 = vpop.f32.mrb[208].mxu1 }
 0x3e3   : > { %v15163_v17 = vadd.f32 %v10798_v11, %v16519_v19  ;;  %v10801_v56 = vadd.f32 %v10800_v46, %v10799_v14  ;;  %v10897_v33 = vpop.f32.mrb[209].mxu1  ;;  %v5998_v11 = vld [vmem:[#allocation2 + $0x260] sm:$0x3]  ;;  %v12082_v14 = vld [vmem:[#allocation3 + $0x1b8] sm:$0xff]  }
 0x3e4   : > { %v10898_v38 = vadd.f32 %v10897_v33, %v10896_v20  ;;  %v10899_v34 = vpop.f32.mrb[210].mxu1  ;;  %6402 = vmatmul.mubr.bf16.gmra.mrb[36].mxu0 %v6126_v13  ;;  %v6002_v33 = vpack.c.bf16 %v5998_v11, %v5998_v11 }
 0x3e5   : > { %11307 = vmatpush3.bf16.msra.mxu1 %v12076_v45  ;;  %v15173_v50 = vadd.f32 %v10801_v56, %v16520_v29  ;;  %v10900_v58 = vpop.f32.mrb[211].mxu1  ;;  %6409 = vmatprep.mubr.bf16.mxu0 %v15170_v6  ;;  %v6135_v45 = vrot.slane %v6003_v57, 1  ;;  %v16521_v57 = vld [vmem:[#allocation12_spill] sm:$0xff] }
 0x3e6   : > { %11308 = vmatprep.subr.bf16.mxu1 %v12078_v41  ;;  %v15177_v7 = vadd.f32 %v10898_v38, %v15117_v32  ;;  %v10901_v24 = vadd.f32 %v10900_v58, %v10899_v34  ;;  %v12092_v41 = vld [vmem:[#allocation3 + $0x2c0] sm:$0xff]   ;;  %v7219_v29 = vld [vmem:[#allocation2 + $0x208] sm:$0xfc] }
 0x3e7   : > { %v10802_v27 = vpop.f32.mrb[188].mxu0  ;;  %v6136_v34 = vsel %vm2874_vm1, %v15160_v9, %v6135_v45 }
 0x3e8   : > { %7178 = vmatmul.mubr.bf16.gmra.mrb[60].mxu1 %v14890_v25  ;;  %v15184_v55 = vadd.f32 %v10901_v24, %v15123_v3  ;;  %v10803_v37 = vpop.f32.mrb[189].mxu0  ;;  %v15193_v3 = vsel %vm2874_vm1, %v15153_v47, %v15181_v60  ;;  %v7223_v24 = vpack.c.bf16 %v15069_v54, %v7219_v29 }
 0x3e9   : > { %7185 = vmatprep.mubr.bf16.mxu1 %v14897_v63  ;;  %11309 = vmatpush3.bf16.msra.mxu1 %v12079_v8  ;;  %v10804_v53 = vadd.f32 %v10803_v37, %v10802_v27  ;;  %v10805_v32 = vpop.f32.mrb[190].mxu0  ;;  %v6133_v37 = vrot.slane %v6002_v33, 1 }
 0x3ea   : > { %11310 = vmatprep.subr.bf16.mxu1 %v12080_v28  ;;  %v10806_v46 = vpop.f32.mrb[191].mxu0  ;;  %v10902_v20 = vpop.f32.mrb[212].mxu1 }
 0x3eb   : > { %v15188_v19 = vadd.f32 %v10804_v53, %v14818_v61  ;;  %v10807_v51 = vadd.f32 %v10806_v46, %v10805_v32  ;;  %v10903_v56 = vpop.f32.mrb[213].mxu1  ;;  %v7279_v46 = vrot.slane %v7223_v24, 1 }
 0x3ec   : > { %v10904_v13 = vadd.f32 %v10903_v56, %v10902_v20  ;;  %v10905_v38 = vpop.f32.mrb[214].mxu1  ;;  %6410 = vmatmul.mubr.bf16.gmra.mrb[40].mxu0 %v15193_v3 }
 0x3ed   : > { %11311 = vmatpush3.bf16.msra.mxu1 %v12082_v14  ;;  %v15199_v8 = vadd.f32 %v10807_v51, %v16521_v57  ;;  %v10906_v61 = vpop.f32.mrb[215].mxu1  ;;  %6417 = vmatprep.mubr.bf16.mxu0 %v6136_v34  ;;  %v6134_v51 = vsel %vm2874_vm1, %v15181_v60, %v6133_v37  ;;  %v12177_v57 = vld [vmem:[#allocation2 + $0x210] sm:$0xff] }
 0x3ee   : > { %11424 = vmatprep.subr.bf16.mxu1 %v12092_v41  ;;  %v15202_v58 = vadd.f32 %v10904_v13, %v15138_v26  ;;  %v10907_v28 = vadd.f32 %v10906_v61, %v10905_v38  ;;  %v7218_v13 = vld [vmem:[#allocation2 + $0x200] sm:$0xfc] }
 0x3ef   : > { %v10808_v27 = vpop.f32.mrb[192].mxu0 }
 0x3f0   : > { %7186 = vmatmul.mubr.bf16.gmra.mrb[64].mxu1 %v14929_v31  ;;  %v15207_v45 = vadd.f32 %v10907_v28, %v15146_v15  ;;  %v10809_v11 = vpop.f32.mrb[193].mxu0  ;;  %v7281_v15 = vsel %vm2874_vm1, %v7279_v46, %v15135_v12 }
 0x3f1   : > { %7193 = vmatprep.mubr.bf16.mxu1 %v14430_v22  ;;  %v10810_v14 = vadd.f32 %v10809_v11, %v10808_v27  ;;  %v10811_v53 = vpop.f32.mrb[194].mxu0  ;;  %v12071_v11 = vld [vmem:[#allocation3 + $0x200] sm:$0xff]  }
 0x3f2   : > { %v10812_v32 = vpop.f32.mrb[195].mxu0  ;;  %v10908_v41 = vpop.f32.mrb[216].mxu1 }
 0x3f3   : > { %v15211_v26 = vadd.f32 %v10810_v14, %v14851_v18  ;;  %v10813_v20 = vadd.f32 %v10812_v32, %v10811_v53  ;;  %v10909_v54 = vpop.f32.mrb[217].mxu1  ;;  %v7222_v18 = vpack.c.bf16 %v12177_v57, %v7218_v13  ;;  %v12075_v32 = vld [vmem:[#allocation3 + $0x248] sm:$0xff]  }
 0x3f4   : > { %v10910_v56 = vadd.f32 %v10909_v54, %v10908_v41  ;;  %v10911_v33 = vpop.f32.mrb[218].mxu1  ;;  %6418 = vmatmul.mubr.bf16.gmra.mrb[44].mxu0 %v6134_v51  ;;  %v16522_v51 = vld [vmem:[#allocation13_spill] sm:$0xff] }
 0x3f5   : > { %v15218_v38 = vadd.f32 %v10813_v20, %v14858_v0  ;;  %v10912_v34 = vpop.f32.mrb[219].mxu1  ;;  %7454 = vmatprep.mubr.bf16.mxu0 %v7281_v15  ;;  %v7276_v37 = vrot.slane %v7222_v18, 1  ;;  %v12077_v15 = vld [vmem:[#allocation3 + $0x208] sm:$0xff]  }
 0x3f6   : > { %v15221_v61 = vadd.f32 %v10910_v56, %v15163_v17  ;;  %v10913_v29 = vadd.f32 %v10912_v34, %v10911_v33  ;;  %v12081_v34 = vld [vmem:[#allocation3 + $0x250] sm:$0xff]  }
 0x3f7   : > { %v10814_v28 = vpop.f32.mrb[196].mxu0  ;;  %v7278_v20 = vsel %vm2874_vm1, %v7276_v37, %v15153_v47  ;;  %v16523_v37 = vld [vmem:[#allocation17_spill] sm:$0xff] }
 0x3f8   : > { %7194 = vmatmul.mubr.bf16.gmra.mrb[68].mxu1 %v16485_v44  ;;  %v15225_v24 = vadd.f32 %v10913_v29, %v15173_v50  ;;  %v10815_v27 = vpop.f32.mrb[197].mxu0  ;;  %v7288_v29 = vrot.slane %v14868_v40, 1 }
 0x3f9   : > { %7201 = vmatprep.mubr.bf16.mxu1 %v16489_v52  ;;  %v10816_v12 = vadd.f32 %v10815_v27, %v10814_v28  ;;  %v10817_v0 = vpop.f32.mrb[198].mxu0  ;;  %v12083_v27 = vld [vmem:[#allocation3 + $0x210] sm:$0xff]  }
 0x3fa   : > { %v10818_v14 = vpop.f32.mrb[199].mxu0  ;;  %v10914_v53 = vpop.f32.mrb[220].mxu1  ;;  %v7289_v40 = vsel %vm2874_vm1, %v15160_v9, %v7288_v29 }
 0x3fb   : > { %v15229_v17 = vadd.f32 %v10816_v12, %v14882_v1  ;;  %v10819_v41 = vadd.f32 %v10818_v14, %v10817_v0  ;;  %v10915_v46 = vpop.f32.mrb[221].mxu1  ;;  %v12084_v0 = vld [vmem:[#allocation3 + $0x258] sm:$0xff]  }
 0x3fc   : > { %v10916_v50 = vadd.f32 %v10915_v46, %v10914_v53  ;;  %v10917_v54 = vpop.f32.mrb[222].mxu1  ;;  %7455 = vmatmul.mubr.bf16.vlgmr.msra.gmra.mrb[48].mxu0 %v7278_v20 }
 0x3fd   : > { %v15234_v56 = vadd.f32 %v10819_v41, %v16522_v51  ;;  %11361 = vmatpush3.bf16.msra.mxu0 %v12071_v11  ;;  %v10918_v33 = vpop.f32.mrb[223].mxu1  ;;  %7462 = vmatprep.mubr.bf16.mxu0 %v15170_v6 }
 0x3fe   : > { %v15238_v13 = vadd.f32 %v10916_v50, %v15188_v19  ;;  %v10919_v1 = vadd.f32 %v10918_v33, %v10917_v54  ;;  %11362 = vmatprep.subr.bf16.mxu0 %v12075_v32  ;;  %v15255_v50 = vld [vmem:[#allocation2 + $0x248] sm:$0xff] }
 0x3ff   : > { %v10820_v57 = vpop.f32.mrb[200].mxu0  ;;  %v12085_v54 = vld [vmem:[#allocation3 + $0x218] sm:$0xff]  }
 0x400   : > { %7202 = vmatmul.mubr.bf16.gmra.mrb[72].mxu1 %v16498_v62  ;;  %v15242_v47 = vadd.f32 %v10919_v1, %v15199_v8  ;;  %v10821_v18 = vpop.f32.mrb[201].mxu0  ;;  %v7536_v8 = vld [vmem:[#allocation2 + $0x238] sm:$0xff] }
 0x401   : > { %7209 = vmatprep.mubr.bf16.mxu1 %v16496_v2  ;;  %v10822_v28 = vadd.f32 %v10821_v18, %v10820_v57  ;;  %v10823_v6 = vpop.f32.mrb[202].mxu0  ;;  %11363 = vmatpush3.bf16.msra.mxu0 %v12077_v15  ;;  %v7568_v15 = vpack.c.bf16 %v15255_v50, %v7536_v8  ;;  %v7292_v57 = vrot.slane %v14897_v63, 1 }
 0x402   : > { %v10824_v19 = vpop.f32.mrb[203].mxu0  ;;  %v10920_v12 = vpop.f32.mrb[224].mxu1  ;;  %11364 = vmatprep.subr.bf16.mxu0 %v12081_v34 }
 0x403   : > { %v15247_v11 = vadd.f32 %v10822_v28, %v16523_v37  ;;  %v10825_v14 = vadd.f32 %v10824_v19, %v10823_v6  ;;  %v10921_v53 = vpop.f32.mrb[225].mxu1  ;;  %v12087_v28 = vld [vmem:[#allocation3 + $0x220] sm:$0xff]   ;;  %v12088_v19 = vld [vmem:[#allocation3 + $0x268] sm:$0xff]   ;;  %v7293_v8 = vsel %vm2874_vm1, %v7288_v29, %v7292_v57  ;;  %v7290_v29 = vrot.slane %v14929_v31, 1 }
 0x404   : > { %v10922_v32 = vadd.f32 %v10921_v53, %v10920_v12  ;;  %v10923_v41 = vpop.f32.mrb[226].mxu1  ;;  %7463 = vmatmul.mubr.bf16.gmra.mrb[52].mxu0 %v15193_v3  ;;  %v12086_v3 = vld [vmem:[#allocation3 + $0x260] sm:$0xff]   ;;  %v7540_v37 = vld [vmem:[#allocation2 + $0x258] sm:$0xff] }
 0x405   : > { %v15253_v46 = vadd.f32 %v10825_v14, %v14922_v16  ;;  %v10924_v20 = vpop.f32.mrb[227].mxu1  ;;  %7470 = vmatprep.mubr.bf16.mxu0 %v7289_v40  ;;  %11365 = vmatpush3.bf16.msra.mxu0 %v12083_v27  ;;  %v7286_v16 = vrot.slane %v14890_v25, 1  ;;  %v7542_v14 = vld [vmem:[#allocation2 + $0x268] sm:$0xff] }
 0x406   : > { %v15258_v51 = vadd.f32 %v10922_v32, %v15211_v26  ;;  %v10925_v33 = vadd.f32 %v10924_v20, %v10923_v41  ;;  %11366 = vmatprep.subr.bf16.mxu0 %v12084_v0  ;;  %v12093_v32 = vld [vmem:[#allocation3 + $0x280] sm:$0xff]   ;;  %v16524_v41 = vld [vmem:[#allocation16_spill] sm:$0xff] }
 0x407   : > { %v10826_v1 = vpop.f32.mrb[204].mxu0 }
 0x408   : > { %7210 = vmatmul.mubr.bf16.gmra.mrb[76].mxu1 %v16502_v35  ;;  %v15264_v9 = vadd.f32 %v10925_v33, %v15218_v38  ;;  %v10827_v34 = vpop.f32.mrb[205].mxu0  ;;  %v7287_v38 = vsel %vm2874_vm1, %v15181_v60, %v7286_v16 }
 0x409   : > { %7743 = vmatprep.mubr.bf16.mxu1 %v7568_v15  ;;  %v10828_v18 = vadd.f32 %v10827_v34, %v10826_v1  ;;  %v10829_v26 = vpop.f32.mrb[206].mxu0  ;;  %11367 = vmatpush3.bf16.msra.mxu0 %v12085_v54  ;;  %v12095_v54 = vld [vmem:[#allocation3 + $0x2c8] sm:$0xff]   ;;  %v15279_v15 = vpack.c.bf16 %v7542_v14, %v7540_v37  ;;  %v16525_v34 = vld [vmem:[#allocation21_spill] sm:$0xff]  ;;  %v7541_v37 = vld [vmem:[#allocation2 + $0x260] sm:$0xff] }
 0x40a   : > { %v10830_v6 = vpop.f32.mrb[207].mxu0  ;;  %v10926_v27 = vpop.f32.mrb[228].mxu1  ;;  %11368 = vmatprep.subr.bf16.mxu0 %v12086_v3  ;;  %v12090_v3 = vld [vmem:[#allocation3 + $0x270] sm:$0xff]   ;;  %v12094_v14 = vld [vmem:[#allocation3 + $0x278] sm:$0xff]  }
 0x40b   : > { %v15268_v12 = vadd.f32 %v10828_v18, %v14948_v59  ;;  %v10831_v0 = vadd.f32 %v10830_v6, %v10829_v26  ;;  %v10927_v25 = vpop.f32.mrb[229].mxu1  ;;  %v12089_v59 = vld [vmem:[#allocation3 + $0x228] sm:$0xff]  }
 0x40c   : > { %v10928_v53 = vadd.f32 %v10927_v25, %v10926_v27  ;;  %v10929_v63 = vpop.f32.mrb[230].mxu1  ;;  %7471 = vmatmul.mubr.bf16.gmra.mrb[56].mxu0 %v7287_v38 }
 0x40d   : > { %v15274_v40 = vadd.f32 %v10831_v0, %v16524_v41  ;;  %v10930_v20 = vpop.f32.mrb[231].mxu1  ;;  %7478 = vmatprep.mubr.bf16.mxu0 %v7293_v8  ;;  %11369 = vmatpush3.bf16.msra.mxu0 %v12087_v28  ;;  %v7296_v28 = vrot.slane %v14430_v22, 1  ;;  %v7539_v0 = vld [vmem:[#allocation2 + $0x250] sm:$0xff] }
 0x40e   : > { %v15277_v33 = vadd.f32 %v10928_v53, %v15229_v17  ;;  %v10931_v60 = vadd.f32 %v10930_v20, %v10929_v63  ;;  %11370 = vmatprep.subr.bf16.mxu0 %v12088_v19  ;;  %v12097_v17 = vld [vmem:[#allocation3 + $0x288] sm:$0xff]   ;;  %v12091_v19 = vld [vmem:[#allocation3 + $0x230] sm:$0xff]  }
 0x40f   : > { %v10832_v1 = vpop.f32.mrb[208].mxu0  ;;  %v16527_v53 = vld [vmem:[#allocation22_spill] sm:$0xff] }
 0x410   : > { %7744 = vmatmul.mubr.bf16.vlgmr.msra.gmra.mrb[80].mxu1 %v16525_v34  ;;  %v15284_v18 = vadd.f32 %v10931_v60, %v15234_v56  ;;  %v10833_v26 = vpop.f32.mrb[209].mxu0  ;;  %v12098_v56 = vld [vmem:[#allocation3 + $0x2d0] sm:$0xff]   ;;  %v7544_v20 = vld [vmem:[#allocation2 + $0x278] sm:$0xff]  ;;  %v7546_v60 = vld [vmem:[#allocation2 + $0x288] sm:$0xff] }
 0x411   : > { %7751 = vmatprep.mubr.bf16.mxu1 %v15279_v15  ;;  %11425 = vmatpush3.bf16.msra.mxu1 %v12093_v32  ;;  %v10834_v6 = vadd.f32 %v10833_v26, %v10832_v1  ;;  %v10835_v27 = vpop.f32.mrb[210].mxu0  ;;  %v7291_v32 = vsel %vm2874_vm1, %v7286_v16, %v7290_v29  ;;  %v16528_v34 = vld [vmem:[#allocation32_spill] sm:$0xff] }
 0x412   : > { %16526 = vst [vmem:[#allocation24_spill] sm:$0xff] %v15284_v18  ;;  %11371 = vmatpush3.bf16.msra.mxu0 %v12089_v59  ;;  %11426 = vmatprep.subr.bf16.mxu1 %v12095_v54  ;;  %v10836_v25 = vpop.f32.mrb[211].mxu0  ;;  %v10932_v38 = vpop.f32.mrb[232].mxu1  ;;  %v7297_v54 = vsel %vm2874_vm1, %v7292_v57, %v7296_v28  ;;  %v12096_v16 = vld [vmem:[#allocation3 + $0x238] sm:$0xff]   ;;  %v12101_v57 = vld [vmem:[#allocation3 + $0x340] sm:$0xff]   ;;  %v16540_v18 = vrot.slane %v16496_v2, 1 }
 0x413   : > { %11372 = vmatprep.subr.bf16.mxu0 %v12090_v3  ;;  %v15289_v63 = vadd.f32 %v10834_v6, %v16527_v53  ;;  %v10837_v8 = vadd.f32 %v10836_v25, %v10835_v27  ;;  %v10933_v41 = vpop.f32.mrb[233].mxu1  ;;  %v12099_v3 = vld [vmem:[#allocation3 + $0x290] sm:$0xff]   ;;  %v15300_v27 = vpack.c.bf16 %v7541_v37, %v7539_v0  ;;  %v12100_v25 = vld [vmem:[#allocation3 + $0x2d8] sm:$0xff]  }
 0x414   : > { %v10934_v59 = vadd.f32 %v10933_v41, %v10932_v38  ;;  %v10935_v1 = vpop.f32.mrb[234].mxu1  ;;  %7479 = vmatmul.mubr.bf16.gmra.mrb[60].mxu0 %v7291_v32  ;;  %v15305_v41 = vpack.c.bf16 %v7546_v60, %v7544_v20  ;;  %v12102_v37 = vld [vmem:[#allocation3 + $0x298] sm:$0xff]  }
 0x415   : > { %11427 = vmatpush3.bf16.msra.mxu1 %v12097_v17  ;;  %v15298_v26 = vadd.f32 %v10837_v8, %v16528_v34  ;;  %v10936_v6 = vpop.f32.mrb[235].mxu1  ;;  %7486 = vmatprep.mubr.bf16.mxu0 %v7297_v54  ;;  %v7294_v8 = vrot.slane %v16485_v44, 1  ;;  %v16531_v44 = vld [vmem:[#allocation34_spill] sm:$0xff] }
 0x416   : > { %11373 = vmatpush3.bf16.msra.mxu0 %v12091_v19  ;;  %v15303_v38 = vadd.f32 %v10934_v59, %v15247_v11  ;;  %v10937_v53 = vadd.f32 %v10936_v6, %v10935_v1  ;;  %11428 = vmatprep.subr.bf16.mxu1 %v12098_v56  ;;  %v16283_v11 = vrot.slane %v16489_v52, 1  ;;  %v7543_v59 = vld [vmem:[#allocation2 + $0x270] sm:$0xff]  ;;  %v7545_v1 = vld [vmem:[#allocation2 + $0x280] sm:$0xff]  ;;  %v7548_v6 = vld [vmem:[#allocation2 + $0x298] sm:$0xff] }
 0x417   : > { %11374 = vmatprep.subr.bf16.mxu0 %v12094_v14  ;;  %v10838_v17 = vpop.f32.mrb[212].mxu0  ;;  %v12104_v14 = vld [vmem:[#allocation3 + $0x2e0] sm:$0xff]   ;;  %v15328_v31 = vpack.c.bf16 %v7545_v1, %v7543_v59  ;;  %v7825_v59 = vld [vmem:[#allocation2 + $0x238] sm:$0xfe] }
 0x418   : > { %16529 = vst [vmem:[#allocation36_spill] sm:$0xff] %v15303_v38  ;;  %7752 = vmatmul.mubr.bf16.gmra.mrb[84].mxu1 %v15300_v27  ;;  %v15310_v0 = vadd.f32 %v10937_v53, %v15253_v46  ;;  %v10839_v19 = vpop.f32.mrb[213].mxu0  ;;  %v7550_v53 = vld [vmem:[#allocation2 + $0x2a8] sm:$0xff] }
 0x419   : > { %7759 = vmatprep.mubr.bf16.mxu1 %v15305_v41  ;;  %11429 = vmatpush3.bf16.msra.mxu1 %v12099_v3  ;;  %v10840_v32 = vadd.f32 %v10839_v19, %v10838_v17  ;;  %v10841_v20 = vpop.f32.mrb[214].mxu0  ;;  %v7295_v3 = vsel %vm2874_vm1, %v7290_v29, %v7294_v8  ;;  %v16532_v19 = vld [vmem:[#allocation33_spill] sm:$0xff]  ;;  %v12106_v29 = vld [vmem:[#allocation3 + $0x2e8] sm:$0xff]  }
 0x41a   : > { %16530 = vst [vmem:[#allocation15_spill] sm:$0xff] %v15310_v0  ;;  %11375 = vmatpush3.bf16.msra.mxu0 %v12096_v16  ;;  %11430 = vmatprep.subr.bf16.mxu1 %v12100_v25  ;;  %v10842_v56 = vpop.f32.mrb[215].mxu0  ;;  %v7301_v25 = vsel %vm2874_vm1, %v7296_v28, %v16283_v11  ;;  %v16284_v28 = vrot.slane %v16498_v62, 1  ;;  %v7554_v11 = vld [vmem:[#allocation2 + $0x2c8] sm:$0xff] }
 0x41b   : > { %v10938_v60 = vpop.f32.mrb[236].mxu1  ;;  %11488 = vmatprep.subr.bf16.mxu0 %v12101_v57  ;;  %v15315_v46 = vadd.f32 %v10840_v32, %v16531_v44  ;;  %v10843_v54 = vadd.f32 %v10842_v56, %v10841_v20  ;;  %v12105_v57 = vld [vmem:[#allocation3 + $0x2a0] sm:$0xff]   ;;  %v15333_v44 = vpack.c.bf16 %v7550_v53, %v7548_v6  ;;  %v12110_v6 = vld [vmem:[#allocation3 + $0x2f0] sm:$0xff]  }
 0x41c   : > { %v10939_v34 = vpop.f32.mrb[237].mxu1  ;;  %7487 = vmatmul.mubr.bf16.gmra.mrb[64].mxu0 %v7295_v3  ;;  %v7221_v3 = vld [vmem:[#allocation2 + $0x308] sm:$0x3] }
 0x41d   : > { %v10940_v17 = vadd.f32 %v10939_v34, %v10938_v60  ;;  %v10941_v16 = vpop.f32.mrb[238].mxu1  ;;  %11431 = vmatpush3.bf16.msra.mxu1 %v12102_v37  ;;  %v15326_v32 = vadd.f32 %v10843_v54, %v16532_v19  ;;  %7494 = vmatprep.mubr.bf16.mxu0 %v7301_v25  ;;  %v7549_v25 = vld [vmem:[#allocation2 + $0x2a0] sm:$0xff] }
 0x41e   : > { %v10942_v20 = vpop.f32.mrb[239].mxu1  ;;  %11432 = vmatprep.subr.bf16.mxu1 %v12104_v14  ;;  %v16285_v14 = vrot.slane %v16496_v2, 1 }
 0x41f   : > { %v15331_v56 = vadd.f32 %v10940_v17, %v15268_v12  ;;  %v10943_v60 = vadd.f32 %v10942_v20, %v10941_v16  ;;  %v10844_v22 = vpop.f32.mrb[216].mxu0  ;;  %v12108_v12 = vld [vmem:[#allocation3 + $0x2a8] sm:$0xff]   ;;  %v7547_v16 = vld [vmem:[#allocation2 + $0x290] sm:$0xff] }
 0x420   : > { %7760 = vmatmul.mubr.bf16.gmra.mrb[88].mxu1 %v15328_v31  ;;  %v10845_v54 = vpop.f32.mrb[217].mxu0 }
 0x421   : > { %16533 = vst [vmem:[#allocation35_spill] sm:$0xff] %v15331_v56  ;;  %v15338_v37 = vadd.f32 %v10943_v60, %v15274_v40  ;;  %7767 = vmatprep.mubr.bf16.mxu1 %v15333_v44  ;;  %11433 = vmatpush3.bf16.msra.mxu1 %v12105_v57  ;;  %v10846_v1 = vadd.f32 %v10845_v54, %v10844_v22  ;;  %v10847_v34 = vpop.f32.mrb[218].mxu0  ;;  %v7552_v57 = vld [vmem:[#allocation2 + $0x2b8] sm:$0xff] }
 0x422   : > { %11434 = vmatprep.subr.bf16.mxu1 %v12106_v29  ;;  %v10848_v53 = vpop.f32.mrb[219].mxu0  ;;  %v7299_v60 = vsel %vm2874_vm1, %v7294_v8, %v16284_v28  ;;  %v15349_v22 = vpack.c.bf16 %v15255_v50, %v7825_v59  ;;  %v15359_v28 = vpack.c.bf16 %v7549_v25, %v7547_v16  ;;  %v12112_v59 = vld [vmem:[#allocation3 + $0x2f8] sm:$0xff]  }
 0x423   : > { %16534 = vst [vmem:[#allocation37_spill] sm:$0xff] %v15338_v37  ;;  %v10944_v17 = vpop.f32.mrb[240].mxu1  ;;  %v15343_v40 = vadd.f32 %v10846_v1, %v15030_v39  ;;  %v10849_v19 = vadd.f32 %v10848_v53, %v10847_v34  ;;  %v16535_v37 = vrot.slane %v16489_v52, 1  ;;  %v7225_v1 = vpack.c.bf16 %v7221_v3, %v7221_v3  ;;  %v12111_v34 = vld [vmem:[#allocation3 + $0x2b0] sm:$0xff]  }
 0x424   : > { %v10945_v20 = vpop.f32.mrb[241].mxu1  ;;  %7495 = vmatmul.mubr.bf16.gmra.mrb[68].mxu0 %v7299_v60  ;;  %v15364_v60 = vpack.c.bf16 %v7554_v11, %v7552_v57  ;;  %v7923_v25 = vshll.u32 %v15349_v22, 16  ;;  %v12114_v11 = vld [vmem:[#allocation3 + $0x2b8] sm:$0xff]  }
 0x425   : > { %v10946_v29 = vadd.f32 %v10945_v20, %v10944_v17  ;;  %v10947_v54 = vpop.f32.mrb[242].mxu1  ;;  %v7305_v39 = vsel %vm2874_vm1, %v16535_v37, %v16285_v14  ;;  %11435 = vmatpush3.bf16.msra.mxu1 %v12108_v12  ;;  %v15357_v53 = vadd.f32 %v10849_v19, %v15035_v49  ;;  %v7824_v12 = vld [vmem:[#allocation2 + $0x230] sm:$0xfe]  ;;  %v15368_v49 = vld [vmem:[#allocation2 + $0x240] sm:$0xff] }
 0x426   : > { %v10948_v8 = vpop.f32.mrb[243].mxu1  ;;  %7502 = vmatprep.mubr.bf16.mxu0 %v7305_v39  ;;  %11436 = vmatprep.subr.bf16.mxu1 %v12110_v6  ;;  %v7308_v6 = vrot.slane %v7225_v1, 1  ;;  %v7553_v14 = vld [vmem:[#allocation2 + $0x2c0] sm:$0xff] }
 0x427   : > { %v15362_v17 = vadd.f32 %v10946_v29, %v15289_v63  ;;  %v10949_v20 = vadd.f32 %v10948_v8, %v10947_v54  ;;  %v10850_v52 = vpop.f32.mrb[220].mxu0  ;;  %v7220_v63 = vld [vmem:[#allocation2 + $0x300] sm:$0x3]  ;;  %v12124_v29 = vld [vmem:[#allocation3 + $0x3c0] sm:$0xff]  }
 0x428   : > { %7768 = vmatmul.mubr.bf16.gmra.mrb[92].mxu1 %v15359_v28  ;;  %v10851_v16 = vpop.f32.mrb[221].mxu0  ;;  %v7551_v8 = vld [vmem:[#allocation2 + $0x2b0] sm:$0xff]  ;;  %v7224_v56 = vpack.c.bf16 %v7220_v63, %v7220_v63 }
 0x429   : > { %16536 = vst [vmem:[#allocation38_spill] sm:$0xff] %v15362_v17  ;;  %v15371_v3 = vadd.f32 %v10949_v20, %v15298_v26  ;;  %7775 = vmatprep.mubr.bf16.mxu1 %v15364_v60  ;;  %11437 = vmatpush3.bf16.msra.mxu1 %v12111_v34  ;;  %v10852_v19 = vadd.f32 %v10851_v16, %v10850_v52  ;;  %v10853_v57 = vpop.f32.mrb[222].mxu0  ;;  %v7928_v26 = vshll.u32 %v15279_v15, 16  ;;  %v16538_v34 = vrot.slane %v16502_v35, 1  ;;  %v7556_v16 = vld [vmem:[#allocation2 + $0x2d8] sm:$0xff]  ;;  %v7558_v17 = vld [vmem:[#allocation2 + $0x2e8] sm:$0xff] }
 0x42a   : > { %11438 = vmatprep.subr.bf16.mxu1 %v12112_v59  ;;  %v10854_v54 = vpop.f32.mrb[223].mxu0  ;;  %v7858_v20 = vpack.c.bf16 %v15368_v49, %v7824_v12  ;;  %v16539_v52 = vrot.slane %v16498_v62, 1  ;;  %v7309_v12 = vsel %vm2874_vm1, %v16540_v18, %v7308_v6 }
 0x42b   : > { %16537 = vst [vmem:[#allocation23_spill] sm:$0xff] %v15371_v3  ;;  %v10950_v39 = vpop.f32.mrb[244].mxu1  ;;  %v15378_v37 = vadd.f32 %v10852_v19, %v15050_v23  ;;  %v10855_v1 = vadd.f32 %v10854_v54, %v10853_v57  ;;  %v7921_v23 = vshrl.u32 %v15349_v22, 16  ;;  %v7925_v19 = vrot.slane %v7923_v25, 1 }
 0x42c   : > { %v10951_v3 = vpop.f32.mrb[245].mxu1  ;;  %v7303_v59 = vsel %vm2874_vm1, %v16539_v52, %v16538_v34  ;;  %v15392_v54 = vpack.c.bf16 %v7553_v14, %v7551_v8  ;;  %v7911_v2 = vshll.u32 %v7858_v20, 16  ;;  %v7306_v22 = vrot.slane %v7224_v56, 1  ;;  %v7557_v8 = vld [vmem:[#allocation2 + $0x2e0] sm:$0xff] }
 0x42d   : > { %v10952_v0 = vadd.f32 %v10951_v3, %v10950_v39  ;;  %v10953_v38 = vpop.f32.mrb[246].mxu1  ;;  %7503 = vmatmul.mubr.bf16.gmra.mrb[72].mxu0 %v7303_v59  ;;  %11439 = vmatpush3.bf16.msra.mxu1 %v12114_v11  ;;  %v15390_v57 = vadd.f32 %v10855_v1, %v15053_v48  ;;  %v15397_v39 = vpack.c.bf16 %v7558_v17, %v7556_v16  ;;  %v7930_v25 = vrot.slane %v7928_v26, 1  ;;  %v7555_v17 = vld [vmem:[#allocation2 + $0x2d0] sm:$0xff]  ;;  %v7560_v26 = vld [vmem:[#allocation2 + $0x2f8] sm:$0xff] }
 0x42e   : > { %v10954_v62 = vpop.f32.mrb[247].mxu1  ;;  %7510 = vmatprep.mubr.bf16.mxu0 %v7309_v12  ;;  %11552 = vmatprep.subr.bf16.mxu1 %v12124_v29  ;;  %v7926_v14 = vor.u32 %v7925_v19, %v7921_v23  ;;  %v7909_v1 = vshrl.u32 %v7858_v20, 16  ;;  %v7913_v34 = vrot.slane %v7911_v2, 1  ;;  %v16541_v59 = vrot.slane %v16502_v35, 1  ;;  %v7562_v12 = vld [vmem:[#allocation2 + $0x308] sm:$0xff] }
 0x42f   : > { %v15395_v3 = vadd.f32 %v10952_v0, %v15315_v46  ;;  %v10955_v63 = vadd.f32 %v10954_v62, %v10953_v38  ;;  %v10856_v18 = vpop.f32.mrb[224].mxu0  ;;  %v7916_v0 = vshll.u32 %v15300_v27, 16  ;;  %v7944_v20 = vshll.u32 %v15305_v41, 16 }
 0x430   : > { %7776 = vmatmul.mubr.bf16.gmra.mrb[96].mxu1 %v15392_v54  ;;  %v10857_v48 = vpop.f32.mrb[225].mxu0  ;;  %v7307_v16 = vsel %vm2874_vm1, %v16541_v59, %v7306_v22  ;;  %v7931_v62 = vsel %vm1988_vm0, %v7926_v14, %v7930_v25 }
 0x431   : > { %v15401_v6 = vadd.f32 %v10955_v63, %v15326_v32  ;;  %7783 = vmatprep.mubr.bf16.mxu1 %v15397_v39  ;;  %v10858_v11 = vadd.f32 %v10857_v48, %v10856_v18  ;;  %v10859_v29 = vpop.f32.mrb[226].mxu0  ;;  %v7940_v63 = vshrl.u32 %v15279_v15, 16  ;;  %v15417_v18 = vpack.c.bf16 %v7557_v8, %v7555_v17 }
 0x432   : > { %v10860_v38 = vpop.f32.mrb[227].mxu0  ;;  %v7918_v35 = vrot.slane %v7916_v0, 1  ;;  %v7946_v17 = vrot.slane %v7944_v20, 1 }
 0x433   : > { %v10956_v46 = vpop.f32.mrb[248].mxu1  ;;  %v15406_v56 = vadd.f32 %v10858_v11, %v15067_v5  ;;  %v10861_v32 = vadd.f32 %v10860_v38, %v10859_v29  ;;  %v15422_v11 = vpack.c.bf16 %v7562_v12, %v7560_v26  ;;  %v7914_v29 = vor.u32 %v7913_v34, %v7909_v1  ;;  %v7561_v1 = vld [vmem:[#allocation2 + $0x300] sm:$0xff]  ;;  %v12107_v34 = vld [vmem:[#allocation3 + $0x348] sm:$0xff]  }
 0x434   : > { %v10957_v52 = vpop.f32.mrb[249].mxu1 }
 0x435   : > { %v10958_v23 = vadd.f32 %v10957_v52, %v10956_v46  ;;  %v10959_v19 = vpop.f32.mrb[250].mxu1  ;;  %7511 = vmatmul.mubr.bf16.gmra.mrb[76].mxu0 %v7307_v16  ;;  %v15415_v5 = vadd.f32 %v10861_v32, %v15075_v42  ;;  %v7942_v46 = vor.u32 %v7940_v63, %v7930_v25  ;;  %v12103_v32 = vld [vmem:[#allocation3 + $0x300] sm:$0xff]   ;;  %v7919_v59 = vsel %vm1988_vm0, %v7914_v29, %v7918_v35 }
 0x436   : > { %v10960_v2 = vpop.f32.mrb[251].mxu1  ;;  %8188 = vmatprep.mubr.bf16.mxu0 %v7931_v62  ;;  %v7559_v16 = vld [vmem:[#allocation2 + $0x2f0] sm:$0xff]  ;;  %v7932_v25 = vshrl.u32 %v15300_v27, 16  ;;  %v7936_v62 = vshll.u32 %v15328_v31, 16  ;;  %v7960_v29 = vshll.u32 %v15333_v44, 16 }
 0x437   : > { %v15420_v22 = vadd.f32 %v10958_v23, %v15343_v40  ;;  %v10961_v48 = vadd.f32 %v10960_v2, %v10959_v19  ;;  %v10862_v14 = vpop.f32.mrb[228].mxu0  ;;  %v7564_v23 = vld [vmem:[#allocation2 + $0x318] sm:$0xff]  ;;  %v7566_v19 = vld [vmem:[#allocation2 + $0x328] sm:$0xff]  ;;  %v7947_v2 = vsel %vm1988_vm0, %v7942_v46, %v7946_v17  ;;  %v12113_v46 = vld [vmem:[#allocation3 + $0x350] sm:$0xff]  }
 0x438   : > { %7784 = vmatmul.mubr.bf16.gmra.mrb[100].mxu1 %v15417_v18  ;;  %v10863_v42 = vpop.f32.mrb[229].mxu0 }
 0x439   : > { %v15426_v38 = vadd.f32 %v10961_v48, %v15357_v53  ;;  %7791 = vmatprep.mubr.bf16.mxu1 %v15422_v11  ;;  %v10864_v8 = vadd.f32 %v10863_v42, %v10862_v14  ;;  %v10865_v0 = vpop.f32.mrb[230].mxu0  ;;  %v7956_v48 = vshrl.u32 %v15305_v41, 16  ;;  %v8270_v14 = vld [vmem:[#allocation2 + $0x238] sm:$0xfc] }
 0x43a   : > { %v10866_v40 = vpop.f32.mrb[231].mxu0 }
 0x43b   : > { %16542 = vst [vmem:[#allocation18_spill] sm:$0xff] %v15426_v38  ;;  %v10962_v52 = vpop.f32.mrb[252].mxu1  ;;  %v15431_v26 = vadd.f32 %v10864_v8, %v15099_v4  ;;  %v10867_v53 = vadd.f32 %v10866_v40, %v10865_v0  ;;  %v15441_v8 = vpack.c.bf16 %v7561_v1, %v7559_v16  ;;  %v12109_v0 = vld [vmem:[#allocation3 + $0x308] sm:$0xff]   ;;  %v7934_v38 = vor.u32 %v7932_v25, %v7918_v35 }
 0x43c   : > { %v10963_v12 = vpop.f32.mrb[253].mxu1  ;;  %v7962_v1 = vrot.slane %v7960_v29, 1 }
 0x43d   : > { %v10964_v63 = vadd.f32 %v10963_v12, %v10962_v52  ;;  %v10965_v20 = vpop.f32.mrb[254].mxu1  ;;  %8189 = vmatmul.mubr.bf16.vlgmr.msra.gmra.mrb[80].mxu0 %v7919_v59  ;;  %v15439_v4 = vadd.f32 %v10867_v53, %v15107_v21  ;;  %v15446_v59 = vpack.c.bf16 %v7566_v19, %v7564_v23  ;;  %v7938_v21 = vrot.slane %v7936_v62, 1  ;;  %v7565_v62 = vld [vmem:[#allocation2 + $0x320] sm:$0xff] }
 0x43e   : > { %11489 = vmatpush3.bf16.msra.mxu0 %v12103_v32  ;;  %v10966_v42 = vpop.f32.mrb[255].mxu1  ;;  %8196 = vmatprep.mubr.bf16.mxu0 %v7947_v2  ;;  %v8274_v32 = vpack.c.bf16 %v15255_v50, %v8270_v14  ;;  %v8269_v2 = vld [vmem:[#allocation2 + $0x230] sm:$0xfc]  ;;  %v7948_v50 = vshrl.u32 %v15328_v31, 16  ;;  %v12116_v14 = vld [vmem:[#allocation3 + $0x358] sm:$0xff]   ;;  %v7976_v19 = vshll.u32 %v15364_v60, 16 }
 0x43f   : > { %v15444_v40 = vadd.f32 %v10964_v63, %v15378_v37  ;;  %v10967_v52 = vadd.f32 %v10966_v42, %v10965_v20  ;;  %11490 = vmatprep.subr.bf16.mxu0 %v12107_v34  ;;  %v10868_v12 = vpop.f32.mrb[232].mxu0  ;;  %v7958_v37 = vor.u32 %v7956_v48, %v7946_v17  ;;  %v7563_v34 = vld [vmem:[#allocation2 + $0x310] sm:$0xff]  ;;  %v12115_v20 = vld [vmem:[#allocation3 + $0x310] sm:$0xff]   ;;  %v7939_v42 = vsel %vm1988_vm0, %v7934_v38, %v7938_v21 }
 0x440   : > { %7792 = vmatmul.mubr.bf16.gmra.mrb[104].mxu1 %v15441_v8  ;;  %v10869_v16 = vpop.f32.mrb[233].mxu0  ;;  %v8273_v38 = vpack.c.bf16 %v15368_v49, %v8269_v2 }
 0x441   : > { %16543 = vst [vmem:[#allocation39_spill] sm:$0xff] %v15444_v40  ;;  %v15451_v53 = vadd.f32 %v10967_v52, %v15390_v57  ;;  %7799 = vmatprep.mubr.bf16.mxu1 %v15446_v59  ;;  %v10870_v63 = vadd.f32 %v10869_v16, %v10868_v12  ;;  %v10871_v23 = vpop.f32.mrb[234].mxu0  ;;  %v7952_v57 = vshll.u32 %v15359_v28, 16  ;;  %v7963_v16 = vsel %vm1988_vm0, %v7958_v37, %v7962_v1 }
 0x442   : > { %11491 = vmatpush3.bf16.msra.mxu0 %v12109_v0  ;;  %v10872_v35 = vpop.f32.mrb[235].mxu0  ;;  %v8330_v0 = vrot.slane %v8274_v32, 1  ;;  %v12117_v32 = vld [vmem:[#allocation3 + $0x318] sm:$0xff]   ;;  %v7950_v37 = vor.u32 %v7948_v50, %v7938_v21  ;;  %v12119_v21 = vld [vmem:[#allocation3 + $0x320] sm:$0xff]  }
 0x443   : > { %16544 = vst [vmem:[#allocation19_spill] sm:$0xff] %v15451_v53  ;;  %v10968_v25 = vpop.f32.mrb[0].mxu1  ;;  %11492 = vmatprep.subr.bf16.mxu0 %v12113_v46  ;;  %v15458_v17 = vadd.f32 %v10870_v63, %v15126_v43  ;;  %v10873_v48 = vadd.f32 %v10872_v35, %v10871_v23  ;;  %v7972_v46 = vshrl.u32 %v15333_v44, 16  ;;  %v15467_v43 = vpack.c.bf16 %v7565_v62, %v7563_v34 }
 0x444   : > { %v10969_v29 = vpop.f32.mrb[1].mxu1  ;;  %v7954_v35 = vrot.slane %v7952_v57, 1 }
 0x445   : > { %v10970_v52 = vadd.f32 %v10969_v29, %v10968_v25  ;;  %v10971_v12 = vpop.f32.mrb[2].mxu1  ;;  %8197 = vmatmul.mubr.bf16.gmra.mrb[84].mxu0 %v7939_v42  ;;  %v15465_v53 = vadd.f32 %v10873_v48, %v15131_v10  ;;  %v12118_v25 = vld [vmem:[#allocation3 + $0x360] sm:$0xff]   ;;  %v16545_v10 = vrot.slane %v15279_v15, 1  ;;  %v7974_v2 = vor.u32 %v7972_v46, %v7962_v1 }
 0x446   : > { %v10972_v40 = vpop.f32.mrb[3].mxu1  ;;  %8204 = vmatprep.mubr.bf16.mxu0 %v7963_v16  ;;  %11493 = vmatpush3.bf16.msra.mxu0 %v12115_v20  ;;  %v8327_v48 = vrot.slane %v8273_v38, 1  ;;  %v8328_v42 = vrot.slane %v15300_v27, 1  ;;  %v7964_v16 = vshrl.u32 %v15359_v28, 16  ;;  %v7968_v46 = vshll.u32 %v15392_v54, 16 }
 0x447   : > { %v15471_v63 = vadd.f32 %v10970_v52, %v15406_v56  ;;  %v10973_v23 = vadd.f32 %v10972_v40, %v10971_v12  ;;  %11494 = vmatprep.subr.bf16.mxu0 %v12116_v14  ;;  %v10874_v29 = vpop.f32.mrb[236].mxu0  ;;  %v8332_v34 = vsel %vm2874_vm1, %v8330_v0, %v16545_v10  ;;  %v7978_v56 = vrot.slane %v7976_v19, 1 }
 0x448   : > { %7800 = vmatmul.mubr.bf16.gmra.mrb[108].mxu1 %v15467_v43  ;;  %v10875_v49 = vpop.f32.mrb[237].mxu0  ;;  %v7955_v14 = vsel %vm1988_vm0, %v7950_v37, %v7954_v35  ;;  %v16286_v0 = vrot.slane %v15305_v41, 1  ;;  %v12300_v52 = vmov 0.0   ;;  %v7988_v37 = vshrl.u32 %v15364_v60, 16 }
 0x449   : > { %v15478_v20 = vadd.f32 %v10973_v23, %v15415_v5  ;;  %8505 = vmatprep.mubr.bf16.mxu1 %v8332_v34  ;;  %v10876_v62 = vadd.f32 %v10875_v49, %v10874_v29  ;;  %v10877_v40 = vpop.f32.mrb[238].mxu0  ;;  %v12120_v5 = vld [vmem:[#allocation3 + $0x368] sm:$0xff]   ;;  %1816 = vst [vmem:[#allocation2 + $0x360] sm:$0xff] %v12300_v52  ;;  %1817 = vst [vmem:[#allocation2 + $0x368] sm:$0xff] %v12300_v52  ;;  %v7979_v23 = vsel %vm1988_vm0, %v7974_v2, %v7978_v56  ;;  %v12125_v29 = vld [vmem:[#allocation3 + $0x380] sm:$0xff]  }
 0x44a   : > { %11495 = vmatpush3.bf16.msra.mxu0 %v12117_v32  ;;  %v10878_v50 = vpop.f32.mrb[239].mxu0  ;;  %v12121_v34 = vld [vmem:[#allocation3 + $0x328] sm:$0xff]   ;;  %v8329_v2 = vsel %vm2874_vm1, %v8327_v48, %v8328_v42  ;;  %v7990_v48 = vor.u32 %v7988_v37, %v7978_v56  ;;  %v12126_v37 = vld [vmem:[#allocation3 + $0x378] sm:$0xff]   ;;  %v16547_v27 = vrot.slane %v15305_v41, 1  ;;  %v12136_v41 = vld [vmem:[#allocation3 + $0x3e0] sm:$0xff]  }
 0x44b   : > { %v10974_v57 = vpop.f32.mrb[4].mxu1  ;;  %11496 = vmatprep.subr.bf16.mxu0 %v12118_v25  ;;  %v15484_v1 = vadd.f32 %v10876_v62, %v15149_v36  ;;  %v10879_v19 = vadd.f32 %v10878_v50, %v10877_v40  ;;  %v7992_v25 = vshll.u32 %v15397_v39, 16  ;;  %v12127_v49 = vld [vmem:[#allocation3 + $0x3c8] sm:$0xff]   ;;  %v12122_v50 = vld [vmem:[#allocation3 + $0x370] sm:$0xff]  }
 0x44c   : > { %v10975_v12 = vpop.f32.mrb[5].mxu1 }
 0x44d   : > { %v10976_v32 = vadd.f32 %v10975_v12, %v10974_v57  ;;  %v10977_v38 = vpop.f32.mrb[6].mxu1  ;;  %8205 = vmatmul.mubr.bf16.gmra.mrb[88].mxu0 %v7955_v14  ;;  %v15492_v36 = vadd.f32 %v10879_v19, %v15156_v30  ;;  %v16546_v30 = vrot.slane %v15279_v15, 1  ;;  %v7966_v14 = vor.u32 %v7964_v16, %v7954_v35  ;;  %v15516_v15 = vld [vmem:[%s16190_s4] ss:$0 sm:$0xff] }
 0x44e   : > { %v10978_v10 = vpop.f32.mrb[7].mxu1  ;;  %8212 = vmatprep.mubr.bf16.mxu0 %v7979_v23  ;;  %11497 = vmatpush3.bf16.msra.mxu0 %v12119_v21  ;;  %v7994_v12 = vrot.slane %v7992_v25, 1  ;;  %v8333_v16 = vrot.slane %v15328_v31, 1  ;;  %v7984_v23 = vshll.u32 %v15417_v18, 16  ;;  %v12130_v25 = vld [vmem:[#allocation3 + $0x3d0] sm:$0xff]  }
 0x44f   : > { %v15495_v62 = vadd.f32 %v10976_v32, %v15431_v26  ;;  %v10979_v40 = vadd.f32 %v10978_v10, %v10977_v38  ;;  %11498 = vmatprep.subr.bf16.mxu0 %v12120_v5  ;;  %v11008_v57 = vpop.f32.mrb[240].mxu0  ;;  %v8336_v21 = vsel %vm2874_vm1, %v16546_v30, %v16286_v0  ;;  %v7970_v26 = vrot.slane %v7968_v46, 1  ;;  %v12129_v5 = vld [vmem:[#allocation3 + $0x388] sm:$0xff]  }
 0x450   : > { %8506 = vmatmul.mubr.bf16.vlgmr.msra.gmra.mrb[112].mxu1 %v8329_v2  ;;  %v11009_v19 = vpop.f32.mrb[241].mxu0  ;;  %v7980_v38 = vshrl.u32 %v15392_v54, 16 }
 0x451   : > { %v15507_v52 = vadd.f32 %v10979_v40, %v15439_v4  ;;  %8513 = vmatprep.mubr.bf16.mxu1 %v8336_v21  ;;  %11553 = vmatpush3.bf16.msra.mxu1 %v12125_v29  ;;  %v11010_v32 = vadd.f32 %v11009_v19, %v11008_v57  ;;  %v11011_v35 = vpop.f32.mrb[242].mxu0  ;;  %v12123_v4 = vld [vmem:[#allocation3 + $0x330] sm:$0xff]   ;;  %v7971_v2 = vsel %vm1988_vm0, %v7966_v14, %v7970_v26  ;;  %v8339_v57 = vrot.slane %v15333_v44, 1  ;;  %v12140_v44 = vld [vmem:[#allocation3 + $0x3a8] sm:$0xff]  }
 0x452   : > { %11499 = vmatpush3.bf16.msra.mxu0 %v12121_v34  ;;  %11554 = vmatprep.subr.bf16.mxu1 %v12127_v49  ;;  %v11012_v56 = vpop.f32.mrb[243].mxu0  ;;  %v7995_v49 = vsel %vm1988_vm0, %v7990_v48, %v7994_v12  ;;  %v8004_v21 = vshrl.u32 %v15397_v39, 16  ;;  %v8008_v19 = vshll.u32 %v15422_v11, 16  ;;  %v8334_v14 = vsel %vm2874_vm1, %v8328_v42, %v8333_v16  ;;  %v12128_v48 = vld [vmem:[#allocation3 + $0x338] sm:$0xff]  }
 0x453   : > { %v10980_v46 = vpop.f32.mrb[8].mxu1  ;;  %11500 = vmatprep.subr.bf16.mxu0 %v12122_v50  ;;  %v6426_v29 = vadd.f32 %v11010_v32, %v15177_v7  ;;  %v11013_v10 = vadd.f32 %v11012_v56, %v11011_v35  ;;  %v12131_v50 = vld [vmem:[#allocation3 + $0x390] sm:$0xff]   ;;  %v12132_v35 = vld [vmem:[#allocation3 + $0x3d8] sm:$0xff]   ;;  %v7982_v56 = vor.u32 %v7980_v38, %v7970_v26  ;;  %v8340_v42 = vsel %vm2874_vm1, %v16547_v27, %v8339_v57  ;;  %v12138_v27 = vld [vmem:[#allocation3 + $0x3e8] sm:$0xff]  }
 0x454   : > { %v10981_v40 = vpop.f32.mrb[9].mxu1  ;;  %v8010_v38 = vrot.slane %v8008_v19, 1 }
 0x455   : > { %v10982_v34 = vadd.f32 %v10981_v40, %v10980_v46  ;;  %v10983_v30 = vpop.f32.mrb[10].mxu1  ;;  %8213 = vmatmul.mubr.bf16.gmra.mrb[92].mxu0 %v7971_v2  ;;  %11555 = vmatpush3.bf16.msra.mxu1 %v12129_v5  ;;  %v6464_v0 = vadd.f32 %v15516_v15, %v6426_v29  ;;  %v6427_v7 = vadd.f32 %v11013_v10, %v15184_v55  ;;  %v7986_v40 = vrot.slane %v7984_v23, 1  ;;  %v12133_v55 = vld [vmem:[#allocation3 + $0x440] sm:$0xff]   ;;  %v12134_v23 = vld [vmem:[#allocation3 + $0x398] sm:$0xff]  }
 0x456   : > { %v10984_v32 = vpop.f32.mrb[11].mxu1  ;;  %8220 = vmatprep.mubr.bf16.mxu0 %v7995_v49  ;;  %11501 = vmatpush3.bf16.msra.mxu0 %v12123_v4  ;;  %v8006_v4 = vor.u32 %v8004_v21, %v7994_v12  ;;  %v8337_v12 = vrot.slane %v15359_v28, 1  ;;  %v8343_v49 = vrot.slane %v15364_v60, 1  ;;  %v8345_v60 = vrot.slane %v15417_v18, 1 }
 0x457   : > { %v15535_v46 = vadd.f32 %v10982_v34, %v15458_v17  ;;  %v10985_v5 = vadd.f32 %v10984_v32, %v10983_v30  ;;  %11502 = vmatprep.subr.bf16.mxu0 %v12126_v37  ;;  %11556 = vmatprep.subr.bf16.mxu1 %v12130_v25  ;;  %v6496_v29 = vmax.f32 %v6464_v0, 0.0  ;;  %v6465_v10 = vadd.f32 %v15516_v15, %v6427_v7  ;;  %v11014_v2 = vpop.f32.mrb[244].mxu0 }
 0x458   : > { %8514 = vmatmul.mubr.bf16.gmra.mrb[116].mxu1 %v8334_v14  ;;  %v11015_v26 = vpop.f32.mrb[245].mxu0  ;;  %v7987_v30 = vsel %vm1988_vm0, %v7982_v56, %v7986_v40  ;;  %v7996_v7 = vshrl.u32 %v15417_v18, 16  ;;  %v8000_v32 = vshll.u32 %v15441_v8, 16  ;;  %v8024_v56 = vshll.u32 %v15446_v59, 16 }
 0x459   : > { %v15544_v17 = vadd.f32 %v10985_v5, %v15465_v53  ;;  %8521 = vmatprep.mubr.bf16.mxu1 %v8340_v42  ;;  %11557 = vmatpush3.bf16.msra.mxu1 %v12131_v50  ;;  %6528 = vst [vmem:[%s15547_s11] sm:$0xff] %v6496_v29  ;;  %v6497_v0 = vmax.f32 %v6465_v10, 0.0  ;;  %v11016_v37 = vadd.f32 %v11015_v26, %v11014_v2  ;;  %v11017_v25 = vpop.f32.mrb[246].mxu0  ;;  %v8020_v5 = vshrl.u32 %v15422_v11, 16  ;;  %v7857_v2 = vld [vmem:[#allocation2 + $0x338] sm:$0x1] }
 0x45a   : > { %11503 = vmatpush3.bf16.msra.mxu0 %v12128_v48  ;;  %11558 = vmatprep.subr.bf16.mxu1 %v12132_v35  ;;  %v11018_v53 = vpop.f32.mrb[247].mxu0  ;;  %v8011_v35 = vsel %vm1988_vm0, %v8006_v4, %v8010_v38  ;;  %v8338_v4 = vsel %vm2874_vm1, %v8333_v16, %v8337_v12 }
 0x45b   : > { %v10986_v34 = vpop.f32.mrb[12].mxu1  ;;  %11616 = vmatprep.subr.bf16.mxu0 %v12133_v55  ;;  %6529 = vst [vmem:[%s15547_s11 + $0x8] sm:$0xff] %v6497_v0  ;;  %v6428_v21 = vadd.f32 %v11016_v37, %v15202_v58  ;;  %v11019_v19 = vadd.f32 %v11018_v53, %v11017_v25  ;;  %v12137_v55 = vld [vmem:[#allocation3 + $0x3a0] sm:$0xff]   ;;  %v8002_v25 = vrot.slane %v8000_v32, 1  ;;  %v8022_v16 = vor.u32 %v8020_v5, %v8010_v38 }
 0x45c   : > { %v10987_v50 = vpop.f32.mrb[13].mxu1  ;;  %v7875_v53 = vpack.c.bf16 %v7857_v2, %v7857_v2  ;;  %v8016_v32 = vshll.u32 %v15467_v43, 16  ;;  %v8347_v5 = vrot.slane %v15397_v39, 1  ;;  %v7856_v2 = vld [vmem:[#allocation2 + $0x330] sm:$0x1]  ;;  %v12144_v39 = vld [vmem:[#allocation3 + $0x3f8] sm:$0xff]  }
 0x45d   : > { %v10988_v14 = vadd.f32 %v10987_v50, %v10986_v34  ;;  %v10989_v48 = vpop.f32.mrb[14].mxu1  ;;  %8221 = vmatmul.mubr.bf16.gmra.mrb[96].mxu0 %v7987_v30  ;;  %11559 = vmatpush3.bf16.msra.mxu1 %v12134_v23  ;;  %v6466_v29 = vadd.f32 %v15516_v15, %v6428_v21  ;;  %v6429_v58 = vadd.f32 %v11019_v19, %v15207_v45  ;;  %v8026_v34 = vrot.slane %v8024_v56, 1  ;;  %v12142_v19 = vld [vmem:[#allocation3 + $0x3f0] sm:$0xff]  }
 0x45e   : > { %v10990_v10 = vpop.f32.mrb[15].mxu1  ;;  %8228 = vmatprep.mubr.bf16.mxu0 %v8011_v35  ;;  %11560 = vmatprep.subr.bf16.mxu1 %v12136_v41  ;;  %v8344_v45 = vsel %vm2874_vm1, %v8339_v57, %v8343_v49 }
 0x45f   : > { %v15563_v42 = vadd.f32 %v10988_v14, %v15484_v1  ;;  %v10991_v26 = vadd.f32 %v10990_v10, %v10989_v48  ;;  %v6498_v23 = vmax.f32 %v6466_v29, 0.0  ;;  %v6467_v0 = vadd.f32 %v15516_v15, %v6429_v58  ;;  %v11020_v37 = vpop.f32.mrb[248].mxu0 }
 0x460   : > { %8522 = vmatmul.mubr.bf16.gmra.mrb[120].mxu1 %v8338_v4  ;;  %v7998_v1 = vor.u32 %v7996_v7, %v7986_v40  ;;  %v11021_v31 = vpop.f32.mrb[249].mxu0  ;;  %v8341_v7 = vrot.slane %v15392_v54, 1  ;;  %v8027_v29 = vsel %vm1988_vm0, %v8022_v16, %v8026_v34  ;;  %v8036_v58 = vshrl.u32 %v15446_v59, 16  ;;  %v15624_v54 = vld [vmem:[#allocation2 + $0x278] sm:$0xff] }
 0x461   : > { %v15577_v41 = vadd.f32 %v10991_v26, %v15492_v36  ;;  %8529 = vmatprep.mubr.bf16.mxu1 %v8344_v45  ;;  %11561 = vmatpush3.bf16.msra.mxu1 %v12137_v55  ;;  %6530 = vst [vmem:[%s15547_s11 + $0x10] sm:$0xff] %v6498_v23  ;;  %v6499_v57 = vmax.f32 %v6467_v0, 0.0  ;;  %v11022_v30 = vadd.f32 %v11021_v31, %v11020_v37  ;;  %v11023_v21 = vpop.f32.mrb[250].mxu0  ;;  %v8012_v36 = vshrl.u32 %v15441_v8, 16 }
 0x462   : > { %11562 = vmatprep.subr.bf16.mxu1 %v12138_v27  ;;  %v11024_v50 = vpop.f32.mrb[251].mxu0  ;;  %v8003_v35 = vsel %vm1988_vm0, %v7998_v1, %v8002_v25  ;;  %v8040_v10 = vshll.u32 %v7875_v53, 16  ;;  %v12143_v27 = vld [vmem:[#allocation3 + $0x3b0] sm:$0xff]   ;;  %v8342_v23 = vsel %vm2874_vm1, %v8337_v12, %v8341_v7  ;;  %v8018_v37 = vrot.slane %v8016_v32, 1 }
 0x463   : > { %v11120_v40 = vpop.f32.mrb[16].mxu1  ;;  %6531 = vst [vmem:[%s15547_s11 + $0x18] sm:$0xff] %v6499_v57  ;;  %v6430_v38 = vadd.f32 %v11022_v30, %v15221_v61  ;;  %v11025_v14 = vadd.f32 %v11024_v50, %v11023_v21  ;;  %v8014_v0 = vor.u32 %v8012_v36, %v8002_v25  ;;  %v7874_v53 = vpack.c.bf16 %v7856_v2, %v7856_v2  ;;  %v12146_v30 = vld [vmem:[#allocation3 + $0x3b8] sm:$0xff]  }
 0x464   : > { %v11121_v48 = vpop.f32.mrb[17].mxu1  ;;  %v8038_v57 = vor.u32 %v8036_v58, %v8026_v34  ;;  %v8042_v28 = vrot.slane %v8040_v10, 1  ;;  %v8346_v58 = vsel %vm2874_vm1, %v8341_v7, %v8345_v60 }
 0x465   : > { %v15587_v56 = vadd.f32 %v11121_v48, %v11120_v40  ;;  %v11123_v55 = vpop.f32.mrb[18].mxu1  ;;  %8229 = vmatmul.mubr.bf16.gmra.mrb[100].mxu0 %v8003_v35  ;;  %11563 = vmatpush3.bf16.msra.mxu1 %v12140_v44  ;;  %v6468_v61 = vadd.f32 %v15516_v15, %v6430_v38  ;;  %v6431_v26 = vadd.f32 %v11025_v14, %v15225_v24  ;;  %v8028_v38 = vshrl.u32 %v15467_v43, 16 }
 0x466   : > { %v11124_v4 = vpop.f32.mrb[19].mxu1  ;;  %8236 = vmatprep.mubr.bf16.mxu0 %v8027_v29  ;;  %11564 = vmatprep.subr.bf16.mxu1 %v12142_v19  ;;  %v8348_v24 = vsel %vm2874_vm1, %v8343_v49, %v8347_v5  ;;  %v8019_v40 = vsel %vm1988_vm0, %v8014_v0, %v8018_v37  ;;  %v8351_v49 = vrot.slane %v15422_v11, 1  ;;  %v8032_v14 = vshll.u32 %v7874_v53, 16 }
 0x467   : > { %v15593_v45 = vadd.f32 %v11124_v4, %v11123_v55  ;;  %v6500_v1 = vmax.f32 %v6468_v61, 0.0  ;;  %v6469_v31 = vadd.f32 %v15516_v15, %v6431_v26  ;;  %v11026_v16 = vpop.f32.mrb[252].mxu0  ;;  %v8043_v55 = vsel %vm1988_vm0, %v8038_v57, %v8042_v28  ;;  %v8876_v28 = vld [vmem:[#allocation2 + $0x268] sm:$0xfe] }
 0x468   : > { %8530 = vmatmul.mubr.bf16.gmra.mrb[124].mxu1 %v8342_v23  ;;  %v11027_v44 = vpop.f32.mrb[253].mxu0  ;;  %v8352_v10 = vsel %vm2874_vm1, %v8347_v5, %v8351_v49  ;;  %v8030_v26 = vor.u32 %v8028_v38, %v8018_v37  ;;  %v8034_v4 = vrot.slane %v8032_v14, 1  ;;  %v8355_v57 = vrot.slane %v15446_v59, 1  ;;  %v8593_v14 = vld [vmem:[#allocation2 + $0x298] sm:$0xff] }
 0x469   : > { %8537 = vmatprep.mubr.bf16.mxu1 %v8348_v24  ;;  %11565 = vmatpush3.bf16.msra.mxu1 %v12143_v27  ;;  %6532 = vst [vmem:[%s15547_s11 + $0x20] sm:$0xff] %v6500_v1  ;;  %v6501_v12 = vmax.f32 %v6469_v31, 0.0  ;;  %v11028_v25 = vadd.f32 %v11027_v44, %v11026_v16  ;;  %v11029_v21 = vpop.f32.mrb[254].mxu0  ;;  %v8349_v16 = vrot.slane %v15441_v8, 1 }
 0x46a   : > { %11566 = vmatprep.subr.bf16.mxu1 %v12144_v39  ;;  %v11030_v19 = vpop.f32.mrb[255].mxu0  ;;  %v8587_v39 = vld [vmem:[#allocation2 + $0x268] sm:$0xff]  ;;  %v8035_v44 = vsel %vm1988_vm0, %v8030_v26, %v8034_v4  ;;  %v8356_v38 = vsel %vm2874_vm1, %v8351_v49, %v8355_v57  ;;  %v12178_v26 = vld [vmem:[#allocation2 + $0x260] sm:$0xff]  ;;  %v12179_v49 = vld [vmem:[#allocation2 + $0x270] sm:$0xff] }
 0x46b   : > { %v11126_v50 = vpop.f32.mrb[20].mxu1  ;;  %6533 = vst [vmem:[%s15547_s11 + $0x28] sm:$0xff] %v6501_v12  ;;  %v6432_v36 = vadd.f32 %v11028_v25, %v15238_v13  ;;  %v11031_v34 = vadd.f32 %v11030_v19, %v11029_v21  ;;  %v8619_v5 = vpack.c.bf16 %v15624_v54, %v8587_v39  ;;  %v8272_v25 = vld [vmem:[#allocation2 + $0x338] sm:$0x3]  ;;  %v8618_v4 = vpack.c.bf16 %v12179_v49, %v12178_v26 }
 0x46c   : > { %v11127_v32 = vpop.f32.mrb[21].mxu1 }
 0x46d   : > { %v15611_v48 = vadd.f32 %v11127_v32, %v11126_v50  ;;  %v11129_v35 = vpop.f32.mrb[22].mxu1  ;;  %8237 = vmatmul.mubr.bf16.gmra.mrb[104].mxu0 %v8019_v40  ;;  %11567 = vmatpush3.bf16.msra.mxu1 %v12146_v30  ;;  %v6470_v29 = vadd.f32 %v15516_v15, %v6432_v36  ;;  %v6433_v18 = vadd.f32 %v11031_v34, %v15242_v47 }
 0x46e   : > { %v11130_v11 = vpop.f32.mrb[23].mxu1  ;;  %8244 = vmatprep.mubr.bf16.mxu0 %v8043_v55  ;;  %v8350_v50 = vsel %vm2874_vm1, %v8345_v60, %v8349_v16  ;;  %v15640_v40 = vpack.c.bf16 %v15624_v54, %v8876_v28 }
 0x46f   : > { %v15616_v13 = vadd.f32 %v11130_v11, %v11129_v35  ;;  %v6502_v2 = vmax.f32 %v6470_v29, 0.0  ;;  %v6471_v27 = vadd.f32 %v15516_v15, %v6433_v18  ;;  %v11032_v61 = vpop.f32.mrb[0].mxu0  ;;  %v8276_v35 = vpack.c.bf16 %v8272_v25, %v8272_v25 }
 0x470   : > { %8538 = vmatmul.mubr.bf16.gmra.mrb[128].mxu1 %v8346_v58  ;;  %v11033_v47 = vpop.f32.mrb[1].mxu0  ;;  %v8353_v29 = vrot.slane %v15467_v43, 1  ;;  %v12135_v58 = vld [vmem:[#allocation3 + $0x400] sm:$0xff]  }
 0x471   : > { %8545 = vmatprep.mubr.bf16.mxu1 %v8352_v10  ;;  %6534 = vst [vmem:[%s15547_s11 + $0x30] sm:$0xff] %v6502_v2  ;;  %v6503_v23 = vmax.f32 %v6471_v27, 0.0  ;;  %v11034_v0 = vadd.f32 %v11033_v47, %v11032_v61  ;;  %v11035_v1 = vpop.f32.mrb[2].mxu0  ;;  %v8875_v10 = vld [vmem:[#allocation2 + $0x260] sm:$0xfe]  ;;  %v15648_v2 = vld [vmem:[#allocation2 + $0x270] sm:$0xff] }
 0x472   : > { %v11036_v7 = vpop.f32.mrb[3].mxu0  ;;  %v12139_v47 = vld [vmem:[#allocation3 + $0x448] sm:$0xff]  }
 0x473   : > { %v11132_v31 = vpop.f32.mrb[24].mxu1  ;;  %6535 = vst [vmem:[%s15547_s11 + $0x38] sm:$0xff] %v6503_v23  ;;  %v6434_v24 = vadd.f32 %v11034_v0, %v15258_v51  ;;  %v11037_v37 = vadd.f32 %v11036_v7, %v11035_v1  ;;  %v8271_v23 = vld [vmem:[#allocation2 + $0x330] sm:$0x3]  ;;  %v8974_v0 = vshll.u32 %v15640_v40, 16 }
 0x474   : > { %v11133_v53 = vpop.f32.mrb[25].mxu1 }
 0x475   : > { %v15632_v30 = vadd.f32 %v11133_v53, %v11132_v31  ;;  %v11135_v12 = vpop.f32.mrb[26].mxu1  ;;  %8245 = vmatmul.mubr.bf16.gmra.mrb[108].mxu0 %v8035_v44  ;;  %v6472_v21 = vadd.f32 %v15516_v15, %v6434_v24  ;;  %v6435_v19 = vadd.f32 %v11037_v37, %v15264_v9  ;;  %v8591_v9 = vld [vmem:[#allocation2 + $0x288] sm:$0xff]  ;;  %v8354_v53 = vsel %vm2874_vm1, %v8349_v16, %v8353_v29 }
 0x476   : > { %v11136_v8 = vpop.f32.mrb[27].mxu1  ;;  %8794 = vmatprep.mubr.bf16.mxu0 %v8619_v5  ;;  %v15650_v39 = vpack.c.bf16 %v8593_v14, %v8591_v9  ;;  %v8359_v5 = vrot.slane %v8276_v35, 1  ;;  %v15661_v44 = vpack.c.bf16 %v15648_v2, %v8875_v10  ;;  %v8972_v16 = vshrl.u32 %v15640_v40, 16 }
 0x477   : > { %v15636_v51 = vadd.f32 %v11136_v8, %v11135_v12  ;;  %v6504_v36 = vmax.f32 %v6472_v21, 0.0  ;;  %v6473_v34 = vadd.f32 %v15516_v15, %v6435_v19  ;;  %v11038_v32 = vpop.f32.mrb[4].mxu0  ;;  %v16548_v12 = vld [vmem:[#allocation24_spill] sm:$0xff]  ;;  %v12141_v21 = vld [vmem:[#allocation3 + $0x408] sm:$0xff]   ;;  %v8275_v19 = vpack.c.bf16 %v8271_v23, %v8271_v23 }
 0x478   : > { %8546 = vmatmul.mubr.bf16.gmra.mrb[132].mxu1 %v8350_v50  ;;  %v11039_v55 = vpop.f32.mrb[5].mxu0  ;;  %v8590_v50 = vld [vmem:[#allocation2 + $0x280] sm:$0xff]  ;;  %v8962_v26 = vshll.u32 %v15661_v44, 16  ;;  %v12148_v23 = vld [vmem:[#allocation3 + $0x458] sm:$0xff]  }
 0x479   : > { %8553 = vmatprep.mubr.bf16.mxu1 %v8356_v38  ;;  %6536 = vst [vmem:[%s15547_s11 + $0x40] sm:$0xff] %v6504_v36  ;;  %v6505_v60 = vmax.f32 %v6473_v34, 0.0  ;;  %v11040_v18 = vadd.f32 %v11039_v55, %v11038_v32  ;;  %v11041_v11 = vpop.f32.mrb[6].mxu0  ;;  %v8592_v36 = vld [vmem:[#allocation2 + $0x290] sm:$0xff]  ;;  %v8976_v34 = vrot.slane %v8974_v0, 1  ;;  %v8979_v32 = vshll.u32 %v15650_v39, 16 }
 0x47a   : > { %v11042_v27 = vpop.f32.mrb[7].mxu0  ;;  %v12145_v38 = vld [vmem:[#allocation3 + $0x450] sm:$0xff]   ;;  %v8360_v55 = vsel %vm2874_vm1, %v8355_v57, %v8359_v5  ;;  %v8357_v59 = vrot.slane %v8275_v19, 1  ;;  %v16549_v0 = vld [vmem:[#allocation36_spill] sm:$0xff]  ;;  %v8964_v19 = vrot.slane %v8962_v26, 1 }
 0x47b   : > { %v11138_v61 = vpop.f32.mrb[28].mxu1  ;;  %6537 = vst [vmem:[%s15547_s11 + $0x48] sm:$0xff] %v6505_v60  ;;  %v6436_v1 = vadd.f32 %v11040_v18, %v15277_v33  ;;  %v11043_v7 = vadd.f32 %v11042_v27, %v11041_v11  ;;  %v8595_v18 = vld [vmem:[#allocation2 + $0x2a8] sm:$0xff]  ;;  %v8597_v11 = vld [vmem:[#allocation2 + $0x2b8] sm:$0xff]  ;;  %v15675_v27 = vpack.c.bf16 %v8592_v36, %v8590_v50  ;;  %v8981_v57 = vrot.slane %v8979_v32, 1  ;;  %v8594_v32 = vld [vmem:[#allocation2 + $0x2a0] sm:$0xff] }
 0x47c   : > { %v11139_v31 = vpop.f32.mrb[29].mxu1  ;;  %v15680_v5 = vpack.c.bf16 %v8597_v11, %v8595_v18  ;;  %v12149_v36 = vld [vmem:[#allocation3 + $0x418] sm:$0xff]   ;;  %v8601_v18 = vld [vmem:[#allocation2 + $0x2d8] sm:$0xff]  ;;  %v8991_v11 = vshrl.u32 %v15650_v39, 16 }
 0x47d   : > { %v15655_v24 = vadd.f32 %v11139_v31, %v11138_v61  ;;  %v11141_v37 = vpop.f32.mrb[30].mxu1  ;;  %8795 = vmatmul.mubr.bf16.vlgmr.msra.gmra.mrb[112].mxu0 %v8618_v4  ;;  %v6474_v28 = vadd.f32 %v15516_v15, %v6436_v1  ;;  %v6437_v25 = vadd.f32 %v11043_v7, %v16548_v12  ;;  %v12147_v61 = vld [vmem:[#allocation3 + $0x410] sm:$0xff]   ;;  %v8967_v50 = vshll.u32 %v15675_v27, 16 }
 0x47e   : > { %11617 = vmatpush3.bf16.msra.mxu0 %v12135_v58  ;;  %v11142_v33 = vpop.f32.mrb[31].mxu1  ;;  %8802 = vmatprep.mubr.bf16.mxu0 %v15650_v39  ;;  %v8995_v43 = vshll.u32 %v15680_v5, 16 }
 0x47f   : > { %v15666_v8 = vadd.f32 %v11142_v33, %v11141_v37  ;;  %11618 = vmatprep.subr.bf16.mxu0 %v12139_v47  ;;  %v6506_v9 = vmax.f32 %v6474_v28, 0.0  ;;  %v6475_v14 = vadd.f32 %v15516_v15, %v6437_v25  ;;  %v11044_v35 = vpop.f32.mrb[8].mxu0  ;;  %v8977_v47 = vor.u32 %v8976_v34, %v8972_v16  ;;  %v16550_v25 = vld [vmem:[#allocation15_spill] sm:$0xff] }
 0x480   : > { %8554 = vmatmul.mubr.bf16.gmra.mrb[136].mxu1 %v8354_v53  ;;  %v11045_v60 = vpop.f32.mrb[9].mxu0  ;;  %v8960_v28 = vshrl.u32 %v15661_v44, 16  ;;  %v8358_v34 = vsel %vm2874_vm1, %v8353_v29, %v8357_v59  ;;  %v8969_v26 = vrot.slane %v8967_v50, 1 }
 0x481   : > { %8561 = vmatprep.mubr.bf16.mxu1 %v8360_v55  ;;  %6538 = vst [vmem:[%s15547_s11 + $0x50] sm:$0xff] %v6506_v9  ;;  %v6507_v40 = vmax.f32 %v6475_v14, 0.0  ;;  %v11046_v58 = vadd.f32 %v11045_v60, %v11044_v35  ;;  %v11047_v10 = vpop.f32.mrb[10].mxu0  ;;  %v8982_v44 = vsel %vm1988_vm0, %v8977_v47, %v8981_v57  ;;  %v12150_v9 = vld [vmem:[#allocation3 + $0x460] sm:$0xff]   ;;  %v8599_v60 = vld [vmem:[#allocation2 + $0x2c8] sm:$0xff] }
 0x482   : > { %11619 = vmatpush3.bf16.msra.mxu0 %v12141_v21  ;;  %v11048_v49 = vpop.f32.mrb[11].mxu0 }
 0x483   : > { %v11144_v4 = vpop.f32.mrb[32].mxu1  ;;  %11620 = vmatprep.subr.bf16.mxu0 %v12145_v38  ;;  %6539 = vst [vmem:[%s15547_s11 + $0x58] sm:$0xff] %v6507_v40  ;;  %v6438_v1 = vadd.f32 %v11046_v58, %v16549_v0  ;;  %v11049_v7 = vadd.f32 %v11048_v49, %v11047_v10  ;;  %v8596_v38 = vld [vmem:[#allocation2 + $0x2b0] sm:$0xff]  ;;  %v12152_v0 = vld [vmem:[#allocation3 + $0x468] sm:$0xff]  }
 0x484   : > { %v11145_v31 = vpop.f32.mrb[33].mxu1  ;;  %v12151_v49 = vld [vmem:[#allocation3 + $0x420] sm:$0xff]   ;;  %v15700_v47 = vpack.c.bf16 %v8596_v38, %v8594_v32  ;;  %v12153_v32 = vld [vmem:[#allocation3 + $0x428] sm:$0xff]   ;;  %v8598_v38 = vld [vmem:[#allocation2 + $0x2c0] sm:$0xff] }
 0x485   : > { %v15682_v37 = vadd.f32 %v11145_v31, %v11144_v4  ;;  %v11147_v53 = vpop.f32.mrb[34].mxu1  ;;  %8803 = vmatmul.mubr.bf16.gmra.mrb[116].mxu0 %v15675_v27  ;;  %v6476_v12 = vadd.f32 %v15516_v15, %v6438_v1  ;;  %v6439_v33 = vadd.f32 %v11049_v7, %v16550_v25  ;;  %v16551_v1 = vld [vmem:[#allocation35_spill] sm:$0xff]  ;;  %v8997_v25 = vrot.slane %v8995_v43, 1 }
 0x486   : > { %v11148_v21 = vpop.f32.mrb[35].mxu1  ;;  %8810 = vmatprep.mubr.bf16.mxu0 %v15680_v5  ;;  %11621 = vmatpush3.bf16.msra.mxu0 %v12147_v61  ;;  %v8965_v61 = vor.u32 %v8964_v19, %v8960_v28  ;;  %v16552_v19 = vld [vmem:[#allocation37_spill] sm:$0xff] }
 0x487   : > { %v15690_v16 = vadd.f32 %v11148_v21, %v11147_v53  ;;  %11622 = vmatprep.subr.bf16.mxu0 %v12148_v23  ;;  %v6508_v14 = vmax.f32 %v6476_v12, 0.0  ;;  %v6477_v35 = vadd.f32 %v15516_v15, %v6439_v33  ;;  %v11050_v55 = vpop.f32.mrb[12].mxu0  ;;  %v15702_v23 = vpack.c.bf16 %v8601_v18, %v8599_v60  ;;  %v12154_v60 = vld [vmem:[#allocation3 + $0x470] sm:$0xff]  }
 0x488   : > { %8562 = vmatmul.mubr.bf16.gmra.mrb[140].mxu1 %v8358_v34  ;;  %v11051_v40 = vpop.f32.mrb[13].mxu0  ;;  %v8993_v12 = vor.u32 %v8991_v11, %v8981_v57  ;;  %v8970_v34 = vsel %vm1988_vm0, %v8965_v61, %v8969_v26 }
 0x489   : > { %9239 = vmatprep.mubr.bf16.mxu1 %v8982_v44  ;;  %6540 = vst [vmem:[%s15547_s11 + $0x60] sm:$0xff] %v6508_v14  ;;  %v6509_v29 = vmax.f32 %v6477_v35, 0.0  ;;  %v11052_v58 = vadd.f32 %v11051_v40, %v11050_v55  ;;  %v11053_v10 = vpop.f32.mrb[14].mxu0  ;;  %v8983_v44 = vshrl.u32 %v15675_v27, 16  ;;  %v8987_v14 = vshll.u32 %v15700_v47, 16 }
 0x48a   : > { %11623 = vmatpush3.bf16.msra.mxu0 %v12149_v36  ;;  %v11054_v4 = vpop.f32.mrb[15].mxu0  ;;  %v9007_v35 = vshrl.u32 %v15680_v5, 16  ;;  %v9011_v55 = vshll.u32 %v15702_v23, 16  ;;  %v8998_v40 = vsel %vm1988_vm0, %v8993_v12, %v8997_v25  ;;  %v12156_v12 = vld [vmem:[#allocation3 + $0x478] sm:$0xff]  }
 0x48b   : > { %v11150_v59 = vpop.f32.mrb[36].mxu1  ;;  %11624 = vmatprep.subr.bf16.mxu0 %v12150_v9  ;;  %6541 = vst [vmem:[%s15547_s11 + $0x68] sm:$0xff] %v6509_v29  ;;  %v6440_v7 = vadd.f32 %v11052_v58, %v16551_v1  ;;  %v11055_v31 = vadd.f32 %v11054_v4, %v11053_v10  ;;  %v8600_v9 = vld [vmem:[#allocation2 + $0x2d0] sm:$0xff]  ;;  %v8603_v58 = vld [vmem:[#allocation2 + $0x2e8] sm:$0xff]  ;;  %v8605_v10 = vld [vmem:[#allocation2 + $0x2f8] sm:$0xff] }
 0x48c   : > { %v11151_v53 = vpop.f32.mrb[37].mxu1 }
 0x48d   : > { %v15706_v33 = vadd.f32 %v11151_v53, %v11150_v59  ;;  %v11153_v28 = vpop.f32.mrb[38].mxu1  ;;  %8811 = vmatmul.mubr.bf16.gmra.mrb[120].mxu0 %v15700_v47  ;;  %v6478_v21 = vadd.f32 %v15516_v15, %v6440_v7  ;;  %v6441_v50 = vadd.f32 %v11055_v31, %v16552_v19  ;;  %v15722_v59 = vpack.c.bf16 %v8600_v9, %v8598_v38  ;;  %v16553_v19 = vld [vmem:[#allocation38_spill] sm:$0xff] }
 0x48e   : > { %v11154_v36 = vpop.f32.mrb[39].mxu1  ;;  %8818 = vmatprep.mubr.bf16.mxu0 %v15702_v23  ;;  %11625 = vmatpush3.bf16.msra.mxu0 %v12151_v49  ;;  %v8985_v7 = vor.u32 %v8983_v44, %v8969_v26  ;;  %v8989_v31 = vrot.slane %v8987_v14, 1  ;;  %v16554_v44 = vld [vmem:[#allocation23_spill] sm:$0xff]  ;;  %v8999_v14 = vshrl.u32 %v15700_v47, 16 }
 0x48f   : > { %v15714_v57 = vadd.f32 %v11154_v36, %v11153_v28  ;;  %11626 = vmatprep.subr.bf16.mxu0 %v12152_v0  ;;  %v6510_v18 = vmax.f32 %v6478_v21, 0.0  ;;  %v6479_v11 = vadd.f32 %v15516_v15, %v6441_v50  ;;  %v11056_v43 = vpop.f32.mrb[16].mxu0  ;;  %v12155_v0 = vld [vmem:[#allocation3 + $0x430] sm:$0xff]   ;;  %v9009_v28 = vor.u32 %v9007_v35, %v8997_v25 }
 0x490   : > { %9240 = vmatmul.mubr.bf16.vlgmr.msra.gmra.mrb[144].mxu1 %v8970_v34  ;;  %v11057_v29 = vpop.f32.mrb[17].mxu0  ;;  %v9013_v21 = vrot.slane %v9011_v55, 1  ;;  %v15726_v34 = vpack.c.bf16 %v8605_v10, %v8603_v58  ;;  %v9003_v35 = vshll.u32 %v15722_v59, 16  ;;  %v12157_v55 = vld [vmem:[#allocation3 + $0x438] sm:$0xff]  }
 0x491   : > { %9247 = vmatprep.mubr.bf16.mxu1 %v8998_v40  ;;  %6542 = vst [vmem:[%s15547_s11 + $0x70] sm:$0xff] %v6510_v18  ;;  %v6511_v61 = vmax.f32 %v6479_v11, 0.0  ;;  %v11058_v49 = vadd.f32 %v11057_v29, %v11056_v43  ;;  %v11059_v4 = vpop.f32.mrb[18].mxu0  ;;  %v8602_v40 = vld [vmem:[#allocation2 + $0x2e0] sm:$0xff]  ;;  %v8604_v29 = vld [vmem:[#allocation2 + $0x2f0] sm:$0xff] }
 0x492   : > { %11627 = vmatpush3.bf16.msra.mxu0 %v12153_v32  ;;  %v11060_v1 = vpop.f32.mrb[19].mxu0  ;;  %v9014_v11 = vsel %vm1988_vm0, %v9009_v28, %v9013_v21 }
 0x493   : > { %v11156_v53 = vpop.f32.mrb[40].mxu1  ;;  %11628 = vmatprep.subr.bf16.mxu0 %v12154_v60  ;;  %6543 = vst [vmem:[%s15547_s11 + $0x78] sm:$0xff] %v6511_v61  ;;  %v6442_v50 = vadd.f32 %v11058_v49, %v16553_v19  ;;  %v11061_v36 = vadd.f32 %v11060_v1, %v11059_v4  ;;  %v8990_v60 = vsel %vm1988_vm0, %v8985_v7, %v8989_v31  ;;  %v8607_v49 = vld [vmem:[#allocation2 + $0x308] sm:$0xff]  ;;  %v8609_v4 = vld [vmem:[#allocation2 + $0x318] sm:$0xff]  ;;  %v9027_v1 = vshll.u32 %v15726_v34, 16 }
 0x494   : > { %v11157_v18 = vpop.f32.mrb[41].mxu1 }
 0x495   : > { %8819 = vmatmul.mubr.bf16.gmra.mrb[124].mxu0 %v15722_v59  ;;  %v15729_v38 = vadd.f32 %v11157_v18, %v11156_v53  ;;  %v11159_v32 = vpop.f32.mrb[42].mxu1  ;;  %v6480_v26 = vadd.f32 %v15516_v15, %v6442_v50  ;;  %v6443_v9 = vadd.f32 %v11061_v36, %v16554_v44  ;;  %v9001_v50 = vor.u32 %v8999_v14, %v8989_v31 }
 0x496   : > { %8826 = vmatprep.mubr.bf16.mxu0 %v15726_v34  ;;  %v11160_v25 = vpop.f32.mrb[43].mxu1  ;;  %11629 = vmatpush3.bf16.msra.mxu0 %v12155_v0  ;;  %v9023_v0 = vshrl.u32 %v15702_v23, 16  ;;  %v15744_v18 = vpack.c.bf16 %v8604_v29, %v8602_v40  ;;  %v8606_v29 = vld [vmem:[#allocation2 + $0x300] sm:$0xff] }
 0x497   : > { %v15738_v43 = vadd.f32 %v11160_v25, %v11159_v32  ;;  %11630 = vmatprep.subr.bf16.mxu0 %v12156_v12  ;;  %v6512_v58 = vmax.f32 %v6480_v26, 0.0  ;;  %v6481_v10 = vadd.f32 %v15516_v15, %v6443_v9  ;;  %v11062_v61 = vpop.f32.mrb[20].mxu0  ;;  %v9005_v12 = vrot.slane %v9003_v35, 1 }
 0x498   : > { %9248 = vmatmul.mubr.bf16.gmra.mrb[148].mxu1 %v8990_v60  ;;  %v11063_v7 = vpop.f32.mrb[21].mxu0  ;;  %v15746_v32 = vpack.c.bf16 %v8609_v4, %v8607_v49  ;;  %v9025_v60 = vor.u32 %v9023_v0, %v9013_v21  ;;  %v9015_v21 = vshrl.u32 %v15722_v59, 16  ;;  %v9039_v49 = vshrl.u32 %v15726_v34, 16 }
 0x499   : > { %16555 = vst [vmem:[#allocation25_spill] sm:$0xff] %v15738_v43  ;;  %9255 = vmatprep.mubr.bf16.mxu1 %v9014_v11  ;;  %6544 = vst [vmem:[%s15547_s11 + $0x80] sm:$0xff] %v6512_v58  ;;  %v6513_v53 = vmax.f32 %v6481_v10, 0.0  ;;  %v11064_v28 = vadd.f32 %v11063_v7, %v11062_v61  ;;  %v11065_v19 = vpop.f32.mrb[22].mxu0  ;;  %v9029_v11 = vrot.slane %v9027_v1, 1  ;;  %v9019_v61 = vshll.u32 %v15744_v18, 16 }
 0x49a   : > { %11631 = vmatpush3.bf16.msra.mxu0 %v12157_v55  ;;  %v11066_v36 = vpop.f32.mrb[23].mxu0  ;;  %v9006_v55 = vsel %vm1988_vm0, %v9001_v50, %v9005_v12  ;;  %v9043_v4 = vshll.u32 %v15746_v32, 16  ;;  %v8613_v50 = vld [vmem:[#allocation2 + $0x338] sm:$0xff] }
 0x49b   : > { %v11162_v26 = vpop.f32.mrb[44].mxu1  ;;  %6545 = vst [vmem:[%s15547_s11 + $0x88] sm:$0xff] %v6513_v53  ;;  %v6444_v44 = vadd.f32 %v11064_v28, %v15395_v3  ;;  %v11067_v9 = vadd.f32 %v11066_v36, %v11065_v19  ;;  %v8608_v3 = vld [vmem:[#allocation2 + $0x310] sm:$0xff]  ;;  %v9030_v7 = vsel %vm1988_vm0, %v9025_v60, %v9029_v11  ;;  %v8611_v19 = vld [vmem:[#allocation2 + $0x328] sm:$0xff] }
 0x49c   : > { %v11163_v25 = vpop.f32.mrb[45].mxu1  ;;  %v15765_v28 = vpack.c.bf16 %v8608_v3, %v8606_v29 }
 0x49d   : > { %8827 = vmatmul.mubr.bf16.gmra.mrb[128].mxu0 %v15744_v18  ;;  %v15751_v58 = vadd.f32 %v11163_v25, %v11162_v26  ;;  %v11165_v31 = vpop.f32.mrb[46].mxu1  ;;  %v6482_v14 = vadd.f32 %v15516_v15, %v6444_v44  ;;  %v6445_v35 = vadd.f32 %v11067_v9, %v15401_v6 }
 0x49e   : > { %8834 = vmatprep.mubr.bf16.mxu0 %v15746_v32  ;;  %v11166_v40 = vpop.f32.mrb[47].mxu1 }
 0x49f   : > { %16556 = vst [vmem:[#allocation40_spill] sm:$0xff] %v15751_v58  ;;  %v15758_v10 = vadd.f32 %v11166_v40, %v11165_v31  ;;  %v6514_v0 = vmax.f32 %v6482_v14, 0.0  ;;  %v6483_v6 = vadd.f32 %v15516_v15, %v6445_v35  ;;  %v11068_v1 = vpop.f32.mrb[24].mxu0  ;;  %v9017_v31 = vor.u32 %v9015_v21, %v9005_v12  ;;  %v16558_v21 = vld [vmem:[#allocation18_spill] sm:$0xff] }
 0x4a0   : > { %9256 = vmatmul.mubr.bf16.gmra.mrb[152].mxu1 %v9006_v55  ;;  %v11069_v53 = vpop.f32.mrb[25].mxu0  ;;  %v9021_v14 = vrot.slane %v9019_v61, 1  ;;  %v9041_v35 = vor.u32 %v9039_v49, %v9029_v11  ;;  %v9045_v40 = vrot.slane %v9043_v4, 1 }
 0x4a1   : > { %16557 = vst [vmem:[#allocation26_spill] sm:$0xff] %v15758_v10  ;;  %9263 = vmatprep.mubr.bf16.mxu1 %v9030_v7  ;;  %6546 = vst [vmem:[%s15547_s11 + $0x90] sm:$0xff] %v6514_v0  ;;  %v6515_v36 = vmax.f32 %v6483_v6, 0.0  ;;  %v11070_v26 = vadd.f32 %v11069_v53, %v11068_v1  ;;  %v11071_v44 = vpop.f32.mrb[26].mxu0  ;;  %v15770_v7 = vpack.c.bf16 %v8613_v50, %v8611_v19  ;;  %v9031_v0 = vshrl.u32 %v15744_v18, 16  ;;  %v8610_v1 = vld [vmem:[#allocation2 + $0x320] sm:$0xff] }
 0x4a2   : > { %v11072_v9 = vpop.f32.mrb[27].mxu0  ;;  %v9035_v6 = vshll.u32 %v15765_v28, 16  ;;  %v9046_v4 = vsel %vm1988_vm0, %v9041_v35, %v9045_v40  ;;  %v8612_v53 = vld [vmem:[#allocation2 + $0x330] sm:$0xff] }
 0x4a3   : > { %v11184_v25 = vpop.f32.mrb[48].mxu1  ;;  %6547 = vst [vmem:[%s15547_s11 + $0x98] sm:$0xff] %v6515_v36  ;;  %v6446_v60 = vadd.f32 %v11070_v26, %v15420_v22  ;;  %v11073_v55 = vadd.f32 %v11072_v9, %v11071_v44  ;;  %v8615_v26 = vld [vmem:[#allocation2 + $0x348] sm:$0xff]  ;;  %v8617_v44 = vld [vmem:[#allocation2 + $0x358] sm:$0xff]  ;;  %v9055_v9 = vshrl.u32 %v15746_v32, 16  ;;  %v9033_v35 = vor.u32 %v9031_v0, %v9021_v14 }
 0x4a4   : > { %v11185_v10 = vpop.f32.mrb[49].mxu1 }
 0x4a5   : > { %v11186_v29 = vadd.f32 %v11185_v10, %v11184_v25  ;;  %v11187_v3 = vpop.f32.mrb[50].mxu1  ;;  %8835 = vmatmul.mubr.bf16.gmra.mrb[132].mxu0 %v15765_v28  ;;  %v6484_v12 = vadd.f32 %v15516_v15, %v6446_v60  ;;  %v6447_v11 = vadd.f32 %v11073_v55, %v16558_v21  ;;  %v9022_v10 = vsel %vm1988_vm0, %v9017_v31, %v9021_v14 }
 0x4a6   : > { %v11188_v61 = vpop.f32.mrb[51].mxu1  ;;  %8842 = vmatprep.mubr.bf16.mxu0 %v15770_v7  ;;  %v9037_v60 = vrot.slane %v9035_v6, 1  ;;  %v9057_v43 = vor.u32 %v9055_v9, %v9045_v40  ;;  %v9047_v40 = vshrl.u32 %v15765_v28, 16  ;;  %v9320_v9 = vld [vmem:[#allocation2 + $0x260] sm:$0xfc] }
 0x4a7   : > { %v15779_v22 = vadd.f32 %v11186_v29, %v15587_v56  ;;  %v11189_v49 = vadd.f32 %v11188_v61, %v11187_v3  ;;  %v6516_v19 = vmax.f32 %v6484_v12, 0.0  ;;  %v6485_v50 = vadd.f32 %v15516_v15, %v6447_v11  ;;  %v11074_v36 = vpop.f32.mrb[28].mxu0  ;;  %v9321_v12 = vld [vmem:[#allocation2 + $0x268] sm:$0xfc] }
 0x4a8   : > { %9264 = vmatmul.mubr.bf16.gmra.mrb[156].mxu1 %v9022_v10  ;;  %v9059_v56 = vshll.u32 %v15770_v7, 16  ;;  %v11075_v31 = vpop.f32.mrb[29].mxu0  ;;  %v15790_v3 = vpack.c.bf16 %v8612_v53, %v8610_v1  ;;  %v15792_v61 = vpack.c.bf16 %v8617_v44, %v8615_v26  ;;  %v16559_v10 = vld [vmem:[#allocation39_spill] sm:$0xff]  ;;  %v9038_v6 = vsel %vm1988_vm0, %v9033_v35, %v9037_v60  ;;  %v8616_v35 = vld [vmem:[#allocation2 + $0x350] sm:$0xff] }
 0x4a9   : > { %v15787_v25 = vadd.f32 %v11189_v49, %v15593_v45  ;;  %9271 = vmatprep.mubr.bf16.mxu1 %v9046_v4  ;;  %6548 = vst [vmem:[%s15547_s11 + $0xa0] sm:$0xff] %v6516_v19  ;;  %v6517_v55 = vmax.f32 %v6485_v50, 0.0  ;;  %v11076_v29 = vadd.f32 %v11075_v31, %v11074_v36  ;;  %v11077_v15 = vpop.f32.mrb[30].mxu0  ;;  %v9325_v1 = vpack.c.bf16 %v15624_v54, %v9321_v12  ;;  %v15802_v53 = vld [vmem:[%s16190_s4] ss:$0 sm:$0xff] }
 0x4aa   : > { %v11078_v21 = vpop.f32.mrb[31].mxu0  ;;  %v9061_v4 = vrot.slane %v9059_v56, 1  ;;  %v16560_v50 = vld [vmem:[#allocation19_spill] sm:$0xff]  ;;  %v9051_v44 = vshll.u32 %v15790_v3, 16 }
 0x4ab   : > { %v11190_v11 = vpop.f32.mrb[52].mxu1  ;;  %6549 = vst [vmem:[%s15547_s11 + $0xa8] sm:$0xff] %v6517_v55  ;;  %v6448_v58 = vadd.f32 %v11076_v29, %v16559_v10  ;;  %v11079_v45 = vadd.f32 %v11078_v21, %v11077_v15  ;;  %v8614_v31 = vld [vmem:[#allocation2 + $0x340] sm:$0xff]  ;;  %v9071_v55 = vshrl.u32 %v15770_v7, 16  ;;  %v9381_v10 = vrot.slane %v9325_v1, 1 }
 0x4ac   : > { %v11191_v49 = vpop.f32.mrb[53].mxu1  ;;  %v9062_v21 = vsel %vm1988_vm0, %v9057_v43, %v9061_v4 }
 0x4ad   : > { %v11192_v14 = vadd.f32 %v11191_v49, %v11190_v11  ;;  %v11193_v0 = vpop.f32.mrb[54].mxu1  ;;  %8843 = vmatmul.mubr.bf16.gmra.mrb[136].mxu0 %v15790_v3  ;;  %v6486_v19 = vadd.f32 %v15802_v53, %v6448_v58  ;;  %v6449_v36 = vadd.f32 %v11079_v45, %v16560_v50  ;;  %v9075_v58 = vshll.u32 %v15792_v61, 16 }
 0x4ae   : > { %v11194_v26 = vpop.f32.mrb[55].mxu1  ;;  %8850 = vmatprep.mubr.bf16.mxu0 %v15792_v61  ;;  %v9324_v49 = vpack.c.bf16 %v15648_v2, %v9320_v9 }
 0x4af   : > { %v15810_v56 = vadd.f32 %v11192_v14, %v15611_v48  ;;  %v11195_v54 = vadd.f32 %v11194_v26, %v11193_v0  ;;  %v6518_v29 = vmax.f32 %v6486_v19, 0.0  ;;  %v6487_v15 = vadd.f32 %v15802_v53, %v6449_v36  ;;  %v11080_v12 = vpop.f32.mrb[32].mxu0  ;;  %v8908_v14 = vld [vmem:[#allocation2 + $0x368] sm:$0x1] }
 0x4b0   : > { %9272 = vmatmul.mubr.bf16.gmra.mrb[160].mxu1 %v9038_v6  ;;  %v11081_v48 = vpop.f32.mrb[33].mxu0  ;;  %v15822_v36 = vpack.c.bf16 %v8616_v35, %v8614_v31  ;;  %v9049_v26 = vor.u32 %v9047_v40, %v9037_v60  ;;  %v9378_v35 = vrot.slane %v9324_v49, 1  ;;  %v9379_v60 = vrot.slane %v15675_v27, 1 }
 0x4b1   : > { %16561 = vst [vmem:[#allocation27_spill] sm:$0xff] %v15810_v56  ;;  %v15817_v11 = vadd.f32 %v11195_v54, %v15616_v13  ;;  %9279 = vmatprep.mubr.bf16.mxu1 %v9062_v21  ;;  %6550 = vst [vmem:[%s15547_s11 + $0xb0] sm:$0xff] %v6518_v29  ;;  %v6519_v0 = vmax.f32 %v6487_v15, 0.0  ;;  %v11082_v19 = vadd.f32 %v11081_v48, %v11080_v12  ;;  %v11083_v50 = vpop.f32.mrb[34].mxu0  ;;  %v9053_v13 = vrot.slane %v9051_v44, 1 }
 0x4b2   : > { %v11084_v6 = vpop.f32.mrb[35].mxu0  ;;  %v9073_v54 = vor.u32 %v9071_v55, %v9061_v4  ;;  %v8926_v56 = vpack.c.bf16 %v8908_v14, %v8908_v14  ;;  %v16563_v29 = vrot.slane %v15650_v39, 1  ;;  %v9067_v55 = vshll.u32 %v15822_v36, 16 }
 0x4b3   : > { %16562 = vst [vmem:[#allocation28_spill] sm:$0xff] %v15817_v11  ;;  %v11196_v43 = vpop.f32.mrb[56].mxu1  ;;  %v9077_v11 = vrot.slane %v9075_v58, 1  ;;  %6551 = vst [vmem:[%s15547_s11 + $0xb8] sm:$0xff] %v6519_v0  ;;  %v6450_v1 = vadd.f32 %v11082_v19, %v15471_v63  ;;  %v11085_v21 = vadd.f32 %v11084_v6, %v11083_v50  ;;  %v9063_v63 = vshrl.u32 %v15790_v3, 16 }
 0x4b4   : > { %v11197_v45 = vpop.f32.mrb[57].mxu1  ;;  %v9383_v31 = vsel %vm2874_vm1, %v9381_v10, %v16563_v29  ;;  %v9054_v12 = vsel %vm1988_vm0, %v9049_v26, %v9053_v13  ;;  %v9091_v14 = vshll.u32 %v8926_v56, 16  ;;  %v8907_v0 = vld [vmem:[#allocation2 + $0x360] sm:$0x1]  ;;  %v9386_v50 = vrot.slane %v15680_v5, 1 }
 0x4b5   : > { %v11198_v2 = vadd.f32 %v11197_v45, %v11196_v43  ;;  %v11199_v9 = vpop.f32.mrb[58].mxu1  ;;  %8851 = vmatmul.mubr.bf16.gmra.mrb[140].mxu0 %v15822_v36  ;;  %v6488_v4 = vadd.f32 %v15802_v53, %v6450_v1  ;;  %v6451_v40 = vadd.f32 %v11085_v21, %v15478_v20  ;;  %v9078_v48 = vsel %vm1988_vm0, %v9073_v54, %v9077_v11 }
 0x4b6   : > { %v11200_v44 = vpop.f32.mrb[59].mxu1  ;;  %9556 = vmatprep.mubr.bf16.mxu0 %v9383_v31  ;;  %v9087_v20 = vshrl.u32 %v15792_v61, 16  ;;  %v9065_v54 = vor.u32 %v9063_v63, %v9053_v13  ;;  %v9069_v1 = vrot.slane %v9067_v55, 1  ;;  %v9380_v56 = vsel %vm2874_vm1, %v9378_v35, %v9379_v60 }
 0x4b7   : > { %v15836_v58 = vadd.f32 %v11198_v2, %v15632_v30  ;;  %v11201_v15 = vadd.f32 %v11200_v44, %v11199_v9  ;;  %v6520_v10 = vmax.f32 %v6488_v4, 0.0  ;;  %v6489_v45 = vadd.f32 %v15802_v53, %v6451_v40  ;;  %v11086_v49 = vpop.f32.mrb[36].mxu0 }
 0x4b8   : > { %9280 = vmatmul.mubr.bf16.gmra.mrb[164].mxu1 %v9054_v12  ;;  %v11087_v30 = vpop.f32.mrb[37].mxu0  ;;  %v8925_v9 = vpack.c.bf16 %v8907_v0, %v8907_v0  ;;  %v9089_v4 = vor.u32 %v9087_v20, %v9077_v11  ;;  %v9093_v5 = vrot.slane %v9091_v14, 1  ;;  %v16564_v13 = vrot.slane %v15650_v39, 1 }
 0x4b9   : > { %v15843_v19 = vadd.f32 %v11201_v15, %v15636_v51  ;;  %9287 = vmatprep.mubr.bf16.mxu1 %v9078_v48  ;;  %6552 = vst [vmem:[%s15547_s11 + $0xc0] sm:$0xff] %v6520_v10  ;;  %v6521_v6 = vmax.f32 %v6489_v45, 0.0  ;;  %v11088_v43 = vadd.f32 %v11087_v30, %v11086_v49  ;;  %v11089_v26 = vpop.f32.mrb[38].mxu0  ;;  %v9079_v48 = vshrl.u32 %v15822_v36, 16 }
 0x4ba   : > { %v11090_v21 = vpop.f32.mrb[39].mxu0  ;;  %v9387_v63 = vsel %vm2874_vm1, %v16564_v13, %v9386_v50  ;;  %v9083_v10 = vshll.u32 %v8925_v9, 16  ;;  %v9384_v20 = vrot.slane %v15700_v47, 1 }
 0x4bb   : > { %v11202_v2 = vpop.f32.mrb[60].mxu1  ;;  %6553 = vst [vmem:[%s15547_s11 + $0xc8] sm:$0xff] %v6521_v6  ;;  %v6452_v51 = vadd.f32 %v11088_v43, %v15495_v62  ;;  %v11091_v29 = vadd.f32 %v11090_v21, %v11089_v26  ;;  %v9070_v62 = vsel %vm1988_vm0, %v9065_v54, %v9069_v1  ;;  %v9081_v21 = vor.u32 %v9079_v48, %v9069_v1 }
 0x4bc   : > { %v11203_v31 = vpop.f32.mrb[61].mxu1 }
 0x4bd   : > { %v11204_v40 = vadd.f32 %v11203_v31, %v11202_v2  ;;  %v11205_v44 = vpop.f32.mrb[62].mxu1  ;;  %9557 = vmatmul.mubr.bf16.vlgmr.msra.gmra.mrb[144].mxu0 %v9380_v56  ;;  %v6490_v55 = vadd.f32 %v15802_v53, %v6452_v51  ;;  %v6453_v15 = vadd.f32 %v11091_v29, %v15507_v52  ;;  %v9094_v52 = vsel %vm1988_vm0, %v9089_v4, %v9093_v5 }
 0x4be   : > { %v11206_v35 = vpop.f32.mrb[63].mxu1  ;;  %9564 = vmatprep.mubr.bf16.mxu0 %v9387_v63  ;;  %v9085_v2 = vrot.slane %v9083_v10, 1  ;;  %v9394_v63 = vrot.slane %v15726_v34, 1 }
 0x4bf   : > { %v15859_v12 = vadd.f32 %v11204_v40, %v15655_v24  ;;  %v11207_v11 = vadd.f32 %v11206_v35, %v11205_v44  ;;  %v6522_v45 = vmax.f32 %v6490_v55, 0.0  ;;  %v6491_v39 = vadd.f32 %v15802_v53, %v6453_v15  ;;  %v11092_v49 = vpop.f32.mrb[40].mxu0 }
 0x4c0   : > { %9288 = vmatmul.mubr.bf16.gmra.mrb[168].mxu1 %v9070_v62  ;;  %v11093_v0 = vpop.f32.mrb[41].mxu0  ;;  %v9390_v24 = vrot.slane %v15702_v23, 1  ;;  %v9086_v27 = vsel %vm1988_vm0, %v9081_v21, %v9085_v2 }
 0x4c1   : > { %v15866_v14 = vadd.f32 %v11207_v11, %v15666_v8  ;;  %9295 = vmatprep.mubr.bf16.mxu1 %v9094_v52  ;;  %6554 = vst [vmem:[%s15547_s11 + $0xd0] sm:$0xff] %v6522_v45  ;;  %v6523_v30 = vmax.f32 %v6491_v39, 0.0  ;;  %v11094_v6 = vadd.f32 %v11093_v0, %v11092_v49  ;;  %v11095_v43 = vpop.f32.mrb[42].mxu0  ;;  %v9385_v8 = vsel %vm2874_vm1, %v9379_v60, %v9384_v20 }
 0x4c2   : > { %v11096_v26 = vpop.f32.mrb[43].mxu0  ;;  %v9391_v23 = vsel %vm2874_vm1, %v9386_v50, %v9390_v24  ;;  %v9388_v50 = vrot.slane %v15722_v59, 1 }
 0x4c3   : > { %v11208_v54 = vpop.f32.mrb[64].mxu1  ;;  %6555 = vst [vmem:[%s15547_s11 + $0xd8] sm:$0xff] %v6523_v30  ;;  %v6454_v56 = vadd.f32 %v11094_v6, %v15535_v46  ;;  %v11097_v9 = vadd.f32 %v11096_v26, %v11095_v43  ;;  %v9392_v43 = vrot.slane %v15744_v18, 1 }
 0x4c4   : > { %v11209_v47 = vpop.f32.mrb[65].mxu1  ;;  %v9389_v45 = vsel %vm2874_vm1, %v9384_v20, %v9388_v50 }
 0x4c5   : > { %v11210_v51 = vadd.f32 %v11209_v47, %v11208_v54  ;;  %v11211_v29 = vpop.f32.mrb[66].mxu1  ;;  %9565 = vmatmul.mubr.bf16.gmra.mrb[148].mxu0 %v9385_v8  ;;  %v6492_v31 = vadd.f32 %v15802_v53, %v6454_v56  ;;  %v6455_v1 = vadd.f32 %v11097_v9, %v15544_v17  ;;  %v9398_v54 = vrot.slane %v15746_v32, 1 }
 0x4c6   : > { %v11212_v4 = vpop.f32.mrb[67].mxu1  ;;  %9572 = vmatprep.mubr.bf16.mxu0 %v9391_v23  ;;  %v9393_v8 = vsel %vm2874_vm1, %v9388_v50, %v9392_v43 }
 0x4c7   : > { %v15879_v46 = vadd.f32 %v11210_v51, %v15682_v37  ;;  %v11213_v5 = vadd.f32 %v11212_v4, %v11211_v29  ;;  %v6524_v60 = vmax.f32 %v6492_v31, 0.0  ;;  %v6493_v40 = vadd.f32 %v15802_v53, %v6455_v1  ;;  %v11098_v44 = vpop.f32.mrb[44].mxu0  ;;  %v16565_v4 = vld [vmem:[#allocation25_spill] sm:$0xff] }
 0x4c8   : > { %9296 = vmatmul.mubr.bf16.gmra.mrb[172].mxu1 %v9086_v27  ;;  %v11099_v17 = vpop.f32.mrb[45].mxu0 }
 0x4c9   : > { %v15885_v13 = vadd.f32 %v11213_v5, %v15690_v16  ;;  %6556 = vst [vmem:[%s15547_s11 + $0xe0] sm:$0xff] %v6524_v60  ;;  %v6525_v37 = vmax.f32 %v6493_v40, 0.0  ;;  %v11100_v55 = vadd.f32 %v11099_v17, %v11098_v44  ;;  %v11101_v15 = vpop.f32.mrb[46].mxu0  ;;  %v9395_v16 = vsel %vm2874_vm1, %v9390_v24, %v9394_v63 }
 0x4ca   : > { %v11102_v35 = vpop.f32.mrb[47].mxu0  ;;  %v9402_v60 = vrot.slane %v15770_v7, 1  ;;  %v16568_v7 = vld [vmem:[#allocation40_spill] sm:$0xff] }
 0x4cb   : > { %v11214_v62 = vpop.f32.mrb[68].mxu1  ;;  %6557 = vst [vmem:[%s15547_s11 + $0xe8] sm:$0xff] %v6525_v37  ;;  %v6456_v11 = vadd.f32 %v11100_v55, %v15563_v42  ;;  %v11103_v48 = vadd.f32 %v11102_v35, %v11101_v15 }
 0x4cc   : > { %v11215_v10 = vpop.f32.mrb[69].mxu1 }
 0x4cd   : > { %v11216_v59 = vadd.f32 %v11215_v10, %v11214_v62  ;;  %v11217_v39 = vpop.f32.mrb[70].mxu1  ;;  %9573 = vmatmul.mubr.bf16.gmra.mrb[152].mxu0 %v9389_v45  ;;  %v6494_v34 = vadd.f32 %v15802_v53, %v6456_v11  ;;  %v6457_v49 = vadd.f32 %v11103_v48, %v15577_v41  ;;  %v16567_v62 = vld [vmem:[#allocation28_spill] sm:$0xff] }
 0x4ce   : > { %v11218_v52 = vpop.f32.mrb[71].mxu1  ;;  %9580 = vmatprep.mubr.bf16.mxu0 %v9395_v16  ;;  %v16569_v16 = vld [vmem:[#allocation26_spill] sm:$0xff] }
 0x4cf   : > { %v15896_v0 = vadd.f32 %v11216_v59, %v15706_v33  ;;  %v11219_v42 = vadd.f32 %v11218_v52, %v11217_v39  ;;  %v6526_v30 = vmax.f32 %v6494_v34, 0.0  ;;  %v6495_v20 = vadd.f32 %v15802_v53, %v6457_v49  ;;  %v11248_v6 = vpop.f32.mrb[48].mxu0 }
 0x4d0   : > { %v11249_v24 = vpop.f32.mrb[49].mxu0  ;;  %v9400_v39 = vrot.slane %v15790_v3, 1  ;;  %v9406_v52 = vrot.slane %v15792_v61, 1 }
 0x4d1   : > { %v15901_v26 = vadd.f32 %v11219_v42, %v15714_v57  ;;  %6558 = vst [vmem:[%s15547_s11 + $0xf0] sm:$0xff] %v6526_v30  ;;  %v6527_v41 = vmax.f32 %v6495_v20, 0.0  ;;  %v11250_v21 = vadd.f32 %v11249_v24, %v11248_v6  ;;  %v11251_v2 = vpop.f32.mrb[50].mxu0  ;;  %v9399_v57 = vsel %vm2874_vm1, %v9394_v63, %v9398_v54  ;;  %v9323_v20 = vld [vmem:[#allocation2 + $0x368] sm:$0x3] }
 0x4d2   : > { %v11252_v33 = vpop.f32.mrb[51].mxu0  ;;  %v9407_v3 = vsel %vm2874_vm1, %v9402_v60, %v9406_v52 }
 0x4d3   : > { %v11220_v56 = vpop.f32.mrb[72].mxu1  ;;  %6559 = vst [vmem:[%s15547_s11 + $0xf8] sm:$0xff] %v6527_v41  ;;  %v7519_v9 = vadd.f32 %v11250_v21, %v15779_v22  ;;  %v11253_v47 = vadd.f32 %v11252_v33, %v11251_v2  ;;  %v9396_v22 = vrot.slane %v15765_v28, 1  ;;  %v9403_v28 = vsel %vm2874_vm1, %v9398_v54, %v9402_v60 }
 0x4d4   : > { %v11221_v53 = vpop.f32.mrb[73].mxu1  ;;  %v9327_v33 = vpack.c.bf16 %v9323_v20, %v9323_v20 }
 0x4d5   : > { %v11222_v18 = vadd.f32 %v11221_v53, %v11220_v56  ;;  %v11223_v51 = vpop.f32.mrb[74].mxu1  ;;  %9581 = vmatmul.mubr.bf16.gmra.mrb[156].mxu0 %v9393_v8  ;;  %v7520_v32 = vadd.f32 %v11253_v47, %v15787_v25  ;;  %v16566_v25 = vld [vmem:[#allocation27_spill] sm:$0xff]  ;;  %v9401_v21 = vsel %vm2874_vm1, %v9396_v22, %v9400_v39 }
 0x4d6   : > { %v11224_v29 = vpop.f32.mrb[75].mxu1  ;;  %9588 = vmatprep.mubr.bf16.mxu0 %v9399_v57 }
 0x4d7   : > { %v15911_v23 = vadd.f32 %v11222_v18, %v15729_v38  ;;  %v11225_v31 = vadd.f32 %v11224_v29, %v11223_v51  ;;  %v11254_v1 = vpop.f32.mrb[52].mxu0  ;;  %v9397_v38 = vsel %vm2874_vm1, %v9392_v43, %v9396_v22  ;;  %v9410_v29 = vrot.slane %v9327_v33, 1 }
 0x4d8   : > { %v11255_v27 = vpop.f32.mrb[53].mxu0 }
 0x4d9   : > { %v15915_v5 = vadd.f32 %v11225_v31, %v16565_v4  ;;  %v11256_v40 = vadd.f32 %v11255_v27, %v11254_v1  ;;  %v11257_v44 = vpop.f32.mrb[54].mxu0  ;;  %v9322_v31 = vld [vmem:[#allocation2 + $0x360] sm:$0x3] }
 0x4da   : > { %v11258_v17 = vpop.f32.mrb[55].mxu0 }
 0x4db   : > { %v11226_v50 = vpop.f32.mrb[76].mxu1  ;;  %v7521_v63 = vadd.f32 %v11256_v40, %v16566_v25  ;;  %v11259_v37 = vadd.f32 %v11258_v17, %v11257_v44  ;;  %v9326_v44 = vpack.c.bf16 %v9322_v31, %v9322_v31 }
 0x4dc   : > { %v11227_v55 = vpop.f32.mrb[77].mxu1 }
 0x4dd   : > { %v11228_v15 = vadd.f32 %v11227_v55, %v11226_v50  ;;  %v11229_v35 = vpop.f32.mrb[78].mxu1  ;;  %9589 = vmatmul.mubr.bf16.gmra.mrb[160].mxu0 %v9397_v38  ;;  %v7522_v11 = vadd.f32 %v11259_v37, %v16567_v62 }
 0x4de   : > { %v11230_v48 = vpop.f32.mrb[79].mxu1  ;;  %9596 = vmatprep.mubr.bf16.mxu0 %v9403_v28 }
 0x4df   : > { %v15923_v10 = vadd.f32 %v11228_v15, %v16568_v7  ;;  %v11231_v45 = vadd.f32 %v11230_v48, %v11229_v35  ;;  %v11260_v59 = vpop.f32.mrb[56].mxu0  ;;  %v9408_v15 = vrot.slane %v9326_v44, 1 }
 0x4e0   : > { %v11261_v49 = vpop.f32.mrb[57].mxu0 }
 0x4e1   : > { %v15927_v34 = vadd.f32 %v11231_v45, %v16569_v16  ;;  %v11262_v42 = vadd.f32 %v11261_v49, %v11260_v59  ;;  %v11263_v30 = vpop.f32.mrb[58].mxu0 }
 0x4e2   : > { %v11264_v6 = vpop.f32.mrb[59].mxu0 }
 0x4e3   : > { %v11312_v43 = vpop.f32.mrb[80].mxu1  ;;  %v7523_v24 = vadd.f32 %v11262_v42, %v15836_v58  ;;  %v11265_v54 = vadd.f32 %v11264_v6, %v11263_v30  ;;  %v9404_v58 = vrot.slane %v15822_v36, 1  ;;  %v9411_v36 = vsel %vm2874_vm1, %v9406_v52, %v9410_v29 }
 0x4e4   : > { %v11313_v41 = vpop.f32.mrb[81].mxu1 }
 0x4e5   : > { %v11314_v2 = vadd.f32 %v11313_v41, %v11312_v43  ;;  %v11315_v56 = vpop.f32.mrb[82].mxu1  ;;  %9597 = vmatmul.mubr.bf16.gmra.mrb[164].mxu0 %v9401_v21  ;;  %v7524_v47 = vadd.f32 %v11265_v54, %v15843_v19 }
 0x4e6   : > { %v11316_v61 = vpop.f32.mrb[83].mxu1  ;;  %9604 = vmatprep.mubr.bf16.mxu0 %v9407_v3 }
 0x4e7   : > { %v15934_v53 = vadd.f32 %v11314_v2, %v7519_v9  ;;  %v11317_v8 = vadd.f32 %v11316_v61, %v11315_v56  ;;  %v11266_v18 = vpop.f32.mrb[60].mxu0  ;;  %v9405_v9 = vsel %vm2874_vm1, %v9400_v39, %v9404_v58 }
 0x4e8   : > { %v11267_v57 = vpop.f32.mrb[61].mxu0 }
 0x4e9   : > { %v15937_v51 = vadd.f32 %v11317_v8, %v7520_v32  ;;  %v11268_v1 = vadd.f32 %v11267_v57, %v11266_v18  ;;  %v11269_v22 = vpop.f32.mrb[62].mxu0 }
 0x4ea   : > { %v11270_v4 = vpop.f32.mrb[63].mxu0 }
 0x4eb   : > { %v11318_v27 = vpop.f32.mrb[84].mxu1  ;;  %v7525_v60 = vadd.f32 %v11268_v1, %v15859_v12  ;;  %v11271_v19 = vadd.f32 %v11270_v4, %v11269_v22 }
 0x4ec   : > { %v11319_v40 = vpop.f32.mrb[85].mxu1 }
 0x4ed   : > { %v11320_v50 = vadd.f32 %v11319_v40, %v11318_v27  ;;  %v11321_v17 = vpop.f32.mrb[86].mxu1  ;;  %9605 = vmatmul.mubr.bf16.gmra.mrb[168].mxu0 %v9405_v9  ;;  %v7526_v32 = vadd.f32 %v11271_v19, %v15866_v14  ;;  %v9409_v14 = vsel %vm2874_vm1, %v9404_v58, %v9408_v15 }
 0x4ee   : > { %v11322_v25 = vpop.f32.mrb[87].mxu1  ;;  %9612 = vmatprep.mubr.bf16.mxu0 %v9411_v36 }
 0x4ef   : > { %v15943_v37 = vadd.f32 %v11320_v50, %v7521_v63  ;;  %v11323_v55 = vadd.f32 %v11322_v25, %v11321_v17  ;;  %v11272_v38 = vpop.f32.mrb[64].mxu0 }
 0x4f0   : > { %v11273_v35 = vpop.f32.mrb[65].mxu0 }
 0x4f1   : > { %v15945_v12 = vadd.f32 %v11323_v55, %v7522_v11  ;;  %v11274_v28 = vadd.f32 %v11273_v35, %v11272_v38  ;;  %v11275_v62 = vpop.f32.mrb[66].mxu0 }
 0x4f2   : > { %v11276_v48 = vpop.f32.mrb[67].mxu0 }
 0x4f3   : > { %v11324_v7 = vpop.f32.mrb[88].mxu1  ;;  %v7527_v45 = vadd.f32 %v11274_v28, %v15879_v46  ;;  %v11277_v59 = vadd.f32 %v11276_v48, %v11275_v62 }
 0x4f4   : > { %v11325_v39 = vpop.f32.mrb[89].mxu1 }
 0x4f5   : > { %v11326_v16 = vadd.f32 %v11325_v39, %v11324_v7  ;;  %v11327_v49 = vpop.f32.mrb[90].mxu1  ;;  %9613 = vmatmul.mubr.bf16.gmra.mrb[172].mxu0 %v9409_v14  ;;  %v7528_v63 = vadd.f32 %v11277_v59, %v15885_v13 }
 0x4f6   : > { %v11328_v52 = vpop.f32.mrb[91].mxu1 }
 0x4f7   : > { %v15950_v42 = vadd.f32 %v11326_v16, %v7523_v24  ;;  %v11329_v11 = vadd.f32 %v11328_v52, %v11327_v49  ;;  %v11278_v30 = vpop.f32.mrb[68].mxu0 }
 0x4f8   : > { %v11279_v6 = vpop.f32.mrb[69].mxu0 }
 0x4f9   : > { %v15952_v20 = vadd.f32 %v11329_v11, %v7524_v47  ;;  %v11280_v43 = vadd.f32 %v11279_v6, %v11278_v30  ;;  %v11281_v54 = vpop.f32.mrb[70].mxu0 }
 0x4fa   : > { %v11282_v46 = vpop.f32.mrb[71].mxu0 }
 0x4fb   : > { %v11330_v41 = vpop.f32.mrb[92].mxu1  ;;  %v7529_v21 = vadd.f32 %v11280_v43, %v15896_v0  ;;  %v11283_v2 = vadd.f32 %v11282_v46, %v11281_v54 }
 0x4fc   : > { %v11331_v56 = vpop.f32.mrb[93].mxu1 }
 0x4fd   : > { %v11332_v3 = vadd.f32 %v11331_v56, %v11330_v41  ;;  %v11333_v33 = vpop.f32.mrb[94].mxu1  ;;  %v7530_v13 = vadd.f32 %v11283_v2, %v15901_v26 }
 0x4fe   : > { %v11334_v61 = vpop.f32.mrb[95].mxu1 }
 0x4ff   : > { %v15956_v24 = vadd.f32 %v11332_v3, %v7525_v60  ;;  %v11335_v8 = vadd.f32 %v11334_v61, %v11333_v33 }
 0x500   : > { %v11284_v18 = vpop.f32.mrb[72].mxu0 }
 0x501   : > { %v15958_v47 = vadd.f32 %v11335_v8, %v7526_v32  ;;  %v11285_v58 = vpop.f32.mrb[73].mxu0 }
 0x502   : > { %v11286_v57 = vadd.f32 %v11285_v58, %v11284_v18  ;;  %v11287_v29 = vpop.f32.mrb[74].mxu0 }
 0x503   : > { %v11288_v31 = vpop.f32.mrb[75].mxu0  ;;  %v11336_v1 = vpop.f32.mrb[96].mxu1 }
 0x504   : > { %v7531_v0 = vadd.f32 %v11286_v57, %v15911_v23  ;;  %v11289_v22 = vadd.f32 %v11288_v31, %v11287_v29  ;;  %v11337_v4 = vpop.f32.mrb[97].mxu1 }
 0x505   : > { %v11338_v27 = vadd.f32 %v11337_v4, %v11336_v1  ;;  %v11339_v19 = vpop.f32.mrb[98].mxu1 }
 0x506   : > { %v7532_v26 = vadd.f32 %v11289_v22, %v15915_v5  ;;  %v11340_v40 = vpop.f32.mrb[99].mxu1 }
 0x507   : > { %v15962_v60 = vadd.f32 %v11338_v27, %v7527_v45  ;;  %v11341_v9 = vadd.f32 %v11340_v40, %v11339_v19 }
 0x508   : > { %v11290_v44 = vpop.f32.mrb[76].mxu0 }
 0x509   : > { %v15964_v50 = vadd.f32 %v11341_v9, %v7528_v63  ;;  %v11291_v17 = vpop.f32.mrb[77].mxu0 }
 0x50a   : > { %v11292_v36 = vadd.f32 %v11291_v17, %v11290_v44  ;;  %v11293_v32 = vpop.f32.mrb[78].mxu0 }
 0x50b   : > { %v11294_v25 = vpop.f32.mrb[79].mxu0  ;;  %v11342_v55 = vpop.f32.mrb[100].mxu1 }
 0x50c   : > { %v7533_v23 = vadd.f32 %v11292_v36, %v15923_v10  ;;  %v11295_v38 = vadd.f32 %v11294_v25, %v11293_v32  ;;  %v11343_v15 = vpop.f32.mrb[101].mxu1 }
 0x50d   : > { %v11344_v35 = vadd.f32 %v11343_v15, %v11342_v55  ;;  %v11345_v28 = vpop.f32.mrb[102].mxu1 }
 0x50e   : > { %v7534_v5 = vadd.f32 %v11295_v38, %v15927_v34  ;;  %v11346_v62 = vpop.f32.mrb[103].mxu1 }
 0x50f   : > { %v15968_v48 = vadd.f32 %v11344_v35, %v7529_v21  ;;  %v11347_v7 = vadd.f32 %v11346_v62, %v11345_v28 }
 0x510   : > { %v11376_v45 = vpop.f32.mrb[80].mxu0 }
 0x511   : > { %v15970_v59 = vadd.f32 %v11347_v7, %v7530_v13  ;;  %v11377_v39 = vpop.f32.mrb[81].mxu0 }
 0x512   : > { %v11378_v14 = vadd.f32 %v11377_v39, %v11376_v45  ;;  %v11379_v16 = vpop.f32.mrb[82].mxu0 }
 0x513   : > { %v11348_v49 = vpop.f32.mrb[104].mxu1  ;;  %v11380_v63 = vpop.f32.mrb[83].mxu0 }
 0x514   : > { %v8253_v10 = vadd.f32 %v11378_v14, %v15934_v53  ;;  %v11381_v52 = vadd.f32 %v11380_v63, %v11379_v16  ;;  %v11349_v11 = vpop.f32.mrb[105].mxu1 }
 0x515   : > { %v11350_v30 = vadd.f32 %v11349_v11, %v11348_v49  ;;  %v11351_v6 = vpop.f32.mrb[106].mxu1 }
 0x516   : > { %v8254_v34 = vadd.f32 %v11381_v52, %v15937_v51  ;;  %v11352_v43 = vpop.f32.mrb[107].mxu1 }
 0x517   : > { %v15974_v54 = vadd.f32 %v11350_v30, %v7531_v0  ;;  %v11353_v46 = vadd.f32 %v11352_v43, %v11351_v6 }
 0x518   : > { %v11382_v41 = vpop.f32.mrb[84].mxu0 }
 0x519   : > { %v15976_v21 = vadd.f32 %v11353_v46, %v7532_v26  ;;  %v11383_v2 = vpop.f32.mrb[85].mxu0 }
 0x51a   : > { %v11384_v56 = vadd.f32 %v11383_v2, %v11382_v41  ;;  %v11385_v3 = vpop.f32.mrb[86].mxu0 }
 0x51b   : > { %v11354_v33 = vpop.f32.mrb[108].mxu1  ;;  %v11386_v13 = vpop.f32.mrb[87].mxu0 }
 0x51c   : > { %v8255_v53 = vadd.f32 %v11384_v56, %v15943_v37  ;;  %v11387_v61 = vadd.f32 %v11386_v13, %v11385_v3  ;;  %v11355_v8 = vpop.f32.mrb[109].mxu1 }
 0x51d   : > { %v11356_v18 = vadd.f32 %v11355_v8, %v11354_v33  ;;  %v11357_v58 = vpop.f32.mrb[110].mxu1 }
 0x51e   : > { %v8256_v51 = vadd.f32 %v11387_v61, %v15945_v12  ;;  %v11358_v57 = vpop.f32.mrb[111].mxu1 }
 0x51f   : > { %v15980_v29 = vadd.f32 %v11356_v18, %v7533_v23  ;;  %v11359_v31 = vadd.f32 %v11358_v57, %v11357_v58 }
 0x520   : > { %v11388_v1 = vpop.f32.mrb[88].mxu0 }
 0x521   : > { %v15982_v0 = vadd.f32 %v11359_v31, %v7534_v5  ;;  %v11389_v22 = vpop.f32.mrb[89].mxu0 }
 0x522   : > { %v11390_v4 = vadd.f32 %v11389_v22, %v11388_v1  ;;  %v11391_v27 = vpop.f32.mrb[90].mxu0 }
 0x523   : > { %v11392_v19 = vpop.f32.mrb[91].mxu0  ;;  %v11440_v26 = vpop.f32.mrb[112].mxu1 }
 0x524   : > { %v8257_v37 = vadd.f32 %v11390_v4, %v15950_v42  ;;  %v11393_v40 = vadd.f32 %v11392_v19, %v11391_v27  ;;  %v11441_v9 = vpop.f32.mrb[113].mxu1 }
 0x525   : > { %v11442_v44 = vadd.f32 %v11441_v9, %v11440_v26  ;;  %v11443_v17 = vpop.f32.mrb[114].mxu1 }
 0x526   : > { %v8258_v12 = vadd.f32 %v11393_v40, %v15952_v20  ;;  %v11444_v36 = vpop.f32.mrb[115].mxu1 }
 0x527   : > { %v15986_v32 = vadd.f32 %v11442_v44, %v8253_v10  ;;  %v11445_v25 = vadd.f32 %v11444_v36, %v11443_v17 }
 0x528   : > { %v11394_v55 = vpop.f32.mrb[92].mxu0 }
 0x529   : > { %v15988_v23 = vadd.f32 %v11445_v25, %v8254_v34  ;;  %v11395_v38 = vpop.f32.mrb[93].mxu0 }
 0x52a   : > { %v11396_v15 = vadd.f32 %v11395_v38, %v11394_v55  ;;  %v11397_v35 = vpop.f32.mrb[94].mxu0 }
 0x52b   : > { %v11398_v28 = vpop.f32.mrb[95].mxu0  ;;  %v11446_v5 = vpop.f32.mrb[116].mxu1 }
 0x52c   : > { %v8259_v42 = vadd.f32 %v11396_v15, %v15956_v24  ;;  %v11399_v62 = vadd.f32 %v11398_v28, %v11397_v35  ;;  %v11447_v7 = vpop.f32.mrb[117].mxu1 }
 0x52d   : > { %v11448_v45 = vadd.f32 %v11447_v7, %v11446_v5  ;;  %v11449_v39 = vpop.f32.mrb[118].mxu1 }
 0x52e   : > { %v8260_v20 = vadd.f32 %v11399_v62, %v15958_v47  ;;  %v11450_v14 = vpop.f32.mrb[119].mxu1 }
 0x52f   : > { %v15992_v16 = vadd.f32 %v11448_v45, %v8255_v53  ;;  %v11451_v49 = vadd.f32 %v11450_v14, %v11449_v39 }
 0x530   : > { %v11400_v63 = vpop.f32.mrb[96].mxu0 }
 0x531   : > { %v15994_v10 = vadd.f32 %v11451_v49, %v8256_v51  ;;  %v11401_v52 = vpop.f32.mrb[97].mxu0 }
 0x532   : > { %v11402_v11 = vadd.f32 %v11401_v52, %v11400_v63  ;;  %v11403_v30 = vpop.f32.mrb[98].mxu0 }
 0x533   : > { %v11404_v6 = vpop.f32.mrb[99].mxu0  ;;  %v11452_v34 = vpop.f32.mrb[120].mxu1 }
 0x534   : > { %v8261_v24 = vadd.f32 %v11402_v11, %v15962_v60  ;;  %v11405_v43 = vadd.f32 %v11404_v6, %v11403_v30  ;;  %v11453_v46 = vpop.f32.mrb[121].mxu1 }
 0x535   : > { %v11454_v41 = vadd.f32 %v11453_v46, %v11452_v34  ;;  %v11455_v2 = vpop.f32.mrb[122].mxu1 }
 0x536   : > { %v8262_v47 = vadd.f32 %v11405_v43, %v15964_v50  ;;  %v11456_v56 = vpop.f32.mrb[123].mxu1 }
 0x537   : > { %v15998_v3 = vadd.f32 %v11454_v41, %v8257_v37  ;;  %v11457_v33 = vadd.f32 %v11456_v56, %v11455_v2 }
 0x538   : > { %v11406_v13 = vpop.f32.mrb[100].mxu0 }
 0x539   : > { %v16000_v53 = vadd.f32 %v11457_v33, %v8258_v12  ;;  %v11407_v61 = vpop.f32.mrb[101].mxu0 }
 0x53a   : > { %v11408_v8 = vadd.f32 %v11407_v61, %v11406_v13  ;;  %v11409_v18 = vpop.f32.mrb[102].mxu0 }
 0x53b   : > { %v11410_v58 = vpop.f32.mrb[103].mxu0  ;;  %v11458_v51 = vpop.f32.mrb[124].mxu1 }
 0x53c   : > { %v8263_v60 = vadd.f32 %v11408_v8, %v15968_v48  ;;  %v11411_v57 = vadd.f32 %v11410_v58, %v11409_v18  ;;  %v11459_v31 = vpop.f32.mrb[125].mxu1 }
 0x53d   : > { %v11460_v1 = vadd.f32 %v11459_v31, %v11458_v51  ;;  %v11461_v22 = vpop.f32.mrb[126].mxu1 }
 0x53e   : > { %v8264_v50 = vadd.f32 %v11411_v57, %v15970_v59  ;;  %v11462_v4 = vpop.f32.mrb[127].mxu1 }
 0x53f   : > { %v16004_v27 = vadd.f32 %v11460_v1, %v8259_v42  ;;  %v11463_v19 = vadd.f32 %v11462_v4, %v11461_v22 }
 0x540   : > { %v11412_v26 = vpop.f32.mrb[104].mxu0 }
 0x541   : > { %v16006_v37 = vadd.f32 %v11463_v19, %v8260_v20  ;;  %v11413_v40 = vpop.f32.mrb[105].mxu0 }
 0x542   : > { %v11414_v9 = vadd.f32 %v11413_v40, %v11412_v26  ;;  %v11415_v44 = vpop.f32.mrb[106].mxu0 }
 0x543   : > { %v11416_v17 = vpop.f32.mrb[107].mxu0  ;;  %v11464_v12 = vpop.f32.mrb[128].mxu1 }
 0x544   : > { %v8265_v48 = vadd.f32 %v11414_v9, %v15974_v54  ;;  %v11417_v36 = vadd.f32 %v11416_v17, %v11415_v44  ;;  %v11465_v25 = vpop.f32.mrb[129].mxu1 }
 0x545   : > { %v11466_v55 = vadd.f32 %v11465_v25, %v11464_v12  ;;  %v11467_v38 = vpop.f32.mrb[130].mxu1 }
 0x546   : > { %v8266_v59 = vadd.f32 %v11417_v36, %v15976_v21  ;;  %v11468_v15 = vpop.f32.mrb[131].mxu1 }
 0x547   : > { %v16010_v35 = vadd.f32 %v11466_v55, %v8261_v24  ;;  %v11469_v28 = vadd.f32 %v11468_v15, %v11467_v38 }
 0x548   : > { %v11418_v5 = vpop.f32.mrb[108].mxu0 }
 0x549   : > { %v16012_v42 = vadd.f32 %v11469_v28, %v8262_v47  ;;  %v11419_v62 = vpop.f32.mrb[109].mxu0 }
 0x54a   : > { %v11420_v7 = vadd.f32 %v11419_v62, %v11418_v5  ;;  %v11421_v45 = vpop.f32.mrb[110].mxu0 }
 0x54b   : > { %v11422_v39 = vpop.f32.mrb[111].mxu0  ;;  %v11470_v20 = vpop.f32.mrb[132].mxu1 }
 0x54c   : > { %v8267_v54 = vadd.f32 %v11420_v7, %v15980_v29  ;;  %v11423_v14 = vadd.f32 %v11422_v39, %v11421_v45  ;;  %v11471_v49 = vpop.f32.mrb[133].mxu1 }
 0x54d   : > { %v11472_v63 = vadd.f32 %v11471_v49, %v11470_v20  ;;  %v11473_v52 = vpop.f32.mrb[134].mxu1 }
 0x54e   : > { %v8268_v21 = vadd.f32 %v11423_v14, %v15982_v0  ;;  %v11474_v11 = vpop.f32.mrb[135].mxu1 }
 0x54f   : > { %v16016_v30 = vadd.f32 %v11472_v63, %v8263_v60  ;;  %v11475_v6 = vadd.f32 %v11474_v11, %v11473_v52 }
 0x550   : > { %v11504_v34 = vpop.f32.mrb[112].mxu0 }
 0x551   : > { %v16018_v24 = vadd.f32 %v11475_v6, %v8264_v50  ;;  %v11505_v43 = vpop.f32.mrb[113].mxu0 }
 0x552   : > { %v11506_v46 = vadd.f32 %v11505_v43, %v11504_v34  ;;  %v11507_v41 = vpop.f32.mrb[114].mxu0 }
 0x553   : > { %v11476_v2 = vpop.f32.mrb[136].mxu1  ;;  %v11508_v47 = vpop.f32.mrb[115].mxu0 }
 0x554   : > { %v8859_v29 = vadd.f32 %v11506_v46, %v15986_v32  ;;  %v11509_v56 = vadd.f32 %v11508_v47, %v11507_v41  ;;  %v11477_v33 = vpop.f32.mrb[137].mxu1 }
 0x555   : > { %v11478_v13 = vadd.f32 %v11477_v33, %v11476_v2  ;;  %v11479_v61 = vpop.f32.mrb[138].mxu1 }
 0x556   : > { %v8860_v0 = vadd.f32 %v11509_v56, %v15988_v23  ;;  %v11480_v8 = vpop.f32.mrb[139].mxu1 }
 0x557   : > { %v16022_v18 = vadd.f32 %v11478_v13, %v8265_v48  ;;  %v11481_v58 = vadd.f32 %v11480_v8, %v11479_v61 }
 0x558   : > { %v11510_v51 = vpop.f32.mrb[116].mxu0 }
 0x559   : > { %v16024_v60 = vadd.f32 %v11481_v58, %v8266_v59  ;;  %v11511_v57 = vpop.f32.mrb[117].mxu0 }
 0x55a   : > { %v11512_v31 = vadd.f32 %v11511_v57, %v11510_v51  ;;  %v11513_v1 = vpop.f32.mrb[118].mxu0 }
 0x55b   : > { %v11482_v22 = vpop.f32.mrb[140].mxu1  ;;  %v11514_v50 = vpop.f32.mrb[119].mxu0 }
 0x55c   : > { %v8861_v32 = vadd.f32 %v11512_v31, %v15992_v16  ;;  %v11515_v4 = vadd.f32 %v11514_v50, %v11513_v1  ;;  %v11483_v19 = vpop.f32.mrb[141].mxu1 }
 0x55d   : > { %v11484_v26 = vadd.f32 %v11483_v19, %v11482_v22  ;;  %v11485_v40 = vpop.f32.mrb[142].mxu1 }
 0x55e   : > { %v8862_v23 = vadd.f32 %v11515_v4, %v15994_v10  ;;  %v11486_v9 = vpop.f32.mrb[143].mxu1 }
 0x55f   : > { %v16028_v44 = vadd.f32 %v11484_v26, %v8267_v54  ;;  %v11487_v17 = vadd.f32 %v11486_v9, %v11485_v40 }
 0x560   : > { %v11516_v12 = vpop.f32.mrb[120].mxu0 }
 0x561   : > { %v16030_v48 = vadd.f32 %v11487_v17, %v8268_v21  ;;  %v11517_v36 = vpop.f32.mrb[121].mxu0 }
 0x562   : > { %v11518_v25 = vadd.f32 %v11517_v36, %v11516_v12  ;;  %v11519_v55 = vpop.f32.mrb[122].mxu0 }
 0x563   : > { %v11520_v38 = vpop.f32.mrb[123].mxu0  ;;  %v11568_v59 = vpop.f32.mrb[144].mxu1 }
 0x564   : > { %v8863_v16 = vadd.f32 %v11518_v25, %v15998_v3  ;;  %v11521_v15 = vadd.f32 %v11520_v38, %v11519_v55  ;;  %v11569_v28 = vpop.f32.mrb[145].mxu1 }
 0x565   : > { %v11570_v5 = vadd.f32 %v11569_v28, %v11568_v59  ;;  %v11571_v62 = vpop.f32.mrb[146].mxu1 }
 0x566   : > { %v8864_v10 = vadd.f32 %v11521_v15, %v16000_v53  ;;  %v11572_v7 = vpop.f32.mrb[147].mxu1 }
 0x567   : > { %v16034_v45 = vadd.f32 %v11570_v5, %v8859_v29  ;;  %v11573_v39 = vadd.f32 %v11572_v7, %v11571_v62 }
 0x568   : > { %v11522_v20 = vpop.f32.mrb[124].mxu0 }
 0x569   : > { %v16036_v54 = vadd.f32 %v11573_v39, %v8860_v0  ;;  %v11523_v14 = vpop.f32.mrb[125].mxu0 }
 0x56a   : > { %v11524_v49 = vadd.f32 %v11523_v14, %v11522_v20  ;;  %v11525_v63 = vpop.f32.mrb[126].mxu0 }
 0x56b   : > { %v11526_v52 = vpop.f32.mrb[127].mxu0  ;;  %v11574_v21 = vpop.f32.mrb[148].mxu1 }
 0x56c   : > { %v8865_v3 = vadd.f32 %v11524_v49, %v16004_v27  ;;  %v11527_v11 = vadd.f32 %v11526_v52, %v11525_v63  ;;  %v11575_v6 = vpop.f32.mrb[149].mxu1 }
 0x56d   : > { %v11576_v34 = vadd.f32 %v11575_v6, %v11574_v21  ;;  %v11577_v43 = vpop.f32.mrb[150].mxu1 }
 0x56e   : > { %v8866_v53 = vadd.f32 %v11527_v11, %v16006_v37  ;;  %v11578_v46 = vpop.f32.mrb[151].mxu1 }
 0x56f   : > { %v16040_v41 = vadd.f32 %v11576_v34, %v8861_v32  ;;  %v11579_v2 = vadd.f32 %v11578_v46, %v11577_v43 }
 0x570   : > { %v11528_v47 = vpop.f32.mrb[128].mxu0 }
 0x571   : > { %v16042_v29 = vadd.f32 %v11579_v2, %v8862_v23  ;;  %v11529_v56 = vpop.f32.mrb[129].mxu0 }
 0x572   : > { %v11530_v33 = vadd.f32 %v11529_v56, %v11528_v47  ;;  %v11531_v13 = vpop.f32.mrb[130].mxu0 }
 0x573   : > { %v11532_v61 = vpop.f32.mrb[131].mxu0  ;;  %v11580_v0 = vpop.f32.mrb[152].mxu1 }
 0x574   : > { %v8867_v27 = vadd.f32 %v11530_v33, %v16010_v35  ;;  %v11533_v8 = vadd.f32 %v11532_v61, %v11531_v13  ;;  %v11581_v58 = vpop.f32.mrb[153].mxu1 }
 0x575   : > { %v11582_v51 = vadd.f32 %v11581_v58, %v11580_v0  ;;  %v11583_v57 = vpop.f32.mrb[154].mxu1 }
 0x576   : > { %v8868_v37 = vadd.f32 %v11533_v8, %v16012_v42  ;;  %v11584_v31 = vpop.f32.mrb[155].mxu1 }
 0x577   : > { %v16046_v1 = vadd.f32 %v11582_v51, %v8863_v16  ;;  %v11585_v22 = vadd.f32 %v11584_v31, %v11583_v57 }
 0x578   : > { %v11534_v50 = vpop.f32.mrb[132].mxu0 }
 0x579   : > { %v16048_v32 = vadd.f32 %v11585_v22, %v8864_v10  ;;  %v11535_v4 = vpop.f32.mrb[133].mxu0 }
 0x57a   : > { %v11536_v19 = vadd.f32 %v11535_v4, %v11534_v50  ;;  %v11537_v26 = vpop.f32.mrb[134].mxu0 }
 0x57b   : > { %v11538_v40 = vpop.f32.mrb[135].mxu0  ;;  %v11586_v23 = vpop.f32.mrb[156].mxu1 }
 0x57c   : > { %v8869_v35 = vadd.f32 %v11536_v19, %v16016_v30  ;;  %v11539_v9 = vadd.f32 %v11538_v40, %v11537_v26  ;;  %v11587_v17 = vpop.f32.mrb[157].mxu1 }
 0x57d   : > { %v11588_v12 = vadd.f32 %v11587_v17, %v11586_v23  ;;  %v11589_v36 = vpop.f32.mrb[158].mxu1 }
 0x57e   : > { %v8870_v42 = vadd.f32 %v11539_v9, %v16018_v24  ;;  %v11590_v25 = vpop.f32.mrb[159].mxu1 }
 0x57f   : > { %v16052_v55 = vadd.f32 %v11588_v12, %v8865_v3  ;;  %v11591_v38 = vadd.f32 %v11590_v25, %v11589_v36 }
 0x580   : > { %v11540_v59 = vpop.f32.mrb[136].mxu0 }
 0x581   : > { %v16054_v16 = vadd.f32 %v11591_v38, %v8866_v53  ;;  %v11541_v15 = vpop.f32.mrb[137].mxu0 }
 0x582   : > { %v11542_v28 = vadd.f32 %v11541_v15, %v11540_v59  ;;  %v11543_v5 = vpop.f32.mrb[138].mxu0 }
 0x583   : > { %v11544_v62 = vpop.f32.mrb[139].mxu0  ;;  %v11592_v10 = vpop.f32.mrb[160].mxu1 }
 0x584   : > { %v8871_v30 = vadd.f32 %v11542_v28, %v16022_v18  ;;  %v11545_v7 = vadd.f32 %v11544_v62, %v11543_v5  ;;  %v11593_v39 = vpop.f32.mrb[161].mxu1 }
 0x585   : > { %v11594_v20 = vadd.f32 %v11593_v39, %v11592_v10  ;;  %v11595_v14 = vpop.f32.mrb[162].mxu1 }
 0x586   : > { %v8872_v24 = vadd.f32 %v11545_v7, %v16024_v60  ;;  %v11596_v49 = vpop.f32.mrb[163].mxu1 }
 0x587   : > { %v16058_v63 = vadd.f32 %v11594_v20, %v8867_v27  ;;  %v11597_v52 = vadd.f32 %v11596_v49, %v11595_v14 }
 0x588   : > { %v11546_v21 = vpop.f32.mrb[140].mxu0 }
 0x589   : > { %v16060_v3 = vadd.f32 %v11597_v52, %v8868_v37  ;;  %v11547_v11 = vpop.f32.mrb[141].mxu0 }
 0x58a   : > { %v11548_v6 = vadd.f32 %v11547_v11, %v11546_v21  ;;  %v11549_v34 = vpop.f32.mrb[142].mxu0 }
 0x58b   : > { %v11550_v43 = vpop.f32.mrb[143].mxu0  ;;  %v11598_v53 = vpop.f32.mrb[164].mxu1 }
 0x58c   : > { %v8873_v18 = vadd.f32 %v11548_v6, %v16028_v44  ;;  %v11551_v46 = vadd.f32 %v11550_v43, %v11549_v34  ;;  %v11599_v2 = vpop.f32.mrb[165].mxu1 }
 0x58d   : > { %v11600_v47 = vadd.f32 %v11599_v2, %v11598_v53  ;;  %v11601_v56 = vpop.f32.mrb[166].mxu1 }
 0x58e   : > { %v8874_v60 = vadd.f32 %v11551_v46, %v16030_v48  ;;  %v11602_v33 = vpop.f32.mrb[167].mxu1  ;;  %v16072_v48 = vld [vmem:[%s16190_s4] ss:$0 sm:$0xff] }
 0x58f   : > { %v16064_v13 = vadd.f32 %v11600_v47, %v8869_v35  ;;  %v11603_v61 = vadd.f32 %v11602_v33, %v11601_v56 }
 0x590   : > { %v11632_v0 = vpop.f32.mrb[144].mxu0 }
 0x591   : > { %v16066_v27 = vadd.f32 %v11603_v61, %v8870_v42  ;;  %v11633_v8 = vpop.f32.mrb[145].mxu0 }
 0x592   : > { %v11634_v58 = vadd.f32 %v11633_v8, %v11632_v0  ;;  %v11635_v51 = vpop.f32.mrb[146].mxu0 }
 0x593   : > { %v11604_v57 = vpop.f32.mrb[168].mxu1  ;;  %v11636_v37 = vpop.f32.mrb[147].mxu0 }
 0x594   : > { %v9621_v44 = vadd.f32 %v11634_v58, %v16034_v45  ;;  %v11637_v31 = vadd.f32 %v11636_v37, %v11635_v51  ;;  %v11605_v22 = vpop.f32.mrb[169].mxu1 }
 0x595   : > { %v11606_v50 = vadd.f32 %v11605_v22, %v11604_v57  ;;  %v11607_v4 = vpop.f32.mrb[170].mxu1 }
 0x596   : > { %v9637_v19 = vadd.f32 %v16072_v48, %v9621_v44  ;;  %v9622_v26 = vadd.f32 %v11637_v31, %v16036_v54  ;;  %v11608_v40 = vpop.f32.mrb[171].mxu1 }
 0x597   : > { %v16076_v23 = vadd.f32 %v11606_v50, %v8871_v30  ;;  %v11609_v35 = vadd.f32 %v11608_v40, %v11607_v4 }
 0x598   : > { %v9653_v45 = vmax.f32 %v9637_v19, 0.0  ;;  %v9638_v9 = vadd.f32 %v16072_v48, %v9622_v26  ;;  %v11638_v17 = vpop.f32.mrb[148].mxu0 }
 0x599   : > { %v16079_v12 = vadd.f32 %v11609_v35, %v8872_v24  ;;  %v11639_v36 = vpop.f32.mrb[149].mxu0 }
 0x59a   : > { %9669 = vst [vmem:[%s15547_s11 + $0x100] sm:$0xff] %v9653_v45  ;;  %v9654_v42 = vmax.f32 %v9638_v9, 0.0  ;;  %v11640_v25 = vadd.f32 %v11639_v36, %v11638_v17  ;;  %v11641_v38 = vpop.f32.mrb[150].mxu0 }
 0x59b   : > { %v11610_v59 = vpop.f32.mrb[172].mxu1  ;;  %v11642_v15 = vpop.f32.mrb[151].mxu0 }
 0x59c   : > { %9670 = vst [vmem:[%s15547_s11 + $0x108] sm:$0xff] %v9654_v42  ;;  %v9623_v54 = vadd.f32 %v11640_v25, %v16040_v41  ;;  %v11643_v28 = vadd.f32 %v11642_v15, %v11641_v38  ;;  %v11611_v5 = vpop.f32.mrb[173].mxu1 }
 0x59d   : > { %v11612_v62 = vadd.f32 %v11611_v5, %v11610_v59  ;;  %v11613_v10 = vpop.f32.mrb[174].mxu1 }
 0x59e   : > { %v9639_v30 = vadd.f32 %v16072_v48, %v9623_v54  ;;  %v9624_v7 = vadd.f32 %v11643_v28, %v16042_v29  ;;  %v11614_v39 = vpop.f32.mrb[175].mxu1 }
 0x59f   : > { %v16086_v20 = vadd.f32 %v11612_v62, %v8873_v18  ;;  %v11615_v14 = vadd.f32 %v11614_v39, %v11613_v10 }
 0x5a0   : > { %v9655_v24 = vmax.f32 %v9639_v30, 0.0  ;;  %v9640_v49 = vadd.f32 %v16072_v48, %v9624_v7  ;;  %v11644_v52 = vpop.f32.mrb[152].mxu0 }
 0x5a1   : > { %v16089_v21 = vadd.f32 %v11615_v14, %v8874_v60  ;;  %v11645_v41 = vpop.f32.mrb[153].mxu0 }
 0x5a2   : > { %9671 = vst [vmem:[%s15547_s11 + $0x110] sm:$0xff] %v9655_v24  ;;  %v9656_v11 = vmax.f32 %v9640_v49, 0.0  ;;  %v11646_v6 = vadd.f32 %v11645_v41, %v11644_v52  ;;  %v11647_v34 = vpop.f32.mrb[154].mxu0 }
 0x5a3   : > { %v11648_v43 = vpop.f32.mrb[155].mxu0 }
 0x5a4   : > { %9672 = vst [vmem:[%s15547_s11 + $0x118] sm:$0xff] %v9656_v11  ;;  %v9625_v29 = vadd.f32 %v11646_v6, %v16046_v1  ;;  %v11649_v53 = vadd.f32 %v11648_v43, %v11647_v34 }
 0x5a6   : > { %v9641_v18 = vadd.f32 %v16072_v48, %v9625_v29  ;;  %v9626_v46 = vadd.f32 %v11649_v53, %v16048_v32 }
 0x5a8   : > { %v9657_v2 = vmax.f32 %v9641_v18, 0.0  ;;  %v9642_v47 = vadd.f32 %v16072_v48, %v9626_v46  ;;  %v11650_v56 = vpop.f32.mrb[156].mxu0 }
 0x5a9   : > { %v11651_v60 = vpop.f32.mrb[157].mxu0 }
 0x5aa   : > { %9673 = vst [vmem:[%s15547_s11 + $0x120] sm:$0xff] %v9657_v2  ;;  %v9658_v33 = vmax.f32 %v9642_v47, 0.0  ;;  %v11652_v61 = vadd.f32 %v11651_v60, %v11650_v56  ;;  %v11653_v0 = vpop.f32.mrb[158].mxu0 }
 0x5ab   : > { %v11654_v8 = vpop.f32.mrb[159].mxu0 }
 0x5ac   : > { %9674 = vst [vmem:[%s15547_s11 + $0x128] sm:$0xff] %v9658_v33  ;;  %v9627_v1 = vadd.f32 %v11652_v61, %v16052_v55  ;;  %v11655_v58 = vadd.f32 %v11654_v8, %v11653_v0 }
 0x5ae   : > { %v9643_v51 = vadd.f32 %v16072_v48, %v9627_v1  ;;  %v9628_v32 = vadd.f32 %v11655_v58, %v16054_v16 }
 0x5b0   : > { %v9659_v57 = vmax.f32 %v9643_v51, 0.0  ;;  %v9644_v37 = vadd.f32 %v16072_v48, %v9628_v32  ;;  %v11656_v44 = vpop.f32.mrb[160].mxu0 }
 0x5b1   : > { %v11657_v31 = vpop.f32.mrb[161].mxu0 }
 0x5b2   : > { %9675 = vst [vmem:[%s15547_s11 + $0x130] sm:$0xff] %v9659_v57  ;;  %v9660_v22 = vmax.f32 %v9644_v37, 0.0  ;;  %v11658_v50 = vadd.f32 %v11657_v31, %v11656_v44  ;;  %v11659_v4 = vpop.f32.mrb[162].mxu0 }
 0x5b3   : > { %v11660_v19 = vpop.f32.mrb[163].mxu0 }
 0x5b4   : > { %9676 = vst [vmem:[%s15547_s11 + $0x138] sm:$0xff] %v9660_v22  ;;  %v9629_v55 = vadd.f32 %v11658_v50, %v16058_v63  ;;  %v11661_v26 = vadd.f32 %v11660_v19, %v11659_v4 }
 0x5b6   : > { %v9645_v40 = vadd.f32 %v16072_v48, %v9629_v55  ;;  %v9630_v16 = vadd.f32 %v11661_v26, %v16060_v3 }
 0x5b8   : > { %v9661_v35 = vmax.f32 %v9645_v40, 0.0  ;;  %v9646_v45 = vadd.f32 %v16072_v48, %v9630_v16  ;;  %v11662_v9 = vpop.f32.mrb[164].mxu0 }
 0x5b9   : > { %v11663_v17 = vpop.f32.mrb[165].mxu0 }
 0x5ba   : > { %9677 = vst [vmem:[%s15547_s11 + $0x140] sm:$0xff] %v9661_v35  ;;  %v9662_v36 = vmax.f32 %v9646_v45, 0.0  ;;  %v11664_v42 = vadd.f32 %v11663_v17, %v11662_v9  ;;  %v11665_v25 = vpop.f32.mrb[166].mxu0 }
 0x5bb   : > { %v11666_v38 = vpop.f32.mrb[167].mxu0 }
 0x5bc   : > { %9678 = vst [vmem:[%s15547_s11 + $0x148] sm:$0xff] %v9662_v36  ;;  %v9631_v63 = vadd.f32 %v11664_v42, %v16064_v13  ;;  %v11667_v59 = vadd.f32 %v11666_v38, %v11665_v25 }
 0x5be   : > { %v9647_v15 = vadd.f32 %v16072_v48, %v9631_v63  ;;  %v9632_v3 = vadd.f32 %v11667_v59, %v16066_v27 }
 0x5c0   : > { %v9663_v54 = vmax.f32 %v9647_v15, 0.0  ;;  %v9648_v28 = vadd.f32 %v16072_v48, %v9632_v3  ;;  %v11668_v5 = vpop.f32.mrb[168].mxu0 }
 0x5c1   : > { %v11669_v62 = vpop.f32.mrb[169].mxu0 }
 0x5c2   : > { %9679 = vst [vmem:[%s15547_s11 + $0x150] sm:$0xff] %v9663_v54  ;;  %v9664_v10 = vmax.f32 %v9648_v28, 0.0  ;;  %v11670_v30 = vadd.f32 %v11669_v62, %v11668_v5  ;;  %v11671_v7 = vpop.f32.mrb[170].mxu0 }
 0x5c3   : > { %v11672_v39 = vpop.f32.mrb[171].mxu0 }
 0x5c4   : > { %9680 = vst [vmem:[%s15547_s11 + $0x158] sm:$0xff] %v9664_v10  ;;  %v9633_v13 = vadd.f32 %v11670_v30, %v16076_v23  ;;  %v11673_v14 = vadd.f32 %v11672_v39, %v11671_v7 }
 0x5c6   : > { %v9649_v24 = vadd.f32 %v16072_v48, %v9633_v13  ;;  %v9634_v27 = vadd.f32 %v11673_v14, %v16079_v12 }
 0x5c8   : > { %v9665_v49 = vmax.f32 %v9649_v24, 0.0  ;;  %v9650_v52 = vadd.f32 %v16072_v48, %v9634_v27  ;;  %v11674_v41 = vpop.f32.mrb[172].mxu0 }
 0x5c9   : > { %v11675_v11 = vpop.f32.mrb[173].mxu0 }
 0x5ca   : > { %9681 = vst [vmem:[%s15547_s11 + $0x160] sm:$0xff] %v9665_v49  ;;  %v9666_v6 = vmax.f32 %v9650_v52, 0.0  ;;  %v11676_v34 = vadd.f32 %v11675_v11, %v11674_v41  ;;  %v11677_v43 = vpop.f32.mrb[174].mxu0 }
 0x5cb   : > { %v11678_v23 = vpop.f32.mrb[175].mxu0 }
 0x5cc   : > { %9682 = vst [vmem:[%s15547_s11 + $0x168] sm:$0xff] %v9666_v6  ;;  %v9635_v29 = vadd.f32 %v11676_v34, %v16086_v20  ;;  %v11679_v53 = vadd.f32 %v11678_v23, %v11677_v43 }
 0x5ce   : > { %v9651_v12 = vadd.f32 %v16072_v48, %v9635_v29  ;;  %v9636_v18 = vadd.f32 %v11679_v53, %v16089_v21 }
 0x5d0   : > { %v9667_v46 = vmax.f32 %v9651_v12, 0.0  ;;  %v9652_v2 = vadd.f32 %v16072_v48, %v9636_v18 }
 0x5d2   : > { %9683 = vst [vmem:[%s15547_s11 + $0x170] sm:$0xff] %v9667_v46  ;;  %v9668_v47 = vmax.f32 %v9652_v2, 0.0 }
 0x5d4   : > { %9684 = vst [vmem:[%s15547_s11 + $0x178] sm:$0xff] %v9668_v47 }
 0x5d5   : > { %12223 = shalt.err (!%p12220_p6)
}
 0x5d6   : > { %s12224_s27 = scalar_lea.hbm %s16132_s24, 6144  ;;  %s12228_s10 = scalar_lea.hbm %s16191_s5, 12288 }
 0x5d7   : > { %p12225_p7 = scmp.ne.s32.totalorder %s16132_s24, %s12224_s27  ;;  %p12229_p0 = scmp.lt.u32.totalorder %s16132_s24, %s16191_s5 }
 0x5d8   : > { %p12230_p2 = scmp.lt.u32.totalorder %s12228_s10, %s12224_s27  ;;  %p12232_p8 = scmp.lt.u32.totalorder %s12224_s27, %s16132_s24 }
 0x5d9   : > { %p12226_p9 = pnand %p12225_p7, %p16570_p10 }
 0x5da   : > { %p12231_p4 = por %p12230_p2, %p12229_p0 }
 0x5db   : > { %p12227_p12 = pneg %p12226_p9 }
 0x5dc   : > { %p12233_p11 = por %p12232_p8, %p12231_p4 }
 0x5de   : > { %p12234_p13 = pnand %p12233_p11, %p12227_p12 }
 0x5e0   : > { %12237 = shalt.err (!%p12234_p13)
}
 0x5e1   : > { %s12302_s8 = smov 128   ;;  %s12303_s16 = smov 8  }
 0x5e2   : > { %11703 = dma.vmem_to_hbm [thread:$0]  (%p16570_p10), %s16135_s15, 6144, %s16132_s24, %s16140_s21, %s12302_s8, %s12302_s8, %s12303_s16  }
 0x5e3 PF: > { %p11715_p1 = scmp.ge.s32.totalorder %s12292_s23, 2  ;;  %s9716_s17 = sand.u32 1, %s12272_s18  }
 0x5e4   : > { %p16571_p3 = scmp.ne.s32.totalorder %s16288_s30, 0  ;;  %s9717_s25 = scalar_lea.sflag [#allocation5], %s9716_s17 }
 0x5e6   : > { %p11710_p5 = pnand %p11715_p1, %p16571_p3 }
 0x5e8   : > { %12267 = dma.done.wait (!%p11710_p5), %s9717_s25, 6144  }
 0x5e9   : > { %12269 = vsyncadd (!%p11710_p5), %s9717_s25, 4294961152  ;;  %s19_s23 = sadd.s32 1, %s12292_s23   ;;  %s16572_s18 = smov %s12276_s19 }
 0x5ea   : > { %p16_p6 = scmp.ge.s32.totalorder %s19_s23, 4   ;;  %s16573_s19 = smov %s12280_s20 }
 0x5eb   : > { %s16574_s20 = smov %s12387_s6  ;;  %s16575_s21 = smov %s12288_s22 }
 0x5ec   : > { %s16576_s22 = smov %s16578_s26  ;;  %18 = sbr.rel (!%p16_p6) target bundleno = 5 (0x5), region = 89 }
 0x5f3   :  { %9722 = vsyncpa [#allocation4], 1 }
 0x5f4   :  { %9724 = vsyncpa [#allocation4 + $0x1], 1 }
 0x5f5   :  { %9725 = vsyncpa [#allocation5], 1 }
 0x5f6   :  { %9727 = vsyncpa [#allocation5 + $0x1], 1 }

</bundles_post_ra>
